<compile_context>
chip_gen: v6e
topology: v6e:2x2x1
jax: 0.10.0
libtpu: 0.0.40
codegen_flags: <defaults>
</compile_context>

<pallas_src>
import functools

import jax
import jax.numpy as jnp
from jax.experimental import pallas as pl
from jax.experimental.pallas import tpu as pltpu


def _round_up(x, m):
    return ((x + m - 1) // m) * m


def _pick_tile(dim, cap, quantum=128):
    """dim is a multiple of `quantum`; largest multiple of `quantum` <= cap dividing dim."""
    best = quantum
    t = quantum
    while t <= min(dim, cap):
        if dim % t == 0:
            best = t
        t += quantum
    return best


@functools.lru_cache()
def _vmem_limit_bytes():
    """48 MiB on 64-MiB-VMEM parts (v7x), 96 MiB on 128-MiB parts (v5e/v6e)."""
    cap = 64 * 1024 * 1024
    try:
        info = pltpu.get_tpu_info()
        cap = int(getattr(info, "vmem_capacity_bytes", cap))
    except Exception:
        pass
    return 96 * 1024 * 1024 if cap >= 128 * 1024 * 1024 else 48 * 1024 * 1024


@functools.lru_cache()
def _num_tensorcores():
    """2 TensorCores (megacore / v7x) vs 1 (v5e/v6e). Conservative default 1."""
    try:
        kind = jax.devices()[0].device_kind.lower()
    except Exception:
        return 1
    for tag in ("v7", "v5p", "v4"):
        if tag in kind:
            return 2
    return 1


def _cparams(dim_sem):
    return pltpu.CompilerParams(dimension_semantics=dim_sem,
                                vmem_limit_bytes=_vmem_limit_bytes())


# ----------------------------- Pallas kernels --------------------------------

def _mm_fused_kernel(relu, has_res, *refs):
    """Tiled matmul with fused per-channel affine (+ residual add) (+ ReLU)."""
    if has_res:
        a_ref, b_ref, s_ref, c_ref, r_ref, o_ref, acc_ref = refs
    else:
        a_ref, b_ref, s_ref, c_ref, o_ref, acc_ref = refs
        r_ref = None
    k = pl.program_id(2)

    @pl.when(k == 0)
    def _():
        acc_ref[...] = jnp.zeros_like(acc_ref)

    acc_ref[...] += jnp.dot(a_ref[...], b_ref[...],
                            preferred_element_type=jnp.float32)

    @pl.when(k == pl.num_programs(2) - 1)
    def _():
        y = acc_ref[...] * s_ref[...] + c_ref[...]
        if has_res:
            y = y + r_ref[...].astype(jnp.float32)
        if relu:
            y = jnp.maximum(y, 0.0)
        o_ref[...] = y.astype(o_ref.dtype)


def fused_matmul(a, b, scale, bias, residual=None, relu=False,
                 out_dtype=jnp.bfloat16):
    """(M,K) @ (Kb,N) -> (M,N) with fused BN/bias (+residual) (+ReLU) epilogue.

    b is a pre-padded bf16 weight: Kb >= K, Kb and N multiples of 128.  Only A is
    padded here (M to 16/256, K up to Kb); padded rows are sliced off on return.
    """
    M, K = a.shape
    Kb, N = b.shape
    assert Kb >= K and Kb % 128 == 0 and N % 128 == 0
    assert b.dtype == jnp.bfloat16

    Mpad = _round_up(M, 16) if M <= 512 else _round_up(M, 256)

    if a.dtype != jnp.bfloat16:
        a = a.astype(jnp.bfloat16)
    if Mpad != M or Kb != K:
        a = jnp.pad(a, ((0, Mpad - M), (0, Kb - K)))

    scale = scale.reshape(1, N).astype(jnp.float32)
    bias = bias.reshape(1, N).astype(jnp.float32)

    # Tile selection: grow tm before tn, big caps (VMEM has plenty of headroom).
    tm = Mpad if Mpad <= 512 else _pick_tile(Mpad, 512, 256)
    tn = _pick_tile(N, 512)
    tk = _pick_tile(Kb, 1024)

    # On 2-TensorCore parts make sure the parallel sub-grid has >= 2 steps.
    if _num_tensorcores() >= 2:
        while (Mpad // tm) * (N // tn) < 2:
            if tn > 128:
                tn = _pick_tile(N, tn - 128)
            elif tm >= 32 and (tm // 2) % 16 == 0:
                tm //= 2
            else:
                break

    in_specs = [
        pl.BlockSpec((tm, tk), lambda i, j, k: (i, k)),
        pl.BlockSpec((tk, tn), lambda i, j, k: (k, j)),
        pl.BlockSpec((1, tn), lambda i, j, k: (0, j)),
        pl.BlockSpec((1, tn), lambda i, j, k: (0, j)),
    ]
    args = [a, b, scale, bias]
    has_res = residual is not None
    if has_res:
        r = residual
        if r.shape[0] != Mpad:
            r = jnp.pad(r, ((0, Mpad - r.shape[0]), (0, 0)))
        args.append(r)
        in_specs.append(pl.BlockSpec((tm, tn), lambda i, j, k: (i, j)))

    out = pl.pallas_call(
        functools.partial(_mm_fused_kernel, relu, has_res),
        out_shape=jax.ShapeDtypeStruct((Mpad, N), out_dtype),
        grid=(Mpad // tm, N // tn, Kb // tk),
        in_specs=in_specs,
        out_specs=pl.BlockSpec((tm, tn), lambda i, j, k: (i, j)),
        scratch_shapes=[pltpu.VMEM((tm, tn), jnp.float32)],
        compiler_params=_cparams(("parallel", "parallel", "arbitrary")),
    )(*args)
    return out[:M] if Mpad != M else out


def _head_kernel(inv_hw, x_ref, w1_ref, b1_ref, w2_ref, b2_ref, o_ref):
    """Fused GAP -> Linear -> ReLU -> Linear (BYOL projector head)."""
    feat = jnp.sum(x_ref[...].astype(jnp.float32), axis=1) * inv_hw      # (N, C)
    h = jnp.dot(feat.astype(jnp.bfloat16), w1_ref[...],
                preferred_element_type=jnp.float32) + b1_ref[...]
    h = jnp.maximum(h, 0.0)
    z = jnp.dot(h.astype(jnp.bfloat16), w2_ref[...],
                preferred_element_type=jnp.float32) + b2_ref[...]
    o_ref[...] = z


def projector_head(x, w1, b1, w2, b2):
    """x: (N,H,W,C) bf16 -> (N, proj_pad) f32, single pallas_call."""
    N, H, W, C = x.shape
    hw = H * W
    xr = x.reshape(N, hw, C)
    mid_pad = w1.shape[1]
    proj_pad = w2.shape[1]
    return pl.pallas_call(
        functools.partial(_head_kernel, 1.0 / hw),
        out_shape=jax.ShapeDtypeStruct((N, proj_pad), jnp.float32),
        grid=(1,),
        in_specs=[
            pl.BlockSpec((N, hw, C), lambda i: (0, 0, 0)),
            pl.BlockSpec((C, mid_pad), lambda i: (0, 0)),
            pl.BlockSpec((1, mid_pad), lambda i: (0, 0)),
            pl.BlockSpec((mid_pad, proj_pad), lambda i: (0, 0)),
            pl.BlockSpec((1, proj_pad), lambda i: (0, 0)),
        ],
        out_specs=pl.BlockSpec((N, proj_pad), lambda i: (0, 0)),
        compiler_params=_cparams(("arbitrary",)),
    )(xr, w1, b1, w2, b2)


# --------------------------- glue (layout plumbing) ---------------------------

def im2col_nhwc(x, kh, kw, stride, pad):
    """x: (N,H,W,C) -> ((N*Ho*Wo, kh*kw*C), Ho, Wo). Feature order: (kh,kw)-major, C-minor."""
    N, H, W, C = x.shape
    if pad:
        x = jnp.pad(x, ((0, 0), (pad, pad), (pad, pad), (0, 0)))
    Hp, Wp = H + 2 * pad, W + 2 * pad
    Ho = (Hp - kh) // stride + 1
    Wo = (Wp - kw) // stride + 1
    patches = []
    for i in range(kh):
        for j in range(kw):
            patches.append(x[:, i:i + stride * Ho:stride,
                             j:j + stride * Wo:stride, :])
    cols = patches[0] if len(patches) == 1 else jnp.concatenate(patches, axis=-1)
    return cols.reshape(N * Ho * Wo, kh * kw * C), Ho, Wo


def conv_bn(x, wmat, scale, bias, kh, kw, stride, pad, relu):
    N = x.shape[0]
    cols, Ho, Wo = im2col_nhwc(x, kh, kw, stride, pad)
    rows = fused_matmul(cols, wmat, scale, bias, relu=relu)
    return rows.reshape(N, Ho, Wo, -1), Ho, Wo


def maxpool2d_nhwc(x, k, stride, pad):
    """Fused XLA max over the k*k shifted window slices (no extra materialization)."""
    N, H, W, C = x.shape
    xp = jnp.pad(x, ((0, 0), (pad, pad), (pad, pad), (0, 0)),
                 constant_values=-jnp.inf)
    Hp, Wp = H + 2 * pad, W + 2 * pad
    Ho = (Hp - k) // stride + 1
    Wo = (Wp - k) // stride + 1
    out = None
    for i in range(k):
        for j in range(k):
            s = xp[:, i:i + stride * Ho:stride, j:j + stride * Wo:stride, :]
            out = s if out is None else jnp.maximum(out, s)
    return out


def basic_block(x, blk, stride):
    N, H, W, C = x.shape
    y, _, _ = conv_bn(x, blk['w1'], blk['s1'], blk['b1'], 3, 3, stride, 1,
                      relu=True)
    if 'wd' in blk:     # downsample path: 1x1 conv + BN, fused
        cols_d, _, _ = im2col_nhwc(x, 1, 1, stride, 0)
        id_rows = fused_matmul(cols_d, blk['wd'], blk['sd'], blk['bd'],
                               relu=False)
    else:
        id_rows = x.reshape(N * H * W, C)
    cols2, Ho, Wo = im2col_nhwc(y, 3, 3, 1, 1)
    out_rows = fused_matmul(cols2, blk['w2'], blk['s2'], blk['b2'],
                            residual=id_rows, relu=True)   # conv+BN+add+ReLU fused
    return out_rows.reshape(N, Ho, Wo, -1)


# ------------------------------ parameters ------------------------------------

class KeyGen:
    def __init__(self, key):
        self.key = key

    def __call__(self):
        self.key, sub = jax.random.split(self.key)
        return sub


_LAYER_CFG = [(64, 2, 1), (128, 2, 2), (256, 2, 2), (512, 2, 2)]  # resnet18


def init_params(key, mid_dim=100, projection_dim=100):
    kg = KeyGen(key)

    def conv(o, i, kh, kw):
        return 0.05 * jax.random.normal(kg(), (o, i, kh, kw), jnp.float32)

    def bn(c):
        return (1.0 + 0.1 * jax.random.normal(kg(), (c,), jnp.float32),
                0.1 * jax.random.normal(kg(), (c,), jnp.float32))

    P = {'conv1': conv(64, 3, 7, 7), 'bn1': bn(64), 'layers': []}
    in_c = 64
    for (c, nblocks, stride) in _LAYER_CFG:
        blocks = []
        for b in range(nblocks):
            s = stride if b == 0 else 1
            blk = {'conv1': conv(c, in_c, 3, 3), 'bn1': bn(c),
                   'conv2': conv(c, c, 3, 3), 'bn2': bn(c)}
            if s != 1 or in_c != c:
                blk['down_conv'] = conv(c, in_c, 1, 1)
                blk['down_bn'] = bn(c)
            blocks.append(blk)
            in_c = c
        P['layers'].append(blocks)
    P['fc1_w'] = 0.05 * jax.random.normal(kg(), (mid_dim, 512), jnp.float32)
    P['fc1_b'] = 0.1 * jax.random.normal(kg(), (mid_dim,), jnp.float32)
    P['fc2_w'] = 0.05 * jax.random.normal(kg(), (projection_dim, mid_dim),
                                          jnp.float32)
    P['fc2_b'] = 0.1 * jax.random.normal(kg(), (projection_dim,), jnp.float32)
    return P


def _prep_conv(w, in_pad, out_pad):
    """OIHW f32 -> (K_pad, out_pad) bf16 matmul weight, im2col feature order."""
    O, C, kh, kw = w.shape
    w = jnp.pad(w, ((0, out_pad - O), (0, in_pad - C), (0, 0), (0, 0)))
    wmat = w.transpose(2, 3, 1, 0).reshape(kh * kw * in_pad, out_pad)
    K = wmat.shape[0]
    Kpad = _round_up(K, 128)
    if Kpad != K:
        wmat = jnp.pad(wmat, ((0, Kpad - K), (0, 0)))
    return wmat.astype(jnp.bfloat16)


def _prep_bn(gamma, beta, out_pad):
    eps = 1e-5
    scale = gamma / jnp.sqrt(1.0 + eps)   # running_mean=0, running_var=1
    scale = jnp.pad(scale, (0, out_pad - scale.shape[0]))
    beta = jnp.pad(beta, (0, out_pad - beta.shape[0]))
    return scale.astype(jnp.float32), beta.astype(jnp.float32)


def prepare_params(P):
    """One-time: pad channels to multiples of 128, fold BN, reshape + cast to bf16."""
    Q = {'stem_w': _prep_conv(P['conv1'], 3, 128)}
    Q['stem_s'], Q['stem_b'] = _prep_bn(*P['bn1'], 128)
    Q['blocks'] = []
    for blocks in P['layers']:
        for blk in blocks:
            O, C_in, _, _ = blk['conv1'].shape
            in_pad = _round_up(C_in, 128)
            out_pad = _round_up(O, 128)
            d = {'w1': _prep_conv(blk['conv1'], in_pad, out_pad),
                 'w2': _prep_conv(blk['conv2'], out_pad, out_pad)}
            d['s1'], d['b1'] = _prep_bn(*blk['bn1'], out_pad)
            d['s2'], d['b2'] = _prep_bn(*blk['bn2'], out_pad)
            if 'down_conv' in blk:
                d['wd'] = _prep_conv(blk['down_conv'], in_pad, out_pad)
                d['sd'], d['bd'] = _prep_bn(*blk['down_bn'], out_pad)
            Q['blocks'].append(d)
    mid = P['fc1_b'].shape[0]
    proj = P['fc2_b'].shape[0]
    mid_pad = _round_up(mid, 128)
    proj_pad = _round_up(proj, 128)
    Q['fc1_w'] = jnp.pad(P['fc1_w'].T, ((0, 0), (0, mid_pad - mid))
                         ).astype(jnp.bfloat16)
    Q['fc1_b'] = jnp.pad(P['fc1_b'], (0, mid_pad - mid)
                         ).reshape(1, mid_pad).astype(jnp.float32)
    Q['fc2_w'] = jnp.pad(P['fc2_w'].T, ((0, mid_pad - mid), (0, proj_pad - proj))
                         ).astype(jnp.bfloat16)
    Q['fc2_b'] = jnp.pad(P['fc2_b'], (0, proj_pad - proj)
                         ).reshape(1, proj_pad).astype(jnp.float32)
    return Q


# ------------------------------- forward --------------------------------------

@functools.partial(jax.jit, static_argnames=("proj_dim",))
def resnet_byol_forward(P, x, proj_dim):
    """x: (N, 3, H, W) float32 -> (N, proj_dim) float32."""
    x = jnp.transpose(x, (0, 2, 3, 1)).astype(jnp.bfloat16)   # NHWC, bf16
    # stem: conv7x7 s2 p3 + BN + ReLU (fused) -> maxpool3x3 s2 p1
    x, _, _ = conv_bn(x, P['stem_w'], P['stem_s'], P['stem_b'], 7, 7, 2, 3,
                      relu=True)
    x = maxpool2d_nhwc(x, 3, 2, 1)
    # residual stages (strides are static, derived from the fixed resnet18 config)
    bi = 0
    for (_, nblocks, stride0) in _LAYER_CFG:
        for b in range(nblocks):
            s = stride0 if b == 0 else 1
            x = basic_block(x, P['blocks'][bi], s)
            bi += 1
    # fused GAP + projector MLP (single Pallas launch)
    z = projector_head(x, P['fc1_w'], P['fc1_b'], P['fc2_w'], P['fc2_b'])
    return z[:, :proj_dim]


# --------------------------------- main ----------------------------------------

if __name__ == "__main__":
    key = jax.random.PRNGKey(0)
    kp, kx = jax.random.split(key)
    raw_params = init_params(kp, mid_dim=100, projection_dim=100)
    params = prepare_params(raw_params)
    x = jax.random.normal(kx, (2, 3, 32, 32), jnp.float32)   # small NCHW images
    out = resnet_byol_forward(params, x, proj_dim=100)
    out = jax.block_until_ready(out)
    assert out.shape == (2, 100), out.shape
    assert bool(jnp.all(jnp.isfinite(out)))
    print("KERNEL_OK")
</pallas_src>

<mosaic_0001>
module attributes {stable_mosaic.version = 11 : i64} {
  func.func @_mm_fused_kernel(%arg0: i32, %arg1: i32, %arg2: i32, %arg3: memref<512x256xbf16, #tpu.memory_space<vmem>>, %arg4: memref<256x128xbf16, #tpu.memory_space<vmem>>, %arg5: memref<1x128xf32, #tpu.memory_space<vmem>>, %arg6: memref<1x128xf32, #tpu.memory_space<vmem>>, %arg7: memref<512x128xbf16, #tpu.memory_space<vmem>>, %arg8: memref<512x128xf32, #tpu.memory_space<vmem>>) attributes {dimension_semantics = [#tpu.dimension_semantics<parallel>, #tpu.dimension_semantics<parallel>, #tpu.dimension_semantics<arbitrary>], iteration_bounds = array<i64: 1, 1, 1>, scalar_prefetch = 0 : i64, scratch_operands = 1 : i64, tpu.core_type = #tpu.core_type<tc>, window_params = [{transform_indices = @transform_0, window_bounds = array<i64: 512, 256>}, {transform_indices = @transform_1, window_bounds = array<i64: 256, 128>}, {transform_indices = @transform_2, window_bounds = array<i64: 1, 128>}, {transform_indices = @transform_3, window_bounds = array<i64: 1, 128>}, {transform_indices = @transform_4, window_bounds = array<i64: 512, 128>}]} {
    %c0_i32 = arith.constant 0 : i32
    %0 = arith.cmpi eq, %arg2, %c0_i32 : i32
    %1 = arith.extui %0 : i1 to i32
    %c0_i32_0 = arith.constant 0 : i32
    %2 = arith.cmpi ne, %1, %c0_i32_0 : i32
    scf.if %2 {
      %cst_10 = arith.constant 0.000000e+00 : f32
      %12 = vector.broadcast %cst_10 : f32 to vector<512x128xf32>
      %c0_11 = arith.constant 0 : index
      %c0_12 = arith.constant 0 : index
      %13 = vector.load %arg8[%c0_11, %c0_12] : memref<512x128xf32, #tpu.memory_space<vmem>>, vector<512x128xf32>
      tpu.vector_store %arg8[%c0_11, %c0_12], %12 {strides = array<i32>} : memref<512x128xf32, #tpu.memory_space<vmem>>, vector<512x128xf32>,
    } else {
    }
    %c0 = arith.constant 0 : index
    %c0_1 = arith.constant 0 : index
    %3 = vector.load %arg8[%c0, %c0_1] : memref<512x128xf32, #tpu.memory_space<vmem>>, vector<512x128xf32>
    %c0_2 = arith.constant 0 : index
    %c0_3 = arith.constant 0 : index
    %4 = vector.load %arg3[%c0_2, %c0_3] : memref<512x256xbf16, #tpu.memory_space<vmem>>, vector<512x256xbf16>
    %c0_4 = arith.constant 0 : index
    %c0_5 = arith.constant 0 : index
    %5 = vector.load %arg4[%c0_4, %c0_5] : memref<256x128xbf16, #tpu.memory_space<vmem>>, vector<256x128xbf16>
    %cst = arith.constant dense<0.000000e+00> : vector<512x128xf32>
    %6 = tpu.matmul %4, %5, %cst {dimension_numbers = #tpu.dot_dimension_numbers<[1], [0], [0], [1], [0, 0, 1, 1], [], []>} : vector<512x256xbf16>, vector<256x128xbf16>, vector<512x128xf32> -> vector<512x128xf32>
    %7 = arith.addf %3, %6 : vector<512x128xf32>
    %c0_6 = arith.constant 0 : index
    %c0_7 = arith.constant 0 : index
    %8 = vector.load %arg8[%c0_6, %c0_7] : memref<512x128xf32, #tpu.memory_space<vmem>>, vector<512x128xf32>
    tpu.vector_store %arg8[%c0_6, %c0_7], %7 {strides = array<i32>} : memref<512x128xf32, #tpu.memory_space<vmem>>, vector<512x128xf32>,
    %c0_i32_8 = arith.constant 0 : i32
    %9 = arith.cmpi eq, %arg2, %c0_i32_8 : i32
    %10 = arith.extui %9 : i1 to i32
    %c0_i32_9 = arith.constant 0 : i32
    %11 = arith.cmpi ne, %10, %c0_i32_9 : i32
    scf.if %11 {
      %c0_10 = arith.constant 0 : index
      %c0_11 = arith.constant 0 : index
      %12 = vector.load %arg8[%c0_10, %c0_11] : memref<512x128xf32, #tpu.memory_space<vmem>>, vector<512x128xf32>
      %c0_12 = arith.constant 0 : index
      %c0_13 = arith.constant 0 : index
      %13 = vector.load %arg5[%c0_12, %c0_13] : memref<1x128xf32, #tpu.memory_space<vmem>>, vector<1x128xf32>
      %14 = vector.broadcast %13 : vector<1x128xf32> to vector<512x128xf32>
      %15 = arith.mulf %12, %14 : vector<512x128xf32>
      %c0_14 = arith.constant 0 : index
      %c0_15 = arith.constant 0 : index
      %16 = vector.load %arg6[%c0_14, %c0_15] : memref<1x128xf32, #tpu.memory_space<vmem>>, vector<1x128xf32>
      %17 = vector.broadcast %16 : vector<1x128xf32> to vector<512x128xf32>
      %18 = arith.addf %15, %17 : vector<512x128xf32>
      %cst_16 = arith.constant 0.000000e+00 : f32
      %19 = vector.broadcast %cst_16 : f32 to vector<512x128xf32>
      %20 = arith.maximumf %18, %19 : vector<512x128xf32>
      %21 = arith.truncf %20 : vector<512x128xf32> to vector<512x128xbf16>
      %c0_17 = arith.constant 0 : index
      %c0_18 = arith.constant 0 : index
      %22 = vector.load %arg7[%c0_17, %c0_18] : memref<512x128xbf16, #tpu.memory_space<vmem>>, vector<512x128xbf16>
      tpu.vector_store %arg7[%c0_17, %c0_18], %21 {strides = array<i32>} : memref<512x128xbf16, #tpu.memory_space<vmem>>, vector<512x128xbf16>,
    } else {
    }
    return
  }
  func.func @transform_0(%arg0: i32, %arg1: i32, %arg2: i32) -> (i32, i32) {
    %c0_i32 = arith.constant 0 : i32
    return %arg0, %arg2 : i32, i32
  }
  func.func @transform_1(%arg0: i32, %arg1: i32, %arg2: i32) -> (i32, i32) {
    %c0_i32 = arith.constant 0 : i32
    return %arg2, %arg1 : i32, i32
  }
  func.func @transform_2(%arg0: i32, %arg1: i32, %arg2: i32) -> (i32, i32) {
    %c0_i32 = arith.constant 0 : i32
    %c0_i32_0 = arith.constant 0 : i32
    return %c0_i32, %arg1 : i32, i32
  }
  func.func @transform_3(%arg0: i32, %arg1: i32, %arg2: i32) -> (i32, i32) {
    %c0_i32 = arith.constant 0 : i32
    %c0_i32_0 = arith.constant 0 : i32
    return %c0_i32, %arg1 : i32, i32
  }
  func.func @transform_4(%arg0: i32, %arg1: i32, %arg2: i32) -> (i32, i32) {
    %c0_i32 = arith.constant 0 : i32
    return %arg0, %arg1 : i32, i32
  }
}

module attributes {stable_mosaic.version = 11 : i64} {
  func.func @_mm_fused_kernel(%arg0: i32, %arg1: i32, %arg2: i32, %arg3: memref<128x384xbf16, #tpu.memory_space<vmem>>, %arg4: memref<384x128xbf16, #tpu.memory_space<vmem>>, %arg5: memref<1x128xf32, #tpu.memory_space<vmem>>, %arg6: memref<1x128xf32, #tpu.memory_space<vmem>>, %arg7: memref<128x128xbf16, #tpu.memory_space<vmem>>, %arg8: memref<128x128xf32, #tpu.memory_space<vmem>>) attributes {dimension_semantics = [#tpu.dimension_semantics<parallel>, #tpu.dimension_semantics<parallel>, #tpu.dimension_semantics<arbitrary>], iteration_bounds = array<i64: 1, 1, 3>, scalar_prefetch = 0 : i64, scratch_operands = 1 : i64, tpu.core_type = #tpu.core_type<tc>, window_params = [{transform_indices = @transform_0, window_bounds = array<i64: 128, 384>}, {transform_indices = @transform_1, window_bounds = array<i64: 384, 128>}, {transform_indices = @transform_2, window_bounds = array<i64: 1, 128>}, {transform_indices = @transform_3, window_bounds = array<i64: 1, 128>}, {transform_indices = @transform_4, window_bounds = array<i64: 128, 128>}]} {
    %c0_i32 = arith.constant 0 : i32
    %0 = arith.cmpi eq, %arg2, %c0_i32 : i32
    %1 = arith.extui %0 : i1 to i32
    %c0_i32_0 = arith.constant 0 : i32
    %2 = arith.cmpi ne, %1, %c0_i32_0 : i32
    scf.if %2 {
      %cst_9 = arith.constant 0.000000e+00 : f32
      %12 = vector.broadcast %cst_9 : f32 to vector<128x128xf32>
      %c0_10 = arith.constant 0 : index
      %c0_11 = arith.constant 0 : index
      %13 = vector.load %arg8[%c0_10, %c0_11] : memref<128x128xf32, #tpu.memory_space<vmem>>, vector<128x128xf32>
      tpu.vector_store %arg8[%c0_10, %c0_11], %12 {strides = array<i32>} : memref<128x128xf32, #tpu.memory_space<vmem>>, vector<128x128xf32>,
    } else {
    }
    %c0 = arith.constant 0 : index
    %c0_1 = arith.constant 0 : index
    %3 = vector.load %arg8[%c0, %c0_1] : memref<128x128xf32, #tpu.memory_space<vmem>>, vector<128x128xf32>
    %c0_2 = arith.constant 0 : index
    %c0_3 = arith.constant 0 : index
    %4 = vector.load %arg3[%c0_2, %c0_3] : memref<128x384xbf16, #tpu.memory_space<vmem>>, vector<128x384xbf16>
    %c0_4 = arith.constant 0 : index
    %c0_5 = arith.constant 0 : index
    %5 = vector.load %arg4[%c0_4, %c0_5] : memref<384x128xbf16, #tpu.memory_space<vmem>>, vector<384x128xbf16>
    %cst = arith.constant dense<0.000000e+00> : vector<128x128xf32>
    %6 = tpu.matmul %4, %5, %cst {dimension_numbers = #tpu.dot_dimension_numbers<[1], [0], [0], [1], [0, 0, 1, 1], [], []>} : vector<128x384xbf16>, vector<384x128xbf16>, vector<128x128xf32> -> vector<128x128xf32>
    %7 = arith.addf %3, %6 : vector<128x128xf32>
    %c0_6 = arith.constant 0 : index
    %c0_7 = arith.constant 0 : index
    %8 = vector.load %arg8[%c0_6, %c0_7] : memref<128x128xf32, #tpu.memory_space<vmem>>, vector<128x128xf32>
    tpu.vector_store %arg8[%c0_6, %c0_7], %7 {strides = array<i32>} : memref<128x128xf32, #tpu.memory_space<vmem>>, vector<128x128xf32>,
    %c2_i32 = arith.constant 2 : i32
    %9 = arith.cmpi eq, %arg2, %c2_i32 : i32
    %10 = arith.extui %9 : i1 to i32
    %c0_i32_8 = arith.constant 0 : i32
    %11 = arith.cmpi ne, %10, %c0_i32_8 : i32
    scf.if %11 {
      %c0_9 = arith.constant 0 : index
      %c0_10 = arith.constant 0 : index
      %12 = vector.load %arg8[%c0_9, %c0_10] : memref<128x128xf32, #tpu.memory_space<vmem>>, vector<128x128xf32>
      %c0_11 = arith.constant 0 : index
      %c0_12 = arith.constant 0 : index
      %13 = vector.load %arg5[%c0_11, %c0_12] : memref<1x128xf32, #tpu.memory_space<vmem>>, vector<1x128xf32>
      %14 = vector.broadcast %13 : vector<1x128xf32> to vector<128x128xf32>
      %15 = arith.mulf %12, %14 : vector<128x128xf32>
      %c0_13 = arith.constant 0 : index
      %c0_14 = arith.constant 0 : index
      %16 = vector.load %arg6[%c0_13, %c0_14] : memref<1x128xf32, #tpu.memory_space<vmem>>, vector<1x128xf32>
      %17 = vector.broadcast %16 : vector<1x128xf32> to vector<128x128xf32>
      %18 = arith.addf %15, %17 : vector<128x128xf32>
      %cst_15 = arith.constant 0.000000e+00 : f32
      %19 = vector.broadcast %cst_15 : f32 to vector<128x128xf32>
      %20 = arith.maximumf %18, %19 : vector<128x128xf32>
      %21 = arith.truncf %20 : vector<128x128xf32> to vector<128x128xbf16>
      %c0_16 = arith.constant 0 : index
      %c0_17 = arith.constant 0 : index
      %22 = vector.load %arg7[%c0_16, %c0_17] : memref<128x128xbf16, #tpu.memory_space<vmem>>, vector<128x128xbf16>
      tpu.vector_store %arg7[%c0_16, %c0_17], %21 {strides = array<i32>} : memref<128x128xbf16, #tpu.memory_space<vmem>>, vector<128x128xbf16>,
    } else {
    }
    return
  }
  func.func @transform_0(%arg0: i32, %arg1: i32, %arg2: i32) -> (i32, i32) {
    %c0_i32 = arith.constant 0 : i32
    return %arg0, %arg2 : i32, i32
  }
  func.func @transform_1(%arg0: i32, %arg1: i32, %arg2: i32) -> (i32, i32) {
    %c0_i32 = arith.constant 0 : i32
    return %arg2, %arg1 : i32, i32
  }
  func.func @transform_2(%arg0: i32, %arg1: i32, %arg2: i32) -> (i32, i32) {
    %c0_i32 = arith.constant 0 : i32
    %c0_i32_0 = arith.constant 0 : i32
    return %c0_i32, %arg1 : i32, i32
  }
  func.func @transform_3(%arg0: i32, %arg1: i32, %arg2: i32) -> (i32, i32) {
    %c0_i32 = arith.constant 0 : i32
    %c0_i32_0 = arith.constant 0 : i32
    return %c0_i32, %arg1 : i32, i32
  }
  func.func @transform_4(%arg0: i32, %arg1: i32, %arg2: i32) -> (i32, i32) {
    %c0_i32 = arith.constant 0 : i32
    return %arg0, %arg1 : i32, i32
  }
}

module attributes {stable_mosaic.version = 11 : i64} {
  func.func @_mm_fused_kernel(%arg0: i32, %arg1: i32, %arg2: i32, %arg3: memref<128x384xbf16, #tpu.memory_space<vmem>>, %arg4: memref<384x128xbf16, #tpu.memory_space<vmem>>, %arg5: memref<1x128xf32, #tpu.memory_space<vmem>>, %arg6: memref<1x128xf32, #tpu.memory_space<vmem>>, %arg7: memref<128x128xbf16, #tpu.memory_space<vmem>>, %arg8: memref<128x128xbf16, #tpu.memory_space<vmem>>, %arg9: memref<128x128xf32, #tpu.memory_space<vmem>>) attributes {dimension_semantics = [#tpu.dimension_semantics<parallel>, #tpu.dimension_semantics<parallel>, #tpu.dimension_semantics<arbitrary>], iteration_bounds = array<i64: 1, 1, 3>, scalar_prefetch = 0 : i64, scratch_operands = 1 : i64, tpu.core_type = #tpu.core_type<tc>, window_params = [{transform_indices = @transform_0, window_bounds = array<i64: 128, 384>}, {transform_indices = @transform_1, window_bounds = array<i64: 384, 128>}, {transform_indices = @transform_2, window_bounds = array<i64: 1, 128>}, {transform_indices = @transform_3, window_bounds = array<i64: 1, 128>}, {transform_indices = @transform_4, window_bounds = array<i64: 128, 128>}, {transform_indices = @transform_5, window_bounds = array<i64: 128, 128>}]} {
    %c0_i32 = arith.constant 0 : i32
    %0 = arith.cmpi eq, %arg2, %c0_i32 : i32
    %1 = arith.extui %0 : i1 to i32
    %c0_i32_0 = arith.constant 0 : i32
    %2 = arith.cmpi ne, %1, %c0_i32_0 : i32
    scf.if %2 {
      %cst_9 = arith.constant 0.000000e+00 : f32
      %12 = vector.broadcast %cst_9 : f32 to vector<128x128xf32>
      %c0_10 = arith.constant 0 : index
      %c0_11 = arith.constant 0 : index
      %13 = vector.load %arg9[%c0_10, %c0_11] : memref<128x128xf32, #tpu.memory_space<vmem>>, vector<128x128xf32>
      tpu.vector_store %arg9[%c0_10, %c0_11], %12 {strides = array<i32>} : memref<128x128xf32, #tpu.memory_space<vmem>>, vector<128x128xf32>,
    } else {
    }
    %c0 = arith.constant 0 : index
    %c0_1 = arith.constant 0 : index
    %3 = vector.load %arg9[%c0, %c0_1] : memref<128x128xf32, #tpu.memory_space<vmem>>, vector<128x128xf32>
    %c0_2 = arith.constant 0 : index
    %c0_3 = arith.constant 0 : index
    %4 = vector.load %arg3[%c0_2, %c0_3] : memref<128x384xbf16, #tpu.memory_space<vmem>>, vector<128x384xbf16>
    %c0_4 = arith.constant 0 : index
    %c0_5 = arith.constant 0 : index
    %5 = vector.load %arg4[%c0_4, %c0_5] : memref<384x128xbf16, #tpu.memory_space<vmem>>, vector<384x128xbf16>
    %cst = arith.constant dense<0.000000e+00> : vector<128x128xf32>
    %6 = tpu.matmul %4, %5, %cst {dimension_numbers = #tpu.dot_dimension_numbers<[1], [0], [0], [1], [0, 0, 1, 1], [], []>} : vector<128x384xbf16>, vector<384x128xbf16>, vector<128x128xf32> -> vector<128x128xf32>
    %7 = arith.addf %3, %6 : vector<128x128xf32>
    %c0_6 = arith.constant 0 : index
    %c0_7 = arith.constant 0 : index
    %8 = vector.load %arg9[%c0_6, %c0_7] : memref<128x128xf32, #tpu.memory_space<vmem>>, vector<128x128xf32>
    tpu.vector_store %arg9[%c0_6, %c0_7], %7 {strides = array<i32>} : memref<128x128xf32, #tpu.memory_space<vmem>>, vector<128x128xf32>,
    %c2_i32 = arith.constant 2 : i32
    %9 = arith.cmpi eq, %arg2, %c2_i32 : i32
    %10 = arith.extui %9 : i1 to i32
    %c0_i32_8 = arith.constant 0 : i32
    %11 = arith.cmpi ne, %10, %c0_i32_8 : i32
    scf.if %11 {
      %c0_9 = arith.constant 0 : index
      %c0_10 = arith.constant 0 : index
      %12 = vector.load %arg9[%c0_9, %c0_10] : memref<128x128xf32, #tpu.memory_space<vmem>>, vector<128x128xf32>
      %c0_11 = arith.constant 0 : index
      %c0_12 = arith.constant 0 : index
      %13 = vector.load %arg5[%c0_11, %c0_12] : memref<1x128xf32, #tpu.memory_space<vmem>>, vector<1x128xf32>
      %14 = vector.broadcast %13 : vector<1x128xf32> to vector<128x128xf32>
      %15 = arith.mulf %12, %14 : vector<128x128xf32>
      %c0_13 = arith.constant 0 : index
      %c0_14 = arith.constant 0 : index
      %16 = vector.load %arg6[%c0_13, %c0_14] : memref<1x128xf32, #tpu.memory_space<vmem>>, vector<1x128xf32>
      %17 = vector.broadcast %16 : vector<1x128xf32> to vector<128x128xf32>
      %18 = arith.addf %15, %17 : vector<128x128xf32>
      %c0_15 = arith.constant 0 : index
      %c0_16 = arith.constant 0 : index
      %19 = vector.load %arg7[%c0_15, %c0_16] : memref<128x128xbf16, #tpu.memory_space<vmem>>, vector<128x128xbf16>
      %20 = arith.extf %19 : vector<128x128xbf16> to vector<128x128xf32>
      %21 = arith.addf %18, %20 : vector<128x128xf32>
      %cst_17 = arith.constant 0.000000e+00 : f32
      %22 = vector.broadcast %cst_17 : f32 to vector<128x128xf32>
      %23 = arith.maximumf %21, %22 : vector<128x128xf32>
      %24 = arith.truncf %23 : vector<128x128xf32> to vector<128x128xbf16>
      %c0_18 = arith.constant 0 : index
      %c0_19 = arith.constant 0 : index
      %25 = vector.load %arg8[%c0_18, %c0_19] : memref<128x128xbf16, #tpu.memory_space<vmem>>, vector<128x128xbf16>
      tpu.vector_store %arg8[%c0_18, %c0_19], %24 {strides = array<i32>} : memref<128x128xbf16, #tpu.memory_space<vmem>>, vector<128x128xbf16>,
    } else {
    }
    return
  }
  func.func @transform_0(%arg0: i32, %arg1: i32, %arg2: i32) -> (i32, i32) {
    %c0_i32 = arith.constant 0 : i32
    return %arg0, %arg2 : i32, i32
  }
  func.func @transform_1(%arg0: i32, %arg1: i32, %arg2: i32) -> (i32, i32) {
    %c0_i32 = arith.constant 0 : i32
    return %arg2, %arg1 : i32, i32
  }
  func.func @transform_2(%arg0: i32, %arg1: i32, %arg2: i32) -> (i32, i32) {
    %c0_i32 = arith.constant 0 : i32
    %c0_i32_0 = arith.constant 0 : i32
    return %c0_i32, %arg1 : i32, i32
  }
  func.func @transform_3(%arg0: i32, %arg1: i32, %arg2: i32) -> (i32, i32) {
    %c0_i32 = arith.constant 0 : i32
    %c0_i32_0 = arith.constant 0 : i32
    return %c0_i32, %arg1 : i32, i32
  }
  func.func @transform_4(%arg0: i32, %arg1: i32, %arg2: i32) -> (i32, i32) {
    %c0_i32 = arith.constant 0 : i32
    return %arg0, %arg1 : i32, i32
  }
  func.func @transform_5(%arg0: i32, %arg1: i32, %arg2: i32) -> (i32, i32) {
    %c0_i32 = arith.constant 0 : i32
    return %arg0, %arg1 : i32, i32
  }
}

module attributes {stable_mosaic.version = 11 : i64} {
  func.func @_mm_fused_kernel(%arg0: i32, %arg1: i32, %arg2: i32, %arg3: memref<32x384xbf16, #tpu.memory_space<vmem>>, %arg4: memref<384x128xbf16, #tpu.memory_space<vmem>>, %arg5: memref<1x128xf32, #tpu.memory_space<vmem>>, %arg6: memref<1x128xf32, #tpu.memory_space<vmem>>, %arg7: memref<32x128xbf16, #tpu.memory_space<vmem>>, %arg8: memref<32x128xf32, #tpu.memory_space<vmem>>) attributes {dimension_semantics = [#tpu.dimension_semantics<parallel>, #tpu.dimension_semantics<parallel>, #tpu.dimension_semantics<arbitrary>], iteration_bounds = array<i64: 1, 1, 3>, scalar_prefetch = 0 : i64, scratch_operands = 1 : i64, tpu.core_type = #tpu.core_type<tc>, window_params = [{transform_indices = @transform_0, window_bounds = array<i64: 32, 384>}, {transform_indices = @transform_1, window_bounds = array<i64: 384, 128>}, {transform_indices = @transform_2, window_bounds = array<i64: 1, 128>}, {transform_indices = @transform_3, window_bounds = array<i64: 1, 128>}, {transform_indices = @transform_4, window_bounds = array<i64: 32, 128>}]} {
    %c0_i32 = arith.constant 0 : i32
    %0 = arith.cmpi eq, %arg2, %c0_i32 : i32
    %1 = arith.extui %0 : i1 to i32
    %c0_i32_0 = arith.constant 0 : i32
    %2 = arith.cmpi ne, %1, %c0_i32_0 : i32
    scf.if %2 {
      %cst_9 = arith.constant 0.000000e+00 : f32
      %12 = vector.broadcast %cst_9 : f32 to vector<32x128xf32>
      %c0_10 = arith.constant 0 : index
      %c0_11 = arith.constant 0 : index
      %13 = vector.load %arg8[%c0_10, %c0_11] : memref<32x128xf32, #tpu.memory_space<vmem>>, vector<32x128xf32>
      tpu.vector_store %arg8[%c0_10, %c0_11], %12 {strides = array<i32>} : memref<32x128xf32, #tpu.memory_space<vmem>>, vector<32x128xf32>,
    } else {
    }
    %c0 = arith.constant 0 : index
    %c0_1 = arith.constant 0 : index
    %3 = vector.load %arg8[%c0, %c0_1] : memref<32x128xf32, #tpu.memory_space<vmem>>, vector<32x128xf32>
    %c0_2 = arith.constant 0 : index
    %c0_3 = arith.constant 0 : index
    %4 = vector.load %arg3[%c0_2, %c0_3] : memref<32x384xbf16, #tpu.memory_space<vmem>>, vector<32x384xbf16>
    %c0_4 = arith.constant 0 : index
    %c0_5 = arith.constant 0 : index
    %5 = vector.load %arg4[%c0_4, %c0_5] : memref<384x128xbf16, #tpu.memory_space<vmem>>, vector<384x128xbf16>
    %cst = arith.constant dense<0.000000e+00> : vector<32x128xf32>
    %6 = tpu.matmul %4, %5, %cst {dimension_numbers = #tpu.dot_dimension_numbers<[1], [0], [0], [1], [0, 0, 1, 1], [], []>} : vector<32x384xbf16>, vector<384x128xbf16>, vector<32x128xf32> -> vector<32x128xf32>
    %7 = arith.addf %3, %6 : vector<32x128xf32>
    %c0_6 = arith.constant 0 : index
    %c0_7 = arith.constant 0 : index
    %8 = vector.load %arg8[%c0_6, %c0_7] : memref<32x128xf32, #tpu.memory_space<vmem>>, vector<32x128xf32>
    tpu.vector_store %arg8[%c0_6, %c0_7], %7 {strides = array<i32>} : memref<32x128xf32, #tpu.memory_space<vmem>>, vector<32x128xf32>,
    %c2_i32 = arith.constant 2 : i32
    %9 = arith.cmpi eq, %arg2, %c2_i32 : i32
    %10 = arith.extui %9 : i1 to i32
    %c0_i32_8 = arith.constant 0 : i32
    %11 = arith.cmpi ne, %10, %c0_i32_8 : i32
    scf.if %11 {
      %c0_9 = arith.constant 0 : index
      %c0_10 = arith.constant 0 : index
      %12 = vector.load %arg8[%c0_9, %c0_10] : memref<32x128xf32, #tpu.memory_space<vmem>>, vector<32x128xf32>
      %c0_11 = arith.constant 0 : index
      %c0_12 = arith.constant 0 : index
      %13 = vector.load %arg5[%c0_11, %c0_12] : memref<1x128xf32, #tpu.memory_space<vmem>>, vector<1x128xf32>
      %14 = vector.broadcast %13 : vector<1x128xf32> to vector<32x128xf32>
      %15 = arith.mulf %12, %14 : vector<32x128xf32>
      %c0_13 = arith.constant 0 : index
      %c0_14 = arith.constant 0 : index
      %16 = vector.load %arg6[%c0_13, %c0_14] : memref<1x128xf32, #tpu.memory_space<vmem>>, vector<1x128xf32>
      %17 = vector.broadcast %16 : vector<1x128xf32> to vector<32x128xf32>
      %18 = arith.addf %15, %17 : vector<32x128xf32>
      %cst_15 = arith.constant 0.000000e+00 : f32
      %19 = vector.broadcast %cst_15 : f32 to vector<32x128xf32>
      %20 = arith.maximumf %18, %19 : vector<32x128xf32>
      %21 = arith.truncf %20 : vector<32x128xf32> to vector<32x128xbf16>
      %c0_16 = arith.constant 0 : index
      %c0_17 = arith.constant 0 : index
      %22 = vector.load %arg7[%c0_16, %c0_17] : memref<32x128xbf16, #tpu.memory_space<vmem>>, vector<32x128xbf16>
      tpu.vector_store %arg7[%c0_16, %c0_17], %21 {strides = array<i32>} : memref<32x128xbf16, #tpu.memory_space<vmem>>, vector<32x128xbf16>,
    } else {
    }
    return
  }
  func.func @transform_0(%arg0: i32, %arg1: i32, %arg2: i32) -> (i32, i32) {
    %c0_i32 = arith.constant 0 : i32
    return %arg0, %arg2 : i32, i32
  }
  func.func @transform_1(%arg0: i32, %arg1: i32, %arg2: i32) -> (i32, i32) {
    %c0_i32 = arith.constant 0 : i32
    return %arg2, %arg1 : i32, i32
  }
  func.func @transform_2(%arg0: i32, %arg1: i32, %arg2: i32) -> (i32, i32) {
    %c0_i32 = arith.constant 0 : i32
    %c0_i32_0 = arith.constant 0 : i32
    return %c0_i32, %arg1 : i32, i32
  }
  func.func @transform_3(%arg0: i32, %arg1: i32, %arg2: i32) -> (i32, i32) {
    %c0_i32 = arith.constant 0 : i32
    %c0_i32_0 = arith.constant 0 : i32
    return %c0_i32, %arg1 : i32, i32
  }
  func.func @transform_4(%arg0: i32, %arg1: i32, %arg2: i32) -> (i32, i32) {
    %c0_i32 = arith.constant 0 : i32
    return %arg0, %arg1 : i32, i32
  }
}

module attributes {stable_mosaic.version = 11 : i64} {
  func.func @_mm_fused_kernel(%arg0: i32, %arg1: i32, %arg2: i32, %arg3: memref<32x384xbf16, #tpu.memory_space<vmem>>, %arg4: memref<384x128xbf16, #tpu.memory_space<vmem>>, %arg5: memref<1x128xf32, #tpu.memory_space<vmem>>, %arg6: memref<1x128xf32, #tpu.memory_space<vmem>>, %arg7: memref<32x128xbf16, #tpu.memory_space<vmem>>, %arg8: memref<32x128xbf16, #tpu.memory_space<vmem>>, %arg9: memref<32x128xf32, #tpu.memory_space<vmem>>) attributes {dimension_semantics = [#tpu.dimension_semantics<parallel>, #tpu.dimension_semantics<parallel>, #tpu.dimension_semantics<arbitrary>], iteration_bounds = array<i64: 1, 1, 3>, scalar_prefetch = 0 : i64, scratch_operands = 1 : i64, tpu.core_type = #tpu.core_type<tc>, window_params = [{transform_indices = @transform_0, window_bounds = array<i64: 32, 384>}, {transform_indices = @transform_1, window_bounds = array<i64: 384, 128>}, {transform_indices = @transform_2, window_bounds = array<i64: 1, 128>}, {transform_indices = @transform_3, window_bounds = array<i64: 1, 128>}, {transform_indices = @transform_4, window_bounds = array<i64: 32, 128>}, {transform_indices = @transform_5, window_bounds = array<i64: 32, 128>}]} {
    %c0_i32 = arith.constant 0 : i32
    %0 = arith.cmpi eq, %arg2, %c0_i32 : i32
    %1 = arith.extui %0 : i1 to i32
    %c0_i32_0 = arith.constant 0 : i32
    %2 = arith.cmpi ne, %1, %c0_i32_0 : i32
    scf.if %2 {
      %cst_9 = arith.constant 0.000000e+00 : f32
      %12 = vector.broadcast %cst_9 : f32 to vector<32x128xf32>
      %c0_10 = arith.constant 0 : index
      %c0_11 = arith.constant 0 : index
      %13 = vector.load %arg9[%c0_10, %c0_11] : memref<32x128xf32, #tpu.memory_space<vmem>>, vector<32x128xf32>
      tpu.vector_store %arg9[%c0_10, %c0_11], %12 {strides = array<i32>} : memref<32x128xf32, #tpu.memory_space<vmem>>, vector<32x128xf32>,
    } else {
    }
    %c0 = arith.constant 0 : index
    %c0_1 = arith.constant 0 : index
    %3 = vector.load %arg9[%c0, %c0_1] : memref<32x128xf32, #tpu.memory_space<vmem>>, vector<32x128xf32>
    %c0_2 = arith.constant 0 : index
    %c0_3 = arith.constant 0 : index
    %4 = vector.load %arg3[%c0_2, %c0_3] : memref<32x384xbf16, #tpu.memory_space<vmem>>, vector<32x384xbf16>
    %c0_4 = arith.constant 0 : index
    %c0_5 = arith.constant 0 : index
    %5 = vector.load %arg4[%c0_4, %c0_5] : memref<384x128xbf16, #tpu.memory_space<vmem>>, vector<384x128xbf16>
    %cst = arith.constant dense<0.000000e+00> : vector<32x128xf32>
    %6 = tpu.matmul %4, %5, %cst {dimension_numbers = #tpu.dot_dimension_numbers<[1], [0], [0], [1], [0, 0, 1, 1], [], []>} : vector<32x384xbf16>, vector<384x128xbf16>, vector<32x128xf32> -> vector<32x128xf32>
    %7 = arith.addf %3, %6 : vector<32x128xf32>
    %c0_6 = arith.constant 0 : index
    %c0_7 = arith.constant 0 : index
    %8 = vector.load %arg9[%c0_6, %c0_7] : memref<32x128xf32, #tpu.memory_space<vmem>>, vector<32x128xf32>
    tpu.vector_store %arg9[%c0_6, %c0_7], %7 {strides = array<i32>} : memref<32x128xf32, #tpu.memory_space<vmem>>, vector<32x128xf32>,
    %c2_i32 = arith.constant 2 : i32
    %9 = arith.cmpi eq, %arg2, %c2_i32 : i32
    %10 = arith.extui %9 : i1 to i32
    %c0_i32_8 = arith.constant 0 : i32
    %11 = arith.cmpi ne, %10, %c0_i32_8 : i32
    scf.if %11 {
      %c0_9 = arith.constant 0 : index
      %c0_10 = arith.constant 0 : index
      %12 = vector.load %arg9[%c0_9, %c0_10] : memref<32x128xf32, #tpu.memory_space<vmem>>, vector<32x128xf32>
      %c0_11 = arith.constant 0 : index
      %c0_12 = arith.constant 0 : index
      %13 = vector.load %arg5[%c0_11, %c0_12] : memref<1x128xf32, #tpu.memory_space<vmem>>, vector<1x128xf32>
      %14 = vector.broadcast %13 : vector<1x128xf32> to vector<32x128xf32>
      %15 = arith.mulf %12, %14 : vector<32x128xf32>
      %c0_13 = arith.constant 0 : index
      %c0_14 = arith.constant 0 : index
      %16 = vector.load %arg6[%c0_13, %c0_14] : memref<1x128xf32, #tpu.memory_space<vmem>>, vector<1x128xf32>
      %17 = vector.broadcast %16 : vector<1x128xf32> to vector<32x128xf32>
      %18 = arith.addf %15, %17 : vector<32x128xf32>
      %c0_15 = arith.constant 0 : index
      %c0_16 = arith.constant 0 : index
      %19 = vector.load %arg7[%c0_15, %c0_16] : memref<32x128xbf16, #tpu.memory_space<vmem>>, vector<32x128xbf16>
      %20 = arith.extf %19 : vector<32x128xbf16> to vector<32x128xf32>
      %21 = arith.addf %18, %20 : vector<32x128xf32>
      %cst_17 = arith.constant 0.000000e+00 : f32
      %22 = vector.broadcast %cst_17 : f32 to vector<32x128xf32>
      %23 = arith.maximumf %21, %22 : vector<32x128xf32>
      %24 = arith.truncf %23 : vector<32x128xf32> to vector<32x128xbf16>
      %c0_18 = arith.constant 0 : index
      %c0_19 = arith.constant 0 : index
      %25 = vector.load %arg8[%c0_18, %c0_19] : memref<32x128xbf16, #tpu.memory_space<vmem>>, vector<32x128xbf16>
      tpu.vector_store %arg8[%c0_18, %c0_19], %24 {strides = array<i32>} : memref<32x128xbf16, #tpu.memory_space<vmem>>, vector<32x128xbf16>,
    } else {
    }
    return
  }
  func.func @transform_0(%arg0: i32, %arg1: i32, %arg2: i32) -> (i32, i32) {
    %c0_i32 = arith.constant 0 : i32
    return %arg0, %arg2 : i32, i32
  }
  func.func @transform_1(%arg0: i32, %arg1: i32, %arg2: i32) -> (i32, i32) {
    %c0_i32 = arith.constant 0 : i32
    return %arg2, %arg1 : i32, i32
  }
  func.func @transform_2(%arg0: i32, %arg1: i32, %arg2: i32) -> (i32, i32) {
    %c0_i32 = arith.constant 0 : i32
    %c0_i32_0 = arith.constant 0 : i32
    return %c0_i32, %arg1 : i32, i32
  }
  func.func @transform_3(%arg0: i32, %arg1: i32, %arg2: i32) -> (i32, i32) {
    %c0_i32 = arith.constant 0 : i32
    %c0_i32_0 = arith.constant 0 : i32
    return %c0_i32, %arg1 : i32, i32
  }
  func.func @transform_4(%arg0: i32, %arg1: i32, %arg2: i32) -> (i32, i32) {
    %c0_i32 = arith.constant 0 : i32
    return %arg0, %arg1 : i32, i32
  }
  func.func @transform_5(%arg0: i32, %arg1: i32, %arg2: i32) -> (i32, i32) {
    %c0_i32 = arith.constant 0 : i32
    return %arg0, %arg1 : i32, i32
  }
}

module attributes {stable_mosaic.version = 11 : i64} {
  func.func @_mm_fused_kernel(%arg0: i32, %arg1: i32, %arg2: i32, %arg3: memref<32x128xbf16, #tpu.memory_space<vmem>>, %arg4: memref<128x128xbf16, #tpu.memory_space<vmem>>, %arg5: memref<1x128xf32, #tpu.memory_space<vmem>>, %arg6: memref<1x128xf32, #tpu.memory_space<vmem>>, %arg7: memref<32x128xbf16, #tpu.memory_space<vmem>>, %arg8: memref<32x128xf32, #tpu.memory_space<vmem>>) attributes {dimension_semantics = [#tpu.dimension_semantics<parallel>, #tpu.dimension_semantics<parallel>, #tpu.dimension_semantics<arbitrary>], iteration_bounds = array<i64: 1, 1, 1>, scalar_prefetch = 0 : i64, scratch_operands = 1 : i64, tpu.core_type = #tpu.core_type<tc>, window_params = [{transform_indices = @transform_0, window_bounds = array<i64: 32, 128>}, {transform_indices = @transform_1, window_bounds = array<i64: 128, 128>}, {transform_indices = @transform_2, window_bounds = array<i64: 1, 128>}, {transform_indices = @transform_3, window_bounds = array<i64: 1, 128>}, {transform_indices = @transform_4, window_bounds = array<i64: 32, 128>}]} {
    %c0_i32 = arith.constant 0 : i32
    %0 = arith.cmpi eq, %arg2, %c0_i32 : i32
    %1 = arith.extui %0 : i1 to i32
    %c0_i32_0 = arith.constant 0 : i32
    %2 = arith.cmpi ne, %1, %c0_i32_0 : i32
    scf.if %2 {
      %cst_10 = arith.constant 0.000000e+00 : f32
      %12 = vector.broadcast %cst_10 : f32 to vector<32x128xf32>
      %c0_11 = arith.constant 0 : index
      %c0_12 = arith.constant 0 : index
      %13 = vector.load %arg8[%c0_11, %c0_12] : memref<32x128xf32, #tpu.memory_space<vmem>>, vector<32x128xf32>
      tpu.vector_store %arg8[%c0_11, %c0_12], %12 {strides = array<i32>} : memref<32x128xf32, #tpu.memory_space<vmem>>, vector<32x128xf32>,
    } else {
    }
    %c0 = arith.constant 0 : index
    %c0_1 = arith.constant 0 : index
    %3 = vector.load %arg8[%c0, %c0_1] : memref<32x128xf32, #tpu.memory_space<vmem>>, vector<32x128xf32>
    %c0_2 = arith.constant 0 : index
    %c0_3 = arith.constant 0 : index
    %4 = vector.load %arg3[%c0_2, %c0_3] : memref<32x128xbf16, #tpu.memory_space<vmem>>, vector<32x128xbf16>
    %c0_4 = arith.constant 0 : index
    %c0_5 = arith.constant 0 : index
    %5 = vector.load %arg4[%c0_4, %c0_5] : memref<128x128xbf16, #tpu.memory_space<vmem>>, vector<128x128xbf16>
    %cst = arith.constant dense<0.000000e+00> : vector<32x128xf32>
    %6 = tpu.matmul %4, %5, %cst {dimension_numbers = #tpu.dot_dimension_numbers<[1], [0], [0], [1], [0, 0, 1, 1], [], []>} : vector<32x128xbf16>, vector<128x128xbf16>, vector<32x128xf32> -> vector<32x128xf32>
    %7 = arith.addf %3, %6 : vector<32x128xf32>
    %c0_6 = arith.constant 0 : index
    %c0_7 = arith.constant 0 : index
    %8 = vector.load %arg8[%c0_6, %c0_7] : memref<32x128xf32, #tpu.memory_space<vmem>>, vector<32x128xf32>
    tpu.vector_store %arg8[%c0_6, %c0_7], %7 {strides = array<i32>} : memref<32x128xf32, #tpu.memory_space<vmem>>, vector<32x128xf32>,
    %c0_i32_8 = arith.constant 0 : i32
    %9 = arith.cmpi eq, %arg2, %c0_i32_8 : i32
    %10 = arith.extui %9 : i1 to i32
    %c0_i32_9 = arith.constant 0 : i32
    %11 = arith.cmpi ne, %10, %c0_i32_9 : i32
    scf.if %11 {
      %c0_10 = arith.constant 0 : index
      %c0_11 = arith.constant 0 : index
      %12 = vector.load %arg8[%c0_10, %c0_11] : memref<32x128xf32, #tpu.memory_space<vmem>>, vector<32x128xf32>
      %c0_12 = arith.constant 0 : index
      %c0_13 = arith.constant 0 : index
      %13 = vector.load %arg5[%c0_12, %c0_13] : memref<1x128xf32, #tpu.memory_space<vmem>>, vector<1x128xf32>
      %14 = vector.broadcast %13 : vector<1x128xf32> to vector<32x128xf32>
      %15 = arith.mulf %12, %14 : vector<32x128xf32>
      %c0_14 = arith.constant 0 : index
      %c0_15 = arith.constant 0 : index
      %16 = vector.load %arg6[%c0_14, %c0_15] : memref<1x128xf32, #tpu.memory_space<vmem>>, vector<1x128xf32>
      %17 = vector.broadcast %16 : vector<1x128xf32> to vector<32x128xf32>
      %18 = arith.addf %15, %17 : vector<32x128xf32>
      %19 = arith.truncf %18 : vector<32x128xf32> to vector<32x128xbf16>
      %c0_16 = arith.constant 0 : index
      %c0_17 = arith.constant 0 : index
      %20 = vector.load %arg7[%c0_16, %c0_17] : memref<32x128xbf16, #tpu.memory_space<vmem>>, vector<32x128xbf16>
      tpu.vector_store %arg7[%c0_16, %c0_17], %19 {strides = array<i32>} : memref<32x128xbf16, #tpu.memory_space<vmem>>, vector<32x128xbf16>,
    } else {
    }
    return
  }
  func.func @transform_0(%arg0: i32, %arg1: i32, %arg2: i32) -> (i32, i32) {
    %c0_i32 = arith.constant 0 : i32
    return %arg0, %arg2 : i32, i32
  }
  func.func @transform_1(%arg0: i32, %arg1: i32, %arg2: i32) -> (i32, i32) {
    %c0_i32 = arith.constant 0 : i32
    return %arg2, %arg1 : i32, i32
  }
  func.func @transform_2(%arg0: i32, %arg1: i32, %arg2: i32) -> (i32, i32) {
    %c0_i32 = arith.constant 0 : i32
    %c0_i32_0 = arith.constant 0 : i32
    return %c0_i32, %arg1 : i32, i32
  }
  func.func @transform_3(%arg0: i32, %arg1: i32, %arg2: i32) -> (i32, i32) {
    %c0_i32 = arith.constant 0 : i32
    %c0_i32_0 = arith.constant 0 : i32
    return %c0_i32, %arg1 : i32, i32
  }
  func.func @transform_4(%arg0: i32, %arg1: i32, %arg2: i32) -> (i32, i32) {
    %c0_i32 = arith.constant 0 : i32
    return %arg0, %arg1 : i32, i32
  }
}

module attributes {stable_mosaic.version = 11 : i64} {
  func.func @_mm_fused_kernel(%arg0: i32, %arg1: i32, %arg2: i32, %arg3: memref<16x384xbf16, #tpu.memory_space<vmem>>, %arg4: memref<384x256xbf16, #tpu.memory_space<vmem>>, %arg5: memref<1x256xf32, #tpu.memory_space<vmem>>, %arg6: memref<1x256xf32, #tpu.memory_space<vmem>>, %arg7: memref<16x256xbf16, #tpu.memory_space<vmem>>, %arg8: memref<16x256xf32, #tpu.memory_space<vmem>>) attributes {dimension_semantics = [#tpu.dimension_semantics<parallel>, #tpu.dimension_semantics<parallel>, #tpu.dimension_semantics<arbitrary>], iteration_bounds = array<i64: 1, 1, 3>, scalar_prefetch = 0 : i64, scratch_operands = 1 : i64, tpu.core_type = #tpu.core_type<tc>, window_params = [{transform_indices = @transform_0, window_bounds = array<i64: 16, 384>}, {transform_indices = @transform_1, window_bounds = array<i64: 384, 256>}, {transform_indices = @transform_2, window_bounds = array<i64: 1, 256>}, {transform_indices = @transform_3, window_bounds = array<i64: 1, 256>}, {transform_indices = @transform_4, window_bounds = array<i64: 16, 256>}]} {
    %c0_i32 = arith.constant 0 : i32
    %0 = arith.cmpi eq, %arg2, %c0_i32 : i32
    %1 = arith.extui %0 : i1 to i32
    %c0_i32_0 = arith.constant 0 : i32
    %2 = arith.cmpi ne, %1, %c0_i32_0 : i32
    scf.if %2 {
      %cst_9 = arith.constant 0.000000e+00 : f32
      %12 = vector.broadcast %cst_9 : f32 to vector<16x256xf32>
      %c0_10 = arith.constant 0 : index
      %c0_11 = arith.constant 0 : index
      %13 = vector.load %arg8[%c0_10, %c0_11] : memref<16x256xf32, #tpu.memory_space<vmem>>, vector<16x256xf32>
      tpu.vector_store %arg8[%c0_10, %c0_11], %12 {strides = array<i32>} : memref<16x256xf32, #tpu.memory_space<vmem>>, vector<16x256xf32>,
    } else {
    }
    %c0 = arith.constant 0 : index
    %c0_1 = arith.constant 0 : index
    %3 = vector.load %arg8[%c0, %c0_1] : memref<16x256xf32, #tpu.memory_space<vmem>>, vector<16x256xf32>
    %c0_2 = arith.constant 0 : index
    %c0_3 = arith.constant 0 : index
    %4 = vector.load %arg3[%c0_2, %c0_3] : memref<16x384xbf16, #tpu.memory_space<vmem>>, vector<16x384xbf16>
    %c0_4 = arith.constant 0 : index
    %c0_5 = arith.constant 0 : index
    %5 = vector.load %arg4[%c0_4, %c0_5] : memref<384x256xbf16, #tpu.memory_space<vmem>>, vector<384x256xbf16>
    %cst = arith.constant dense<0.000000e+00> : vector<16x256xf32>
    %6 = tpu.matmul %4, %5, %cst {dimension_numbers = #tpu.dot_dimension_numbers<[1], [0], [0], [1], [0, 0, 1, 1], [], []>} : vector<16x384xbf16>, vector<384x256xbf16>, vector<16x256xf32> -> vector<16x256xf32>
    %7 = arith.addf %3, %6 : vector<16x256xf32>
    %c0_6 = arith.constant 0 : index
    %c0_7 = arith.constant 0 : index
    %8 = vector.load %arg8[%c0_6, %c0_7] : memref<16x256xf32, #tpu.memory_space<vmem>>, vector<16x256xf32>
    tpu.vector_store %arg8[%c0_6, %c0_7], %7 {strides = array<i32>} : memref<16x256xf32, #tpu.memory_space<vmem>>, vector<16x256xf32>,
    %c2_i32 = arith.constant 2 : i32
    %9 = arith.cmpi eq, %arg2, %c2_i32 : i32
    %10 = arith.extui %9 : i1 to i32
    %c0_i32_8 = arith.constant 0 : i32
    %11 = arith.cmpi ne, %10, %c0_i32_8 : i32
    scf.if %11 {
      %c0_9 = arith.constant 0 : index
      %c0_10 = arith.constant 0 : index
      %12 = vector.load %arg8[%c0_9, %c0_10] : memref<16x256xf32, #tpu.memory_space<vmem>>, vector<16x256xf32>
      %c0_11 = arith.constant 0 : index
      %c0_12 = arith.constant 0 : index
      %13 = vector.load %arg5[%c0_11, %c0_12] : memref<1x256xf32, #tpu.memory_space<vmem>>, vector<1x256xf32>
      %14 = vector.broadcast %13 : vector<1x256xf32> to vector<16x256xf32>
      %15 = arith.mulf %12, %14 : vector<16x256xf32>
      %c0_13 = arith.constant 0 : index
      %c0_14 = arith.constant 0 : index
      %16 = vector.load %arg6[%c0_13, %c0_14] : memref<1x256xf32, #tpu.memory_space<vmem>>, vector<1x256xf32>
      %17 = vector.broadcast %16 : vector<1x256xf32> to vector<16x256xf32>
      %18 = arith.addf %15, %17 : vector<16x256xf32>
      %cst_15 = arith.constant 0.000000e+00 : f32
      %19 = vector.broadcast %cst_15 : f32 to vector<16x256xf32>
      %20 = arith.maximumf %18, %19 : vector<16x256xf32>
      %21 = arith.truncf %20 : vector<16x256xf32> to vector<16x256xbf16>
      %c0_16 = arith.constant 0 : index
      %c0_17 = arith.constant 0 : index
      %22 = vector.load %arg7[%c0_16, %c0_17] : memref<16x256xbf16, #tpu.memory_space<vmem>>, vector<16x256xbf16>
      tpu.vector_store %arg7[%c0_16, %c0_17], %21 {strides = array<i32>} : memref<16x256xbf16, #tpu.memory_space<vmem>>, vector<16x256xbf16>,
    } else {
    }
    return
  }
  func.func @transform_0(%arg0: i32, %arg1: i32, %arg2: i32) -> (i32, i32) {
    %c0_i32 = arith.constant 0 : i32
    return %arg0, %arg2 : i32, i32
  }
  func.func @transform_1(%arg0: i32, %arg1: i32, %arg2: i32) -> (i32, i32) {
    %c0_i32 = arith.constant 0 : i32
    return %arg2, %arg1 : i32, i32
  }
  func.func @transform_2(%arg0: i32, %arg1: i32, %arg2: i32) -> (i32, i32) {
    %c0_i32 = arith.constant 0 : i32
    %c0_i32_0 = arith.constant 0 : i32
    return %c0_i32, %arg1 : i32, i32
  }
  func.func @transform_3(%arg0: i32, %arg1: i32, %arg2: i32) -> (i32, i32) {
    %c0_i32 = arith.constant 0 : i32
    %c0_i32_0 = arith.constant 0 : i32
    return %c0_i32, %arg1 : i32, i32
  }
  func.func @transform_4(%arg0: i32, %arg1: i32, %arg2: i32) -> (i32, i32) {
    %c0_i32 = arith.constant 0 : i32
    return %arg0, %arg1 : i32, i32
  }
}

module attributes {stable_mosaic.version = 11 : i64} {
  func.func @_mm_fused_kernel(%arg0: i32, %arg1: i32, %arg2: i32, %arg3: memref<16x128xbf16, #tpu.memory_space<vmem>>, %arg4: memref<128x256xbf16, #tpu.memory_space<vmem>>, %arg5: memref<1x256xf32, #tpu.memory_space<vmem>>, %arg6: memref<1x256xf32, #tpu.memory_space<vmem>>, %arg7: memref<16x256xbf16, #tpu.memory_space<vmem>>, %arg8: memref<16x256xf32, #tpu.memory_space<vmem>>) attributes {dimension_semantics = [#tpu.dimension_semantics<parallel>, #tpu.dimension_semantics<parallel>, #tpu.dimension_semantics<arbitrary>], iteration_bounds = array<i64: 1, 1, 1>, scalar_prefetch = 0 : i64, scratch_operands = 1 : i64, tpu.core_type = #tpu.core_type<tc>, window_params = [{transform_indices = @transform_0, window_bounds = array<i64: 16, 128>}, {transform_indices = @transform_1, window_bounds = array<i64: 128, 256>}, {transform_indices = @transform_2, window_bounds = array<i64: 1, 256>}, {transform_indices = @transform_3, window_bounds = array<i64: 1, 256>}, {transform_indices = @transform_4, window_bounds = array<i64: 16, 256>}]} {
    %c0_i32 = arith.constant 0 : i32
    %0 = arith.cmpi eq, %arg2, %c0_i32 : i32
    %1 = arith.extui %0 : i1 to i32
    %c0_i32_0 = arith.constant 0 : i32
    %2 = arith.cmpi ne, %1, %c0_i32_0 : i32
    scf.if %2 {
      %cst_10 = arith.constant 0.000000e+00 : f32
      %12 = vector.broadcast %cst_10 : f32 to vector<16x256xf32>
      %c0_11 = arith.constant 0 : index
      %c0_12 = arith.constant 0 : index
      %13 = vector.load %arg8[%c0_11, %c0_12] : memref<16x256xf32, #tpu.memory_space<vmem>>, vector<16x256xf32>
      tpu.vector_store %arg8[%c0_11, %c0_12], %12 {strides = array<i32>} : memref<16x256xf32, #tpu.memory_space<vmem>>, vector<16x256xf32>,
    } else {
    }
    %c0 = arith.constant 0 : index
    %c0_1 = arith.constant 0 : index
    %3 = vector.load %arg8[%c0, %c0_1] : memref<16x256xf32, #tpu.memory_space<vmem>>, vector<16x256xf32>
    %c0_2 = arith.constant 0 : index
    %c0_3 = arith.constant 0 : index
    %4 = vector.load %arg3[%c0_2, %c0_3] : memref<16x128xbf16, #tpu.memory_space<vmem>>, vector<16x128xbf16>
    %c0_4 = arith.constant 0 : index
    %c0_5 = arith.constant 0 : index
    %5 = vector.load %arg4[%c0_4, %c0_5] : memref<128x256xbf16, #tpu.memory_space<vmem>>, vector<128x256xbf16>
    %cst = arith.constant dense<0.000000e+00> : vector<16x256xf32>
    %6 = tpu.matmul %4, %5, %cst {dimension_numbers = #tpu.dot_dimension_numbers<[1], [0], [0], [1], [0, 0, 1, 1], [], []>} : vector<16x128xbf16>, vector<128x256xbf16>, vector<16x256xf32> -> vector<16x256xf32>
    %7 = arith.addf %3, %6 : vector<16x256xf32>
    %c0_6 = arith.constant 0 : index
    %c0_7 = arith.constant 0 : index
    %8 = vector.load %arg8[%c0_6, %c0_7] : memref<16x256xf32, #tpu.memory_space<vmem>>, vector<16x256xf32>
    tpu.vector_store %arg8[%c0_6, %c0_7], %7 {strides = array<i32>} : memref<16x256xf32, #tpu.memory_space<vmem>>, vector<16x256xf32>,
    %c0_i32_8 = arith.constant 0 : i32
    %9 = arith.cmpi eq, %arg2, %c0_i32_8 : i32
    %10 = arith.extui %9 : i1 to i32
    %c0_i32_9 = arith.constant 0 : i32
    %11 = arith.cmpi ne, %10, %c0_i32_9 : i32
    scf.if %11 {
      %c0_10 = arith.constant 0 : index
      %c0_11 = arith.constant 0 : index
      %12 = vector.load %arg8[%c0_10, %c0_11] : memref<16x256xf32, #tpu.memory_space<vmem>>, vector<16x256xf32>
      %c0_12 = arith.constant 0 : index
      %c0_13 = arith.constant 0 : index
      %13 = vector.load %arg5[%c0_12, %c0_13] : memref<1x256xf32, #tpu.memory_space<vmem>>, vector<1x256xf32>
      %14 = vector.broadcast %13 : vector<1x256xf32> to vector<16x256xf32>
      %15 = arith.mulf %12, %14 : vector<16x256xf32>
      %c0_14 = arith.constant 0 : index
      %c0_15 = arith.constant 0 : index
      %16 = vector.load %arg6[%c0_14, %c0_15] : memref<1x256xf32, #tpu.memory_space<vmem>>, vector<1x256xf32>
      %17 = vector.broadcast %16 : vector<1x256xf32> to vector<16x256xf32>
      %18 = arith.addf %15, %17 : vector<16x256xf32>
      %19 = arith.truncf %18 : vector<16x256xf32> to vector<16x256xbf16>
      %c0_16 = arith.constant 0 : index
      %c0_17 = arith.constant 0 : index
      %20 = vector.load %arg7[%c0_16, %c0_17] : memref<16x256xbf16, #tpu.memory_space<vmem>>, vector<16x256xbf16>
      tpu.vector_store %arg7[%c0_16, %c0_17], %19 {strides = array<i32>} : memref<16x256xbf16, #tpu.memory_space<vmem>>, vector<16x256xbf16>,
    } else {
    }
    return
  }
  func.func @transform_0(%arg0: i32, %arg1: i32, %arg2: i32) -> (i32, i32) {
    %c0_i32 = arith.constant 0 : i32
    return %arg0, %arg2 : i32, i32
  }
  func.func @transform_1(%arg0: i32, %arg1: i32, %arg2: i32) -> (i32, i32) {
    %c0_i32 = arith.constant 0 : i32
    return %arg2, %arg1 : i32, i32
  }
  func.func @transform_2(%arg0: i32, %arg1: i32, %arg2: i32) -> (i32, i32) {
    %c0_i32 = arith.constant 0 : i32
    %c0_i32_0 = arith.constant 0 : i32
    return %c0_i32, %arg1 : i32, i32
  }
  func.func @transform_3(%arg0: i32, %arg1: i32, %arg2: i32) -> (i32, i32) {
    %c0_i32 = arith.constant 0 : i32
    %c0_i32_0 = arith.constant 0 : i32
    return %c0_i32, %arg1 : i32, i32
  }
  func.func @transform_4(%arg0: i32, %arg1: i32, %arg2: i32) -> (i32, i32) {
    %c0_i32 = arith.constant 0 : i32
    return %arg0, %arg1 : i32, i32
  }
}

module attributes {stable_mosaic.version = 11 : i64} {
  func.func @_mm_fused_kernel(%arg0: i32, %arg1: i32, %arg2: i32, %arg3: memref<16x768xbf16, #tpu.memory_space<vmem>>, %arg4: memref<768x256xbf16, #tpu.memory_space<vmem>>, %arg5: memref<1x256xf32, #tpu.memory_space<vmem>>, %arg6: memref<1x256xf32, #tpu.memory_space<vmem>>, %arg7: memref<16x256xbf16, #tpu.memory_space<vmem>>, %arg8: memref<16x256xf32, #tpu.memory_space<vmem>>) attributes {dimension_semantics = [#tpu.dimension_semantics<parallel>, #tpu.dimension_semantics<parallel>, #tpu.dimension_semantics<arbitrary>], iteration_bounds = array<i64: 1, 1, 3>, scalar_prefetch = 0 : i64, scratch_operands = 1 : i64, tpu.core_type = #tpu.core_type<tc>, window_params = [{transform_indices = @transform_0, window_bounds = array<i64: 16, 768>}, {transform_indices = @transform_1, window_bounds = array<i64: 768, 256>}, {transform_indices = @transform_2, window_bounds = array<i64: 1, 256>}, {transform_indices = @transform_3, window_bounds = array<i64: 1, 256>}, {transform_indices = @transform_4, window_bounds = array<i64: 16, 256>}]} {
    %c0_i32 = arith.constant 0 : i32
    %0 = arith.cmpi eq, %arg2, %c0_i32 : i32
    %1 = arith.extui %0 : i1 to i32
    %c0_i32_0 = arith.constant 0 : i32
    %2 = arith.cmpi ne, %1, %c0_i32_0 : i32
    scf.if %2 {
      %cst_9 = arith.constant 0.000000e+00 : f32
      %12 = vector.broadcast %cst_9 : f32 to vector<16x256xf32>
      %c0_10 = arith.constant 0 : index
      %c0_11 = arith.constant 0 : index
      %13 = vector.load %arg8[%c0_10, %c0_11] : memref<16x256xf32, #tpu.memory_space<vmem>>, vector<16x256xf32>
      tpu.vector_store %arg8[%c0_10, %c0_11], %12 {strides = array<i32>} : memref<16x256xf32, #tpu.memory_space<vmem>>, vector<16x256xf32>,
    } else {
    }
    %c0 = arith.constant 0 : index
    %c0_1 = arith.constant 0 : index
    %3 = vector.load %arg8[%c0, %c0_1] : memref<16x256xf32, #tpu.memory_space<vmem>>, vector<16x256xf32>
    %c0_2 = arith.constant 0 : index
    %c0_3 = arith.constant 0 : index
    %4 = vector.load %arg3[%c0_2, %c0_3] : memref<16x768xbf16, #tpu.memory_space<vmem>>, vector<16x768xbf16>
    %c0_4 = arith.constant 0 : index
    %c0_5 = arith.constant 0 : index
    %5 = vector.load %arg4[%c0_4, %c0_5] : memref<768x256xbf16, #tpu.memory_space<vmem>>, vector<768x256xbf16>
    %cst = arith.constant dense<0.000000e+00> : vector<16x256xf32>
    %6 = tpu.matmul %4, %5, %cst {dimension_numbers = #tpu.dot_dimension_numbers<[1], [0], [0], [1], [0, 0, 1, 1], [], []>} : vector<16x768xbf16>, vector<768x256xbf16>, vector<16x256xf32> -> vector<16x256xf32>
    %7 = arith.addf %3, %6 : vector<16x256xf32>
    %c0_6 = arith.constant 0 : index
    %c0_7 = arith.constant 0 : index
    %8 = vector.load %arg8[%c0_6, %c0_7] : memref<16x256xf32, #tpu.memory_space<vmem>>, vector<16x256xf32>
    tpu.vector_store %arg8[%c0_6, %c0_7], %7 {strides = array<i32>} : memref<16x256xf32, #tpu.memory_space<vmem>>, vector<16x256xf32>,
    %c2_i32 = arith.constant 2 : i32
    %9 = arith.cmpi eq, %arg2, %c2_i32 : i32
    %10 = arith.extui %9 : i1 to i32
    %c0_i32_8 = arith.constant 0 : i32
    %11 = arith.cmpi ne, %10, %c0_i32_8 : i32
    scf.if %11 {
      %c0_9 = arith.constant 0 : index
      %c0_10 = arith.constant 0 : index
      %12 = vector.load %arg8[%c0_9, %c0_10] : memref<16x256xf32, #tpu.memory_space<vmem>>, vector<16x256xf32>
      %c0_11 = arith.constant 0 : index
      %c0_12 = arith.constant 0 : index
      %13 = vector.load %arg5[%c0_11, %c0_12] : memref<1x256xf32, #tpu.memory_space<vmem>>, vector<1x256xf32>
      %14 = vector.broadcast %13 : vector<1x256xf32> to vector<16x256xf32>
      %15 = arith.mulf %12, %14 : vector<16x256xf32>
      %c0_13 = arith.constant 0 : index
      %c0_14 = arith.constant 0 : index
      %16 = vector.load %arg6[%c0_13, %c0_14] : memref<1x256xf32, #tpu.memory_space<vmem>>, vector<1x256xf32>
      %17 = vector.broadcast %16 : vector<1x256xf32> to vector<16x256xf32>
      %18 = arith.addf %15, %17 : vector<16x256xf32>
      %cst_15 = arith.constant 0.000000e+00 : f32
      %19 = vector.broadcast %cst_15 : f32 to vector<16x256xf32>
      %20 = arith.maximumf %18, %19 : vector<16x256xf32>
      %21 = arith.truncf %20 : vector<16x256xf32> to vector<16x256xbf16>
      %c0_16 = arith.constant 0 : index
      %c0_17 = arith.constant 0 : index
      %22 = vector.load %arg7[%c0_16, %c0_17] : memref<16x256xbf16, #tpu.memory_space<vmem>>, vector<16x256xbf16>
      tpu.vector_store %arg7[%c0_16, %c0_17], %21 {strides = array<i32>} : memref<16x256xbf16, #tpu.memory_space<vmem>>, vector<16x256xbf16>,
    } else {
    }
    return
  }
  func.func @transform_0(%arg0: i32, %arg1: i32, %arg2: i32) -> (i32, i32) {
    %c0_i32 = arith.constant 0 : i32
    return %arg0, %arg2 : i32, i32
  }
  func.func @transform_1(%arg0: i32, %arg1: i32, %arg2: i32) -> (i32, i32) {
    %c0_i32 = arith.constant 0 : i32
    return %arg2, %arg1 : i32, i32
  }
  func.func @transform_2(%arg0: i32, %arg1: i32, %arg2: i32) -> (i32, i32) {
    %c0_i32 = arith.constant 0 : i32
    %c0_i32_0 = arith.constant 0 : i32
    return %c0_i32, %arg1 : i32, i32
  }
  func.func @transform_3(%arg0: i32, %arg1: i32, %arg2: i32) -> (i32, i32) {
    %c0_i32 = arith.constant 0 : i32
    %c0_i32_0 = arith.constant 0 : i32
    return %c0_i32, %arg1 : i32, i32
  }
  func.func @transform_4(%arg0: i32, %arg1: i32, %arg2: i32) -> (i32, i32) {
    %c0_i32 = arith.constant 0 : i32
    return %arg0, %arg1 : i32, i32
  }
}

module attributes {stable_mosaic.version = 11 : i64} {
  func.func @_mm_fused_kernel(%arg0: i32, %arg1: i32, %arg2: i32, %arg3: memref<16x768xbf16, #tpu.memory_space<vmem>>, %arg4: memref<768x256xbf16, #tpu.memory_space<vmem>>, %arg5: memref<1x256xf32, #tpu.memory_space<vmem>>, %arg6: memref<1x256xf32, #tpu.memory_space<vmem>>, %arg7: memref<16x256xbf16, #tpu.memory_space<vmem>>, %arg8: memref<16x256xbf16, #tpu.memory_space<vmem>>, %arg9: memref<16x256xf32, #tpu.memory_space<vmem>>) attributes {dimension_semantics = [#tpu.dimension_semantics<parallel>, #tpu.dimension_semantics<parallel>, #tpu.dimension_semantics<arbitrary>], iteration_bounds = array<i64: 1, 1, 3>, scalar_prefetch = 0 : i64, scratch_operands = 1 : i64, tpu.core_type = #tpu.core_type<tc>, window_params = [{transform_indices = @transform_0, window_bounds = array<i64: 16, 768>}, {transform_indices = @transform_1, window_bounds = array<i64: 768, 256>}, {transform_indices = @transform_2, window_bounds = array<i64: 1, 256>}, {transform_indices = @transform_3, window_bounds = array<i64: 1, 256>}, {transform_indices = @transform_4, window_bounds = array<i64: 16, 256>}, {transform_indices = @transform_5, window_bounds = array<i64: 16, 256>}]} {
    %c0_i32 = arith.constant 0 : i32
    %0 = arith.cmpi eq, %arg2, %c0_i32 : i32
    %1 = arith.extui %0 : i1 to i32
    %c0_i32_0 = arith.constant 0 : i32
    %2 = arith.cmpi ne, %1, %c0_i32_0 : i32
    scf.if %2 {
      %cst_9 = arith.constant 0.000000e+00 : f32
      %12 = vector.broadcast %cst_9 : f32 to vector<16x256xf32>
      %c0_10 = arith.constant 0 : index
      %c0_11 = arith.constant 0 : index
      %13 = vector.load %arg9[%c0_10, %c0_11] : memref<16x256xf32, #tpu.memory_space<vmem>>, vector<16x256xf32>
      tpu.vector_store %arg9[%c0_10, %c0_11], %12 {strides = array<i32>} : memref<16x256xf32, #tpu.memory_space<vmem>>, vector<16x256xf32>,
    } else {
    }
    %c0 = arith.constant 0 : index
    %c0_1 = arith.constant 0 : index
    %3 = vector.load %arg9[%c0, %c0_1] : memref<16x256xf32, #tpu.memory_space<vmem>>, vector<16x256xf32>
    %c0_2 = arith.constant 0 : index
    %c0_3 = arith.constant 0 : index
    %4 = vector.load %arg3[%c0_2, %c0_3] : memref<16x768xbf16, #tpu.memory_space<vmem>>, vector<16x768xbf16>
    %c0_4 = arith.constant 0 : index
    %c0_5 = arith.constant 0 : index
    %5 = vector.load %arg4[%c0_4, %c0_5] : memref<768x256xbf16, #tpu.memory_space<vmem>>, vector<768x256xbf16>
    %cst = arith.constant dense<0.000000e+00> : vector<16x256xf32>
    %6 = tpu.matmul %4, %5, %cst {dimension_numbers = #tpu.dot_dimension_numbers<[1], [0], [0], [1], [0, 0, 1, 1], [], []>} : vector<16x768xbf16>, vector<768x256xbf16>, vector<16x256xf32> -> vector<16x256xf32>
    %7 = arith.addf %3, %6 : vector<16x256xf32>
    %c0_6 = arith.constant 0 : index
    %c0_7 = arith.constant 0 : index
    %8 = vector.load %arg9[%c0_6, %c0_7] : memref<16x256xf32, #tpu.memory_space<vmem>>, vector<16x256xf32>
    tpu.vector_store %arg9[%c0_6, %c0_7], %7 {strides = array<i32>} : memref<16x256xf32, #tpu.memory_space<vmem>>, vector<16x256xf32>,
    %c2_i32 = arith.constant 2 : i32
    %9 = arith.cmpi eq, %arg2, %c2_i32 : i32
    %10 = arith.extui %9 : i1 to i32
    %c0_i32_8 = arith.constant 0 : i32
    %11 = arith.cmpi ne, %10, %c0_i32_8 : i32
    scf.if %11 {
      %c0_9 = arith.constant 0 : index
      %c0_10 = arith.constant 0 : index
      %12 = vector.load %arg9[%c0_9, %c0_10] : memref<16x256xf32, #tpu.memory_space<vmem>>, vector<16x256xf32>
      %c0_11 = arith.constant 0 : index
      %c0_12 = arith.constant 0 : index
      %13 = vector.load %arg5[%c0_11, %c0_12] : memref<1x256xf32, #tpu.memory_space<vmem>>, vector<1x256xf32>
      %14 = vector.broadcast %13 : vector<1x256xf32> to vector<16x256xf32>
      %15 = arith.mulf %12, %14 : vector<16x256xf32>
      %c0_13 = arith.constant 0 : index
      %c0_14 = arith.constant 0 : index
      %16 = vector.load %arg6[%c0_13, %c0_14] : memref<1x256xf32, #tpu.memory_space<vmem>>, vector<1x256xf32>
      %17 = vector.broadcast %16 : vector<1x256xf32> to vector<16x256xf32>
      %18 = arith.addf %15, %17 : vector<16x256xf32>
      %c0_15 = arith.constant 0 : index
      %c0_16 = arith.constant 0 : index
      %19 = vector.load %arg7[%c0_15, %c0_16] : memref<16x256xbf16, #tpu.memory_space<vmem>>, vector<16x256xbf16>
      %20 = arith.extf %19 : vector<16x256xbf16> to vector<16x256xf32>
      %21 = arith.addf %18, %20 : vector<16x256xf32>
      %cst_17 = arith.constant 0.000000e+00 : f32
      %22 = vector.broadcast %cst_17 : f32 to vector<16x256xf32>
      %23 = arith.maximumf %21, %22 : vector<16x256xf32>
      %24 = arith.truncf %23 : vector<16x256xf32> to vector<16x256xbf16>
      %c0_18 = arith.constant 0 : index
      %c0_19 = arith.constant 0 : index
      %25 = vector.load %arg8[%c0_18, %c0_19] : memref<16x256xbf16, #tpu.memory_space<vmem>>, vector<16x256xbf16>
      tpu.vector_store %arg8[%c0_18, %c0_19], %24 {strides = array<i32>} : memref<16x256xbf16, #tpu.memory_space<vmem>>, vector<16x256xbf16>,
    } else {
    }
    return
  }
  func.func @transform_0(%arg0: i32, %arg1: i32, %arg2: i32) -> (i32, i32) {
    %c0_i32 = arith.constant 0 : i32
    return %arg0, %arg2 : i32, i32
  }
  func.func @transform_1(%arg0: i32, %arg1: i32, %arg2: i32) -> (i32, i32) {
    %c0_i32 = arith.constant 0 : i32
    return %arg2, %arg1 : i32, i32
  }
  func.func @transform_2(%arg0: i32, %arg1: i32, %arg2: i32) -> (i32, i32) {
    %c0_i32 = arith.constant 0 : i32
    %c0_i32_0 = arith.constant 0 : i32
    return %c0_i32, %arg1 : i32, i32
  }
  func.func @transform_3(%arg0: i32, %arg1: i32, %arg2: i32) -> (i32, i32) {
    %c0_i32 = arith.constant 0 : i32
    %c0_i32_0 = arith.constant 0 : i32
    return %c0_i32, %arg1 : i32, i32
  }
  func.func @transform_4(%arg0: i32, %arg1: i32, %arg2: i32) -> (i32, i32) {
    %c0_i32 = arith.constant 0 : i32
    return %arg0, %arg1 : i32, i32
  }
  func.func @transform_5(%arg0: i32, %arg1: i32, %arg2: i32) -> (i32, i32) {
    %c0_i32 = arith.constant 0 : i32
    return %arg0, %arg1 : i32, i32
  }
}

module attributes {stable_mosaic.version = 11 : i64} {
  func.func @_mm_fused_kernel(%arg0: i32, %arg1: i32, %arg2: i32, %arg3: memref<16x768xbf16, #tpu.memory_space<vmem>>, %arg4: memref<768x512xbf16, #tpu.memory_space<vmem>>, %arg5: memref<1x512xf32, #tpu.memory_space<vmem>>, %arg6: memref<1x512xf32, #tpu.memory_space<vmem>>, %arg7: memref<16x512xbf16, #tpu.memory_space<vmem>>, %arg8: memref<16x512xf32, #tpu.memory_space<vmem>>) attributes {dimension_semantics = [#tpu.dimension_semantics<parallel>, #tpu.dimension_semantics<parallel>, #tpu.dimension_semantics<arbitrary>], iteration_bounds = array<i64: 1, 1, 3>, scalar_prefetch = 0 : i64, scratch_operands = 1 : i64, tpu.core_type = #tpu.core_type<tc>, window_params = [{transform_indices = @transform_0, window_bounds = array<i64: 16, 768>}, {transform_indices = @transform_1, window_bounds = array<i64: 768, 512>}, {transform_indices = @transform_2, window_bounds = array<i64: 1, 512>}, {transform_indices = @transform_3, window_bounds = array<i64: 1, 512>}, {transform_indices = @transform_4, window_bounds = array<i64: 16, 512>}]} {
    %c0_i32 = arith.constant 0 : i32
    %0 = arith.cmpi eq, %arg2, %c0_i32 : i32
    %1 = arith.extui %0 : i1 to i32
    %c0_i32_0 = arith.constant 0 : i32
    %2 = arith.cmpi ne, %1, %c0_i32_0 : i32
    scf.if %2 {
      %cst_9 = arith.constant 0.000000e+00 : f32
      %12 = vector.broadcast %cst_9 : f32 to vector<16x512xf32>
      %c0_10 = arith.constant 0 : index
      %c0_11 = arith.constant 0 : index
      %13 = vector.load %arg8[%c0_10, %c0_11] : memref<16x512xf32, #tpu.memory_space<vmem>>, vector<16x512xf32>
      tpu.vector_store %arg8[%c0_10, %c0_11], %12 {strides = array<i32>} : memref<16x512xf32, #tpu.memory_space<vmem>>, vector<16x512xf32>,
    } else {
    }
    %c0 = arith.constant 0 : index
    %c0_1 = arith.constant 0 : index
    %3 = vector.load %arg8[%c0, %c0_1] : memref<16x512xf32, #tpu.memory_space<vmem>>, vector<16x512xf32>
    %c0_2 = arith.constant 0 : index
    %c0_3 = arith.constant 0 : index
    %4 = vector.load %arg3[%c0_2, %c0_3] : memref<16x768xbf16, #tpu.memory_space<vmem>>, vector<16x768xbf16>
    %c0_4 = arith.constant 0 : index
    %c0_5 = arith.constant 0 : index
    %5 = vector.load %arg4[%c0_4, %c0_5] : memref<768x512xbf16, #tpu.memory_space<vmem>>, vector<768x512xbf16>
    %cst = arith.constant dense<0.000000e+00> : vector<16x512xf32>
    %6 = tpu.matmul %4, %5, %cst {dimension_numbers = #tpu.dot_dimension_numbers<[1], [0], [0], [1], [0, 0, 1, 1], [], []>} : vector<16x768xbf16>, vector<768x512xbf16>, vector<16x512xf32> -> vector<16x512xf32>
    %7 = arith.addf %3, %6 : vector<16x512xf32>
    %c0_6 = arith.constant 0 : index
    %c0_7 = arith.constant 0 : index
    %8 = vector.load %arg8[%c0_6, %c0_7] : memref<16x512xf32, #tpu.memory_space<vmem>>, vector<16x512xf32>
    tpu.vector_store %arg8[%c0_6, %c0_7], %7 {strides = array<i32>} : memref<16x512xf32, #tpu.memory_space<vmem>>, vector<16x512xf32>,
    %c2_i32 = arith.constant 2 : i32
    %9 = arith.cmpi eq, %arg2, %c2_i32 : i32
    %10 = arith.extui %9 : i1 to i32
    %c0_i32_8 = arith.constant 0 : i32
    %11 = arith.cmpi ne, %10, %c0_i32_8 : i32
    scf.if %11 {
      %c0_9 = arith.constant 0 : index
      %c0_10 = arith.constant 0 : index
      %12 = vector.load %arg8[%c0_9, %c0_10] : memref<16x512xf32, #tpu.memory_space<vmem>>, vector<16x512xf32>
      %c0_11 = arith.constant 0 : index
      %c0_12 = arith.constant 0 : index
      %13 = vector.load %arg5[%c0_11, %c0_12] : memref<1x512xf32, #tpu.memory_space<vmem>>, vector<1x512xf32>
      %14 = vector.broadcast %13 : vector<1x512xf32> to vector<16x512xf32>
      %15 = arith.mulf %12, %14 : vector<16x512xf32>
      %c0_13 = arith.constant 0 : index
      %c0_14 = arith.constant 0 : index
      %16 = vector.load %arg6[%c0_13, %c0_14] : memref<1x512xf32, #tpu.memory_space<vmem>>, vector<1x512xf32>
      %17 = vector.broadcast %16 : vector<1x512xf32> to vector<16x512xf32>
      %18 = arith.addf %15, %17 : vector<16x512xf32>
      %cst_15 = arith.constant 0.000000e+00 : f32
      %19 = vector.broadcast %cst_15 : f32 to vector<16x512xf32>
      %20 = arith.maximumf %18, %19 : vector<16x512xf32>
      %21 = arith.truncf %20 : vector<16x512xf32> to vector<16x512xbf16>
      %c0_16 = arith.constant 0 : index
      %c0_17 = arith.constant 0 : index
      %22 = vector.load %arg7[%c0_16, %c0_17] : memref<16x512xbf16, #tpu.memory_space<vmem>>, vector<16x512xbf16>
      tpu.vector_store %arg7[%c0_16, %c0_17], %21 {strides = array<i32>} : memref<16x512xbf16, #tpu.memory_space<vmem>>, vector<16x512xbf16>,
    } else {
    }
    return
  }
  func.func @transform_0(%arg0: i32, %arg1: i32, %arg2: i32) -> (i32, i32) {
    %c0_i32 = arith.constant 0 : i32
    return %arg0, %arg2 : i32, i32
  }
  func.func @transform_1(%arg0: i32, %arg1: i32, %arg2: i32) -> (i32, i32) {
    %c0_i32 = arith.constant 0 : i32
    return %arg2, %arg1 : i32, i32
  }
  func.func @transform_2(%arg0: i32, %arg1: i32, %arg2: i32) -> (i32, i32) {
    %c0_i32 = arith.constant 0 : i32
    %c0_i32_0 = arith.constant 0 : i32
    return %c0_i32, %arg1 : i32, i32
  }
  func.func @transform_3(%arg0: i32, %arg1: i32, %arg2: i32) -> (i32, i32) {
    %c0_i32 = arith.constant 0 : i32
    %c0_i32_0 = arith.constant 0 : i32
    return %c0_i32, %arg1 : i32, i32
  }
  func.func @transform_4(%arg0: i32, %arg1: i32, %arg2: i32) -> (i32, i32) {
    %c0_i32 = arith.constant 0 : i32
    return %arg0, %arg1 : i32, i32
  }
}

module attributes {stable_mosaic.version = 11 : i64} {
  func.func @_mm_fused_kernel(%arg0: i32, %arg1: i32, %arg2: i32, %arg3: memref<16x768xbf16, #tpu.memory_space<vmem>>, %arg4: memref<768x512xbf16, #tpu.memory_space<vmem>>, %arg5: memref<1x512xf32, #tpu.memory_space<vmem>>, %arg6: memref<1x512xf32, #tpu.memory_space<vmem>>, %arg7: memref<16x512xbf16, #tpu.memory_space<vmem>>, %arg8: memref<16x512xbf16, #tpu.memory_space<vmem>>, %arg9: memref<16x512xf32, #tpu.memory_space<vmem>>) attributes {dimension_semantics = [#tpu.dimension_semantics<parallel>, #tpu.dimension_semantics<parallel>, #tpu.dimension_semantics<arbitrary>], iteration_bounds = array<i64: 1, 1, 6>, scalar_prefetch = 0 : i64, scratch_operands = 1 : i64, tpu.core_type = #tpu.core_type<tc>, window_params = [{transform_indices = @transform_0, window_bounds = array<i64: 16, 768>}, {transform_indices = @transform_1, window_bounds = array<i64: 768, 512>}, {transform_indices = @transform_2, window_bounds = array<i64: 1, 512>}, {transform_indices = @transform_3, window_bounds = array<i64: 1, 512>}, {transform_indices = @transform_4, window_bounds = array<i64: 16, 512>}, {transform_indices = @transform_5, window_bounds = array<i64: 16, 512>}]} {
    %c0_i32 = arith.constant 0 : i32
    %0 = arith.cmpi eq, %arg2, %c0_i32 : i32
    %1 = arith.extui %0 : i1 to i32
    %c0_i32_0 = arith.constant 0 : i32
    %2 = arith.cmpi ne, %1, %c0_i32_0 : i32
    scf.if %2 {
      %cst_9 = arith.constant 0.000000e+00 : f32
      %12 = vector.broadcast %cst_9 : f32 to vector<16x512xf32>
      %c0_10 = arith.constant 0 : index
      %c0_11 = arith.constant 0 : index
      %13 = vector.load %arg9[%c0_10, %c0_11] : memref<16x512xf32, #tpu.memory_space<vmem>>, vector<16x512xf32>
      tpu.vector_store %arg9[%c0_10, %c0_11], %12 {strides = array<i32>} : memref<16x512xf32, #tpu.memory_space<vmem>>, vector<16x512xf32>,
    } else {
    }
    %c0 = arith.constant 0 : index
    %c0_1 = arith.constant 0 : index
    %3 = vector.load %arg9[%c0, %c0_1] : memref<16x512xf32, #tpu.memory_space<vmem>>, vector<16x512xf32>
    %c0_2 = arith.constant 0 : index
    %c0_3 = arith.constant 0 : index
    %4 = vector.load %arg3[%c0_2, %c0_3] : memref<16x768xbf16, #tpu.memory_space<vmem>>, vector<16x768xbf16>
    %c0_4 = arith.constant 0 : index
    %c0_5 = arith.constant 0 : index
    %5 = vector.load %arg4[%c0_4, %c0_5] : memref<768x512xbf16, #tpu.memory_space<vmem>>, vector<768x512xbf16>
    %cst = arith.constant dense<0.000000e+00> : vector<16x512xf32>
    %6 = tpu.matmul %4, %5, %cst {dimension_numbers = #tpu.dot_dimension_numbers<[1], [0], [0], [1], [0, 0, 1, 1], [], []>} : vector<16x768xbf16>, vector<768x512xbf16>, vector<16x512xf32> -> vector<16x512xf32>
    %7 = arith.addf %3, %6 : vector<16x512xf32>
    %c0_6 = arith.constant 0 : index
    %c0_7 = arith.constant 0 : index
    %8 = vector.load %arg9[%c0_6, %c0_7] : memref<16x512xf32, #tpu.memory_space<vmem>>, vector<16x512xf32>
    tpu.vector_store %arg9[%c0_6, %c0_7], %7 {strides = array<i32>} : memref<16x512xf32, #tpu.memory_space<vmem>>, vector<16x512xf32>,
    %c5_i32 = arith.constant 5 : i32
    %9 = arith.cmpi eq, %arg2, %c5_i32 : i32
    %10 = arith.extui %9 : i1 to i32
    %c0_i32_8 = arith.constant 0 : i32
    %11 = arith.cmpi ne, %10, %c0_i32_8 : i32
    scf.if %11 {
      %c0_9 = arith.constant 0 : index
      %c0_10 = arith.constant 0 : index
      %12 = vector.load %arg9[%c0_9, %c0_10] : memref<16x512xf32, #tpu.memory_space<vmem>>, vector<16x512xf32>
      %c0_11 = arith.constant 0 : index
      %c0_12 = arith.constant 0 : index
      %13 = vector.load %arg5[%c0_11, %c0_12] : memref<1x512xf32, #tpu.memory_space<vmem>>, vector<1x512xf32>
      %14 = vector.broadcast %13 : vector<1x512xf32> to vector<16x512xf32>
      %15 = arith.mulf %12, %14 : vector<16x512xf32>
      %c0_13 = arith.constant 0 : index
      %c0_14 = arith.constant 0 : index
      %16 = vector.load %arg6[%c0_13, %c0_14] : memref<1x512xf32, #tpu.memory_space<vmem>>, vector<1x512xf32>
      %17 = vector.broadcast %16 : vector<1x512xf32> to vector<16x512xf32>
      %18 = arith.addf %15, %17 : vector<16x512xf32>
      %c0_15 = arith.constant 0 : index
      %c0_16 = arith.constant 0 : index
      %19 = vector.load %arg7[%c0_15, %c0_16] : memref<16x512xbf16, #tpu.memory_space<vmem>>, vector<16x512xbf16>
      %20 = arith.extf %19 : vector<16x512xbf16> to vector<16x512xf32>
      %21 = arith.addf %18, %20 : vector<16x512xf32>
      %cst_17 = arith.constant 0.000000e+00 : f32
      %22 = vector.broadcast %cst_17 : f32 to vector<16x512xf32>
      %23 = arith.maximumf %21, %22 : vector<16x512xf32>
      %24 = arith.truncf %23 : vector<16x512xf32> to vector<16x512xbf16>
      %c0_18 = arith.constant 0 : index
      %c0_19 = arith.constant 0 : index
      %25 = vector.load %arg8[%c0_18, %c0_19] : memref<16x512xbf16, #tpu.memory_space<vmem>>, vector<16x512xbf16>
      tpu.vector_store %arg8[%c0_18, %c0_19], %24 {strides = array<i32>} : memref<16x512xbf16, #tpu.memory_space<vmem>>, vector<16x512xbf16>,
    } else {
    }
    return
  }
  func.func @transform_0(%arg0: i32, %arg1: i32, %arg2: i32) -> (i32, i32) {
    %c0_i32 = arith.constant 0 : i32
    return %arg0, %arg2 : i32, i32
  }
  func.func @transform_1(%arg0: i32, %arg1: i32, %arg2: i32) -> (i32, i32) {
    %c0_i32 = arith.constant 0 : i32
    return %arg2, %arg1 : i32, i32
  }
  func.func @transform_2(%arg0: i32, %arg1: i32, %arg2: i32) -> (i32, i32) {
    %c0_i32 = arith.constant 0 : i32
    %c0_i32_0 = arith.constant 0 : i32
    return %c0_i32, %arg1 : i32, i32
  }
  func.func @transform_3(%arg0: i32, %arg1: i32, %arg2: i32) -> (i32, i32) {
    %c0_i32 = arith.constant 0 : i32
    %c0_i32_0 = arith.constant 0 : i32
    return %c0_i32, %arg1 : i32, i32
  }
  func.func @transform_4(%arg0: i32, %arg1: i32, %arg2: i32) -> (i32, i32) {
    %c0_i32 = arith.constant 0 : i32
    return %arg0, %arg1 : i32, i32
  }
  func.func @transform_5(%arg0: i32, %arg1: i32, %arg2: i32) -> (i32, i32) {
    %c0_i32 = arith.constant 0 : i32
    return %arg0, %arg1 : i32, i32
  }
}

module attributes {stable_mosaic.version = 11 : i64} {
  func.func @_mm_fused_kernel(%arg0: i32, %arg1: i32, %arg2: i32, %arg3: memref<16x768xbf16, #tpu.memory_space<vmem>>, %arg4: memref<768x512xbf16, #tpu.memory_space<vmem>>, %arg5: memref<1x512xf32, #tpu.memory_space<vmem>>, %arg6: memref<1x512xf32, #tpu.memory_space<vmem>>, %arg7: memref<16x512xbf16, #tpu.memory_space<vmem>>, %arg8: memref<16x512xf32, #tpu.memory_space<vmem>>) attributes {dimension_semantics = [#tpu.dimension_semantics<parallel>, #tpu.dimension_semantics<parallel>, #tpu.dimension_semantics<arbitrary>], iteration_bounds = array<i64: 1, 1, 6>, scalar_prefetch = 0 : i64, scratch_operands = 1 : i64, tpu.core_type = #tpu.core_type<tc>, window_params = [{transform_indices = @transform_0, window_bounds = array<i64: 16, 768>}, {transform_indices = @transform_1, window_bounds = array<i64: 768, 512>}, {transform_indices = @transform_2, window_bounds = array<i64: 1, 512>}, {transform_indices = @transform_3, window_bounds = array<i64: 1, 512>}, {transform_indices = @transform_4, window_bounds = array<i64: 16, 512>}]} {
    %c0_i32 = arith.constant 0 : i32
    %0 = arith.cmpi eq, %arg2, %c0_i32 : i32
    %1 = arith.extui %0 : i1 to i32
    %c0_i32_0 = arith.constant 0 : i32
    %2 = arith.cmpi ne, %1, %c0_i32_0 : i32
    scf.if %2 {
      %cst_9 = arith.constant 0.000000e+00 : f32
      %12 = vector.broadcast %cst_9 : f32 to vector<16x512xf32>
      %c0_10 = arith.constant 0 : index
      %c0_11 = arith.constant 0 : index
      %13 = vector.load %arg8[%c0_10, %c0_11] : memref<16x512xf32, #tpu.memory_space<vmem>>, vector<16x512xf32>
      tpu.vector_store %arg8[%c0_10, %c0_11], %12 {strides = array<i32>} : memref<16x512xf32, #tpu.memory_space<vmem>>, vector<16x512xf32>,
    } else {
    }
    %c0 = arith.constant 0 : index
    %c0_1 = arith.constant 0 : index
    %3 = vector.load %arg8[%c0, %c0_1] : memref<16x512xf32, #tpu.memory_space<vmem>>, vector<16x512xf32>
    %c0_2 = arith.constant 0 : index
    %c0_3 = arith.constant 0 : index
    %4 = vector.load %arg3[%c0_2, %c0_3] : memref<16x768xbf16, #tpu.memory_space<vmem>>, vector<16x768xbf16>
    %c0_4 = arith.constant 0 : index
    %c0_5 = arith.constant 0 : index
    %5 = vector.load %arg4[%c0_4, %c0_5] : memref<768x512xbf16, #tpu.memory_space<vmem>>, vector<768x512xbf16>
    %cst = arith.constant dense<0.000000e+00> : vector<16x512xf32>
    %6 = tpu.matmul %4, %5, %cst {dimension_numbers = #tpu.dot_dimension_numbers<[1], [0], [0], [1], [0, 0, 1, 1], [], []>} : vector<16x768xbf16>, vector<768x512xbf16>, vector<16x512xf32> -> vector<16x512xf32>
    %7 = arith.addf %3, %6 : vector<16x512xf32>
    %c0_6 = arith.constant 0 : index
    %c0_7 = arith.constant 0 : index
    %8 = vector.load %arg8[%c0_6, %c0_7] : memref<16x512xf32, #tpu.memory_space<vmem>>, vector<16x512xf32>
    tpu.vector_store %arg8[%c0_6, %c0_7], %7 {strides = array<i32>} : memref<16x512xf32, #tpu.memory_space<vmem>>, vector<16x512xf32>,
    %c5_i32 = arith.constant 5 : i32
    %9 = arith.cmpi eq, %arg2, %c5_i32 : i32
    %10 = arith.extui %9 : i1 to i32
    %c0_i32_8 = arith.constant 0 : i32
    %11 = arith.cmpi ne, %10, %c0_i32_8 : i32
    scf.if %11 {
      %c0_9 = arith.constant 0 : index
      %c0_10 = arith.constant 0 : index
      %12 = vector.load %arg8[%c0_9, %c0_10] : memref<16x512xf32, #tpu.memory_space<vmem>>, vector<16x512xf32>
      %c0_11 = arith.constant 0 : index
      %c0_12 = arith.constant 0 : index
      %13 = vector.load %arg5[%c0_11, %c0_12] : memref<1x512xf32, #tpu.memory_space<vmem>>, vector<1x512xf32>
      %14 = vector.broadcast %13 : vector<1x512xf32> to vector<16x512xf32>
      %15 = arith.mulf %12, %14 : vector<16x512xf32>
      %c0_13 = arith.constant 0 : index
      %c0_14 = arith.constant 0 : index
      %16 = vector.load %arg6[%c0_13, %c0_14] : memref<1x512xf32, #tpu.memory_space<vmem>>, vector<1x512xf32>
      %17 = vector.broadcast %16 : vector<1x512xf32> to vector<16x512xf32>
      %18 = arith.addf %15, %17 : vector<16x512xf32>
      %cst_15 = arith.constant 0.000000e+00 : f32
      %19 = vector.broadcast %cst_15 : f32 to vector<16x512xf32>
      %20 = arith.maximumf %18, %19 : vector<16x512xf32>
      %21 = arith.truncf %20 : vector<16x512xf32> to vector<16x512xbf16>
      %c0_16 = arith.constant 0 : index
      %c0_17 = arith.constant 0 : index
      %22 = vector.load %arg7[%c0_16, %c0_17] : memref<16x512xbf16, #tpu.memory_space<vmem>>, vector<16x512xbf16>
      tpu.vector_store %arg7[%c0_16, %c0_17], %21 {strides = array<i32>} : memref<16x512xbf16, #tpu.memory_space<vmem>>, vector<16x512xbf16>,
    } else {
    }
    return
  }
  func.func @transform_0(%arg0: i32, %arg1: i32, %arg2: i32) -> (i32, i32) {
    %c0_i32 = arith.constant 0 : i32
    return %arg0, %arg2 : i32, i32
  }
  func.func @transform_1(%arg0: i32, %arg1: i32, %arg2: i32) -> (i32, i32) {
    %c0_i32 = arith.constant 0 : i32
    return %arg2, %arg1 : i32, i32
  }
  func.func @transform_2(%arg0: i32, %arg1: i32, %arg2: i32) -> (i32, i32) {
    %c0_i32 = arith.constant 0 : i32
    %c0_i32_0 = arith.constant 0 : i32
    return %c0_i32, %arg1 : i32, i32
  }
  func.func @transform_3(%arg0: i32, %arg1: i32, %arg2: i32) -> (i32, i32) {
    %c0_i32 = arith.constant 0 : i32
    %c0_i32_0 = arith.constant 0 : i32
    return %c0_i32, %arg1 : i32, i32
  }
  func.func @transform_4(%arg0: i32, %arg1: i32, %arg2: i32) -> (i32, i32) {
    %c0_i32 = arith.constant 0 : i32
    return %arg0, %arg1 : i32, i32
  }
}

module attributes {stable_mosaic.version = 11 : i64} {
  func.func @_mm_fused_kernel(%arg0: i32, %arg1: i32, %arg2: i32, %arg3: memref<16x256xbf16, #tpu.memory_space<vmem>>, %arg4: memref<256x512xbf16, #tpu.memory_space<vmem>>, %arg5: memref<1x512xf32, #tpu.memory_space<vmem>>, %arg6: memref<1x512xf32, #tpu.memory_space<vmem>>, %arg7: memref<16x512xbf16, #tpu.memory_space<vmem>>, %arg8: memref<16x512xf32, #tpu.memory_space<vmem>>) attributes {dimension_semantics = [#tpu.dimension_semantics<parallel>, #tpu.dimension_semantics<parallel>, #tpu.dimension_semantics<arbitrary>], iteration_bounds = array<i64: 1, 1, 1>, scalar_prefetch = 0 : i64, scratch_operands = 1 : i64, tpu.core_type = #tpu.core_type<tc>, window_params = [{transform_indices = @transform_0, window_bounds = array<i64: 16, 256>}, {transform_indices = @transform_1, window_bounds = array<i64: 256, 512>}, {transform_indices = @transform_2, window_bounds = array<i64: 1, 512>}, {transform_indices = @transform_3, window_bounds = array<i64: 1, 512>}, {transform_indices = @transform_4, window_bounds = array<i64: 16, 512>}]} {
    %c0_i32 = arith.constant 0 : i32
    %0 = arith.cmpi eq, %arg2, %c0_i32 : i32
    %1 = arith.extui %0 : i1 to i32
    %c0_i32_0 = arith.constant 0 : i32
    %2 = arith.cmpi ne, %1, %c0_i32_0 : i32
    scf.if %2 {
      %cst_10 = arith.constant 0.000000e+00 : f32
      %12 = vector.broadcast %cst_10 : f32 to vector<16x512xf32>
      %c0_11 = arith.constant 0 : index
      %c0_12 = arith.constant 0 : index
      %13 = vector.load %arg8[%c0_11, %c0_12] : memref<16x512xf32, #tpu.memory_space<vmem>>, vector<16x512xf32>
      tpu.vector_store %arg8[%c0_11, %c0_12], %12 {strides = array<i32>} : memref<16x512xf32, #tpu.memory_space<vmem>>, vector<16x512xf32>,
    } else {
    }
    %c0 = arith.constant 0 : index
    %c0_1 = arith.constant 0 : index
    %3 = vector.load %arg8[%c0, %c0_1] : memref<16x512xf32, #tpu.memory_space<vmem>>, vector<16x512xf32>
    %c0_2 = arith.constant 0 : index
    %c0_3 = arith.constant 0 : index
    %4 = vector.load %arg3[%c0_2, %c0_3] : memref<16x256xbf16, #tpu.memory_space<vmem>>, vector<16x256xbf16>
    %c0_4 = arith.constant 0 : index
    %c0_5 = arith.constant 0 : index
    %5 = vector.load %arg4[%c0_4, %c0_5] : memref<256x512xbf16, #tpu.memory_space<vmem>>, vector<256x512xbf16>
    %cst = arith.constant dense<0.000000e+00> : vector<16x512xf32>
    %6 = tpu.matmul %4, %5, %cst {dimension_numbers = #tpu.dot_dimension_numbers<[1], [0], [0], [1], [0, 0, 1, 1], [], []>} : vector<16x256xbf16>, vector<256x512xbf16>, vector<16x512xf32> -> vector<16x512xf32>
    %7 = arith.addf %3, %6 : vector<16x512xf32>
    %c0_6 = arith.constant 0 : index
    %c0_7 = arith.constant 0 : index
    %8 = vector.load %arg8[%c0_6, %c0_7] : memref<16x512xf32, #tpu.memory_space<vmem>>, vector<16x512xf32>
    tpu.vector_store %arg8[%c0_6, %c0_7], %7 {strides = array<i32>} : memref<16x512xf32, #tpu.memory_space<vmem>>, vector<16x512xf32>,
    %c0_i32_8 = arith.constant 0 : i32
    %9 = arith.cmpi eq, %arg2, %c0_i32_8 : i32
    %10 = arith.extui %9 : i1 to i32
    %c0_i32_9 = arith.constant 0 : i32
    %11 = arith.cmpi ne, %10, %c0_i32_9 : i32
    scf.if %11 {
      %c0_10 = arith.constant 0 : index
      %c0_11 = arith.constant 0 : index
      %12 = vector.load %arg8[%c0_10, %c0_11] : memref<16x512xf32, #tpu.memory_space<vmem>>, vector<16x512xf32>
      %c0_12 = arith.constant 0 : index
      %c0_13 = arith.constant 0 : index
      %13 = vector.load %arg5[%c0_12, %c0_13] : memref<1x512xf32, #tpu.memory_space<vmem>>, vector<1x512xf32>
      %14 = vector.broadcast %13 : vector<1x512xf32> to vector<16x512xf32>
      %15 = arith.mulf %12, %14 : vector<16x512xf32>
      %c0_14 = arith.constant 0 : index
      %c0_15 = arith.constant 0 : index
      %16 = vector.load %arg6[%c0_14, %c0_15] : memref<1x512xf32, #tpu.memory_space<vmem>>, vector<1x512xf32>
      %17 = vector.broadcast %16 : vector<1x512xf32> to vector<16x512xf32>
      %18 = arith.addf %15, %17 : vector<16x512xf32>
      %19 = arith.truncf %18 : vector<16x512xf32> to vector<16x512xbf16>
      %c0_16 = arith.constant 0 : index
      %c0_17 = arith.constant 0 : index
      %20 = vector.load %arg7[%c0_16, %c0_17] : memref<16x512xbf16, #tpu.memory_space<vmem>>, vector<16x512xbf16>
      tpu.vector_store %arg7[%c0_16, %c0_17], %19 {strides = array<i32>} : memref<16x512xbf16, #tpu.memory_space<vmem>>, vector<16x512xbf16>,
    } else {
    }
    return
  }
  func.func @transform_0(%arg0: i32, %arg1: i32, %arg2: i32) -> (i32, i32) {
    %c0_i32 = arith.constant 0 : i32
    return %arg0, %arg2 : i32, i32
  }
  func.func @transform_1(%arg0: i32, %arg1: i32, %arg2: i32) -> (i32, i32) {
    %c0_i32 = arith.constant 0 : i32
    return %arg2, %arg1 : i32, i32
  }
  func.func @transform_2(%arg0: i32, %arg1: i32, %arg2: i32) -> (i32, i32) {
    %c0_i32 = arith.constant 0 : i32
    %c0_i32_0 = arith.constant 0 : i32
    return %c0_i32, %arg1 : i32, i32
  }
  func.func @transform_3(%arg0: i32, %arg1: i32, %arg2: i32) -> (i32, i32) {
    %c0_i32 = arith.constant 0 : i32
    %c0_i32_0 = arith.constant 0 : i32
    return %c0_i32, %arg1 : i32, i32
  }
  func.func @transform_4(%arg0: i32, %arg1: i32, %arg2: i32) -> (i32, i32) {
    %c0_i32 = arith.constant 0 : i32
    return %arg0, %arg1 : i32, i32
  }
}

module attributes {stable_mosaic.version = 11 : i64} {
  func.func @_head_kernel(%arg0: i32, %arg1: memref<2x1x512xbf16, #tpu.memory_space<vmem>>, %arg2: memref<512x128xbf16, #tpu.memory_space<vmem>>, %arg3: memref<1x128xf32, #tpu.memory_space<vmem>>, %arg4: memref<128x128xbf16, #tpu.memory_space<vmem>>, %arg5: memref<1x128xf32, #tpu.memory_space<vmem>>, %arg6: memref<2x128xf32, #tpu.memory_space<vmem>>) attributes {dimension_semantics = [#tpu.dimension_semantics<arbitrary>], iteration_bounds = array<i64: 1>, scalar_prefetch = 0 : i64, scratch_operands = 0 : i64, tpu.core_type = #tpu.core_type<tc>, window_params = [{pipeline_mode = #tpu.pipeline_mode<synchronous>, transform_indices = @transform_0, window_bounds = array<i64: 2, 1, 512>}, {pipeline_mode = #tpu.pipeline_mode<synchronous>, transform_indices = @transform_1, window_bounds = array<i64: 512, 128>}, {pipeline_mode = #tpu.pipeline_mode<synchronous>, transform_indices = @transform_2, window_bounds = array<i64: 1, 128>}, {pipeline_mode = #tpu.pipeline_mode<synchronous>, transform_indices = @transform_3, window_bounds = array<i64: 128, 128>}, {pipeline_mode = #tpu.pipeline_mode<synchronous>, transform_indices = @transform_4, window_bounds = array<i64: 1, 128>}, {pipeline_mode = #tpu.pipeline_mode<synchronous>, transform_indices = @transform_5, window_bounds = array<i64: 2, 128>}]} {
    %c0 = arith.constant 0 : index
    %c0_0 = arith.constant 0 : index
    %c0_1 = arith.constant 0 : index
    %0 = vector.load %arg1[%c0, %c0_0, %c0_1] : memref<2x1x512xbf16, #tpu.memory_space<vmem>>, vector<2x1x512xbf16>
    %1 = arith.extf %0 : vector<2x1x512xbf16> to vector<2x1x512xf32>
    %cst = arith.constant dense<0.000000e+00> : vector<2x512xf32>
    %2 = vector.multi_reduction <add>, %1, %cst [1] : vector<2x1x512xf32> to vector<2x512xf32>
    %cst_2 = arith.constant 1.000000e+00 : f32
    %3 = vector.broadcast %cst_2 : f32 to vector<2x512xf32>
    %4 = arith.mulf %2, %3 : vector<2x512xf32>
    %5 = arith.truncf %4 : vector<2x512xf32> to vector<2x512xbf16>
    %c0_3 = arith.constant 0 : index
    %c0_4 = arith.constant 0 : index
    %6 = vector.load %arg2[%c0_3, %c0_4] : memref<512x128xbf16, #tpu.memory_space<vmem>>, vector<512x128xbf16>
    %cst_5 = arith.constant dense<0.000000e+00> : vector<2x128xf32>
    %7 = tpu.matmul %5, %6, %cst_5 {dimension_numbers = #tpu.dot_dimension_numbers<[1], [0], [0], [1], [0, 0, 1, 1], [], []>} : vector<2x512xbf16>, vector<512x128xbf16>, vector<2x128xf32> -> vector<2x128xf32>
    %c0_6 = arith.constant 0 : index
    %c0_7 = arith.constant 0 : index
    %8 = vector.load %arg3[%c0_6, %c0_7] : memref<1x128xf32, #tpu.memory_space<vmem>>, vector<1x128xf32>
    %9 = vector.broadcast %8 : vector<1x128xf32> to vector<2x128xf32>
    %10 = arith.addf %7, %9 : vector<2x128xf32>
    %cst_8 = arith.constant 0.000000e+00 : f32
    %11 = vector.broadcast %cst_8 : f32 to vector<2x128xf32>
    %12 = arith.maximumf %10, %11 : vector<2x128xf32>
    %13 = arith.truncf %12 : vector<2x128xf32> to vector<2x128xbf16>
    %c0_9 = arith.constant 0 : index
    %c0_10 = arith.constant 0 : index
    %14 = vector.load %arg4[%c0_9, %c0_10] : memref<128x128xbf16, #tpu.memory_space<vmem>>, vector<128x128xbf16>
    %cst_11 = arith.constant dense<0.000000e+00> : vector<2x128xf32>
    %15 = tpu.matmul %13, %14, %cst_11 {dimension_numbers = #tpu.dot_dimension_numbers<[1], [0], [0], [1], [0, 0, 1, 1], [], []>} : vector<2x128xbf16>, vector<128x128xbf16>, vector<2x128xf32> -> vector<2x128xf32>
    %c0_12 = arith.constant 0 : index
    %c0_13 = arith.constant 0 : index
    %16 = vector.load %arg5[%c0_12, %c0_13] : memref<1x128xf32, #tpu.memory_space<vmem>>, vector<1x128xf32>
    %17 = vector.broadcast %16 : vector<1x128xf32> to vector<2x128xf32>
    %18 = arith.addf %15, %17 : vector<2x128xf32>
    %c0_14 = arith.constant 0 : index
    %c0_15 = arith.constant 0 : index
    %19 = vector.load %arg6[%c0_14, %c0_15] : memref<2x128xf32, #tpu.memory_space<vmem>>, vector<2x128xf32>
    tpu.vector_store %arg6[%c0_14, %c0_15], %18 {strides = array<i32>} : memref<2x128xf32, #tpu.memory_space<vmem>>, vector<2x128xf32>,
    return
  }
  func.func @transform_0(%arg0: i32) -> (i32, i32, i32) {
    %c0_i32 = arith.constant 0 : i32
    %c0_i32_0 = arith.constant 0 : i32
    %c0_i32_1 = arith.constant 0 : i32
    %c0_i32_2 = arith.constant 0 : i32
    return %c0_i32, %c0_i32_0, %c0_i32_1 : i32, i32, i32
  }
  func.func @transform_1(%arg0: i32) -> (i32, i32) {
    %c0_i32 = arith.constant 0 : i32
    %c0_i32_0 = arith.constant 0 : i32
    %c0_i32_1 = arith.constant 0 : i32
    return %c0_i32, %c0_i32_0 : i32, i32
  }
  func.func @transform_2(%arg0: i32) -> (i32, i32) {
    %c0_i32 = arith.constant 0 : i32
    %c0_i32_0 = arith.constant 0 : i32
    %c0_i32_1 = arith.constant 0 : i32
    return %c0_i32, %c0_i32_0 : i32, i32
  }
  func.func @transform_3(%arg0: i32) -> (i32, i32) {
    %c0_i32 = arith.constant 0 : i32
    %c0_i32_0 = arith.constant 0 : i32
    %c0_i32_1 = arith.constant 0 : i32
    return %c0_i32, %c0_i32_0 : i32, i32
  }
  func.func @transform_4(%arg0: i32) -> (i32, i32) {
    %c0_i32 = arith.constant 0 : i32
    %c0_i32_0 = arith.constant 0 : i32
    %c0_i32_1 = arith.constant 0 : i32
    return %c0_i32, %c0_i32_0 : i32, i32
  }
  func.func @transform_5(%arg0: i32) -> (i32, i32) {
    %c0_i32 = arith.constant 0 : i32
    %c0_i32_0 = arith.constant 0 : i32
    %c0_i32_1 = arith.constant 0 : i32
    return %c0_i32, %c0_i32_0 : i32, i32
  }
}

</mosaic_0001>

<bundles_post_ra>
// kernel: resnet_byol_forward.21
= control target key start
LH: loop header
LB: loop body
LE: loop exit
PB: predicated region body
PF: predicated region fallthrough
CT: control target
= control target key end

     0   :  { %v2222_v0 = vmov 0   ;;  %s2754_s1 = inlined_call_operand.vmem [shape: bf16[256,128], index: 1, kind: input, shape index: {}]   ;;  %s2755_s0 = inlined_call_operand.vmem [shape: bf16[512,256], index: 0, kind: input, shape index: {}]   ;;  %s2756_s2 = inlined_call_operand.vmem [shape: f32[1,128], index: 2, kind: input, shape index: {}]   ;;  %s2757_s3 = inlined_call_operand.vmem [shape: f32[1,128], index: 3, kind: input, shape index: {}]   ;;  %s2758_s4 = inlined_call_operand.vmem [shape: bf16[512,128], index: 4, kind: output, shape index: {}]  }
   0x1   :  { %662 = vmatprep.subr.bf16.mxu0 %v2222_v0  ;;  %2077 = vmatprep.subr.bf16.mxu1 %v2222_v0  ;;  %v2110_v1 = vld [vmem:[%s2754_s1 + $0x38] sm:$0xff]   ;;  %v2111_v2 = vld [vmem:[%s2754_s1 + $0x30] sm:$0xff]   ;;  %v2112_v3 = vld [vmem:[%s2754_s1 + $0x28] sm:$0xff]  }
   0x2   :  { %663 = vmatpush1.bf16.msra.mxu0 %v2110_v1  ;;  %2093 = vmatpush1.bf16.msra.mxu1 %v2110_v1  ;;  %v2113_v4 = vld [vmem:[%s2754_s1 + $0x20] sm:$0xff]   ;;  %v2114_v5 = vld [vmem:[%s2754_s1 + $0x18] sm:$0xff]   ;;  %v2115_v7 = vld [vmem:[%s2754_s1 + $0x10] sm:$0xff]  }
   0x3   :  { %664 = vmatprep.subr.bf16.mxu0 %v2222_v0  ;;  %2078 = vmatprep.subr.bf16.mxu1 %v2222_v0  ;;  %v2128_v6 = vld [vmem:[%s2755_s0 + $0x4] ss:$8 sps:$4 sm:$0xff]   ;;  %v2118_v11 = vld [vmem:[%s2754_s1 + $0x78] sm:$0xff]   ;;  %v2119_v12 = vld [vmem:[%s2754_s1 + $0x70] sm:$0xff]  }
   0x4   :  { %v2131_v8 = vld [vmem:[%s2755_s0 + $0x104] ss:$8 sps:$4 sm:$0xff]   ;;  %694 = vmatprep.mubr.bf16.mxu0 %v2128_v6  ;;  %v2122_v15 = vld [vmem:[%s2754_s1 + $0x58] sm:$0xff]   ;;  %v2123_v16 = vld [vmem:[%s2754_s1 + $0x50] sm:$0xff]  }
   0x5   :  { %822 = vmatprep.mubr.bf16.mxu1 %v2131_v8  ;;  %v2116_v9 = vld [vmem:[%s2754_s1 + $0x8] sm:$0xff]   ;;  %v2117_v10 = vld [vmem:[%s2754_s1] sm:$0xff]   ;;  %v2132_v21 = vld [vmem:[%s2755_s0 + $0x14] ss:$8 sps:$4 sm:$0xff]  }
   0x6   :  { %665 = vmatpush1.bf16.msra.mxu0 %v2111_v2  ;;  %2094 = vmatpush1.bf16.msra.mxu1 %v2111_v2  ;;  %v2120_v13 = vld [vmem:[%s2754_s1 + $0x68] sm:$0xff]   ;;  %v2121_v14 = vld [vmem:[%s2754_s1 + $0x60] sm:$0xff]   ;;  %v2134_v22 = vld [vmem:[%s2755_s0 + $0x114] ss:$8 sps:$4 sm:$0xff]  }
   0x7   :  { %666 = vmatprep.subr.bf16.mxu0 %v2222_v0  ;;  %2079 = vmatprep.subr.bf16.mxu1 %v2222_v0  ;;  %v2124_v17 = vld [vmem:[%s2754_s1 + $0x48] sm:$0xff]   ;;  %v2125_v18 = vld [vmem:[%s2754_s1 + $0x40] sm:$0xff]   ;;  %v2136_v23 = vld [vmem:[%s2755_s0 + $0x10] ss:$8 sps:$4 sm:$0xff]  }
   0x8   :  { %v2126_v19 = vld [vmem:[%s2755_s0] ss:$8 sps:$4 sm:$0xff]   ;;  %v2137_v24 = vld [vmem:[%s2755_s0 + $0x110] ss:$8 sps:$4 sm:$0xff]   ;;  %v2138_v25 = vld [vmem:[%s2755_s0 + $0x24] ss:$8 sps:$4 sm:$0xff]  }
   0x9   :  { %v2129_v20 = vld [vmem:[%s2755_s0 + $0x100] ss:$8 sps:$4 sm:$0xff]   ;;  %v2140_v26 = vld [vmem:[%s2755_s0 + $0x124] ss:$8 sps:$4 sm:$0xff]   ;;  %v2144_v29 = vld [vmem:[%s2755_s0 + $0x34] ss:$8 sps:$4 sm:$0xff]  }
   0xa   :  { %667 = vmatpush1.bf16.msra.mxu0 %v2112_v3  ;;  %2095 = vmatpush1.bf16.msra.mxu1 %v2112_v3  ;;  %v2142_v27 = vld [vmem:[%s2755_s0 + $0x20] ss:$8 sps:$4 sm:$0xff]   ;;  %v2146_v30 = vld [vmem:[%s2755_s0 + $0x134] ss:$8 sps:$4 sm:$0xff]   ;;  %v2148_v31 = vld [vmem:[%s2755_s0 + $0x30] ss:$8 sps:$4 sm:$0xff]  }
   0xb   :  { %668 = vmatprep.subr.bf16.mxu0 %v2222_v0  ;;  %2080 = vmatprep.subr.bf16.mxu1 %v2222_v0  ;;  %v2143_v28 = vld [vmem:[%s2755_s0 + $0x120] ss:$8 sps:$4 sm:$0xff]   ;;  %v2149_v32 = vld [vmem:[%s2755_s0 + $0x130] ss:$8 sps:$4 sm:$0xff]   ;;  %v2150_v33 = vld [vmem:[%s2755_s0 + $0x44] ss:$8 sps:$4 sm:$0xff]  }
   0xc   :  { %v2152_v34 = vld [vmem:[%s2755_s0 + $0x144] ss:$8 sps:$4 sm:$0xff]   ;;  %v2154_v35 = vld [vmem:[%s2755_s0 + $0x40] ss:$8 sps:$4 sm:$0xff]   ;;  %v2156_v37 = vld [vmem:[%s2755_s0 + $0x54] ss:$8 sps:$4 sm:$0xff]  }
   0xd   :  { %v2155_v36 = vld [vmem:[%s2755_s0 + $0x140] ss:$8 sps:$4 sm:$0xff]   ;;  %v2158_v38 = vld [vmem:[%s2755_s0 + $0x154] ss:$8 sps:$4 sm:$0xff]   ;;  %v2160_v39 = vld [vmem:[%s2755_s0 + $0x50] ss:$8 sps:$4 sm:$0xff]  }
   0xe   :  { %669 = vmatpush1.bf16.msra.mxu0 %v2113_v4  ;;  %2096 = vmatpush1.bf16.msra.mxu1 %v2113_v4  ;;  %v2161_v40 = vld [vmem:[%s2755_s0 + $0x150] ss:$8 sps:$4 sm:$0xff]   ;;  %v2162_v41 = vld [vmem:[%s2755_s0 + $0x64] ss:$8 sps:$4 sm:$0xff]   ;;  %v2166_v43 = vld [vmem:[%s2755_s0 + $0x60] ss:$8 sps:$4 sm:$0xff]  }
   0xf   :  { %670 = vmatprep.subr.bf16.mxu0 %v2222_v0  ;;  %2081 = vmatprep.subr.bf16.mxu1 %v2222_v0  ;;  %v2164_v42 = vld [vmem:[%s2755_s0 + $0x164] ss:$8 sps:$4 sm:$0xff]   ;;  %v2167_v44 = vld [vmem:[%s2755_s0 + $0x160] ss:$8 sps:$4 sm:$0xff]   ;;  %v2168_v45 = vld [vmem:[%s2755_s0 + $0x74] ss:$8 sps:$4 sm:$0xff]  }
  0x10   :  { %v2170_v46 = vld [vmem:[%s2755_s0 + $0x174] ss:$8 sps:$4 sm:$0xff]   ;;  %v2172_v47 = vld [vmem:[%s2755_s0 + $0x70] ss:$8 sps:$4 sm:$0xff]   ;;  %v2174_v49 = vld [vmem:[%s2755_s0 + $0x84] ss:$8 sps:$4 sm:$0xff]  }
  0x11   :  { %v2173_v48 = vld [vmem:[%s2755_s0 + $0x170] ss:$8 sps:$4 sm:$0xff]   ;;  %v2176_v50 = vld [vmem:[%s2755_s0 + $0x184] ss:$8 sps:$4 sm:$0xff]   ;;  %v2178_v51 = vld [vmem:[%s2755_s0 + $0x80] ss:$8 sps:$4 sm:$0xff]  }
  0x12   :  { %671 = vmatpush1.bf16.msra.mxu0 %v2114_v5  ;;  %2097 = vmatpush1.bf16.msra.mxu1 %v2114_v5  ;;  %v2179_v52 = vld [vmem:[%s2755_s0 + $0x180] ss:$8 sps:$4 sm:$0xff]   ;;  %v2180_v53 = vld [vmem:[%s2755_s0 + $0x94] ss:$8 sps:$4 sm:$0xff]   ;;  %v2184_v55 = vld [vmem:[%s2755_s0 + $0x90] ss:$8 sps:$4 sm:$0xff]  }
  0x13   :  { %672 = vmatprep.subr.bf16.mxu0 %v2222_v0  ;;  %2082 = vmatprep.subr.bf16.mxu1 %v2222_v0  ;;  %v2182_v54 = vld [vmem:[%s2755_s0 + $0x194] ss:$8 sps:$4 sm:$0xff]   ;;  %v2185_v56 = vld [vmem:[%s2755_s0 + $0x190] ss:$8 sps:$4 sm:$0xff]   ;;  %v2186_v57 = vld [vmem:[%s2755_s0 + $0xa4] ss:$8 sps:$4 sm:$0xff]  }
  0x14   :  { %v2188_v58 = vld [vmem:[%s2755_s0 + $0x1a4] ss:$8 sps:$4 sm:$0xff]   ;;  %v2190_v59 = vld [vmem:[%s2755_s0 + $0xa0] ss:$8 sps:$4 sm:$0xff]   ;;  %v2192_v61 = vld [vmem:[%s2755_s0 + $0xb4] ss:$8 sps:$4 sm:$0xff]  }
  0x15   :  { %v2191_v60 = vld [vmem:[%s2755_s0 + $0x1a0] ss:$8 sps:$4 sm:$0xff]   ;;  %v2194_v62 = vld [vmem:[%s2755_s0 + $0x1b4] ss:$8 sps:$4 sm:$0xff]   ;;  %v2196_v63 = vld [vmem:[%s2755_s0 + $0xb0] ss:$8 sps:$4 sm:$0xff]  }
  0x16   :  { %673 = vmatpush1.bf16.msra.mxu0 %v2115_v7  ;;  %2098 = vmatpush1.bf16.msra.mxu1 %v2115_v7  ;;  %v2198_v1 = vld [vmem:[%s2755_s0 + $0xc4] ss:$8 sps:$4 sm:$0xff]   ;;  %v2202_v3 = vld [vmem:[%s2755_s0 + $0xc0] ss:$8 sps:$4 sm:$0xff]   ;;  %v2204_v5 = vld [vmem:[%s2755_s0 + $0xd4] ss:$8 sps:$4 sm:$0xff]  }
  0x17   :  { %674 = vmatprep.subr.bf16.mxu0 %v2222_v0  ;;  %2083 = vmatprep.subr.bf16.mxu1 %v2222_v0  ;;  %v2200_v2 = vld [vmem:[%s2755_s0 + $0x1c4] ss:$8 sps:$4 sm:$0xff]   ;;  %v2203_v4 = vld [vmem:[%s2755_s0 + $0x1c0] ss:$8 sps:$4 sm:$0xff]   ;;  %v2206_v6 = vld [vmem:[%s2755_s0 + $0x1d4] ss:$8 sps:$4 sm:$0xff]  }
  0x18   :  { %v2208_v7 = vld [vmem:[%s2755_s0 + $0xd0] ss:$8 sps:$4 sm:$0xff]  }
  0x19   :  { %v2209_v8 = vld [vmem:[%s2755_s0 + $0x1d0] ss:$8 sps:$4 sm:$0xff]  }
  0x1a   :  { %675 = vmatpush1.bf16.msra.mxu0 %v2116_v9  ;;  %2099 = vmatpush1.bf16.msra.mxu1 %v2116_v9  ;;  %v2210_v9 = vld [vmem:[%s2755_s0 + $0xe4] ss:$8 sps:$4 sm:$0xff]  }
  0x1b   :  { %676 = vmatprep.subr.bf16.mxu0 %v2222_v0  ;;  %2084 = vmatprep.subr.bf16.mxu1 %v2222_v0 }
  0x1e   :  { %677 = vmatpush1.bf16.msra.mxu0 %v2117_v10  ;;  %2100 = vmatpush1.bf16.msra.mxu1 %v2117_v10  ;;  %v2212_v10 = vld [vmem:[%s2755_s0 + $0x1e4] ss:$8 sps:$4 sm:$0xff]  }
  0x1f   :  { %678 = vmatprep.subr.bf16.mxu0 %v2222_v0  ;;  %2085 = vmatprep.subr.bf16.mxu1 %v2222_v0 }
  0x22   :  { %679 = vmatpush2.bf16.msra.mxu0 %v2118_v11  ;;  %2101 = vmatpush2.bf16.msra.mxu1 %v2118_v11  ;;  %v2214_v11 = vld [vmem:[%s2755_s0 + $0xe0] ss:$8 sps:$4 sm:$0xff]  }
  0x23   :  { %680 = vmatprep.subr.bf16.mxu0 %v2222_v0  ;;  %2086 = vmatprep.subr.bf16.mxu1 %v2222_v0 }
  0x26   :  { %681 = vmatpush2.bf16.msra.mxu0 %v2119_v12  ;;  %2102 = vmatpush2.bf16.msra.mxu1 %v2119_v12  ;;  %v2215_v12 = vld [vmem:[%s2755_s0 + $0x1e0] ss:$8 sps:$4 sm:$0xff]  }
  0x27   :  { %682 = vmatprep.subr.bf16.mxu0 %v2222_v0  ;;  %2087 = vmatprep.subr.bf16.mxu1 %v2222_v0 }
  0x2a   :  { %683 = vmatpush2.bf16.msra.mxu0 %v2120_v13  ;;  %2103 = vmatpush2.bf16.msra.mxu1 %v2120_v13  ;;  %v2216_v13 = vld [vmem:[%s2755_s0 + $0xf4] ss:$8 sps:$4 sm:$0xff]  }
  0x2b   :  { %684 = vmatprep.subr.bf16.mxu0 %v2222_v0  ;;  %2088 = vmatprep.subr.bf16.mxu1 %v2222_v0 }
  0x2e   :  { %685 = vmatpush2.bf16.msra.mxu0 %v2121_v14  ;;  %2104 = vmatpush2.bf16.msra.mxu1 %v2121_v14  ;;  %v2218_v14 = vld [vmem:[%s2755_s0 + $0x1f4] ss:$8 sps:$4 sm:$0xff]  }
  0x2f   :  { %686 = vmatprep.subr.bf16.mxu0 %v2222_v0  ;;  %2089 = vmatprep.subr.bf16.mxu1 %v2222_v0 }
  0x32   :  { %687 = vmatpush2.bf16.msra.mxu0 %v2122_v15  ;;  %2105 = vmatpush2.bf16.msra.mxu1 %v2122_v15  ;;  %v2220_v15 = vld [vmem:[%s2755_s0 + $0xf0] ss:$8 sps:$4 sm:$0xff]  }
  0x33   :  { %688 = vmatprep.subr.bf16.mxu0 %v2222_v0  ;;  %2090 = vmatprep.subr.bf16.mxu1 %v2222_v0 }
  0x36   :  { %689 = vmatpush2.bf16.msra.mxu0 %v2123_v16  ;;  %2106 = vmatpush2.bf16.msra.mxu1 %v2123_v16  ;;  %v2221_v16 = vld [vmem:[%s2755_s0 + $0x1f0] ss:$8 sps:$4 sm:$0xff]  }
  0x37   :  { %690 = vmatprep.subr.bf16.mxu0 %v2222_v0  ;;  %2091 = vmatprep.subr.bf16.mxu1 %v2222_v0 }
  0x3a   :  { %691 = vmatpush2.bf16.msra.mxu0 %v2124_v17  ;;  %2107 = vmatpush2.bf16.msra.mxu1 %v2124_v17  ;;  %v2523_v17 = vld [vmem:[%s2756_s2] ss:$0 sm:$0xff] }
  0x3b   :  { %692 = vmatprep.subr.bf16.mxu0 %v2222_v0  ;;  %2092 = vmatprep.subr.bf16.mxu1 %v2222_v0  ;;  %v2197_v0 = vld [vmem:[%s2755_s0 + $0x1b0] ss:$8 sps:$4 sm:$0xff]  }
  0x3e   :  { %693 = vmatpush2.bf16.msra.mxu0 %v2125_v18  ;;  %2108 = vmatpush2.bf16.msra.mxu1 %v2125_v18 }
  0x41   :  { %695 = vmatmul.mubr.bf16.vlgmr.msra.gmra.mxu0 %v2126_v19  ;;  %823 = vmatmul.mubr.bf16.vlgmr.msra.gmra.mxu1 %v2129_v20 }
  0x42   :  { %702 = vmatprep.mubr.bf16.mxu0 %v2132_v21  ;;  %830 = vmatprep.mubr.bf16.mxu1 %v2134_v22  ;;  %v2529_v21 = vld [vmem:[%s2757_s3] ss:$0 sm:$0xff] }
  0x49   :  { %703 = vmatmul.mubr.bf16.gmra.mxu0 %v2136_v23  ;;  %831 = vmatmul.mubr.bf16.gmra.mxu1 %v2137_v24 }
  0x4a   :  { %710 = vmatprep.mubr.bf16.mxu0 %v2138_v25  ;;  %838 = vmatprep.mubr.bf16.mxu1 %v2140_v26 }
  0x51   :  { %711 = vmatmul.mubr.bf16.gmra.mxu0 %v2142_v27  ;;  %839 = vmatmul.mubr.bf16.gmra.mxu1 %v2143_v28 }
  0x52   :  { %718 = vmatprep.mubr.bf16.mxu0 %v2144_v29  ;;  %846 = vmatprep.mubr.bf16.mxu1 %v2146_v30 }
  0x59   :  { %719 = vmatmul.mubr.bf16.gmra.mxu0 %v2148_v31  ;;  %847 = vmatmul.mubr.bf16.gmra.mxu1 %v2149_v32 }
  0x5a   :  { %726 = vmatprep.mubr.bf16.mxu0 %v2150_v33  ;;  %854 = vmatprep.mubr.bf16.mxu1 %v2152_v34 }
  0x61   :  { %727 = vmatmul.mubr.bf16.gmra.mxu0 %v2154_v35  ;;  %855 = vmatmul.mubr.bf16.gmra.mxu1 %v2155_v36 }
  0x62   :  { %734 = vmatprep.mubr.bf16.mxu0 %v2156_v37  ;;  %862 = vmatprep.mubr.bf16.mxu1 %v2158_v38 }
  0x69   :  { %735 = vmatmul.mubr.bf16.gmra.mxu0 %v2160_v39  ;;  %863 = vmatmul.mubr.bf16.gmra.mxu1 %v2161_v40 }
  0x6a   :  { %742 = vmatprep.mubr.bf16.mxu0 %v2162_v41  ;;  %870 = vmatprep.mubr.bf16.mxu1 %v2164_v42 }
  0x71   :  { %743 = vmatmul.mubr.bf16.gmra.mxu0 %v2166_v43  ;;  %871 = vmatmul.mubr.bf16.gmra.mxu1 %v2167_v44 }
  0x72   :  { %750 = vmatprep.mubr.bf16.mxu0 %v2168_v45  ;;  %878 = vmatprep.mubr.bf16.mxu1 %v2170_v46 }
  0x79   :  { %751 = vmatmul.mubr.bf16.gmra.mxu0 %v2172_v47  ;;  %879 = vmatmul.mubr.bf16.gmra.mxu1 %v2173_v48 }
  0x7a   :  { %758 = vmatprep.mubr.bf16.mxu0 %v2174_v49  ;;  %886 = vmatprep.mubr.bf16.mxu1 %v2176_v50 }
  0x81   :  { %759 = vmatmul.mubr.bf16.gmra.mxu0 %v2178_v51  ;;  %887 = vmatmul.mubr.bf16.gmra.mxu1 %v2179_v52 }
  0x82   :  { %766 = vmatprep.mubr.bf16.mxu0 %v2180_v53  ;;  %894 = vmatprep.mubr.bf16.mxu1 %v2182_v54 }
  0x89   :  { %767 = vmatmul.mubr.bf16.gmra.mxu0 %v2184_v55  ;;  %895 = vmatmul.mubr.bf16.gmra.mxu1 %v2185_v56 }
  0x8a   :  { %774 = vmatprep.mubr.bf16.mxu0 %v2186_v57  ;;  %902 = vmatprep.mubr.bf16.mxu1 %v2188_v58 }
  0x91   :  { %775 = vmatmul.mubr.bf16.gmra.mxu0 %v2190_v59  ;;  %903 = vmatmul.mubr.bf16.gmra.mxu1 %v2191_v60 }
  0x92   :  { %782 = vmatprep.mubr.bf16.mxu0 %v2192_v61  ;;  %910 = vmatprep.mubr.bf16.mxu1 %v2194_v62 }
  0x99   :  { %783 = vmatmul.mubr.bf16.gmra.mxu0 %v2196_v63  ;;  %911 = vmatmul.mubr.bf16.gmra.mxu1 %v2197_v0 }
  0x9a   :  { %790 = vmatprep.mubr.bf16.mxu0 %v2198_v1  ;;  %918 = vmatprep.mubr.bf16.mxu1 %v2200_v2 }
  0xa1   :  { %791 = vmatmul.mubr.bf16.gmra.mxu0 %v2202_v3  ;;  %919 = vmatmul.mubr.bf16.gmra.mxu1 %v2203_v4 }
  0xa2   :  { %798 = vmatprep.mubr.bf16.mxu0 %v2204_v5  ;;  %926 = vmatprep.mubr.bf16.mxu1 %v2206_v6 }
  0xa9   :  { %799 = vmatmul.mubr.bf16.gmra.mxu0 %v2208_v7  ;;  %927 = vmatmul.mubr.bf16.gmra.mxu1 %v2209_v8 }
  0xaa   :  { %806 = vmatprep.mubr.bf16.mxu0 %v2210_v9  ;;  %934 = vmatprep.mubr.bf16.mxu1 %v2212_v10 }
  0xb1   :  { %807 = vmatmul.mubr.bf16.gmra.mxu0 %v2214_v11  ;;  %935 = vmatmul.mubr.bf16.gmra.mxu1 %v2215_v12 }
  0xb2   :  { %814 = vmatprep.mubr.bf16.mxu0 %v2216_v13  ;;  %942 = vmatprep.mubr.bf16.mxu1 %v2218_v14 }
  0xb9   :  { %815 = vmatmul.mubr.bf16.gmra.mxu0 %v2220_v15  ;;  %943 = vmatmul.mubr.bf16.gmra.mxu1 %v2221_v16 }
 0x101   :  { %v696_v18 = vpop.f32.mrf.mxu0  ;;  %v824_v19 = vpop.f32.mrf.mxu1 }
 0x102   :  { %v1153_v20 = vmul.f32 %v2523_v17, %v696_v18  ;;  %v1185_v22 = vmul.f32 %v2523_v17, %v824_v19 }
 0x103   :  { %v698_v23 = vpop.f32.mrf.mxu0  ;;  %v826_v24 = vpop.f32.mrf.mxu1 }
 0x104   :  { %v1224_v25 = vadd.f32 %v2529_v21, %v1153_v20  ;;  %v1256_v26 = vadd.f32 %v2529_v21, %v1185_v22 }
 0x105   :  { %v699_v27 = vpop.f32.mrf.mxu0  ;;  %v827_v28 = vpop.f32.mrf.mxu1 }
 0x106   :  { %v1154_v29 = vmul.f32 %v2523_v17, %v699_v27  ;;  %v1186_v30 = vmul.f32 %v2523_v17, %v827_v28  ;;  %v1288_v35 = vmax.f32 %v1224_v25, 0.0  ;;  %v1320_v36 = vmax.f32 %v1256_v26, 0.0 }
 0x107   :  { %v701_v31 = vpop.f32.mrf.mxu0  ;;  %v829_v32 = vpop.f32.mrf.mxu1 }
 0x108   :  { %v1225_v33 = vadd.f32 %v2529_v21, %v1154_v29  ;;  %v1257_v34 = vadd.f32 %v2529_v21, %v1186_v30 }
 0x109   :  { %v704_v37 = vpop.f32.mrf.mxu0  ;;  %v832_v38 = vpop.f32.mrf.mxu1 }
 0x10a   :  { %v1289_v39 = vmax.f32 %v1225_v33, 0.0  ;;  %v1321_v40 = vmax.f32 %v1257_v34, 0.0  ;;  %v1155_v41 = vmul.f32 %v2523_v17, %v704_v37  ;;  %v1187_v42 = vmul.f32 %v2523_v17, %v832_v38 }
 0x10b   :  { %v706_v43 = vpop.f32.mrf.mxu0  ;;  %v834_v44 = vpop.f32.mrf.mxu1 }
 0x10c   :  { %v1889_v45 = vpack.c.bf16 %v1289_v39, %v1288_v35  ;;  %v1969_v46 = vpack.c.bf16 %v1321_v40, %v1320_v36  ;;  %v1226_v47 = vadd.f32 %v2529_v21, %v1155_v41  ;;  %v1258_v48 = vadd.f32 %v2529_v21, %v1187_v42 }
 0x10d   :  { %v707_v49 = vpop.f32.mrf.mxu0  ;;  %v835_v50 = vpop.f32.mrf.mxu1 }
 0x10e   :  { %1890 = vst [vmem:[%s2758_s4] sm:$0xff] %v1889_v45   ;;  %2061 = vst [vmem:[%s2758_s4 + $0x80] sm:$0xff] %v1969_v46   ;;  %v1156_v51 = vmul.f32 %v2523_v17, %v707_v49  ;;  %v1188_v52 = vmul.f32 %v2523_v17, %v835_v50  ;;  %v1290_v57 = vmax.f32 %v1226_v47, 0.0  ;;  %v1322_v58 = vmax.f32 %v1258_v48, 0.0 }
 0x10f   :  { %v709_v53 = vpop.f32.mrf.mxu0  ;;  %v837_v54 = vpop.f32.mrf.mxu1 }
 0x110   :  { %v1227_v55 = vadd.f32 %v2529_v21, %v1156_v51  ;;  %v1259_v56 = vadd.f32 %v2529_v21, %v1188_v52 }
 0x111   :  { %v712_v59 = vpop.f32.mrf.mxu0  ;;  %v840_v60 = vpop.f32.mrf.mxu1 }
 0x112   :  { %v1291_v61 = vmax.f32 %v1227_v55, 0.0  ;;  %v1323_v62 = vmax.f32 %v1259_v56, 0.0  ;;  %v1157_v63 = vmul.f32 %v2523_v17, %v712_v59  ;;  %v1189_v0 = vmul.f32 %v2523_v17, %v840_v60 }
 0x113   :  { %v714_v1 = vpop.f32.mrf.mxu0  ;;  %v842_v2 = vpop.f32.mrf.mxu1 }
 0x114   :  { %v1894_v3 = vpack.c.bf16 %v1291_v61, %v1290_v57  ;;  %v1974_v4 = vpack.c.bf16 %v1323_v62, %v1322_v58  ;;  %v1228_v5 = vadd.f32 %v2529_v21, %v1157_v63  ;;  %v1260_v6 = vadd.f32 %v2529_v21, %v1189_v0 }
 0x115   :  { %v715_v7 = vpop.f32.mrf.mxu0  ;;  %v843_v8 = vpop.f32.mrf.mxu1 }
 0x116   :  { %2046 = vst [vmem:[%s2758_s4 + $0x8] sm:$0xff] %v1894_v3   ;;  %2062 = vst [vmem:[%s2758_s4 + $0x88] sm:$0xff] %v1974_v4   ;;  %v1158_v9 = vmul.f32 %v2523_v17, %v715_v7  ;;  %v1190_v10 = vmul.f32 %v2523_v17, %v843_v8  ;;  %v1292_v15 = vmax.f32 %v1228_v5, 0.0  ;;  %v1324_v16 = vmax.f32 %v1260_v6, 0.0 }
 0x117   :  { %v717_v11 = vpop.f32.mrf.mxu0  ;;  %v845_v12 = vpop.f32.mrf.mxu1 }
 0x118   :  { %v1229_v13 = vadd.f32 %v2529_v21, %v1158_v9  ;;  %v1261_v14 = vadd.f32 %v2529_v21, %v1190_v10 }
 0x119   :  { %v720_v18 = vpop.f32.mrf.mxu0  ;;  %v848_v19 = vpop.f32.mrf.mxu1 }
 0x11a   :  { %v1293_v20 = vmax.f32 %v1229_v13, 0.0  ;;  %v1325_v22 = vmax.f32 %v1261_v14, 0.0  ;;  %v1159_v23 = vmul.f32 %v2523_v17, %v720_v18  ;;  %v1191_v24 = vmul.f32 %v2523_v17, %v848_v19 }
 0x11b   :  { %v722_v25 = vpop.f32.mrf.mxu0  ;;  %v850_v26 = vpop.f32.mrf.mxu1 }
 0x11c   :  { %v1899_v27 = vpack.c.bf16 %v1293_v20, %v1292_v15  ;;  %v1979_v28 = vpack.c.bf16 %v1325_v22, %v1324_v16  ;;  %v1230_v29 = vadd.f32 %v2529_v21, %v1159_v23  ;;  %v1262_v30 = vadd.f32 %v2529_v21, %v1191_v24 }
 0x11d   :  { %v723_v31 = vpop.f32.mrf.mxu0  ;;  %v851_v32 = vpop.f32.mrf.mxu1 }
 0x11e   :  { %2047 = vst [vmem:[%s2758_s4 + $0x10] sm:$0xff] %v1899_v27   ;;  %2063 = vst [vmem:[%s2758_s4 + $0x90] sm:$0xff] %v1979_v28   ;;  %v1160_v33 = vmul.f32 %v2523_v17, %v723_v31  ;;  %v1192_v34 = vmul.f32 %v2523_v17, %v851_v32  ;;  %v1294_v39 = vmax.f32 %v1230_v29, 0.0  ;;  %v1326_v40 = vmax.f32 %v1262_v30, 0.0 }
 0x11f   :  { %v725_v35 = vpop.f32.mrf.mxu0  ;;  %v853_v36 = vpop.f32.mrf.mxu1 }
 0x120   :  { %v1231_v37 = vadd.f32 %v2529_v21, %v1160_v33  ;;  %v1263_v38 = vadd.f32 %v2529_v21, %v1192_v34 }
 0x121   :  { %v728_v41 = vpop.f32.mrf.mxu0  ;;  %v856_v42 = vpop.f32.mrf.mxu1 }
 0x122   :  { %v1295_v43 = vmax.f32 %v1231_v37, 0.0  ;;  %v1327_v44 = vmax.f32 %v1263_v38, 0.0  ;;  %v1161_v45 = vmul.f32 %v2523_v17, %v728_v41  ;;  %v1193_v46 = vmul.f32 %v2523_v17, %v856_v42 }
 0x123   :  { %v730_v47 = vpop.f32.mrf.mxu0  ;;  %v858_v48 = vpop.f32.mrf.mxu1 }
 0x124   :  { %v1904_v49 = vpack.c.bf16 %v1295_v43, %v1294_v39  ;;  %v1984_v50 = vpack.c.bf16 %v1327_v44, %v1326_v40  ;;  %v1232_v51 = vadd.f32 %v2529_v21, %v1161_v45  ;;  %v1264_v52 = vadd.f32 %v2529_v21, %v1193_v46 }
 0x125   :  { %v731_v53 = vpop.f32.mrf.mxu0  ;;  %v859_v54 = vpop.f32.mrf.mxu1 }
 0x126   :  { %2048 = vst [vmem:[%s2758_s4 + $0x18] sm:$0xff] %v1904_v49   ;;  %2064 = vst [vmem:[%s2758_s4 + $0x98] sm:$0xff] %v1984_v50   ;;  %v1162_v55 = vmul.f32 %v2523_v17, %v731_v53  ;;  %v1194_v56 = vmul.f32 %v2523_v17, %v859_v54  ;;  %v1296_v61 = vmax.f32 %v1232_v51, 0.0  ;;  %v1328_v62 = vmax.f32 %v1264_v52, 0.0 }
 0x127   :  { %v733_v57 = vpop.f32.mrf.mxu0  ;;  %v861_v58 = vpop.f32.mrf.mxu1 }
 0x128   :  { %v1233_v59 = vadd.f32 %v2529_v21, %v1162_v55  ;;  %v1265_v60 = vadd.f32 %v2529_v21, %v1194_v56 }
 0x129   :  { %v736_v63 = vpop.f32.mrf.mxu0  ;;  %v864_v0 = vpop.f32.mrf.mxu1 }
 0x12a   :  { %v1297_v1 = vmax.f32 %v1233_v59, 0.0  ;;  %v1329_v2 = vmax.f32 %v1265_v60, 0.0  ;;  %v1163_v3 = vmul.f32 %v2523_v17, %v736_v63  ;;  %v1195_v4 = vmul.f32 %v2523_v17, %v864_v0 }
 0x12b   :  { %v738_v5 = vpop.f32.mrf.mxu0  ;;  %v866_v6 = vpop.f32.mrf.mxu1 }
 0x12c   :  { %v1909_v7 = vpack.c.bf16 %v1297_v1, %v1296_v61  ;;  %v1989_v8 = vpack.c.bf16 %v1329_v2, %v1328_v62  ;;  %v1234_v9 = vadd.f32 %v2529_v21, %v1163_v3  ;;  %v1266_v10 = vadd.f32 %v2529_v21, %v1195_v4 }
 0x12d   :  { %v739_v11 = vpop.f32.mrf.mxu0  ;;  %v867_v12 = vpop.f32.mrf.mxu1 }
 0x12e   :  { %2049 = vst [vmem:[%s2758_s4 + $0x20] sm:$0xff] %v1909_v7   ;;  %2065 = vst [vmem:[%s2758_s4 + $0xa0] sm:$0xff] %v1989_v8   ;;  %v1164_v13 = vmul.f32 %v2523_v17, %v739_v11  ;;  %v1196_v14 = vmul.f32 %v2523_v17, %v867_v12  ;;  %v1298_v20 = vmax.f32 %v1234_v9, 0.0  ;;  %v1330_v22 = vmax.f32 %v1266_v10, 0.0 }
 0x12f   :  { %v741_v15 = vpop.f32.mrf.mxu0  ;;  %v869_v16 = vpop.f32.mrf.mxu1 }
 0x130   :  { %v1235_v18 = vadd.f32 %v2529_v21, %v1164_v13  ;;  %v1267_v19 = vadd.f32 %v2529_v21, %v1196_v14 }
 0x131   :  { %v744_v23 = vpop.f32.mrf.mxu0  ;;  %v872_v24 = vpop.f32.mrf.mxu1 }
 0x132   :  { %v1299_v25 = vmax.f32 %v1235_v18, 0.0  ;;  %v1331_v26 = vmax.f32 %v1267_v19, 0.0  ;;  %v1165_v27 = vmul.f32 %v2523_v17, %v744_v23  ;;  %v1197_v28 = vmul.f32 %v2523_v17, %v872_v24 }
 0x133   :  { %v746_v29 = vpop.f32.mrf.mxu0  ;;  %v874_v30 = vpop.f32.mrf.mxu1 }
 0x134   :  { %v1914_v31 = vpack.c.bf16 %v1299_v25, %v1298_v20  ;;  %v1994_v32 = vpack.c.bf16 %v1331_v26, %v1330_v22  ;;  %v1236_v33 = vadd.f32 %v2529_v21, %v1165_v27  ;;  %v1268_v34 = vadd.f32 %v2529_v21, %v1197_v28 }
 0x135   :  { %v747_v35 = vpop.f32.mrf.mxu0  ;;  %v875_v36 = vpop.f32.mrf.mxu1 }
 0x136   :  { %2050 = vst [vmem:[%s2758_s4 + $0x28] sm:$0xff] %v1914_v31   ;;  %2066 = vst [vmem:[%s2758_s4 + $0xa8] sm:$0xff] %v1994_v32   ;;  %v1166_v37 = vmul.f32 %v2523_v17, %v747_v35  ;;  %v1198_v38 = vmul.f32 %v2523_v17, %v875_v36  ;;  %v1300_v43 = vmax.f32 %v1236_v33, 0.0  ;;  %v1332_v44 = vmax.f32 %v1268_v34, 0.0 }
 0x137   :  { %v749_v39 = vpop.f32.mrf.mxu0  ;;  %v877_v40 = vpop.f32.mrf.mxu1 }
 0x138   :  { %v1237_v41 = vadd.f32 %v2529_v21, %v1166_v37  ;;  %v1269_v42 = vadd.f32 %v2529_v21, %v1198_v38 }
 0x139   :  { %v752_v45 = vpop.f32.mrf.mxu0  ;;  %v880_v46 = vpop.f32.mrf.mxu1 }
 0x13a   :  { %v1301_v47 = vmax.f32 %v1237_v41, 0.0  ;;  %v1333_v48 = vmax.f32 %v1269_v42, 0.0  ;;  %v1167_v49 = vmul.f32 %v2523_v17, %v752_v45  ;;  %v1199_v50 = vmul.f32 %v2523_v17, %v880_v46 }
 0x13b   :  { %v754_v51 = vpop.f32.mrf.mxu0  ;;  %v882_v52 = vpop.f32.mrf.mxu1 }
 0x13c   :  { %v1919_v53 = vpack.c.bf16 %v1301_v47, %v1300_v43  ;;  %v1999_v54 = vpack.c.bf16 %v1333_v48, %v1332_v44  ;;  %v1238_v55 = vadd.f32 %v2529_v21, %v1167_v49  ;;  %v1270_v56 = vadd.f32 %v2529_v21, %v1199_v50 }
 0x13d   :  { %v755_v57 = vpop.f32.mrf.mxu0  ;;  %v883_v58 = vpop.f32.mrf.mxu1 }
 0x13e   :  { %2051 = vst [vmem:[%s2758_s4 + $0x30] sm:$0xff] %v1919_v53   ;;  %2067 = vst [vmem:[%s2758_s4 + $0xb0] sm:$0xff] %v1999_v54   ;;  %v1168_v59 = vmul.f32 %v2523_v17, %v755_v57  ;;  %v1200_v60 = vmul.f32 %v2523_v17, %v883_v58  ;;  %v1302_v1 = vmax.f32 %v1238_v55, 0.0  ;;  %v1334_v2 = vmax.f32 %v1270_v56, 0.0 }
 0x13f   :  { %v757_v61 = vpop.f32.mrf.mxu0  ;;  %v885_v62 = vpop.f32.mrf.mxu1 }
 0x140   :  { %v1239_v63 = vadd.f32 %v2529_v21, %v1168_v59  ;;  %v1271_v0 = vadd.f32 %v2529_v21, %v1200_v60 }
 0x141   :  { %v760_v3 = vpop.f32.mrf.mxu0  ;;  %v888_v4 = vpop.f32.mrf.mxu1 }
 0x142   :  { %v1303_v5 = vmax.f32 %v1239_v63, 0.0  ;;  %v1335_v6 = vmax.f32 %v1271_v0, 0.0  ;;  %v1169_v7 = vmul.f32 %v2523_v17, %v760_v3  ;;  %v1201_v8 = vmul.f32 %v2523_v17, %v888_v4 }
 0x143   :  { %v762_v9 = vpop.f32.mrf.mxu0  ;;  %v890_v10 = vpop.f32.mrf.mxu1 }
 0x144   :  { %v1924_v11 = vpack.c.bf16 %v1303_v5, %v1302_v1  ;;  %v2004_v12 = vpack.c.bf16 %v1335_v6, %v1334_v2  ;;  %v1240_v13 = vadd.f32 %v2529_v21, %v1169_v7  ;;  %v1272_v14 = vadd.f32 %v2529_v21, %v1201_v8 }
 0x145   :  { %v763_v15 = vpop.f32.mrf.mxu0  ;;  %v891_v16 = vpop.f32.mrf.mxu1 }
 0x146   :  { %2052 = vst [vmem:[%s2758_s4 + $0x38] sm:$0xff] %v1924_v11   ;;  %2068 = vst [vmem:[%s2758_s4 + $0xb8] sm:$0xff] %v2004_v12   ;;  %v1170_v18 = vmul.f32 %v2523_v17, %v763_v15  ;;  %v1202_v19 = vmul.f32 %v2523_v17, %v891_v16  ;;  %v1304_v25 = vmax.f32 %v1240_v13, 0.0  ;;  %v1336_v26 = vmax.f32 %v1272_v14, 0.0 }
 0x147   :  { %v765_v20 = vpop.f32.mrf.mxu0  ;;  %v893_v22 = vpop.f32.mrf.mxu1 }
 0x148   :  { %v1241_v23 = vadd.f32 %v2529_v21, %v1170_v18  ;;  %v1273_v24 = vadd.f32 %v2529_v21, %v1202_v19 }
 0x149   :  { %v768_v27 = vpop.f32.mrf.mxu0  ;;  %v896_v28 = vpop.f32.mrf.mxu1 }
 0x14a   :  { %v1305_v29 = vmax.f32 %v1241_v23, 0.0  ;;  %v1337_v30 = vmax.f32 %v1273_v24, 0.0  ;;  %v1171_v31 = vmul.f32 %v2523_v17, %v768_v27  ;;  %v1203_v32 = vmul.f32 %v2523_v17, %v896_v28 }
 0x14b   :  { %v770_v33 = vpop.f32.mrf.mxu0  ;;  %v898_v34 = vpop.f32.mrf.mxu1 }
 0x14c   :  { %v1929_v35 = vpack.c.bf16 %v1305_v29, %v1304_v25  ;;  %v2009_v36 = vpack.c.bf16 %v1337_v30, %v1336_v26  ;;  %v1242_v37 = vadd.f32 %v2529_v21, %v1171_v31  ;;  %v1274_v38 = vadd.f32 %v2529_v21, %v1203_v32 }
 0x14d   :  { %v771_v39 = vpop.f32.mrf.mxu0  ;;  %v899_v40 = vpop.f32.mrf.mxu1 }
 0x14e   :  { %2053 = vst [vmem:[%s2758_s4 + $0x40] sm:$0xff] %v1929_v35   ;;  %2069 = vst [vmem:[%s2758_s4 + $0xc0] sm:$0xff] %v2009_v36   ;;  %v1172_v41 = vmul.f32 %v2523_v17, %v771_v39  ;;  %v1204_v42 = vmul.f32 %v2523_v17, %v899_v40  ;;  %v1306_v47 = vmax.f32 %v1242_v37, 0.0  ;;  %v1338_v48 = vmax.f32 %v1274_v38, 0.0 }
 0x14f   :  { %v773_v43 = vpop.f32.mrf.mxu0  ;;  %v901_v44 = vpop.f32.mrf.mxu1 }
 0x150   :  { %v1243_v45 = vadd.f32 %v2529_v21, %v1172_v41  ;;  %v1275_v46 = vadd.f32 %v2529_v21, %v1204_v42 }
 0x151   :  { %v776_v49 = vpop.f32.mrf.mxu0  ;;  %v904_v50 = vpop.f32.mrf.mxu1 }
 0x152   :  { %v1307_v51 = vmax.f32 %v1243_v45, 0.0  ;;  %v1339_v52 = vmax.f32 %v1275_v46, 0.0  ;;  %v1173_v53 = vmul.f32 %v2523_v17, %v776_v49  ;;  %v1205_v54 = vmul.f32 %v2523_v17, %v904_v50 }
 0x153   :  { %v778_v55 = vpop.f32.mrf.mxu0  ;;  %v906_v56 = vpop.f32.mrf.mxu1 }
 0x154   :  { %v1934_v57 = vpack.c.bf16 %v1307_v51, %v1306_v47  ;;  %v2014_v58 = vpack.c.bf16 %v1339_v52, %v1338_v48  ;;  %v1244_v59 = vadd.f32 %v2529_v21, %v1173_v53  ;;  %v1276_v60 = vadd.f32 %v2529_v21, %v1205_v54 }
 0x155   :  { %v779_v61 = vpop.f32.mrf.mxu0  ;;  %v907_v62 = vpop.f32.mrf.mxu1 }
 0x156   :  { %2054 = vst [vmem:[%s2758_s4 + $0x48] sm:$0xff] %v1934_v57   ;;  %2070 = vst [vmem:[%s2758_s4 + $0xc8] sm:$0xff] %v2014_v58   ;;  %v1174_v63 = vmul.f32 %v2523_v17, %v779_v61  ;;  %v1206_v0 = vmul.f32 %v2523_v17, %v907_v62  ;;  %v1308_v5 = vmax.f32 %v1244_v59, 0.0  ;;  %v1340_v6 = vmax.f32 %v1276_v60, 0.0 }
 0x157   :  { %v781_v1 = vpop.f32.mrf.mxu0  ;;  %v909_v2 = vpop.f32.mrf.mxu1 }
 0x158   :  { %v1245_v3 = vadd.f32 %v2529_v21, %v1174_v63  ;;  %v1277_v4 = vadd.f32 %v2529_v21, %v1206_v0 }
 0x159   :  { %v784_v7 = vpop.f32.mrf.mxu0  ;;  %v912_v8 = vpop.f32.mrf.mxu1 }
 0x15a   :  { %v1309_v9 = vmax.f32 %v1245_v3, 0.0  ;;  %v1341_v10 = vmax.f32 %v1277_v4, 0.0  ;;  %v1175_v11 = vmul.f32 %v2523_v17, %v784_v7  ;;  %v1207_v12 = vmul.f32 %v2523_v17, %v912_v8 }
 0x15b   :  { %v786_v13 = vpop.f32.mrf.mxu0  ;;  %v914_v14 = vpop.f32.mrf.mxu1 }
 0x15c   :  { %v1939_v15 = vpack.c.bf16 %v1309_v9, %v1308_v5  ;;  %v2019_v16 = vpack.c.bf16 %v1341_v10, %v1340_v6  ;;  %v1246_v18 = vadd.f32 %v2529_v21, %v1175_v11  ;;  %v1278_v19 = vadd.f32 %v2529_v21, %v1207_v12 }
 0x15d   :  { %v787_v20 = vpop.f32.mrf.mxu0  ;;  %v915_v22 = vpop.f32.mrf.mxu1 }
 0x15e   :  { %2055 = vst [vmem:[%s2758_s4 + $0x50] sm:$0xff] %v1939_v15   ;;  %2071 = vst [vmem:[%s2758_s4 + $0xd0] sm:$0xff] %v2019_v16   ;;  %v1176_v23 = vmul.f32 %v2523_v17, %v787_v20  ;;  %v1208_v24 = vmul.f32 %v2523_v17, %v915_v22  ;;  %v1310_v29 = vmax.f32 %v1246_v18, 0.0  ;;  %v1342_v30 = vmax.f32 %v1278_v19, 0.0 }
 0x15f   :  { %v789_v25 = vpop.f32.mrf.mxu0  ;;  %v917_v26 = vpop.f32.mrf.mxu1 }
 0x160   :  { %v1247_v27 = vadd.f32 %v2529_v21, %v1176_v23  ;;  %v1279_v28 = vadd.f32 %v2529_v21, %v1208_v24 }
 0x161   :  { %v792_v31 = vpop.f32.mrf.mxu0  ;;  %v920_v32 = vpop.f32.mrf.mxu1 }
 0x162   :  { %v1311_v33 = vmax.f32 %v1247_v27, 0.0  ;;  %v1343_v34 = vmax.f32 %v1279_v28, 0.0  ;;  %v1177_v35 = vmul.f32 %v2523_v17, %v792_v31  ;;  %v1209_v36 = vmul.f32 %v2523_v17, %v920_v32 }
 0x163   :  { %v794_v37 = vpop.f32.mrf.mxu0  ;;  %v922_v38 = vpop.f32.mrf.mxu1 }
 0x164   :  { %v1944_v39 = vpack.c.bf16 %v1311_v33, %v1310_v29  ;;  %v2024_v40 = vpack.c.bf16 %v1343_v34, %v1342_v30  ;;  %v1248_v41 = vadd.f32 %v2529_v21, %v1177_v35  ;;  %v1280_v42 = vadd.f32 %v2529_v21, %v1209_v36 }
 0x165   :  { %v795_v43 = vpop.f32.mrf.mxu0  ;;  %v923_v44 = vpop.f32.mrf.mxu1 }
 0x166   :  { %2056 = vst [vmem:[%s2758_s4 + $0x58] sm:$0xff] %v1944_v39   ;;  %2072 = vst [vmem:[%s2758_s4 + $0xd8] sm:$0xff] %v2024_v40   ;;  %v1178_v45 = vmul.f32 %v2523_v17, %v795_v43  ;;  %v1210_v46 = vmul.f32 %v2523_v17, %v923_v44  ;;  %v1312_v51 = vmax.f32 %v1248_v41, 0.0  ;;  %v1344_v52 = vmax.f32 %v1280_v42, 0.0 }
 0x167   :  { %v797_v47 = vpop.f32.mrf.mxu0  ;;  %v925_v48 = vpop.f32.mrf.mxu1 }
 0x168   :  { %v1249_v49 = vadd.f32 %v2529_v21, %v1178_v45  ;;  %v1281_v50 = vadd.f32 %v2529_v21, %v1210_v46 }
 0x169   :  { %v800_v53 = vpop.f32.mrf.mxu0  ;;  %v928_v54 = vpop.f32.mrf.mxu1 }
 0x16a   :  { %v1313_v55 = vmax.f32 %v1249_v49, 0.0  ;;  %v1345_v56 = vmax.f32 %v1281_v50, 0.0  ;;  %v1179_v57 = vmul.f32 %v2523_v17, %v800_v53  ;;  %v1211_v58 = vmul.f32 %v2523_v17, %v928_v54 }
 0x16b   :  { %v802_v59 = vpop.f32.mrf.mxu0  ;;  %v930_v60 = vpop.f32.mrf.mxu1 }
 0x16c   :  { %v1949_v61 = vpack.c.bf16 %v1313_v55, %v1312_v51  ;;  %v2029_v62 = vpack.c.bf16 %v1345_v56, %v1344_v52  ;;  %v1250_v63 = vadd.f32 %v2529_v21, %v1179_v57  ;;  %v1282_v0 = vadd.f32 %v2529_v21, %v1211_v58 }
 0x16d   :  { %v803_v1 = vpop.f32.mrf.mxu0  ;;  %v931_v2 = vpop.f32.mrf.mxu1 }
 0x16e   :  { %2057 = vst [vmem:[%s2758_s4 + $0x60] sm:$0xff] %v1949_v61   ;;  %2073 = vst [vmem:[%s2758_s4 + $0xe0] sm:$0xff] %v2029_v62   ;;  %v1180_v3 = vmul.f32 %v2523_v17, %v803_v1  ;;  %v1212_v4 = vmul.f32 %v2523_v17, %v931_v2  ;;  %v1314_v9 = vmax.f32 %v1250_v63, 0.0  ;;  %v1346_v10 = vmax.f32 %v1282_v0, 0.0 }
 0x16f   :  { %v805_v5 = vpop.f32.mrf.mxu0  ;;  %v933_v6 = vpop.f32.mrf.mxu1 }
 0x170   :  { %v1251_v7 = vadd.f32 %v2529_v21, %v1180_v3  ;;  %v1283_v8 = vadd.f32 %v2529_v21, %v1212_v4 }
 0x171   :  { %v808_v11 = vpop.f32.mrf.mxu0  ;;  %v936_v12 = vpop.f32.mrf.mxu1 }
 0x172   :  { %v1315_v13 = vmax.f32 %v1251_v7, 0.0  ;;  %v1347_v14 = vmax.f32 %v1283_v8, 0.0  ;;  %v1181_v15 = vmul.f32 %v2523_v17, %v808_v11  ;;  %v1213_v16 = vmul.f32 %v2523_v17, %v936_v12 }
 0x173   :  { %v810_v18 = vpop.f32.mrf.mxu0  ;;  %v938_v19 = vpop.f32.mrf.mxu1 }
 0x174   :  { %v1954_v20 = vpack.c.bf16 %v1315_v13, %v1314_v9  ;;  %v2034_v22 = vpack.c.bf16 %v1347_v14, %v1346_v10  ;;  %v1252_v23 = vadd.f32 %v2529_v21, %v1181_v15  ;;  %v1284_v24 = vadd.f32 %v2529_v21, %v1213_v16 }
 0x175   :  { %v811_v25 = vpop.f32.mrf.mxu0  ;;  %v939_v26 = vpop.f32.mrf.mxu1 }
 0x176   :  { %2058 = vst [vmem:[%s2758_s4 + $0x68] sm:$0xff] %v1954_v20   ;;  %2074 = vst [vmem:[%s2758_s4 + $0xe8] sm:$0xff] %v2034_v22   ;;  %v1182_v27 = vmul.f32 %v2523_v17, %v811_v25  ;;  %v1214_v28 = vmul.f32 %v2523_v17, %v939_v26  ;;  %v1316_v33 = vmax.f32 %v1252_v23, 0.0  ;;  %v1348_v34 = vmax.f32 %v1284_v24, 0.0 }
 0x177   :  { %v813_v29 = vpop.f32.mrf.mxu0  ;;  %v941_v30 = vpop.f32.mrf.mxu1 }
 0x178   :  { %v1253_v31 = vadd.f32 %v2529_v21, %v1182_v27  ;;  %v1285_v32 = vadd.f32 %v2529_v21, %v1214_v28 }
 0x179   :  { %v816_v35 = vpop.f32.mrf.mxu0  ;;  %v944_v36 = vpop.f32.mrf.mxu1 }
 0x17a   :  { %v1317_v37 = vmax.f32 %v1253_v31, 0.0  ;;  %v1349_v38 = vmax.f32 %v1285_v32, 0.0  ;;  %v1183_v39 = vmul.f32 %v2523_v17, %v816_v35  ;;  %v1215_v40 = vmul.f32 %v2523_v17, %v944_v36 }
 0x17b   :  { %v818_v41 = vpop.f32.mrf.mxu0  ;;  %v946_v42 = vpop.f32.mrf.mxu1 }
 0x17c   :  { %v1959_v43 = vpack.c.bf16 %v1317_v37, %v1316_v33  ;;  %v2039_v44 = vpack.c.bf16 %v1349_v38, %v1348_v34  ;;  %v1254_v47 = vadd.f32 %v2529_v21, %v1183_v39  ;;  %v1286_v48 = vadd.f32 %v2529_v21, %v1215_v40 }
 0x17d   :  { %v819_v45 = vpop.f32.mrf.mxu0  ;;  %v947_v46 = vpop.f32.mrf.mxu1 }
 0x17e   :  { %2059 = vst [vmem:[%s2758_s4 + $0x70] sm:$0xff] %v1959_v43   ;;  %2075 = vst [vmem:[%s2758_s4 + $0xf0] sm:$0xff] %v2039_v44   ;;  %v1184_v49 = vmul.f32 %v2523_v17, %v819_v45  ;;  %v1216_v50 = vmul.f32 %v2523_v17, %v947_v46  ;;  %v1318_v55 = vmax.f32 %v1254_v47, 0.0  ;;  %v1350_v56 = vmax.f32 %v1286_v48, 0.0 }
 0x17f   :  { %v821_v51 = vpop.f32.mrf.mxu0  ;;  %v949_v52 = vpop.f32.mrf.mxu1 }
 0x180   :  { %v1255_v53 = vadd.f32 %v2529_v21, %v1184_v49  ;;  %v1287_v54 = vadd.f32 %v2529_v21, %v1216_v50 }
 0x182   :  { %v1319_v57 = vmax.f32 %v1255_v53, 0.0  ;;  %v1351_v58 = vmax.f32 %v1287_v54, 0.0 }
 0x184   :  { %v1964_v59 = vpack.c.bf16 %v1319_v57, %v1318_v55  ;;  %v2044_v60 = vpack.c.bf16 %v1351_v58, %v1350_v56 }
 0x186   :  { %2060 = vst [vmem:[%s2758_s4 + $0x78] sm:$0xff] %v1964_v59   ;;  %2076 = vst [vmem:[%s2758_s4 + $0xf8] sm:$0xff] %v2044_v60  }

// kernel: resnet_byol_forward.22
= control target key start
LH: loop header
LB: loop body
LE: loop exit
PB: predicated region body
PF: predicated region fallthrough
CT: control target
= control target key end

     0   :  { %s1743_s15 = smov 0   ;;  %s1745_s16 = smov 0   ;;  %s1996_s0 = inlined_call_operand.vmem [shape: bf16[128,1152], index: 0, kind: input, shape index: {}]   ;;  %s1997_s1 = inlined_call_operand.vmem [shape: bf16[1152,128], index: 1, kind: input, shape index: {}]   ;;  %s1998_s2 = inlined_call_operand.vmem [shape: f32[1,128], index: 2, kind: input, shape index: {}]   ;;  %s1999_s3 = inlined_call_operand.vmem [shape: f32[1,128], index: 3, kind: input, shape index: {}]   ;;  %s2000_s4 = inlined_call_operand.vmem [shape: bf16[128,128], index: 4, kind: output, shape index: {}]  }
   0x1   :  { %s1747_s17 = smov 0   ;;  %s1749_s18 = smov 0  }
   0x2   :  { %s1751_s19 = smov 0  }
   0x3 LB: > { %s26_s20 = sadd.s32 1, %s1711_s18  ;;  %p49_p1 = scmp.ne.s32.totalorder %s1703_s16, %s1699_s15  ;;  %s1715_s19 = sphi %s1751_s19, %s14_s19   ;;  %s1711_s18 = sphi %s1749_s18, %s2004_s18   ;;  %s1707_s17 = sphi %s1747_s17, %s2003_s17   ;;  %s1703_s16 = sphi %s1745_s16, %s2002_s16   ;;  %s1699_s15 = sphi %s1743_s15, %s2001_s15  }
   0x4   : > { %p27_p0 = scmp.ge.s32.totalorder %s26_s20, 3  ;;  %p50_p2 = scmp.eq.s32.totalorder %s1715_s19, 0 }
   0x5   : > { %s42_s22 = sadd.s32 1, %s1703_s16  ;;  %p1294_p5 = scmp.ge.s32.totalorder %s1715_s19, 3 }
   0x6   : > { %s2006_s20 = smov (%p27_p0, %s26_s20), 0  ;;  %p51_p3 = por %p50_p2, %p49_p1 }
   0x7   : > { %s38_s21 = ssub.s32 %s1711_s18, %s2006_s20  ;;  %195 = sbr.rel (%p1294_p5) target bundleno = 35 (0x23), region = 24 }
   0x8   : > { %p40_p4 = scmp.eq.s32.totalorder %s38_s21, 0 }
   0xa   : > { %s1778_s23 = scalar_select %p40_p4, %s1703_s16, %s42_s22  }
   0xc   : > { %198 = sbr.rel (!%p51_p3) target bundleno = 35 (0x23), region = 28  ;;  %s200_s24 = sand.u32 (%p51_p3), 1, %s1703_s16  }
   0xd   : > { %s1402_s25 = smul.u32 (%p51_p3), 12, %s1711_s18 }
   0xe   : > { %s1578_s26 = smul.u32 (%p51_p3), 192, %s200_s24 }
   0xf   : > { %s1786_s29 = scalar_lea.vmem (%p51_p3), %s1996_s0, %s1402_s25 }
  0x10   : > { %v223_v0 = vld [vmem:[%s1786_s29] sm:$0xff] (%p51_p3)  ;;  %v227_v2 = vld [vmem:[%s1786_s29 + $0x48] sm:$0xff] (%p51_p3)  ;;  %s1791_s30 = scalar_lea.vmem (%p51_p3), [#allocation3], %s1578_s26  ;;  %v231_v4 = vld [vmem:[%s1786_s29 + $0x90] sm:$0xff] (%p51_p3) }
  0x11   : > { %v225_v1 = vld [vmem:[%s1786_s29 + $0x24] sm:$0xff]  ;;  %224 = vst [vmem:[%s1791_s30] sm:$0xff] %v223_v0  ;;  %228 = vst [vmem:[%s1791_s30 + $0x18] sm:$0xff] %v227_v2  ;;  %v229_v3 = vld [vmem:[%s1786_s29 + $0x6c] sm:$0xff] }
  0x12   : > { %226 = vst [vmem:[%s1791_s30 + $0xc] sm:$0xff] %v225_v1  ;;  %v233_v5 = vld [vmem:[%s1786_s29 + $0xb4] sm:$0xff]  ;;  %230 = vst [vmem:[%s1791_s30 + $0x24] sm:$0xff] %v229_v3  ;;  %v237_v7 = vld [vmem:[%s1786_s29 + $0xfc] sm:$0xff] }
  0x13   : > { %232 = vst [vmem:[%s1791_s30 + $0x30] sm:$0xff] %v231_v4  ;;  %234 = vst [vmem:[%s1791_s30 + $0x3c] sm:$0xff] %v233_v5  ;;  %v235_v6 = vld [vmem:[%s1786_s29 + $0xd8] sm:$0xff]  ;;  %v239_v8 = vld [vmem:[%s1786_s29 + $0x120] sm:$0xff] }
  0x14   : > { %236 = vst [vmem:[%s1791_s30 + $0x48] sm:$0xff] %v235_v6  ;;  %238 = vst [vmem:[%s1791_s30 + $0x54] sm:$0xff] %v237_v7  ;;  %v241_v9 = vld [vmem:[%s1786_s29 + $0x144] sm:$0xff]  ;;  %v245_v11 = vld [vmem:[%s1786_s29 + $0x18c] sm:$0xff] }
  0x15   : > { %240 = vst [vmem:[%s1791_s30 + $0x60] sm:$0xff] %v239_v8  ;;  %v243_v10 = vld [vmem:[%s1786_s29 + $0x168] sm:$0xff]  ;;  %242 = vst [vmem:[%s1791_s30 + $0x6c] sm:$0xff] %v241_v9  ;;  %v247_v12 = vld [vmem:[%s1786_s29 + $0x1b0] sm:$0xff] }
  0x16   : > { %244 = vst [vmem:[%s1791_s30 + $0x78] sm:$0xff] %v243_v10  ;;  %246 = vst [vmem:[%s1791_s30 + $0x84] sm:$0xff] %v245_v11  ;;  %v249_v13 = vld [vmem:[%s1786_s29 + $0x1d4] sm:$0xff]  ;;  %v253_v15 = vld [vmem:[%s1786_s29 + $0x21c] sm:$0xff] }
  0x17   : > { %v251_v14 = vld [vmem:[%s1786_s29 + $0x1f8] sm:$0xff]  ;;  %248 = vst [vmem:[%s1791_s30 + $0x90] sm:$0xff] %v247_v12  ;;  %250 = vst [vmem:[%s1791_s30 + $0x9c] sm:$0xff] %v249_v13  ;;  %v1296_v16 = vld [vmem:[%s1786_s29 + $0x8] sm:$0xf] }
  0x18   : > { %252 = vst [vmem:[%s1791_s30 + $0xa8] sm:$0xff] %v251_v14  ;;  %v1298_v17 = vld [vmem:[%s1786_s29 + $0x2c] sm:$0xf]  ;;  %254 = vst [vmem:[%s1791_s30 + $0xb4] sm:$0xff] %v253_v15  ;;  %v1300_v18 = vld [vmem:[%s1786_s29 + $0x50] sm:$0xf] }
  0x19   : > { %1297 = vst [vmem:[%s1791_s30 + $0x8] sm:$0xf] %v1296_v16  ;;  %1299 = vst [vmem:[%s1791_s30 + $0x14] sm:$0xf] %v1298_v17  ;;  %v1302_v19 = vld [vmem:[%s1786_s29 + $0x74] sm:$0xf] }
  0x1a   : > { %v1304_v20 = vld [vmem:[%s1786_s29 + $0x98] sm:$0xf]  ;;  %1301 = vst [vmem:[%s1791_s30 + $0x20] sm:$0xf] %v1300_v18  ;;  %1303 = vst [vmem:[%s1791_s30 + $0x2c] sm:$0xf] %v1302_v19 }
  0x1b   : > { %1305 = vst [vmem:[%s1791_s30 + $0x38] sm:$0xf] %v1304_v20  ;;  %v1306_v21 = vld [vmem:[%s1786_s29 + $0xbc] sm:$0xf]  ;;  %v1308_v22 = vld [vmem:[%s1786_s29 + $0xe0] sm:$0xf] }
  0x1c   : > { %v1310_v23 = vld [vmem:[%s1786_s29 + $0x104] sm:$0xf]  ;;  %1307 = vst [vmem:[%s1791_s30 + $0x44] sm:$0xf] %v1306_v21  ;;  %1309 = vst [vmem:[%s1791_s30 + $0x50] sm:$0xf] %v1308_v22 }
  0x1d   : > { %1311 = vst [vmem:[%s1791_s30 + $0x5c] sm:$0xf] %v1310_v23  ;;  %v1312_v24 = vld [vmem:[%s1786_s29 + $0x128] sm:$0xf]  ;;  %v1314_v25 = vld [vmem:[%s1786_s29 + $0x14c] sm:$0xf] }
  0x1e   : > { %v1316_v26 = vld [vmem:[%s1786_s29 + $0x170] sm:$0xf]  ;;  %1313 = vst [vmem:[%s1791_s30 + $0x68] sm:$0xf] %v1312_v24  ;;  %1315 = vst [vmem:[%s1791_s30 + $0x74] sm:$0xf] %v1314_v25 }
  0x1f   : > { %1317 = vst [vmem:[%s1791_s30 + $0x80] sm:$0xf] %v1316_v26  ;;  %v1318_v27 = vld [vmem:[%s1786_s29 + $0x194] sm:$0xf]  ;;  %v1320_v28 = vld [vmem:[%s1786_s29 + $0x1b8] sm:$0xf] }
  0x20   : > { %v1322_v29 = vld [vmem:[%s1786_s29 + $0x1dc] sm:$0xf]  ;;  %1319 = vst [vmem:[%s1791_s30 + $0x8c] sm:$0xf] %v1318_v27  ;;  %1321 = vst [vmem:[%s1791_s30 + $0x98] sm:$0xf] %v1320_v28 }
  0x21   : > { %1323 = vst [vmem:[%s1791_s30 + $0xa4] sm:$0xf] %v1322_v29  ;;  %v1324_v30 = vld [vmem:[%s1786_s29 + $0x200] sm:$0xf]  ;;  %v1326_v31 = vld [vmem:[%s1786_s29 + $0x224] sm:$0xf] }
  0x22   : > { %1325 = vst [vmem:[%s1791_s30 + $0xb0] sm:$0xf] %v1324_v30  ;;  %1327 = vst [vmem:[%s1791_s30 + $0xbc] sm:$0xf] %v1326_v31 }
  0x23 PF: > { %p1328_p6 = scmp.ge.s32.totalorder %s1715_s19, 1  ;;  %p311_p7 = scmp.lt.s32.totalorder %s1715_s19, 4 }
  0x25   : > { %p312_p8 = pnand %p1328_p6, %p311_p7 }
  0x26   : > { %s318_s5 = sand.u32 (!%p312_p8), 1, %s1699_s15   ;;  %s362_s6 = smul.u32 (!%p312_p8), 48, %s1707_s17 }
  0x27   : > { %315 = sbr.rel (%p312_p8) target bundleno = 375 (0x177), region = 58  ;;  %p1330_p10 = scmp.ne.s32.totalorder (!%p312_p8), %s1707_s17, 0 }
  0x28   : > { %s1579_s7 = smul.u32 (!%p312_p8), 192, %s318_s5  ;;  %p363_p9 = scmp.lt.s32.totalorder (!%p312_p8), %s362_s6, 143 }
  0x2a   : > { %s1863_s12 = scalar_lea.vmem (!%p312_p8), [#allocation3], %s1579_s7 }
  0x2c   : > { %s2008_s6 = smov (!%p363_p9, %s362_s6), 143  ;;  %390 = sbr.rel (%p1330_p10) target bundleno = 58 (0x3a), region = 66 }
  0x2d   : > { %s1329_s8 = sshll.u32 %s2008_s6, 2 }
  0x2e   : > { %s1861_s11 = scalar_lea.vmem %s1997_s1, %s1329_s8 }
  0x31   : > { %v1717_v32 = vmov 0.0  }
  0x32   : > { %391 = vst [vmem:[#allocation2 + $0x30] sm:$0xff] %v1717_v32  ;;  %392 = vst [vmem:[#allocation2] sm:$0xff] %v1717_v32 }
  0x33   : > { %393 = vst [vmem:[#allocation2 + $0x58] sm:$0xff] %v1717_v32  ;;  %394 = vst [vmem:[#allocation2 + $0x18] sm:$0xff] %v1717_v32 }
  0x34   : > { %395 = vst [vmem:[#allocation2 + $0x50] sm:$0xff] %v1717_v32  ;;  %396 = vst [vmem:[#allocation2 + $0x68] sm:$0xff] %v1717_v32 }
  0x35   : > { %397 = vst [vmem:[#allocation2 + $0x8] sm:$0xff] %v1717_v32  ;;  %398 = vst [vmem:[#allocation2 + $0x48] sm:$0xff] %v1717_v32 }
  0x36   : > { %399 = vst [vmem:[#allocation2 + $0x40] sm:$0xff] %v1717_v32  ;;  %400 = vst [vmem:[#allocation2 + $0x20] sm:$0xff] %v1717_v32 }
  0x37   : > { %401 = vst [vmem:[#allocation2 + $0x10] sm:$0xff] %v1717_v32  ;;  %402 = vst [vmem:[#allocation2 + $0x38] sm:$0xff] %v1717_v32 }
  0x38   : > { %403 = vst [vmem:[#allocation2 + $0x60] sm:$0xff] %v1717_v32  ;;  %404 = vst [vmem:[#allocation2 + $0x70] sm:$0xff] %v1717_v32 }
  0x39   : > { %405 = vst [vmem:[#allocation2 + $0x78] sm:$0xff] %v1717_v32  ;;  %406 = vst [vmem:[#allocation2 + $0x28] sm:$0xff] %v1717_v32 }
  0x3a PF: > { %v1621_v33 = vld [vmem:[%s1861_s11 + $0x78] sm:$0xff]   ;;  %v1624_v36 = vld [vmem:[%s1861_s11 + $0x70] sm:$0xff]   ;;  %v1627_v39 = vld [vmem:[%s1861_s11 + $0x68] sm:$0xff]   ;;  %p1379_p11 = scmp.ne.s32.totalorder %s1707_s17, 2 }
  0x3b   : > { %v1622_v34 = vld [vmem:[%s1861_s11 + $0x38] sm:$0xff]   ;;  %1466 = vmatprep.subr.bf16.mxu0 %v1621_v33  ;;  %v1625_v37 = vld [vmem:[%s1861_s11 + $0x30] sm:$0xff]   ;;  %v1628_v40 = vld [vmem:[%s1861_s11 + $0x28] sm:$0xff]  }
  0x3c   : > { %v1623_v35 = vld [vmem:[%s1861_s11 + $0xb8] sm:$0xff]   ;;  %1467 = vmatpush3.bf16.msra.mxu0 %v1622_v34  ;;  %v1626_v38 = vld [vmem:[%s1861_s11 + $0xb0] sm:$0xff]   ;;  %v1629_v41 = vld [vmem:[%s1861_s11 + $0xa8] sm:$0xff]  }
  0x3d   : > { %1546 = vmatprep.subr.bf16.mxu1 %v1623_v35  ;;  %1468 = vmatprep.subr.bf16.mxu0 %v1624_v36  ;;  %v1630_v42 = vld [vmem:[%s1861_s11 + $0x60] sm:$0xff]   ;;  %v1633_v45 = vld [vmem:[%s1861_s11 + $0x58] sm:$0xff]   ;;  %v1636_v48 = vld [vmem:[%s1861_s11 + $0x50] sm:$0xff]  }
  0x3e   : > { %1547 = vmatpush3.bf16.msra.mxu1 %v1623_v35  ;;  %v1631_v43 = vld [vmem:[%s1861_s11 + $0x20] sm:$0xff]   ;;  %v1635_v46 = vld [vmem:[%s1861_s11 + $0x98] sm:$0xff]   ;;  %v1638_v49 = vld [vmem:[%s1861_s11 + $0x90] sm:$0xff]  }
  0x3f   : > { %1548 = vmatprep.subr.bf16.mxu1 %v1626_v38  ;;  %v1632_v44 = vld [vmem:[%s1861_s11 + $0xa0] sm:$0xff]   ;;  %v1634_v47 = vld [vmem:[%s1861_s11 + $0x18] sm:$0xff]   ;;  %v1637_v50 = vld [vmem:[%s1861_s11 + $0x10] sm:$0xff]  }
  0x40   : > { %1469 = vmatpush3.bf16.msra.mxu0 %v1625_v37  ;;  %v1639_v51 = vld [vmem:[%s1861_s11 + $0x48] sm:$0xff]   ;;  %v1642_v54 = vld [vmem:[%s1861_s11 + $0x40] sm:$0xff]   ;;  %v1657_v1 = vld [vmem:[%s1863_s12 + $0x50] ss:$12 sps:$4 sm:$0xff]  }
  0x41   : > { %1470 = vmatprep.subr.bf16.mxu0 %v1627_v39  ;;  %v1640_v52 = vld [vmem:[%s1861_s11 + $0x8] sm:$0xff]   ;;  %v1644_v55 = vld [vmem:[%s1861_s11 + $0x80] sm:$0xff]   ;;  %v1655_v3 = vld [vmem:[%s1863_s12 + $0x30] ss:$12 sps:$4 sm:$0xff]  }
  0x42   : > { %1549 = vmatpush3.bf16.msra.mxu1 %v1626_v38  ;;  %v1641_v53 = vld [vmem:[%s1861_s11 + $0x88] sm:$0xff]   ;;  %v1647_v56 = vld [vmem:[%s1863_s12 + $0x4] ss:$12 sps:$4 sm:$0xff]   ;;  %v1653_v0 = vld [vmem:[%s1863_s12 + $0x34] ss:$12 sps:$4 sm:$0xff]  }
  0x43   : > { %1550 = vmatprep.subr.bf16.mxu1 %v1629_v41  ;;  %v1648_v57 = vld [vmem:[%s1863_s12 + $0x8] ss:$12 sps:$4 sm:$0xff]   ;;  %v1643_v58 = vld [vmem:[%s1861_s11] sm:$0xff]   ;;  %807 = vmatprep.mubr.bf16.mxu0 %v1647_v56  ;;  %v1658_v4 = vld [vmem:[%s1863_s12 + $0x4c] ss:$12 sps:$4 sm:$0xff]  }
  0x44   : > { %1471 = vmatpush3.bf16.msra.mxu0 %v1628_v40  ;;  %1562 = vmatprep.mubr.bf16.mxu1 %v1648_v57  ;;  %v1645_v59 = vld [vmem:[%s1863_s12] ss:$12 sps:$4 sm:$0xff]   ;;  %v1650_v60 = vld [vmem:[%s1863_s12 + $0x1c] ss:$12 sps:$4 sm:$0xff]   ;;  %v1656_v62 = vld [vmem:[%s1863_s12 + $0x38] ss:$12 sps:$4 sm:$0xff]  }
  0x45   : > { %1472 = vmatprep.subr.bf16.mxu0 %v1630_v42  ;;  %v1649_v61 = vld [vmem:[%s1863_s12 + $0x20] ss:$12 sps:$4 sm:$0xff]   ;;  %v1652_v63 = vld [vmem:[%s1863_s12 + $0x18] ss:$12 sps:$4 sm:$0xff]   ;;  %v1664_v2 = vld [vmem:[%s1863_s12 + $0x68] ss:$12 sps:$4 sm:$0xff]  }
  0x46   : > { %1551 = vmatpush3.bf16.msra.mxu1 %v1629_v41  ;;  %v1665_v5 = vld [vmem:[%s1863_s12 + $0x80] ss:$12 sps:$4 sm:$0xff]   ;;  %v1672_v6 = vld [vmem:[%s1863_s12 + $0x98] ss:$12 sps:$4 sm:$0xff]   ;;  %v1660_v7 = vld [vmem:[%s1863_s12 + $0x48] ss:$12 sps:$4 sm:$0xff]  }
  0x47   : > { %1552 = vmatprep.subr.bf16.mxu1 %v1632_v44  ;;  %v1661_v8 = vld [vmem:[%s1863_s12 + $0x64] ss:$12 sps:$4 sm:$0xff]   ;;  %v1663_v10 = vld [vmem:[%s1863_s12 + $0x60] ss:$12 sps:$4 sm:$0xff]   ;;  %v1666_v11 = vld [vmem:[%s1863_s12 + $0x7c] ss:$12 sps:$4 sm:$0xff]  }
  0x48   : > { %1473 = vmatpush3.bf16.msra.mxu0 %v1631_v43  ;;  %v1673_v9 = vld [vmem:[%s1863_s12 + $0xb0] ss:$12 sps:$4 sm:$0xff]   ;;  %v1668_v12 = vld [vmem:[%s1863_s12 + $0x78] ss:$12 sps:$4 sm:$0xff]   ;;  %v1669_v13 = vld [vmem:[%s1863_s12 + $0x94] ss:$12 sps:$4 sm:$0xff]  }
  0x49   : > { %1474 = vmatprep.subr.bf16.mxu0 %v1633_v45  ;;  %v1671_v14 = vld [vmem:[%s1863_s12 + $0x90] ss:$12 sps:$4 sm:$0xff]   ;;  %v1674_v15 = vld [vmem:[%s1863_s12 + $0xac] ss:$12 sps:$4 sm:$0xff]   ;;  %v1676_v16 = vld [vmem:[%s1863_s12 + $0xa8] ss:$12 sps:$4 sm:$0xff]  }
  0x4a   : > { %1553 = vmatpush3.bf16.msra.mxu1 %v1632_v44  ;;  %v407_v22 = vld [vmem:[#allocation2 + $0x30] sm:$0xff]  ;;  %v408_v30 = vld [vmem:[#allocation2] sm:$0xff]  ;;  %v409_v37 = vld [vmem:[#allocation2 + $0x58] sm:$0xff] }
  0x4b   : > { %1554 = vmatprep.subr.bf16.mxu1 %v1635_v46  ;;  %v410_v44 = vld [vmem:[#allocation2 + $0x18] sm:$0xff] }
  0x4c   : > { %1475 = vmatpush3.bf16.msra.mxu0 %v1634_v47 }
  0x4d   : > { %1476 = vmatprep.subr.bf16.mxu0 %v1636_v48 }
  0x4e   : > { %1555 = vmatpush3.bf16.msra.mxu1 %v1635_v46 }
  0x4f   : > { %1556 = vmatprep.subr.bf16.mxu1 %v1638_v49 }
  0x50   : > { %1477 = vmatpush3.bf16.msra.mxu0 %v1637_v50 }
  0x51   : > { %1478 = vmatprep.subr.bf16.mxu0 %v1639_v51 }
  0x52   : > { %1557 = vmatpush3.bf16.msra.mxu1 %v1638_v49 }
  0x53   : > { %1558 = vmatprep.subr.bf16.mxu1 %v1641_v53 }
  0x54   : > { %1479 = vmatpush3.bf16.msra.mxu0 %v1640_v52  ;;  %v411_v52 = vld [vmem:[#allocation2 + $0x50] sm:$0xff] }
  0x55   : > { %1480 = vmatprep.subr.bf16.mxu0 %v1642_v54 }
  0x56   : > { %1559 = vmatpush3.bf16.msra.mxu1 %v1641_v53 }
  0x57   : > { %1560 = vmatprep.subr.bf16.mxu1 %v1644_v55 }
  0x58   : > { %1481 = vmatpush3.bf16.msra.mxu0 %v1643_v58 }
  0x5a   : > { %1561 = vmatpush3.bf16.msra.mxu1 %v1644_v55 }
  0x5b   : > { %808 = vmatmul.mubr.bf16.vlgmr.msra.gmra.mxu0 %v1645_v59  ;;  %v412_v59 = vld [vmem:[#allocation2 + $0x68] sm:$0xff] }
  0x5c   : > { %815 = vmatprep.mubr.bf16.mxu0 %v1650_v60 }
  0x5d   : > { %1563 = vmatmul.mubr.bf16.vlgmr.msra.gmra.mxu1 %v1649_v61 }
  0x5e   : > { %1566 = vmatprep.mubr.bf16.mxu1 %v1656_v62 }
  0x63   : > { %816 = vmatmul.mubr.bf16.gmra.mxu0 %v1652_v63 }
  0x64   : > { %823 = vmatprep.mubr.bf16.mxu0 %v1653_v0 }
  0x65   : > { %1567 = vmatmul.mubr.bf16.gmra.mxu1 %v1657_v1  ;;  %v413_v1 = vld [vmem:[#allocation2 + $0x8] sm:$0xff] }
  0x66   : > { %1570 = vmatprep.mubr.bf16.mxu1 %v1664_v2 }
  0x6b   : > { %824 = vmatmul.mubr.bf16.gmra.mxu0 %v1655_v3 }
  0x6c   : > { %831 = vmatprep.mubr.bf16.mxu0 %v1658_v4 }
  0x6d   : > { %1571 = vmatmul.mubr.bf16.gmra.mxu1 %v1665_v5 }
  0x6e   : > { %1574 = vmatprep.mubr.bf16.mxu1 %v1672_v6 }
  0x73   : > { %832 = vmatmul.mubr.bf16.gmra.mxu0 %v1660_v7 }
  0x74   : > { %839 = vmatprep.mubr.bf16.mxu0 %v1661_v8  ;;  %v414_v8 = vld [vmem:[#allocation2 + $0x48] sm:$0xff] }
  0x75   : > { %1575 = vmatmul.mubr.bf16.gmra.mxu1 %v1673_v9 }
  0x7b   : > { %840 = vmatmul.mubr.bf16.gmra.mxu0 %v1663_v10 }
  0x7c   : > { %847 = vmatprep.mubr.bf16.mxu0 %v1666_v11 }
  0x83   : > { %848 = vmatmul.mubr.bf16.gmra.mxu0 %v1668_v12 }
  0x84   : > { %855 = vmatprep.mubr.bf16.mxu0 %v1669_v13 }
  0x8b   : > { %856 = vmatmul.mubr.bf16.gmra.mxu0 %v1671_v14 }
  0x8c   : > { %863 = vmatprep.mubr.bf16.mxu0 %v1674_v15 }
  0x93   : > { %864 = vmatmul.mubr.bf16.gmra.mxu0 %v1676_v16  ;;  %v415_v16 = vld [vmem:[#allocation2 + $0x40] sm:$0xff] }
 0x11b   : > { %v1482_v17 = vpop.f32.mrf.mxu0 }
 0x11d   : > { %v1483_v18 = vpop.f32.mrf.mxu0  ;;  %v1564_v19 = vpop.f32.mrf.mxu1 }
 0x11e   : > { %v1484_v20 = vadd.f32 %v1483_v18, %v1482_v17 }
 0x11f   : > { %v1485_v21 = vpop.f32.mrf.mxu0  ;;  %v906_v23 = vpop.f32.mrf.mxu1 }
 0x120   : > { %v907_v24 = vadd.f32 %v1484_v20, %v906_v23  ;;  %v416_v23 = vld [vmem:[#allocation2 + $0x20] sm:$0xff] }
 0x121   : > { %v1486_v25 = vpop.f32.mrf.mxu0  ;;  %v1565_v26 = vpop.f32.mrf.mxu1 }
 0x122   : > { %v969_v27 = vadd.f32 %v907_v24, %v407_v22  ;;  %v1487_v28 = vadd.f32 %v1486_v25, %v1485_v21 }
 0x123   : > { %v1488_v29 = vpop.f32.mrf.mxu0  ;;  %v909_v31 = vpop.f32.mrf.mxu1 }
 0x124   : > { %985 = vst [vmem:[#allocation2 + $0x30] sm:$0xff] %v969_v27  ;;  %v910_v32 = vadd.f32 %v1487_v28, %v909_v31 }
 0x125   : > { %v1489_v33 = vpop.f32.mrf.mxu0  ;;  %v1568_v34 = vpop.f32.mrf.mxu1 }
 0x126   : > { %v970_v35 = vadd.f32 %v910_v32, %v408_v30  ;;  %v1490_v36 = vadd.f32 %v1489_v33, %v1488_v29  ;;  %v417_v29 = vld [vmem:[#allocation2 + $0x10] sm:$0xff] }
 0x127   : > { %v1491_v38 = vpop.f32.mrf.mxu0  ;;  %v922_v41 = vpop.f32.mrf.mxu1 }
 0x128   : > { %986 = vst [vmem:[#allocation2] sm:$0xff] %v970_v35  ;;  %v915_v39 = vadd.f32 %v1564_v19, %v1490_v36  ;;  %v418_v36 = vld [vmem:[#allocation2 + $0x38] sm:$0xff] }
 0x129   : > { %v1492_v40 = vpop.f32.mrf.mxu0  ;;  %v1569_v48 = vpop.f32.mrf.mxu1 }
 0x12a   : > { %v971_v42 = vadd.f32 %v915_v39, %v409_v37  ;;  %v1493_v43 = vadd.f32 %v1492_v40, %v1491_v38 }
 0x12b   : > { %v1494_v45 = vpop.f32.mrf.mxu0  ;;  %v925_v55 = vpop.f32.mrf.mxu1 }
 0x12c   : > { %987 = vst [vmem:[#allocation2 + $0x58] sm:$0xff] %v971_v42  ;;  %v918_v46 = vadd.f32 %v1565_v26, %v1493_v43 }
 0x12d   : > { %v1495_v47 = vpop.f32.mrf.mxu0  ;;  %v1572_v62 = vpop.f32.mrf.mxu1 }
 0x12e   : > { %v972_v49 = vadd.f32 %v918_v46, %v410_v44  ;;  %v1496_v50 = vadd.f32 %v1495_v47, %v1494_v45  ;;  %v419_v44 = vld [vmem:[#allocation2 + $0x60] sm:$0xff] }
 0x12f   : > { %v1497_v51 = vpop.f32.mrf.mxu0  ;;  %v938_v5 = vpop.f32.mrf.mxu1 }
 0x130   : > { %988 = vst [vmem:[#allocation2 + $0x18] sm:$0xff] %v972_v49  ;;  %v923_v53 = vadd.f32 %v1496_v50, %v922_v41 }
 0x131   : > { %v1498_v54 = vpop.f32.mrf.mxu0  ;;  %v1573_v12 = vpop.f32.mrf.mxu1 }
 0x132   : > { %v973_v56 = vadd.f32 %v923_v53, %v411_v52  ;;  %v1499_v57 = vadd.f32 %v1498_v54, %v1497_v51  ;;  %v420_v51 = vld [vmem:[#allocation2 + $0x70] sm:$0xff] }
 0x133   : > { %v1500_v58 = vpop.f32.mrf.mxu0  ;;  %v941_v19 = vpop.f32.mrf.mxu1 }
 0x134   : > { %989 = vst [vmem:[#allocation2 + $0x50] sm:$0xff] %v973_v56  ;;  %v926_v60 = vadd.f32 %v1499_v57, %v925_v55  ;;  %v421_v56 = vld [vmem:[#allocation2 + $0x78] sm:$0xff] }
 0x135   : > { %v1501_v61 = vpop.f32.mrf.mxu0  ;;  %v1576_v26 = vpop.f32.mrf.mxu1 }
 0x136   : > { %v974_v63 = vadd.f32 %v926_v60, %v412_v59  ;;  %v1502_v0 = vadd.f32 %v1501_v61, %v1500_v58 }
 0x137   : > { %v1503_v2 = vpop.f32.mrf.mxu0  ;;  %v954_v33 = vpop.f32.mrf.mxu1 }
 0x138   : > { %990 = vst [vmem:[#allocation2 + $0x68] sm:$0xff] %v974_v63  ;;  %v931_v3 = vadd.f32 %v1568_v34, %v1502_v0 }
 0x139   : > { %v1504_v4 = vpop.f32.mrf.mxu0  ;;  %v1577_v40 = vpop.f32.mrf.mxu1 }
 0x13a   : > { %v975_v6 = vadd.f32 %v931_v3, %v413_v1  ;;  %v1505_v7 = vadd.f32 %v1504_v4, %v1503_v2 }
 0x13b   : > { %v1506_v9 = vpop.f32.mrf.mxu0  ;;  %v957_v47 = vpop.f32.mrf.mxu1 }
 0x13c   : > { %991 = vst [vmem:[#allocation2 + $0x8] sm:$0xff] %v975_v6  ;;  %v934_v10 = vadd.f32 %v1569_v48, %v1505_v7 }
 0x13d   : > { %v1507_v11 = vpop.f32.mrf.mxu0 }
 0x13e   : > { %v976_v13 = vadd.f32 %v934_v10, %v414_v8  ;;  %v1508_v14 = vadd.f32 %v1507_v11, %v1506_v9 }
 0x13f   : > { %v1509_v15 = vpop.f32.mrf.mxu0 }
 0x140   : > { %992 = vst [vmem:[#allocation2 + $0x48] sm:$0xff] %v976_v13  ;;  %v939_v17 = vadd.f32 %v1508_v14, %v938_v5 }
 0x141   : > { %v1510_v18 = vpop.f32.mrf.mxu0 }
 0x142   : > { %v977_v20 = vadd.f32 %v939_v17, %v415_v16  ;;  %v1511_v21 = vadd.f32 %v1510_v18, %v1509_v15 }
 0x143   : > { %v1512_v22 = vpop.f32.mrf.mxu0 }
 0x144   : > { %993 = vst [vmem:[#allocation2 + $0x40] sm:$0xff] %v977_v20  ;;  %v942_v24 = vadd.f32 %v1511_v21, %v941_v19 }
 0x145   : > { %v1513_v25 = vpop.f32.mrf.mxu0 }
 0x146   : > { %v978_v27 = vadd.f32 %v942_v24, %v416_v23  ;;  %v1514_v28 = vadd.f32 %v1513_v25, %v1512_v22 }
 0x147   : > { %v1515_v30 = vpop.f32.mrf.mxu0 }
 0x148   : > { %994 = vst [vmem:[#allocation2 + $0x20] sm:$0xff] %v978_v27  ;;  %v947_v31 = vadd.f32 %v1572_v62, %v1514_v28  ;;  %v422_v62 = vld [vmem:[#allocation2 + $0x28] sm:$0xff] }
 0x149   : > { %v1516_v32 = vpop.f32.mrf.mxu0 }
 0x14a   : > { %v979_v34 = vadd.f32 %v947_v31, %v417_v29  ;;  %v1517_v35 = vadd.f32 %v1516_v32, %v1515_v30 }
 0x14b   : > { %v1518_v37 = vpop.f32.mrf.mxu0 }
 0x14c   : > { %995 = vst [vmem:[#allocation2 + $0x10] sm:$0xff] %v979_v34  ;;  %v950_v38 = vadd.f32 %v1573_v12, %v1517_v35 }
 0x14d   : > { %v1519_v39 = vpop.f32.mrf.mxu0 }
 0x14e   : > { %v980_v41 = vadd.f32 %v950_v38, %v418_v36  ;;  %v1520_v42 = vadd.f32 %v1519_v39, %v1518_v37 }
 0x14f   : > { %v1521_v43 = vpop.f32.mrf.mxu0 }
 0x150   : > { %996 = vst [vmem:[#allocation2 + $0x38] sm:$0xff] %v980_v41  ;;  %v955_v45 = vadd.f32 %v1520_v42, %v954_v33 }
 0x151   : > { %v1522_v46 = vpop.f32.mrf.mxu0 }
 0x152   : > { %v981_v48 = vadd.f32 %v955_v45, %v419_v44  ;;  %v1523_v49 = vadd.f32 %v1522_v46, %v1521_v43 }
 0x153   : > { %v1524_v50 = vpop.f32.mrf.mxu0 }
 0x154   : > { %997 = vst [vmem:[#allocation2 + $0x60] sm:$0xff] %v981_v48  ;;  %v958_v52 = vadd.f32 %v1523_v49, %v957_v47 }
 0x155   : > { %v1525_v53 = vpop.f32.mrf.mxu0 }
 0x156   : > { %v982_v54 = vadd.f32 %v958_v52, %v420_v51  ;;  %v1526_v55 = vadd.f32 %v1525_v53, %v1524_v50 }
 0x157   : > { %v1527_v57 = vpop.f32.mrf.mxu0 }
 0x158   : > { %998 = vst [vmem:[#allocation2 + $0x70] sm:$0xff] %v982_v54  ;;  %v963_v58 = vadd.f32 %v1576_v26, %v1526_v55 }
 0x159   : > { %v1528_v59 = vpop.f32.mrf.mxu0 }
 0x15a   : > { %v983_v60 = vadd.f32 %v963_v58, %v421_v56  ;;  %v1529_v61 = vadd.f32 %v1528_v59, %v1527_v57 }
 0x15c   : > { %999 = vst [vmem:[#allocation2 + $0x78] sm:$0xff] %v983_v60  ;;  %v966_v63 = vadd.f32 %v1577_v40, %v1529_v61  ;;  %1004 = sbr.rel (%p1379_p11) target bundleno = 375 (0x177), region = 70 }
 0x15e   : > { %v984_v0 = vadd.f32 %v966_v63, %v422_v62 }
 0x160   : > { %1000 = vst [vmem:[#allocation2 + $0x28] sm:$0xff] %v984_v0 }
 0x161   : > { %v1005_v1 = vld [vmem:[#allocation2 + $0x30] sm:$0xff]  ;;  %v1006_v2 = vld [vmem:[#allocation2] sm:$0xff]  ;;  %v1007_v7 = vld [vmem:[#allocation2 + $0x58] sm:$0xff] }
 0x162   : > { %v1918_v3 = vld [vmem:[%s1998_s2] ss:$0 sm:$0xff]  ;;  %v1008_v8 = vld [vmem:[#allocation2 + $0x18] sm:$0xff]  ;;  %v1009_v11 = vld [vmem:[#allocation2 + $0x50] sm:$0xff] }
 0x163   : > { %v1028_v4 = vmul.f32 %v1918_v3, %v1005_v1  ;;  %v1029_v5 = vmul.f32 %v1918_v3, %v1006_v2  ;;  %v1925_v6 = vld [vmem:[%s1999_s3] ss:$0 sm:$0xff]  ;;  %v1030_v9 = vmul.f32 %v1918_v3, %v1007_v7  ;;  %v1031_v10 = vmul.f32 %v1918_v3, %v1008_v8  ;;  %v1010_v12 = vld [vmem:[#allocation2 + $0x68] sm:$0xff]  ;;  %v1015_v33 = vld [vmem:[#allocation2 + $0x10] sm:$0xff] }
 0x164   : > { %v1011_v13 = vld [vmem:[#allocation2 + $0x8] sm:$0xff]  ;;  %v1032_v16 = vmul.f32 %v1918_v3, %v1009_v11  ;;  %v1033_v17 = vmul.f32 %v1918_v3, %v1010_v12  ;;  %v1013_v23 = vld [vmem:[#allocation2 + $0x40] sm:$0xff]  ;;  %v1016_v34 = vld [vmem:[#allocation2 + $0x38] sm:$0xff]  ;;  %v1038_v48 = vmul.f32 %v1918_v3, %v1015_v33 }
 0x165   : > { %v1051_v14 = vadd.f32 %v1925_v6, %v1028_v4  ;;  %v1052_v15 = vadd.f32 %v1925_v6, %v1029_v5  ;;  %v1012_v18 = vld [vmem:[#allocation2 + $0x48] sm:$0xff]  ;;  %v1053_v19 = vadd.f32 %v1925_v6, %v1030_v9  ;;  %v1054_v20 = vadd.f32 %v1925_v6, %v1031_v10  ;;  %v1014_v28 = vld [vmem:[#allocation2 + $0x20] sm:$0xff]  ;;  %v1018_v40 = vld [vmem:[#allocation2 + $0x70] sm:$0xff] }
 0x166   : > { %v1034_v21 = vmul.f32 %v1918_v3, %v1011_v13  ;;  %v1035_v22 = vmul.f32 %v1918_v3, %v1012_v18  ;;  %v1055_v26 = vadd.f32 %v1925_v6, %v1032_v16  ;;  %v1056_v27 = vadd.f32 %v1925_v6, %v1033_v17  ;;  %v1017_v39 = vld [vmem:[#allocation2 + $0x60] sm:$0xff]  ;;  %v1019_v45 = vld [vmem:[#allocation2 + $0x78] sm:$0xff] }
 0x167   : > { %v1067_v24 = vmax.f32 %v1051_v14, 0.0  ;;  %v1068_v25 = vmax.f32 %v1052_v15, 0.0  ;;  %v1069_v29 = vmax.f32 %v1053_v19, 0.0  ;;  %v1070_v30 = vmax.f32 %v1054_v20, 0.0  ;;  %v1020_v50 = vld [vmem:[#allocation2 + $0x28] sm:$0xff] }
 0x168   : > { %v1057_v31 = vadd.f32 %v1925_v6, %v1034_v21  ;;  %v1058_v32 = vadd.f32 %v1925_v6, %v1035_v22  ;;  %v1071_v36 = vmax.f32 %v1055_v26, 0.0  ;;  %v1072_v37 = vmax.f32 %v1056_v27, 0.0 }
 0x169   : > { %v1422_v35 = vpack.c.bf16 %v1068_v25, %v1067_v24  ;;  %v1036_v38 = vmul.f32 %v1918_v3, %v1013_v23  ;;  %v1427_v41 = vpack.c.bf16 %v1070_v30, %v1069_v29  ;;  %v1037_v44 = vmul.f32 %v1918_v3, %v1014_v28 }
 0x16a   : > { %v1073_v42 = vmax.f32 %v1057_v31, 0.0  ;;  %v1074_v43 = vmax.f32 %v1058_v32, 0.0  ;;  %v1432_v46 = vpack.c.bf16 %v1072_v37, %v1071_v36  ;;  %v1039_v49 = vmul.f32 %v1918_v3, %v1016_v34 }
 0x16b   : > { %1423 = vst [vmem:[%s2000_s4] sm:$0xff] %v1422_v35   ;;  %v1059_v47 = vadd.f32 %v1925_v6, %v1036_v38  ;;  %1459 = vst [vmem:[%s2000_s4 + $0x8] sm:$0xff] %v1427_v41   ;;  %v1060_v52 = vadd.f32 %v1925_v6, %v1037_v44  ;;  %v1040_v53 = vmul.f32 %v1918_v3, %v1017_v39 }
 0x16c   : > { %v1437_v51 = vpack.c.bf16 %v1074_v43, %v1073_v42  ;;  %v1041_v54 = vmul.f32 %v1918_v3, %v1018_v40  ;;  %1460 = vst [vmem:[%s2000_s4 + $0x10] sm:$0xff] %v1432_v46   ;;  %v1061_v56 = vadd.f32 %v1925_v6, %v1038_v48  ;;  %v1062_v57 = vadd.f32 %v1925_v6, %v1039_v49 }
 0x16d   : > { %v1075_v55 = vmax.f32 %v1059_v47, 0.0  ;;  %v1042_v58 = vmul.f32 %v1918_v3, %v1019_v45  ;;  %v1076_v59 = vmax.f32 %v1060_v52, 0.0  ;;  %v1063_v60 = vadd.f32 %v1925_v6, %v1040_v53 }
 0x16e   : > { %1461 = vst [vmem:[%s2000_s4 + $0x18] sm:$0xff] %v1437_v51   ;;  %v1064_v61 = vadd.f32 %v1925_v6, %v1041_v54  ;;  %v1043_v62 = vmul.f32 %v1918_v3, %v1020_v50  ;;  %v1077_v63 = vmax.f32 %v1061_v56, 0.0  ;;  %v1078_v0 = vmax.f32 %v1062_v57, 0.0 }
 0x16f   : > { %v1065_v1 = vadd.f32 %v1925_v6, %v1042_v58  ;;  %v1442_v2 = vpack.c.bf16 %v1076_v59, %v1075_v55  ;;  %v1079_v4 = vmax.f32 %v1063_v60, 0.0 }
 0x170   : > { %v1080_v5 = vmax.f32 %v1064_v61, 0.0  ;;  %v1066_v7 = vadd.f32 %v1925_v6, %v1043_v62  ;;  %v1447_v8 = vpack.c.bf16 %v1078_v0, %v1077_v63 }
 0x171   : > { %v1081_v9 = vmax.f32 %v1065_v1, 0.0  ;;  %1462 = vst [vmem:[%s2000_s4 + $0x20] sm:$0xff] %v1442_v2  }
 0x172   : > { %v1452_v10 = vpack.c.bf16 %v1080_v5, %v1079_v4  ;;  %v1082_v11 = vmax.f32 %v1066_v7, 0.0  ;;  %1463 = vst [vmem:[%s2000_s4 + $0x28] sm:$0xff] %v1447_v8  }
 0x174   : > { %1464 = vst [vmem:[%s2000_s4 + $0x30] sm:$0xff] %v1452_v10   ;;  %v1457_v3 = vpack.c.bf16 %v1082_v11, %v1081_v9 }
 0x176   : > { %1465 = vst [vmem:[%s2000_s4 + $0x38] sm:$0xff] %v1457_v3  }
 0x177 PF: > { %s14_s19 = sadd.s32 1, %s1715_s19   ;;  %s2001_s15 = smov %s1703_s16 }
 0x178   : > { %p11_p12 = scmp.ge.s32.totalorder %s14_s19, 5   ;;  %s2002_s16 = smov %s1778_s23 }
 0x179   : > { %s2003_s17 = smov %s1711_s18  ;;  %s2004_s18 = smov %s2006_s20 }
 0x17a   :  { %13 = sbr.rel (!%p11_p12) target bundleno = 3 (0x3), region = 120 }

// kernel: resnet_byol_forward.23
= control target key start
LH: loop header
LB: loop body
LE: loop exit
PB: predicated region body
PF: predicated region fallthrough
CT: control target
= control target key end

     0   :  { %s1914_s18 = smov 0   ;;  %s1916_s19 = smov 0   ;;  %s2191_s0 = inlined_call_operand.vmem [shape: bf16[128,1152], index: 0, kind: input, shape index: {}]   ;;  %s2192_s1 = inlined_call_operand.vmem [shape: bf16[1152,128], index: 1, kind: input, shape index: {}]   ;;  %s2193_s2 = inlined_call_operand.vmem [shape: f32[1,128], index: 2, kind: input, shape index: {}]   ;;  %s2194_s3 = inlined_call_operand.vmem [shape: f32[1,128], index: 3, kind: input, shape index: {}]   ;;  %s2195_s4 = inlined_call_operand.vmem [shape: bf16[128,128], index: 4, kind: input, shape index: {}]   ;;  %s2196_s5 = inlined_call_operand.vmem [shape: bf16[128,128], index: 5, kind: output, shape index: {}]  }
   0x1   :  { %s1918_s20 = smov 0   ;;  %s1920_s21 = smov 0  }
   0x2   :  { %s1922_s22 = smov 0  }
   0x3 LB: > { %s27_s23 = sadd.s32 1, %s1877_s21  ;;  %p50_p1 = scmp.ne.s32.totalorder %s1869_s19, %s1865_s18  ;;  %s1881_s22 = sphi %s1922_s22, %s15_s22   ;;  %s1877_s21 = sphi %s1920_s21, %s2200_s21   ;;  %s1873_s20 = sphi %s1918_s20, %s2199_s20   ;;  %s1869_s19 = sphi %s1916_s19, %s2198_s19   ;;  %s1865_s18 = sphi %s1914_s18, %s2197_s18  }
   0x4   : > { %p28_p0 = scmp.ge.s32.totalorder %s27_s23, 3  ;;  %p51_p2 = scmp.eq.s32.totalorder %s1881_s22, 0 }
   0x5   : > { %s43_s25 = sadd.s32 1, %s1869_s19  ;;  %p1421_p5 = scmp.ge.s32.totalorder %s1881_s22, 3 }
   0x6   : > { %s2202_s23 = smov (%p28_p0, %s27_s23), 0  ;;  %p52_p3 = por %p51_p2, %p50_p1 }
   0x7   : > { %s39_s24 = ssub.s32 %s1877_s21, %s2202_s23  ;;  %236 = sbr.rel (%p1421_p5) target bundleno = 35 (0x23), region = 28 }
   0x8   : > { %p41_p4 = scmp.eq.s32.totalorder %s39_s24, 0 }
   0xa   : > { %s1949_s26 = scalar_select %p41_p4, %s1869_s19, %s43_s25  }
   0xc   : > { %239 = sbr.rel (!%p52_p3) target bundleno = 35 (0x23), region = 32  ;;  %s241_s27 = sand.u32 (%p52_p3), 1, %s1869_s19  }
   0xd   : > { %s1529_s28 = smul.u32 (%p52_p3), 12, %s1877_s21 }
   0xe   : > { %s1744_s29 = smul.u32 (%p52_p3), 192, %s241_s27 }
   0xf   : > { %s1957_s7 = scalar_lea.vmem (%p52_p3), %s2191_s0, %s1529_s28 }
  0x10   : > { %v264_v0 = vld [vmem:[%s1957_s7] sm:$0xff] (%p52_p3)  ;;  %v268_v2 = vld [vmem:[%s1957_s7 + $0x48] sm:$0xff] (%p52_p3)  ;;  %s1962_s8 = scalar_lea.vmem (%p52_p3), [#allocation3], %s1744_s29  ;;  %v272_v4 = vld [vmem:[%s1957_s7 + $0x90] sm:$0xff] (%p52_p3) }
  0x11   : > { %v266_v1 = vld [vmem:[%s1957_s7 + $0x24] sm:$0xff]  ;;  %265 = vst [vmem:[%s1962_s8] sm:$0xff] %v264_v0  ;;  %269 = vst [vmem:[%s1962_s8 + $0x18] sm:$0xff] %v268_v2  ;;  %v270_v3 = vld [vmem:[%s1957_s7 + $0x6c] sm:$0xff] }
  0x12   : > { %267 = vst [vmem:[%s1962_s8 + $0xc] sm:$0xff] %v266_v1  ;;  %v274_v5 = vld [vmem:[%s1957_s7 + $0xb4] sm:$0xff]  ;;  %271 = vst [vmem:[%s1962_s8 + $0x24] sm:$0xff] %v270_v3  ;;  %v278_v7 = vld [vmem:[%s1957_s7 + $0xfc] sm:$0xff] }
  0x13   : > { %273 = vst [vmem:[%s1962_s8 + $0x30] sm:$0xff] %v272_v4  ;;  %275 = vst [vmem:[%s1962_s8 + $0x3c] sm:$0xff] %v274_v5  ;;  %v276_v6 = vld [vmem:[%s1957_s7 + $0xd8] sm:$0xff]  ;;  %v280_v8 = vld [vmem:[%s1957_s7 + $0x120] sm:$0xff] }
  0x14   : > { %277 = vst [vmem:[%s1962_s8 + $0x48] sm:$0xff] %v276_v6  ;;  %279 = vst [vmem:[%s1962_s8 + $0x54] sm:$0xff] %v278_v7  ;;  %v282_v9 = vld [vmem:[%s1957_s7 + $0x144] sm:$0xff]  ;;  %v286_v11 = vld [vmem:[%s1957_s7 + $0x18c] sm:$0xff] }
  0x15   : > { %281 = vst [vmem:[%s1962_s8 + $0x60] sm:$0xff] %v280_v8  ;;  %v284_v10 = vld [vmem:[%s1957_s7 + $0x168] sm:$0xff]  ;;  %283 = vst [vmem:[%s1962_s8 + $0x6c] sm:$0xff] %v282_v9  ;;  %v288_v12 = vld [vmem:[%s1957_s7 + $0x1b0] sm:$0xff] }
  0x16   : > { %285 = vst [vmem:[%s1962_s8 + $0x78] sm:$0xff] %v284_v10  ;;  %287 = vst [vmem:[%s1962_s8 + $0x84] sm:$0xff] %v286_v11  ;;  %v290_v13 = vld [vmem:[%s1957_s7 + $0x1d4] sm:$0xff]  ;;  %v294_v15 = vld [vmem:[%s1957_s7 + $0x21c] sm:$0xff] }
  0x17   : > { %v292_v14 = vld [vmem:[%s1957_s7 + $0x1f8] sm:$0xff]  ;;  %289 = vst [vmem:[%s1962_s8 + $0x90] sm:$0xff] %v288_v12  ;;  %291 = vst [vmem:[%s1962_s8 + $0x9c] sm:$0xff] %v290_v13  ;;  %v1423_v16 = vld [vmem:[%s1957_s7 + $0x8] sm:$0xf] }
  0x18   : > { %293 = vst [vmem:[%s1962_s8 + $0xa8] sm:$0xff] %v292_v14  ;;  %v1425_v17 = vld [vmem:[%s1957_s7 + $0x2c] sm:$0xf]  ;;  %295 = vst [vmem:[%s1962_s8 + $0xb4] sm:$0xff] %v294_v15  ;;  %v1427_v18 = vld [vmem:[%s1957_s7 + $0x50] sm:$0xf] }
  0x19   : > { %1424 = vst [vmem:[%s1962_s8 + $0x8] sm:$0xf] %v1423_v16  ;;  %1426 = vst [vmem:[%s1962_s8 + $0x14] sm:$0xf] %v1425_v17  ;;  %v1429_v19 = vld [vmem:[%s1957_s7 + $0x74] sm:$0xf] }
  0x1a   : > { %v1431_v20 = vld [vmem:[%s1957_s7 + $0x98] sm:$0xf]  ;;  %1428 = vst [vmem:[%s1962_s8 + $0x20] sm:$0xf] %v1427_v18  ;;  %1430 = vst [vmem:[%s1962_s8 + $0x2c] sm:$0xf] %v1429_v19 }
  0x1b   : > { %1432 = vst [vmem:[%s1962_s8 + $0x38] sm:$0xf] %v1431_v20  ;;  %v1433_v21 = vld [vmem:[%s1957_s7 + $0xbc] sm:$0xf]  ;;  %v1435_v22 = vld [vmem:[%s1957_s7 + $0xe0] sm:$0xf] }
  0x1c   : > { %v1437_v23 = vld [vmem:[%s1957_s7 + $0x104] sm:$0xf]  ;;  %1434 = vst [vmem:[%s1962_s8 + $0x44] sm:$0xf] %v1433_v21  ;;  %1436 = vst [vmem:[%s1962_s8 + $0x50] sm:$0xf] %v1435_v22 }
  0x1d   : > { %1438 = vst [vmem:[%s1962_s8 + $0x5c] sm:$0xf] %v1437_v23  ;;  %v1439_v24 = vld [vmem:[%s1957_s7 + $0x128] sm:$0xf]  ;;  %v1441_v25 = vld [vmem:[%s1957_s7 + $0x14c] sm:$0xf] }
  0x1e   : > { %v1443_v26 = vld [vmem:[%s1957_s7 + $0x170] sm:$0xf]  ;;  %1440 = vst [vmem:[%s1962_s8 + $0x68] sm:$0xf] %v1439_v24  ;;  %1442 = vst [vmem:[%s1962_s8 + $0x74] sm:$0xf] %v1441_v25 }
  0x1f   : > { %1444 = vst [vmem:[%s1962_s8 + $0x80] sm:$0xf] %v1443_v26  ;;  %v1445_v27 = vld [vmem:[%s1957_s7 + $0x194] sm:$0xf]  ;;  %v1447_v28 = vld [vmem:[%s1957_s7 + $0x1b8] sm:$0xf] }
  0x20   : > { %v1449_v29 = vld [vmem:[%s1957_s7 + $0x1dc] sm:$0xf]  ;;  %1446 = vst [vmem:[%s1962_s8 + $0x8c] sm:$0xf] %v1445_v27  ;;  %1448 = vst [vmem:[%s1962_s8 + $0x98] sm:$0xf] %v1447_v28 }
  0x21   : > { %1450 = vst [vmem:[%s1962_s8 + $0xa4] sm:$0xf] %v1449_v29  ;;  %v1451_v30 = vld [vmem:[%s1957_s7 + $0x200] sm:$0xf]  ;;  %v1453_v31 = vld [vmem:[%s1957_s7 + $0x224] sm:$0xf] }
  0x22   : > { %1452 = vst [vmem:[%s1962_s8 + $0xb0] sm:$0xf] %v1451_v30  ;;  %1454 = vst [vmem:[%s1962_s8 + $0xbc] sm:$0xf] %v1453_v31 }
  0x23 PF: > { %p1455_p6 = scmp.ge.s32.totalorder %s1881_s22, 1  ;;  %p352_p7 = scmp.lt.s32.totalorder %s1881_s22, 4 }
  0x25   : > { %p353_p8 = pnand %p1455_p6, %p352_p7 }
  0x26   : > { %s359_s9 = sand.u32 (!%p353_p8), 1, %s1865_s18   ;;  %s413_s10 = smul.u32 (!%p353_p8), 48, %s1873_s20 }
  0x27   : > { %356 = sbr.rel (%p353_p8) target bundleno = 383 (0x17f), region = 62  ;;  %p1457_p10 = scmp.ne.s32.totalorder (!%p353_p8), %s1873_s20, 0 }
  0x28   : > { %s1745_s11 = smul.u32 (!%p353_p8), 192, %s359_s9  ;;  %p414_p9 = scmp.lt.s32.totalorder (!%p353_p8), %s413_s10, 143 }
  0x2a   : > { %s2034_s16 = scalar_lea.vmem (!%p353_p8), [#allocation3], %s1745_s11 }
  0x2c   : > { %s2204_s10 = smov (!%p414_p9, %s413_s10), 143  ;;  %450 = sbr.rel (%p1457_p10) target bundleno = 58 (0x3a), region = 70 }
  0x2d   : > { %s1456_s12 = sshll.u32 %s2204_s10, 2 }
  0x2e   : > { %s2032_s15 = scalar_lea.vmem %s2192_s1, %s1456_s12 }
  0x31   : > { %v1883_v32 = vmov 0.0  }
  0x32   : > { %451 = vst [vmem:[#allocation2 + $0x30] sm:$0xff] %v1883_v32  ;;  %452 = vst [vmem:[#allocation2] sm:$0xff] %v1883_v32 }
  0x33   : > { %453 = vst [vmem:[#allocation2 + $0x58] sm:$0xff] %v1883_v32  ;;  %454 = vst [vmem:[#allocation2 + $0x18] sm:$0xff] %v1883_v32 }
  0x34   : > { %455 = vst [vmem:[#allocation2 + $0x50] sm:$0xff] %v1883_v32  ;;  %456 = vst [vmem:[#allocation2 + $0x68] sm:$0xff] %v1883_v32 }
  0x35   : > { %457 = vst [vmem:[#allocation2 + $0x8] sm:$0xff] %v1883_v32  ;;  %458 = vst [vmem:[#allocation2 + $0x48] sm:$0xff] %v1883_v32 }
  0x36   : > { %459 = vst [vmem:[#allocation2 + $0x40] sm:$0xff] %v1883_v32  ;;  %460 = vst [vmem:[#allocation2 + $0x20] sm:$0xff] %v1883_v32 }
  0x37   : > { %461 = vst [vmem:[#allocation2 + $0x10] sm:$0xff] %v1883_v32  ;;  %462 = vst [vmem:[#allocation2 + $0x38] sm:$0xff] %v1883_v32 }
  0x38   : > { %463 = vst [vmem:[#allocation2 + $0x60] sm:$0xff] %v1883_v32  ;;  %464 = vst [vmem:[#allocation2 + $0x70] sm:$0xff] %v1883_v32 }
  0x39   : > { %465 = vst [vmem:[#allocation2 + $0x78] sm:$0xff] %v1883_v32  ;;  %466 = vst [vmem:[#allocation2 + $0x28] sm:$0xff] %v1883_v32 }
  0x3a PF: > { %v1787_v33 = vld [vmem:[%s2032_s15 + $0x78] sm:$0xff]   ;;  %v1790_v36 = vld [vmem:[%s2032_s15 + $0x70] sm:$0xff]   ;;  %v1793_v39 = vld [vmem:[%s2032_s15 + $0x68] sm:$0xff]   ;;  %p1506_p11 = scmp.ne.s32.totalorder %s1873_s20, 2 }
  0x3b   : > { %v1788_v34 = vld [vmem:[%s2032_s15 + $0x38] sm:$0xff]   ;;  %1632 = vmatprep.subr.bf16.mxu0 %v1787_v33  ;;  %v1791_v37 = vld [vmem:[%s2032_s15 + $0x30] sm:$0xff]   ;;  %v1794_v40 = vld [vmem:[%s2032_s15 + $0x28] sm:$0xff]  }
  0x3c   : > { %v1789_v35 = vld [vmem:[%s2032_s15 + $0xb8] sm:$0xff]   ;;  %1633 = vmatpush3.bf16.msra.mxu0 %v1788_v34  ;;  %v1792_v38 = vld [vmem:[%s2032_s15 + $0xb0] sm:$0xff]   ;;  %v1795_v41 = vld [vmem:[%s2032_s15 + $0xa8] sm:$0xff]  }
  0x3d   : > { %1712 = vmatprep.subr.bf16.mxu1 %v1789_v35  ;;  %1634 = vmatprep.subr.bf16.mxu0 %v1790_v36  ;;  %v1796_v42 = vld [vmem:[%s2032_s15 + $0x60] sm:$0xff]   ;;  %v1799_v45 = vld [vmem:[%s2032_s15 + $0x58] sm:$0xff]   ;;  %v1802_v48 = vld [vmem:[%s2032_s15 + $0x50] sm:$0xff]  }
  0x3e   : > { %1713 = vmatpush3.bf16.msra.mxu1 %v1789_v35  ;;  %v1797_v43 = vld [vmem:[%s2032_s15 + $0x20] sm:$0xff]   ;;  %v1801_v46 = vld [vmem:[%s2032_s15 + $0x98] sm:$0xff]   ;;  %v1804_v49 = vld [vmem:[%s2032_s15 + $0x90] sm:$0xff]  }
  0x3f   : > { %1714 = vmatprep.subr.bf16.mxu1 %v1792_v38  ;;  %v1798_v44 = vld [vmem:[%s2032_s15 + $0xa0] sm:$0xff]   ;;  %v1800_v47 = vld [vmem:[%s2032_s15 + $0x18] sm:$0xff]   ;;  %v1803_v50 = vld [vmem:[%s2032_s15 + $0x10] sm:$0xff]  }
  0x40   : > { %1635 = vmatpush3.bf16.msra.mxu0 %v1791_v37  ;;  %v1805_v51 = vld [vmem:[%s2032_s15 + $0x48] sm:$0xff]   ;;  %v1808_v54 = vld [vmem:[%s2032_s15 + $0x40] sm:$0xff]   ;;  %v1823_v1 = vld [vmem:[%s2034_s16 + $0x50] ss:$12 sps:$4 sm:$0xff]  }
  0x41   : > { %1636 = vmatprep.subr.bf16.mxu0 %v1793_v39  ;;  %v1806_v52 = vld [vmem:[%s2032_s15 + $0x8] sm:$0xff]   ;;  %v1810_v55 = vld [vmem:[%s2032_s15 + $0x80] sm:$0xff]   ;;  %v1821_v3 = vld [vmem:[%s2034_s16 + $0x30] ss:$12 sps:$4 sm:$0xff]  }
  0x42   : > { %1715 = vmatpush3.bf16.msra.mxu1 %v1792_v38  ;;  %v1807_v53 = vld [vmem:[%s2032_s15 + $0x88] sm:$0xff]   ;;  %v1813_v56 = vld [vmem:[%s2034_s16 + $0x4] ss:$12 sps:$4 sm:$0xff]   ;;  %v1819_v0 = vld [vmem:[%s2034_s16 + $0x34] ss:$12 sps:$4 sm:$0xff]  }
  0x43   : > { %1716 = vmatprep.subr.bf16.mxu1 %v1795_v41  ;;  %v1814_v57 = vld [vmem:[%s2034_s16 + $0x8] ss:$12 sps:$4 sm:$0xff]   ;;  %v1809_v58 = vld [vmem:[%s2032_s15] sm:$0xff]   ;;  %867 = vmatprep.mubr.bf16.mxu0 %v1813_v56  ;;  %v1824_v4 = vld [vmem:[%s2034_s16 + $0x4c] ss:$12 sps:$4 sm:$0xff]  }
  0x44   : > { %1637 = vmatpush3.bf16.msra.mxu0 %v1794_v40  ;;  %1728 = vmatprep.mubr.bf16.mxu1 %v1814_v57  ;;  %v1811_v59 = vld [vmem:[%s2034_s16] ss:$12 sps:$4 sm:$0xff]   ;;  %v1816_v60 = vld [vmem:[%s2034_s16 + $0x1c] ss:$12 sps:$4 sm:$0xff]   ;;  %v1822_v62 = vld [vmem:[%s2034_s16 + $0x38] ss:$12 sps:$4 sm:$0xff]  }
  0x45   : > { %1638 = vmatprep.subr.bf16.mxu0 %v1796_v42  ;;  %v1815_v61 = vld [vmem:[%s2034_s16 + $0x20] ss:$12 sps:$4 sm:$0xff]   ;;  %v1818_v63 = vld [vmem:[%s2034_s16 + $0x18] ss:$12 sps:$4 sm:$0xff]   ;;  %v1830_v2 = vld [vmem:[%s2034_s16 + $0x68] ss:$12 sps:$4 sm:$0xff]  }
  0x46   : > { %1717 = vmatpush3.bf16.msra.mxu1 %v1795_v41  ;;  %v1831_v5 = vld [vmem:[%s2034_s16 + $0x80] ss:$12 sps:$4 sm:$0xff]   ;;  %v1838_v6 = vld [vmem:[%s2034_s16 + $0x98] ss:$12 sps:$4 sm:$0xff]   ;;  %v1826_v7 = vld [vmem:[%s2034_s16 + $0x48] ss:$12 sps:$4 sm:$0xff]  }
  0x47   : > { %1718 = vmatprep.subr.bf16.mxu1 %v1798_v44  ;;  %v1827_v8 = vld [vmem:[%s2034_s16 + $0x64] ss:$12 sps:$4 sm:$0xff]   ;;  %v1829_v10 = vld [vmem:[%s2034_s16 + $0x60] ss:$12 sps:$4 sm:$0xff]   ;;  %v1832_v11 = vld [vmem:[%s2034_s16 + $0x7c] ss:$12 sps:$4 sm:$0xff]  }
  0x48   : > { %1639 = vmatpush3.bf16.msra.mxu0 %v1797_v43  ;;  %v1839_v9 = vld [vmem:[%s2034_s16 + $0xb0] ss:$12 sps:$4 sm:$0xff]   ;;  %v1834_v12 = vld [vmem:[%s2034_s16 + $0x78] ss:$12 sps:$4 sm:$0xff]   ;;  %v1835_v13 = vld [vmem:[%s2034_s16 + $0x94] ss:$12 sps:$4 sm:$0xff]  }
  0x49   : > { %1640 = vmatprep.subr.bf16.mxu0 %v1799_v45  ;;  %v1837_v14 = vld [vmem:[%s2034_s16 + $0x90] ss:$12 sps:$4 sm:$0xff]   ;;  %v1840_v15 = vld [vmem:[%s2034_s16 + $0xac] ss:$12 sps:$4 sm:$0xff]   ;;  %v1842_v16 = vld [vmem:[%s2034_s16 + $0xa8] ss:$12 sps:$4 sm:$0xff]  }
  0x4a   : > { %1719 = vmatpush3.bf16.msra.mxu1 %v1798_v44  ;;  %v467_v22 = vld [vmem:[#allocation2 + $0x30] sm:$0xff]  ;;  %v468_v30 = vld [vmem:[#allocation2] sm:$0xff]  ;;  %v469_v37 = vld [vmem:[#allocation2 + $0x58] sm:$0xff] }
  0x4b   : > { %1720 = vmatprep.subr.bf16.mxu1 %v1801_v46  ;;  %v470_v44 = vld [vmem:[#allocation2 + $0x18] sm:$0xff] }
  0x4c   : > { %1641 = vmatpush3.bf16.msra.mxu0 %v1800_v47 }
  0x4d   : > { %1642 = vmatprep.subr.bf16.mxu0 %v1802_v48 }
  0x4e   : > { %1721 = vmatpush3.bf16.msra.mxu1 %v1801_v46 }
  0x4f   : > { %1722 = vmatprep.subr.bf16.mxu1 %v1804_v49 }
  0x50   : > { %1643 = vmatpush3.bf16.msra.mxu0 %v1803_v50 }
  0x51   : > { %1644 = vmatprep.subr.bf16.mxu0 %v1805_v51 }
  0x52   : > { %1723 = vmatpush3.bf16.msra.mxu1 %v1804_v49 }
  0x53   : > { %1724 = vmatprep.subr.bf16.mxu1 %v1807_v53 }
  0x54   : > { %1645 = vmatpush3.bf16.msra.mxu0 %v1806_v52  ;;  %v471_v52 = vld [vmem:[#allocation2 + $0x50] sm:$0xff] }
  0x55   : > { %1646 = vmatprep.subr.bf16.mxu0 %v1808_v54 }
  0x56   : > { %1725 = vmatpush3.bf16.msra.mxu1 %v1807_v53 }
  0x57   : > { %1726 = vmatprep.subr.bf16.mxu1 %v1810_v55 }
  0x58   : > { %1647 = vmatpush3.bf16.msra.mxu0 %v1809_v58 }
  0x5a   : > { %1727 = vmatpush3.bf16.msra.mxu1 %v1810_v55 }
  0x5b   : > { %868 = vmatmul.mubr.bf16.vlgmr.msra.gmra.mxu0 %v1811_v59  ;;  %v472_v59 = vld [vmem:[#allocation2 + $0x68] sm:$0xff] }
  0x5c   : > { %875 = vmatprep.mubr.bf16.mxu0 %v1816_v60 }
  0x5d   : > { %1729 = vmatmul.mubr.bf16.vlgmr.msra.gmra.mxu1 %v1815_v61 }
  0x5e   : > { %1732 = vmatprep.mubr.bf16.mxu1 %v1822_v62 }
  0x63   : > { %876 = vmatmul.mubr.bf16.gmra.mxu0 %v1818_v63 }
  0x64   : > { %883 = vmatprep.mubr.bf16.mxu0 %v1819_v0 }
  0x65   : > { %1733 = vmatmul.mubr.bf16.gmra.mxu1 %v1823_v1  ;;  %v473_v1 = vld [vmem:[#allocation2 + $0x8] sm:$0xff] }
  0x66   : > { %1736 = vmatprep.mubr.bf16.mxu1 %v1830_v2 }
  0x6b   : > { %884 = vmatmul.mubr.bf16.gmra.mxu0 %v1821_v3 }
  0x6c   : > { %891 = vmatprep.mubr.bf16.mxu0 %v1824_v4 }
  0x6d   : > { %1737 = vmatmul.mubr.bf16.gmra.mxu1 %v1831_v5 }
  0x6e   : > { %1740 = vmatprep.mubr.bf16.mxu1 %v1838_v6 }
  0x73   : > { %892 = vmatmul.mubr.bf16.gmra.mxu0 %v1826_v7 }
  0x74   : > { %899 = vmatprep.mubr.bf16.mxu0 %v1827_v8  ;;  %v474_v8 = vld [vmem:[#allocation2 + $0x48] sm:$0xff] }
  0x75   : > { %1741 = vmatmul.mubr.bf16.gmra.mxu1 %v1839_v9 }
  0x7b   : > { %900 = vmatmul.mubr.bf16.gmra.mxu0 %v1829_v10 }
  0x7c   : > { %907 = vmatprep.mubr.bf16.mxu0 %v1832_v11 }
  0x83   : > { %908 = vmatmul.mubr.bf16.gmra.mxu0 %v1834_v12 }
  0x84   : > { %915 = vmatprep.mubr.bf16.mxu0 %v1835_v13 }
  0x8b   : > { %916 = vmatmul.mubr.bf16.gmra.mxu0 %v1837_v14 }
  0x8c   : > { %923 = vmatprep.mubr.bf16.mxu0 %v1840_v15 }
  0x93   : > { %924 = vmatmul.mubr.bf16.gmra.mxu0 %v1842_v16  ;;  %v475_v16 = vld [vmem:[#allocation2 + $0x40] sm:$0xff] }
 0x11b   : > { %v1648_v17 = vpop.f32.mrf.mxu0 }
 0x11d   : > { %v1649_v18 = vpop.f32.mrf.mxu0  ;;  %v1730_v19 = vpop.f32.mrf.mxu1 }
 0x11e   : > { %v1650_v20 = vadd.f32 %v1649_v18, %v1648_v17 }
 0x11f   : > { %v1651_v21 = vpop.f32.mrf.mxu0  ;;  %v966_v23 = vpop.f32.mrf.mxu1 }
 0x120   : > { %v967_v24 = vadd.f32 %v1650_v20, %v966_v23  ;;  %v476_v23 = vld [vmem:[#allocation2 + $0x20] sm:$0xff] }
 0x121   : > { %v1652_v25 = vpop.f32.mrf.mxu0  ;;  %v1731_v26 = vpop.f32.mrf.mxu1 }
 0x122   : > { %v1029_v27 = vadd.f32 %v967_v24, %v467_v22  ;;  %v1653_v28 = vadd.f32 %v1652_v25, %v1651_v21 }
 0x123   : > { %v1654_v29 = vpop.f32.mrf.mxu0  ;;  %v969_v31 = vpop.f32.mrf.mxu1 }
 0x124   : > { %1045 = vst [vmem:[#allocation2 + $0x30] sm:$0xff] %v1029_v27  ;;  %v970_v32 = vadd.f32 %v1653_v28, %v969_v31 }
 0x125   : > { %v1655_v33 = vpop.f32.mrf.mxu0  ;;  %v1734_v34 = vpop.f32.mrf.mxu1 }
 0x126   : > { %v1030_v35 = vadd.f32 %v970_v32, %v468_v30  ;;  %v1656_v36 = vadd.f32 %v1655_v33, %v1654_v29  ;;  %v477_v29 = vld [vmem:[#allocation2 + $0x10] sm:$0xff] }
 0x127   : > { %v1657_v38 = vpop.f32.mrf.mxu0  ;;  %v982_v41 = vpop.f32.mrf.mxu1 }
 0x128   : > { %1046 = vst [vmem:[#allocation2] sm:$0xff] %v1030_v35  ;;  %v975_v39 = vadd.f32 %v1730_v19, %v1656_v36  ;;  %v478_v36 = vld [vmem:[#allocation2 + $0x38] sm:$0xff] }
 0x129   : > { %v1658_v40 = vpop.f32.mrf.mxu0  ;;  %v1735_v48 = vpop.f32.mrf.mxu1 }
 0x12a   : > { %v1031_v42 = vadd.f32 %v975_v39, %v469_v37  ;;  %v1659_v43 = vadd.f32 %v1658_v40, %v1657_v38 }
 0x12b   : > { %v1660_v45 = vpop.f32.mrf.mxu0  ;;  %v985_v55 = vpop.f32.mrf.mxu1 }
 0x12c   : > { %1047 = vst [vmem:[#allocation2 + $0x58] sm:$0xff] %v1031_v42  ;;  %v978_v46 = vadd.f32 %v1731_v26, %v1659_v43 }
 0x12d   : > { %v1661_v47 = vpop.f32.mrf.mxu0  ;;  %v1738_v62 = vpop.f32.mrf.mxu1 }
 0x12e   : > { %v1032_v49 = vadd.f32 %v978_v46, %v470_v44  ;;  %v1662_v50 = vadd.f32 %v1661_v47, %v1660_v45  ;;  %v479_v44 = vld [vmem:[#allocation2 + $0x60] sm:$0xff] }
 0x12f   : > { %v1663_v51 = vpop.f32.mrf.mxu0  ;;  %v998_v5 = vpop.f32.mrf.mxu1 }
 0x130   : > { %1048 = vst [vmem:[#allocation2 + $0x18] sm:$0xff] %v1032_v49  ;;  %v983_v53 = vadd.f32 %v1662_v50, %v982_v41 }
 0x131   : > { %v1664_v54 = vpop.f32.mrf.mxu0  ;;  %v1739_v12 = vpop.f32.mrf.mxu1 }
 0x132   : > { %v1033_v56 = vadd.f32 %v983_v53, %v471_v52  ;;  %v1665_v57 = vadd.f32 %v1664_v54, %v1663_v51  ;;  %v480_v51 = vld [vmem:[#allocation2 + $0x70] sm:$0xff] }
 0x133   : > { %v1666_v58 = vpop.f32.mrf.mxu0  ;;  %v1001_v19 = vpop.f32.mrf.mxu1 }
 0x134   : > { %1049 = vst [vmem:[#allocation2 + $0x50] sm:$0xff] %v1033_v56  ;;  %v986_v60 = vadd.f32 %v1665_v57, %v985_v55  ;;  %v481_v56 = vld [vmem:[#allocation2 + $0x78] sm:$0xff] }
 0x135   : > { %v1667_v61 = vpop.f32.mrf.mxu0  ;;  %v1742_v26 = vpop.f32.mrf.mxu1 }
 0x136   : > { %v1034_v63 = vadd.f32 %v986_v60, %v472_v59  ;;  %v1668_v0 = vadd.f32 %v1667_v61, %v1666_v58 }
 0x137   : > { %v1669_v2 = vpop.f32.mrf.mxu0  ;;  %v1014_v33 = vpop.f32.mrf.mxu1 }
 0x138   : > { %1050 = vst [vmem:[#allocation2 + $0x68] sm:$0xff] %v1034_v63  ;;  %v991_v3 = vadd.f32 %v1734_v34, %v1668_v0 }
 0x139   : > { %v1670_v4 = vpop.f32.mrf.mxu0  ;;  %v1743_v40 = vpop.f32.mrf.mxu1 }
 0x13a   : > { %v1035_v6 = vadd.f32 %v991_v3, %v473_v1  ;;  %v1671_v7 = vadd.f32 %v1670_v4, %v1669_v2 }
 0x13b   : > { %v1672_v9 = vpop.f32.mrf.mxu0  ;;  %v1017_v47 = vpop.f32.mrf.mxu1 }
 0x13c   : > { %1051 = vst [vmem:[#allocation2 + $0x8] sm:$0xff] %v1035_v6  ;;  %v994_v10 = vadd.f32 %v1735_v48, %v1671_v7 }
 0x13d   : > { %v1673_v11 = vpop.f32.mrf.mxu0 }
 0x13e   : > { %v1036_v13 = vadd.f32 %v994_v10, %v474_v8  ;;  %v1674_v14 = vadd.f32 %v1673_v11, %v1672_v9 }
 0x13f   : > { %v1675_v15 = vpop.f32.mrf.mxu0 }
 0x140   : > { %1052 = vst [vmem:[#allocation2 + $0x48] sm:$0xff] %v1036_v13  ;;  %v999_v17 = vadd.f32 %v1674_v14, %v998_v5 }
 0x141   : > { %v1676_v18 = vpop.f32.mrf.mxu0 }
 0x142   : > { %v1037_v20 = vadd.f32 %v999_v17, %v475_v16  ;;  %v1677_v21 = vadd.f32 %v1676_v18, %v1675_v15 }
 0x143   : > { %v1678_v22 = vpop.f32.mrf.mxu0 }
 0x144   : > { %1053 = vst [vmem:[#allocation2 + $0x40] sm:$0xff] %v1037_v20  ;;  %v1002_v24 = vadd.f32 %v1677_v21, %v1001_v19 }
 0x145   : > { %v1679_v25 = vpop.f32.mrf.mxu0 }
 0x146   : > { %v1038_v27 = vadd.f32 %v1002_v24, %v476_v23  ;;  %v1680_v28 = vadd.f32 %v1679_v25, %v1678_v22 }
 0x147   : > { %v1681_v30 = vpop.f32.mrf.mxu0 }
 0x148   : > { %1054 = vst [vmem:[#allocation2 + $0x20] sm:$0xff] %v1038_v27  ;;  %v1007_v31 = vadd.f32 %v1738_v62, %v1680_v28  ;;  %v482_v62 = vld [vmem:[#allocation2 + $0x28] sm:$0xff] }
 0x149   : > { %v1682_v32 = vpop.f32.mrf.mxu0 }
 0x14a   : > { %v1039_v34 = vadd.f32 %v1007_v31, %v477_v29  ;;  %v1683_v35 = vadd.f32 %v1682_v32, %v1681_v30 }
 0x14b   : > { %v1684_v37 = vpop.f32.mrf.mxu0 }
 0x14c   : > { %1055 = vst [vmem:[#allocation2 + $0x10] sm:$0xff] %v1039_v34  ;;  %v1010_v38 = vadd.f32 %v1739_v12, %v1683_v35 }
 0x14d   : > { %v1685_v39 = vpop.f32.mrf.mxu0 }
 0x14e   : > { %v1040_v41 = vadd.f32 %v1010_v38, %v478_v36  ;;  %v1686_v42 = vadd.f32 %v1685_v39, %v1684_v37 }
 0x14f   : > { %v1687_v43 = vpop.f32.mrf.mxu0 }
 0x150   : > { %1056 = vst [vmem:[#allocation2 + $0x38] sm:$0xff] %v1040_v41  ;;  %v1015_v45 = vadd.f32 %v1686_v42, %v1014_v33 }
 0x151   : > { %v1688_v46 = vpop.f32.mrf.mxu0 }
 0x152   : > { %v1041_v48 = vadd.f32 %v1015_v45, %v479_v44  ;;  %v1689_v49 = vadd.f32 %v1688_v46, %v1687_v43 }
 0x153   : > { %v1690_v50 = vpop.f32.mrf.mxu0 }
 0x154   : > { %1057 = vst [vmem:[#allocation2 + $0x60] sm:$0xff] %v1041_v48  ;;  %v1018_v52 = vadd.f32 %v1689_v49, %v1017_v47 }
 0x155   : > { %v1691_v53 = vpop.f32.mrf.mxu0 }
 0x156   : > { %v1042_v54 = vadd.f32 %v1018_v52, %v480_v51  ;;  %v1692_v55 = vadd.f32 %v1691_v53, %v1690_v50 }
 0x157   : > { %v1693_v57 = vpop.f32.mrf.mxu0 }
 0x158   : > { %1058 = vst [vmem:[#allocation2 + $0x70] sm:$0xff] %v1042_v54  ;;  %v1023_v58 = vadd.f32 %v1742_v26, %v1692_v55 }
 0x159   : > { %v1694_v59 = vpop.f32.mrf.mxu0 }
 0x15a   : > { %v1043_v60 = vadd.f32 %v1023_v58, %v481_v56  ;;  %v1695_v61 = vadd.f32 %v1694_v59, %v1693_v57 }
 0x15c   : > { %1059 = vst [vmem:[#allocation2 + $0x78] sm:$0xff] %v1043_v60  ;;  %v1026_v63 = vadd.f32 %v1743_v40, %v1695_v61  ;;  %1064 = sbr.rel (%p1506_p11) target bundleno = 383 (0x17f), region = 74 }
 0x15e   : > { %v1044_v0 = vadd.f32 %v1026_v63, %v482_v62 }
 0x160   : > { %1060 = vst [vmem:[#allocation2 + $0x28] sm:$0xff] %v1044_v0 }
 0x161   : > { %v1065_v1 = vld [vmem:[#allocation2 + $0x30] sm:$0xff]  ;;  %v1066_v2 = vld [vmem:[#allocation2] sm:$0xff]  ;;  %v1067_v8 = vld [vmem:[#allocation2 + $0x58] sm:$0xff] }
 0x162   : > { %v2089_v3 = vld [vmem:[%s2193_s2] ss:$0 sm:$0xff]  ;;  %v1068_v11 = vld [vmem:[#allocation2 + $0x18] sm:$0xff]  ;;  %v1618_v13 = vld [vmem:[%s2195_s4 + $0x8] sm:$0xff]  }
 0x163   : > { %v1088_v4 = vmul.f32 %v2089_v3, %v1065_v1  ;;  %v1089_v5 = vmul.f32 %v2089_v3, %v1066_v2  ;;  %v2096_v6 = vld [vmem:[%s2194_s3] ss:$0 sm:$0xff]  ;;  %v1090_v12 = vmul.f32 %v2089_v3, %v1067_v8  ;;  %v1069_v14 = vld [vmem:[#allocation2 + $0x50] sm:$0xff]  ;;  %v1091_v17 = vmul.f32 %v2089_v3, %v1068_v11  ;;  %v1070_v19 = vld [vmem:[#allocation2 + $0x68] sm:$0xff] }
 0x164   : > { %v1547_v7 = vld [vmem:[%s2195_s4] sm:$0xff]   ;;  %v1552_v18 = vunpack.c.l.bf16 %v1618_v13  ;;  %v1619_v20 = vld [vmem:[%s2195_s4 + $0x10] sm:$0xff]   ;;  %v1553_v22 = vunpack.c.h.bf16 %v1618_v13  ;;  %v1092_v23 = vmul.f32 %v2089_v3, %v1069_v14  ;;  %v1093_v24 = vmul.f32 %v2089_v3, %v1070_v19  ;;  %v1071_v25 = vld [vmem:[#allocation2 + $0x8] sm:$0xff] }
 0x165   : > { %v1548_v9 = vunpack.c.l.bf16 %v1547_v7  ;;  %v1549_v10 = vunpack.c.h.bf16 %v1547_v7  ;;  %v1111_v15 = vadd.f32 %v2096_v6, %v1088_v4  ;;  %v1112_v16 = vadd.f32 %v2096_v6, %v1089_v5  ;;  %v1072_v30 = vld [vmem:[#allocation2 + $0x48] sm:$0xff]  ;;  %v1620_v35 = vld [vmem:[%s2195_s4 + $0x18] sm:$0xff]   ;;  %v1073_v44 = vld [vmem:[#allocation2 + $0x40] sm:$0xff] }
 0x166   : > { %v1113_v21 = vadd.f32 %v2096_v6, %v1090_v12  ;;  %v1114_v28 = vadd.f32 %v2096_v6, %v1091_v17  ;;  %v1556_v29 = vunpack.c.l.bf16 %v1619_v20  ;;  %v1115_v32 = vadd.f32 %v2096_v6, %v1092_v23  ;;  %v1074_v45 = vld [vmem:[#allocation2 + $0x20] sm:$0xff]  ;;  %v1075_v55 = vld [vmem:[#allocation2 + $0x10] sm:$0xff]  ;;  %v1076_v60 = vld [vmem:[#allocation2 + $0x38] sm:$0xff] }
 0x167   : > { %v1159_v26 = vadd.f32 %v1548_v9, %v1111_v15  ;;  %v1160_v27 = vadd.f32 %v1549_v10, %v1112_v16  ;;  %v1116_v33 = vadd.f32 %v2096_v6, %v1093_v24  ;;  %v1557_v34 = vunpack.c.h.bf16 %v1619_v20  ;;  %v1621_v50 = vld [vmem:[%s2195_s4 + $0x20] sm:$0xff]   ;;  %v1622_v61 = vld [vmem:[%s2195_s4 + $0x28] sm:$0xff]   ;;  %v1078_v9 = vld [vmem:[#allocation2 + $0x70] sm:$0xff] }
 0x168   : > { %v1161_v31 = vadd.f32 %v1552_v18, %v1113_v21  ;;  %v1162_v38 = vadd.f32 %v1553_v22, %v1114_v28  ;;  %v1094_v39 = vmul.f32 %v2089_v3, %v1071_v25  ;;  %v1163_v41 = vadd.f32 %v1556_v29, %v1115_v32  ;;  %v1077_v2 = vld [vmem:[#allocation2 + $0x60] sm:$0xff]  ;;  %v1623_v10 = vld [vmem:[%s2195_s4 + $0x30] sm:$0xff]   ;;  %v1079_v19 = vld [vmem:[#allocation2 + $0x78] sm:$0xff] }
 0x169   : > { %v1175_v36 = vmax.f32 %v1159_v26, 0.0  ;;  %v1176_v37 = vmax.f32 %v1160_v27, 0.0  ;;  %v1164_v42 = vadd.f32 %v1557_v34, %v1116_v33  ;;  %v1095_v43 = vmul.f32 %v2089_v3, %v1072_v30  ;;  %v1080_v24 = vld [vmem:[#allocation2 + $0x28] sm:$0xff]  ;;  %v1624_v29 = vld [vmem:[%s2195_s4 + $0x38] sm:$0xff]  }
 0x16a   : > { %v1177_v40 = vmax.f32 %v1161_v31, 0.0  ;;  %v1178_v47 = vmax.f32 %v1162_v38, 0.0  ;;  %v1117_v48 = vadd.f32 %v2096_v6, %v1094_v39  ;;  %v1560_v49 = vunpack.c.l.bf16 %v1620_v35 }
 0x16b   : > { %v1581_v46 = vpack.c.bf16 %v1176_v37, %v1175_v36  ;;  %v1179_v51 = vmax.f32 %v1163_v41, 0.0  ;;  %v1180_v52 = vmax.f32 %v1164_v42, 0.0  ;;  %v1118_v53 = vadd.f32 %v2096_v6, %v1095_v43 }
 0x16c   : > { %v1561_v54 = vunpack.c.h.bf16 %v1620_v35  ;;  %v1586_v56 = vpack.c.bf16 %v1178_v47, %v1177_v40  ;;  %v1165_v57 = vadd.f32 %v1560_v49, %v1117_v48  ;;  %v1096_v58 = vmul.f32 %v2089_v3, %v1073_v44 }
 0x16d   : > { %1582 = vst [vmem:[%s2196_s5] sm:$0xff] %v1581_v46   ;;  %v1097_v59 = vmul.f32 %v2089_v3, %v1074_v45  ;;  %v1591_v62 = vpack.c.bf16 %v1180_v52, %v1179_v51  ;;  %v1564_v0 = vunpack.c.l.bf16 %v1621_v50  ;;  %v1565_v1 = vunpack.c.h.bf16 %v1621_v50 }
 0x16e   : > { %v1166_v63 = vadd.f32 %v1561_v54, %v1118_v53  ;;  %1625 = vst [vmem:[%s2196_s5 + $0x8] sm:$0xff] %v1586_v56   ;;  %v1181_v4 = vmax.f32 %v1165_v57, 0.0  ;;  %v1119_v5 = vadd.f32 %v2096_v6, %v1096_v58  ;;  %v1098_v8 = vmul.f32 %v2089_v3, %v1075_v55 }
 0x16f   : > { %v1120_v7 = vadd.f32 %v2096_v6, %v1097_v59  ;;  %1626 = vst [vmem:[%s2196_s5 + $0x10] sm:$0xff] %v1591_v62   ;;  %v1099_v12 = vmul.f32 %v2089_v3, %v1076_v60  ;;  %v1568_v13 = vunpack.c.l.bf16 %v1622_v61  ;;  %v1569_v14 = vunpack.c.h.bf16 %v1622_v61 }
 0x170   : > { %v1182_v11 = vmax.f32 %v1166_v63, 0.0  ;;  %v1167_v15 = vadd.f32 %v1564_v0, %v1119_v5  ;;  %v1121_v17 = vadd.f32 %v2096_v6, %v1098_v8  ;;  %v1100_v18 = vmul.f32 %v2089_v3, %v1077_v2 }
 0x171   : > { %v1168_v16 = vadd.f32 %v1565_v1, %v1120_v7  ;;  %v1122_v21 = vadd.f32 %v2096_v6, %v1099_v12  ;;  %v1101_v22 = vmul.f32 %v2089_v3, %v1078_v9  ;;  %v1572_v23 = vunpack.c.l.bf16 %v1623_v10 }
 0x172   : > { %v1596_v20 = vpack.c.bf16 %v1182_v11, %v1181_v4  ;;  %v1183_v25 = vmax.f32 %v1167_v15, 0.0  ;;  %v1169_v27 = vadd.f32 %v1568_v13, %v1121_v17  ;;  %v1123_v28 = vadd.f32 %v2096_v6, %v1100_v18 }
 0x173   : > { %v1184_v26 = vmax.f32 %v1168_v16, 0.0  ;;  %v1170_v30 = vadd.f32 %v1569_v14, %v1122_v21  ;;  %v1124_v31 = vadd.f32 %v2096_v6, %v1101_v22  ;;  %v1573_v32 = vunpack.c.h.bf16 %v1623_v10 }
 0x174   : > { %1627 = vst [vmem:[%s2196_s5 + $0x18] sm:$0xff] %v1596_v20   ;;  %v1102_v33 = vmul.f32 %v2089_v3, %v1079_v19  ;;  %v1185_v35 = vmax.f32 %v1169_v27, 0.0  ;;  %v1171_v36 = vadd.f32 %v1572_v23, %v1123_v28  ;;  %v1103_v37 = vmul.f32 %v2089_v3, %v1080_v24 }
 0x175   : > { %v1601_v34 = vpack.c.bf16 %v1184_v26, %v1183_v25  ;;  %v1186_v38 = vmax.f32 %v1170_v30, 0.0  ;;  %v1172_v39 = vadd.f32 %v1573_v32, %v1124_v31  ;;  %v1576_v41 = vunpack.c.l.bf16 %v1624_v29 }
 0x176   : > { %v1125_v40 = vadd.f32 %v2096_v6, %v1102_v33  ;;  %v1187_v42 = vmax.f32 %v1171_v36, 0.0  ;;  %v1126_v43 = vadd.f32 %v2096_v6, %v1103_v37  ;;  %v1577_v44 = vunpack.c.h.bf16 %v1624_v29 }
 0x177   : > { %1628 = vst [vmem:[%s2196_s5 + $0x20] sm:$0xff] %v1601_v34   ;;  %v1606_v45 = vpack.c.bf16 %v1186_v38, %v1185_v35  ;;  %v1188_v46 = vmax.f32 %v1172_v39, 0.0 }
 0x178   : > { %v1173_v47 = vadd.f32 %v1576_v41, %v1125_v40  ;;  %v1174_v48 = vadd.f32 %v1577_v44, %v1126_v43 }
 0x179   : > { %1629 = vst [vmem:[%s2196_s5 + $0x28] sm:$0xff] %v1606_v45   ;;  %v1611_v3 = vpack.c.bf16 %v1188_v46, %v1187_v42 }
 0x17a   : > { %v1189_v49 = vmax.f32 %v1173_v47, 0.0  ;;  %v1190_v50 = vmax.f32 %v1174_v48, 0.0 }
 0x17b   : > { %1630 = vst [vmem:[%s2196_s5 + $0x30] sm:$0xff] %v1611_v3  }
 0x17c   : > { %v1616_v51 = vpack.c.bf16 %v1190_v50, %v1189_v49 }
 0x17e   : > { %1631 = vst [vmem:[%s2196_s5 + $0x38] sm:$0xff] %v1616_v51  }
 0x17f PF: > { %s15_s22 = sadd.s32 1, %s1881_s22   ;;  %s2197_s18 = smov %s1869_s19 }
 0x180   : > { %p12_p12 = scmp.ge.s32.totalorder %s15_s22, 5   ;;  %s2198_s19 = smov %s1949_s26 }
 0x181   : > { %s2199_s20 = smov %s1877_s21  ;;  %s2200_s21 = smov %s2202_s23 }
 0x182   :  { %14 = sbr.rel (!%p12_p12) target bundleno = 3 (0x3), region = 127 }

// kernel: resnet_byol_forward.26
= control target key start
LH: loop header
LB: loop body
LE: loop exit
PB: predicated region body
PF: predicated region fallthrough
CT: control target
= control target key end

     0   :  { %s1143_s15 = smov 0   ;;  %s1145_s16 = smov 0   ;;  %s1256_s0 = inlined_call_operand.vmem [shape: bf16[32,1152], index: 0, kind: input, shape index: {}]   ;;  %s1257_s1 = inlined_call_operand.vmem [shape: bf16[1152,128], index: 1, kind: input, shape index: {}]   ;;  %s1258_s2 = inlined_call_operand.vmem [shape: f32[1,128], index: 2, kind: input, shape index: {}]   ;;  %s1259_s3 = inlined_call_operand.vmem [shape: f32[1,128], index: 3, kind: input, shape index: {}]   ;;  %s1260_s4 = inlined_call_operand.vmem [shape: bf16[32,128], index: 4, kind: output, shape index: {}]  }
   0x1   :  { %s1147_s17 = smov 0   ;;  %s1149_s18 = smov 0  }
   0x2   :  { %s1151_s19 = smov 0  }
   0x3 LB: > { %s26_s20 = sadd.s32 1, %s1111_s18  ;;  %p49_p1 = scmp.ne.s32.totalorder %s1103_s16, %s1099_s15  ;;  %s1115_s19 = sphi %s1151_s19, %s14_s19   ;;  %s1111_s18 = sphi %s1149_s18, %s1264_s18   ;;  %s1107_s17 = sphi %s1147_s17, %s1263_s17   ;;  %s1103_s16 = sphi %s1145_s16, %s1262_s16   ;;  %s1099_s15 = sphi %s1143_s15, %s1261_s15  }
   0x4   : > { %p27_p0 = scmp.ge.s32.totalorder %s26_s20, 3  ;;  %p50_p2 = scmp.eq.s32.totalorder %s1115_s19, 0 }
   0x5   : > { %s42_s22 = sadd.s32 1, %s1103_s16  ;;  %p874_p5 = scmp.ge.s32.totalorder %s1115_s19, 3 }
   0x6   : > { %s1266_s20 = smov (%p27_p0, %s26_s20), 0  ;;  %p51_p3 = por %p50_p2, %p49_p1 }
   0x7   : > { %s38_s21 = ssub.s32 %s1111_s18, %s1266_s20  ;;  %195 = sbr.rel (%p874_p5) target bundleno = 21 (0x15), region = 24 }
   0x8   : > { %p40_p4 = scmp.eq.s32.totalorder %s38_s21, 0 }
   0xa   : > { %s1178_s23 = scalar_select %p40_p4, %s1103_s16, %s42_s22  }
   0xc   : > { %198 = sbr.rel (!%p51_p3) target bundleno = 21 (0x15), region = 28  ;;  %s200_s24 = sand.u32 (%p51_p3), 1, %s1103_s16  }
   0xd   : > { %s928_s25 = smul.u32 (%p51_p3), 12, %s1111_s18 }
   0xe   : > { %s1002_s26 = smul.u32 (%p51_p3), 48, %s200_s24 }
   0xf   : > { %s208_s29 = scalar_lea.vmem (%p51_p3), %s1256_s0, %s928_s25 }
  0x10   : > { %v223_v0 = vld [vmem:[%s208_s29] sm:$0xff] (%p51_p3)  ;;  %v227_v2 = vld [vmem:[%s208_s29 + $0x48] sm:$0xff] (%p51_p3)  ;;  %s202_s30 = scalar_lea.vmem (%p51_p3), [#allocation3], %s1002_s26  ;;  %v880_v6 = vld [vmem:[%s208_s29 + $0x50] sm:$0xf] (%p51_p3) }
  0x11   : > { %v225_v1 = vld [vmem:[%s208_s29 + $0x24] sm:$0xff]  ;;  %224 = vst [vmem:[%s202_s30] sm:$0xff] %v223_v0  ;;  %228 = vst [vmem:[%s202_s30 + $0x18] sm:$0xff] %v227_v2  ;;  %v229_v3 = vld [vmem:[%s208_s29 + $0x6c] sm:$0xff] }
  0x12   : > { %226 = vst [vmem:[%s202_s30 + $0xc] sm:$0xff] %v225_v1  ;;  %v876_v4 = vld [vmem:[%s208_s29 + $0x8] sm:$0xf]  ;;  %v878_v5 = vld [vmem:[%s208_s29 + $0x2c] sm:$0xf]  ;;  %230 = vst [vmem:[%s202_s30 + $0x24] sm:$0xff] %v229_v3 }
  0x13   : > { %877 = vst [vmem:[%s202_s30 + $0x8] sm:$0xf] %v876_v4  ;;  %879 = vst [vmem:[%s202_s30 + $0x14] sm:$0xf] %v878_v5  ;;  %v882_v7 = vld [vmem:[%s208_s29 + $0x74] sm:$0xf] }
  0x14   : > { %881 = vst [vmem:[%s202_s30 + $0x20] sm:$0xf] %v880_v6  ;;  %883 = vst [vmem:[%s202_s30 + $0x2c] sm:$0xf] %v882_v7 }
  0x15 PF: > { %p884_p6 = scmp.ge.s32.totalorder %s1115_s19, 1  ;;  %p263_p7 = scmp.lt.s32.totalorder %s1115_s19, 4 }
  0x17   : > { %p264_p8 = pnand %p884_p6, %p263_p7 }
  0x18   : > { %s270_s5 = sand.u32 (!%p264_p8), 1, %s1099_s15   ;;  %s314_s6 = smul.u32 (!%p264_p8), 48, %s1107_s17 }
  0x19   : > { %267 = sbr.rel (%p264_p8) target bundleno = 301 (0x12d), region = 58  ;;  %p886_p10 = scmp.ne.s32.totalorder (!%p264_p8), %s1107_s17, 0 }
  0x1a   : > { %s1003_s7 = smul.u32 (!%p264_p8), 48, %s270_s5  ;;  %p315_p9 = scmp.lt.s32.totalorder (!%p264_p8), %s314_s6, 143 }
  0x1c   : > { %s1195_s12 = scalar_lea.vmem (!%p264_p8), [#allocation3], %s1003_s7 }
  0x1e   : > { %s1268_s6 = smov (!%p315_p9, %s314_s6), 143  ;;  %342 = sbr.rel (%p886_p10) target bundleno = 38 (0x26), region = 66 }
  0x1f   : > { %s885_s8 = sshll.u32 %s1268_s6, 2 }
  0x20   : > { %s1193_s11 = scalar_lea.vmem %s1257_s1, %s885_s8 }
  0x23   : > { %v1117_v8 = vmov 0.0  }
  0x24   : > { %343 = vst [vmem:[#allocation2 + $0x10] sm:$0xff] %v1117_v8  ;;  %344 = vst [vmem:[#allocation2] sm:$0xff] %v1117_v8 }
  0x25   : > { %345 = vst [vmem:[#allocation2 + $0x18] sm:$0xff] %v1117_v8  ;;  %346 = vst [vmem:[#allocation2 + $0x8] sm:$0xff] %v1117_v8 }
  0x26 PF: > { %v1045_v9 = vld [vmem:[%s1193_s11 + $0x78] sm:$0xff]   ;;  %v1048_v12 = vld [vmem:[%s1193_s11 + $0x70] sm:$0xff]   ;;  %v1051_v15 = vld [vmem:[%s1193_s11 + $0x68] sm:$0xff]   ;;  %p917_p11 = scmp.ne.s32.totalorder %s1107_s17, 2 }
  0x27   : > { %v1046_v10 = vld [vmem:[%s1193_s11 + $0x38] sm:$0xff]   ;;  %944 = vmatprep.subr.bf16.mxu0 %v1045_v9  ;;  %v1049_v13 = vld [vmem:[%s1193_s11 + $0x30] sm:$0xff]   ;;  %v1052_v16 = vld [vmem:[%s1193_s11 + $0x28] sm:$0xff]  }
  0x28   : > { %v1047_v11 = vld [vmem:[%s1193_s11 + $0xb8] sm:$0xff]   ;;  %945 = vmatpush3.bf16.msra.mxu0 %v1046_v10  ;;  %v1050_v14 = vld [vmem:[%s1193_s11 + $0xb0] sm:$0xff]   ;;  %v1053_v17 = vld [vmem:[%s1193_s11 + $0xa8] sm:$0xff]  }
  0x29   : > { %982 = vmatprep.subr.bf16.mxu1 %v1047_v11  ;;  %946 = vmatprep.subr.bf16.mxu0 %v1048_v12  ;;  %v1054_v18 = vld [vmem:[%s1193_s11 + $0x60] sm:$0xff]   ;;  %v1057_v21 = vld [vmem:[%s1193_s11 + $0x58] sm:$0xff]   ;;  %v1060_v24 = vld [vmem:[%s1193_s11 + $0x50] sm:$0xff]  }
  0x2a   : > { %983 = vmatpush3.bf16.msra.mxu1 %v1047_v11  ;;  %v1055_v19 = vld [vmem:[%s1193_s11 + $0x20] sm:$0xff]   ;;  %v1059_v22 = vld [vmem:[%s1193_s11 + $0x98] sm:$0xff]   ;;  %v1062_v25 = vld [vmem:[%s1193_s11 + $0x90] sm:$0xff]  }
  0x2b   : > { %984 = vmatprep.subr.bf16.mxu1 %v1050_v14  ;;  %v1056_v20 = vld [vmem:[%s1193_s11 + $0xa0] sm:$0xff]   ;;  %v1058_v23 = vld [vmem:[%s1193_s11 + $0x18] sm:$0xff]   ;;  %v1061_v26 = vld [vmem:[%s1193_s11 + $0x10] sm:$0xff]  }
  0x2c   : > { %947 = vmatpush3.bf16.msra.mxu0 %v1049_v13  ;;  %v1063_v27 = vld [vmem:[%s1193_s11 + $0x48] sm:$0xff]   ;;  %v1066_v30 = vld [vmem:[%s1193_s11 + $0x40] sm:$0xff]   ;;  %v347_v44 = vld [vmem:[#allocation2 + $0x10] sm:$0xff] }
  0x2d   : > { %948 = vmatprep.subr.bf16.mxu0 %v1051_v15  ;;  %v1064_v28 = vld [vmem:[%s1193_s11 + $0x8] sm:$0xff]   ;;  %v1068_v31 = vld [vmem:[%s1193_s11 + $0x80] sm:$0xff]   ;;  %v349_v58 = vld [vmem:[#allocation2 + $0x18] sm:$0xff] }
  0x2e   : > { %985 = vmatpush3.bf16.msra.mxu1 %v1050_v14  ;;  %v1065_v29 = vld [vmem:[%s1193_s11 + $0x88] sm:$0xff]   ;;  %v1071_v32 = vld [vmem:[%s1195_s12 + $0x4] ss:$12 sps:$4 sm:$0xff]  }
  0x2f   : > { %986 = vmatprep.subr.bf16.mxu1 %v1053_v17  ;;  %v1072_v33 = vld [vmem:[%s1195_s12 + $0x8] ss:$12 sps:$4 sm:$0xff]   ;;  %615 = vmatprep.mubr.bf16.mxu0 %v1071_v32  ;;  %v1069_v35 = vld [vmem:[%s1195_s12] ss:$12 sps:$4 sm:$0xff]   ;;  %v1076_v38 = vld [vmem:[%s1195_s12 + $0x18] ss:$12 sps:$4 sm:$0xff]  }
  0x30   : > { %949 = vmatpush3.bf16.msra.mxu0 %v1052_v16  ;;  %v1067_v34 = vld [vmem:[%s1193_s11] sm:$0xff]   ;;  %998 = vmatprep.mubr.bf16.mxu1 %v1072_v33  ;;  %v1074_v36 = vld [vmem:[%s1195_s12 + $0x1c] ss:$12 sps:$4 sm:$0xff]  }
  0x31   : > { %950 = vmatprep.subr.bf16.mxu0 %v1054_v18  ;;  %v1073_v37 = vld [vmem:[%s1195_s12 + $0x20] ss:$12 sps:$4 sm:$0xff]  }
  0x32   : > { %987 = vmatpush3.bf16.msra.mxu1 %v1053_v17  ;;  %v348_v52 = vld [vmem:[#allocation2] sm:$0xff]  ;;  %v350_v0 = vld [vmem:[#allocation2 + $0x8] sm:$0xff] }
  0x33   : > { %988 = vmatprep.subr.bf16.mxu1 %v1056_v20 }
  0x34   : > { %951 = vmatpush3.bf16.msra.mxu0 %v1055_v19 }
  0x35   : > { %952 = vmatprep.subr.bf16.mxu0 %v1057_v21 }
  0x36   : > { %989 = vmatpush3.bf16.msra.mxu1 %v1056_v20 }
  0x37   : > { %990 = vmatprep.subr.bf16.mxu1 %v1059_v22 }
  0x38   : > { %953 = vmatpush3.bf16.msra.mxu0 %v1058_v23 }
  0x39   : > { %954 = vmatprep.subr.bf16.mxu0 %v1060_v24 }
  0x3a   : > { %991 = vmatpush3.bf16.msra.mxu1 %v1059_v22 }
  0x3b   : > { %992 = vmatprep.subr.bf16.mxu1 %v1062_v25 }
  0x3c   : > { %955 = vmatpush3.bf16.msra.mxu0 %v1061_v26 }
  0x3d   : > { %956 = vmatprep.subr.bf16.mxu0 %v1063_v27 }
  0x3e   : > { %993 = vmatpush3.bf16.msra.mxu1 %v1062_v25 }
  0x3f   : > { %994 = vmatprep.subr.bf16.mxu1 %v1065_v29 }
  0x40   : > { %957 = vmatpush3.bf16.msra.mxu0 %v1064_v28 }
  0x41   : > { %958 = vmatprep.subr.bf16.mxu0 %v1066_v30 }
  0x42   : > { %995 = vmatpush3.bf16.msra.mxu1 %v1065_v29 }
  0x43   : > { %996 = vmatprep.subr.bf16.mxu1 %v1068_v31 }
  0x44   : > { %959 = vmatpush3.bf16.msra.mxu0 %v1067_v34 }
  0x46   : > { %997 = vmatpush3.bf16.msra.mxu1 %v1068_v31 }
  0x47   : > { %616 = vmatmul.mubr.bf16.vlgmr.msra.gmra.mxu0 %v1069_v35 }
  0x48   : > { %623 = vmatprep.mubr.bf16.mxu0 %v1074_v36 }
  0x49   : > { %999 = vmatmul.mubr.bf16.vlgmr.msra.gmra.mxu1 %v1073_v37 }
  0x4f   : > { %624 = vmatmul.mubr.bf16.gmra.mxu0 %v1076_v38 }
 0x107   : > { %v960_v39 = vpop.f32.mrf.mxu0 }
 0x109   : > { %v961_v40 = vpop.f32.mrf.mxu0  ;;  %v1000_v41 = vpop.f32.mrf.mxu1 }
 0x10a   : > { %v962_v42 = vadd.f32 %v961_v40, %v960_v39 }
 0x10b   : > { %v963_v43 = vpop.f32.mrf.mxu0  ;;  %v666_v45 = vpop.f32.mrf.mxu1 }
 0x10c   : > { %v667_v46 = vadd.f32 %v962_v42, %v666_v45 }
 0x10d   : > { %v964_v47 = vpop.f32.mrf.mxu0  ;;  %v1001_v48 = vpop.f32.mrf.mxu1 }
 0x10e   : > { %v681_v49 = vadd.f32 %v667_v46, %v347_v44  ;;  %v965_v50 = vadd.f32 %v964_v47, %v963_v43 }
 0x10f   : > { %v966_v51 = vpop.f32.mrf.mxu0  ;;  %v669_v53 = vpop.f32.mrf.mxu1 }
 0x110   : > { %685 = vst [vmem:[#allocation2 + $0x10] sm:$0xff] %v681_v49  ;;  %v670_v54 = vadd.f32 %v965_v50, %v669_v53 }
 0x111   : > { %v967_v55 = vpop.f32.mrf.mxu0 }
 0x112   : > { %v682_v56 = vadd.f32 %v670_v54, %v348_v52  ;;  %v968_v57 = vadd.f32 %v967_v55, %v966_v51 }
 0x113   : > { %v969_v59 = vpop.f32.mrf.mxu0 }
 0x114   : > { %686 = vst [vmem:[#allocation2] sm:$0xff] %v682_v56  ;;  %v675_v60 = vadd.f32 %v1000_v41, %v968_v57 }
 0x115   : > { %v970_v61 = vpop.f32.mrf.mxu0 }
 0x116   : > { %v683_v62 = vadd.f32 %v675_v60, %v349_v58  ;;  %v971_v63 = vadd.f32 %v970_v61, %v969_v59 }
 0x118   : > { %687 = vst [vmem:[#allocation2 + $0x18] sm:$0xff] %v683_v62  ;;  %v678_v1 = vadd.f32 %v1001_v48, %v971_v63  ;;  %692 = sbr.rel (%p917_p11) target bundleno = 301 (0x12d), region = 70 }
 0x11a   : > { %v684_v2 = vadd.f32 %v678_v1, %v350_v0 }
 0x11c   : > { %688 = vst [vmem:[#allocation2 + $0x8] sm:$0xff] %v684_v2 }
 0x11d   : > { %v693_v3 = vld [vmem:[#allocation2 + $0x10] sm:$0xff]  ;;  %v694_v4 = vld [vmem:[#allocation2] sm:$0xff] }
 0x11e   : > { %v918_v5 = vld [vmem:[%s1258_s2] ss:$0 sm:$0xff] }
 0x11f   : > { %v704_v6 = vmul.f32 %v918_v5, %v693_v3  ;;  %v705_v7 = vmul.f32 %v918_v5, %v694_v4  ;;  %v919_v8 = vld [vmem:[%s1259_s3] ss:$0 sm:$0xff]  ;;  %v695_v9 = vld [vmem:[#allocation2 + $0x18] sm:$0xff] }
 0x120   : > { %v706_v11 = vmul.f32 %v918_v5, %v695_v9 }
 0x121   : > { %v715_v13 = vadd.f32 %v919_v8, %v704_v6  ;;  %v716_v14 = vadd.f32 %v919_v8, %v705_v7 }
 0x122   : > { %v717_v15 = vadd.f32 %v919_v8, %v706_v11 }
 0x123   : > { %v696_v10 = vld [vmem:[#allocation2 + $0x8] sm:$0xff]  ;;  %v719_v17 = vmax.f32 %v715_v13, 0.0  ;;  %v720_v18 = vmax.f32 %v716_v14, 0.0 }
 0x124   : > { %v707_v12 = vmul.f32 %v918_v5, %v696_v10  ;;  %v721_v19 = vmax.f32 %v717_v15, 0.0 }
 0x125   : > { %v936_v21 = vpack.c.bf16 %v720_v18, %v719_v17 }
 0x126   : > { %v718_v16 = vadd.f32 %v919_v8, %v707_v12 }
 0x127   : > { %937 = vst [vmem:[%s1260_s4] sm:$0xff] %v936_v21  }
 0x128   : > { %v722_v20 = vmax.f32 %v718_v16, 0.0 }
 0x12a   : > { %v941_v22 = vpack.c.bf16 %v722_v20, %v721_v19 }
 0x12c   : > { %943 = vst [vmem:[%s1260_s4 + $0x8] sm:$0xff] %v941_v22  }
 0x12d PF: > { %s14_s19 = sadd.s32 1, %s1115_s19   ;;  %s1261_s15 = smov %s1103_s16 }
 0x12e   : > { %p11_p12 = scmp.ge.s32.totalorder %s14_s19, 5   ;;  %s1262_s16 = smov %s1178_s23 }
 0x12f   : > { %s1263_s17 = smov %s1111_s18  ;;  %s1264_s18 = smov %s1266_s20 }
 0x130   :  { %13 = sbr.rel (!%p11_p12) target bundleno = 3 (0x3), region = 120 }

// kernel: resnet_byol_forward.27
= control target key start
LH: loop header
LB: loop body
LE: loop exit
PB: predicated region body
PF: predicated region fallthrough
CT: control target
= control target key end

     0   :  { %s358_s1 = inlined_call_operand.vmem [shape: bf16[128,128], index: 1, kind: input, shape index: {}]   ;;  %s359_s0 = inlined_call_operand.vmem [shape: bf16[32,128], index: 0, kind: input, shape index: {}]   ;;  %s360_s2 = inlined_call_operand.vmem [shape: f32[1,128], index: 2, kind: input, shape index: {}]   ;;  %s361_s3 = inlined_call_operand.vmem [shape: f32[1,128], index: 3, kind: input, shape index: {}]   ;;  %s362_s4 = inlined_call_operand.vmem [shape: bf16[32,128], index: 4, kind: output, shape index: {}]  }
   0x1   :  { %v281_v0 = vld [vmem:[%s358_s1 + $0x38] sm:$0xff]   ;;  %v282_v1 = vld [vmem:[%s358_s1 + $0x30] sm:$0xff]   ;;  %v283_v2 = vld [vmem:[%s358_s1 + $0x28] sm:$0xff]  }
   0x2   :  { %261 = vmatprep.subr.bf16.mxu0 %v281_v0  ;;  %v284_v3 = vld [vmem:[%s358_s1 + $0x20] sm:$0xff]   ;;  %v285_v5 = vld [vmem:[%s358_s1 + $0x18] sm:$0xff]   ;;  %v286_v6 = vld [vmem:[%s358_s1 + $0x10] sm:$0xff]  }
   0x3   :  { %262 = vmatpush3.bf16.msra.mxu0 %v281_v0  ;;  %v289_v4 = vld [vmem:[%s359_s0] sm:$0xff]   ;;  %v287_v7 = vld [vmem:[%s358_s1 + $0x8] sm:$0xff]  }
   0x4   :  { %263 = vmatprep.subr.bf16.mxu0 %v282_v1  ;;  %277 = vmatprep.mubr.bf16.mxu0 %v289_v4  ;;  %v288_v8 = vld [vmem:[%s358_s1] sm:$0xff]   ;;  %v290_v9 = vld [vmem:[%s359_s0 + $0x8] sm:$0xff]  }
   0x5   :  { %v230_v11 = vld [vmem:[%s360_s2] ss:$0 sm:$0xff] }
   0x6   :  { %v231_v14 = vld [vmem:[%s361_s3] ss:$0 sm:$0xff] }
   0x7   :  { %264 = vmatpush3.bf16.msra.mxu0 %v282_v1 }
   0x8   :  { %265 = vmatprep.subr.bf16.mxu0 %v283_v2 }
   0xb   :  { %266 = vmatpush3.bf16.msra.mxu0 %v283_v2 }
   0xc   :  { %267 = vmatprep.subr.bf16.mxu0 %v284_v3 }
   0xf   :  { %268 = vmatpush3.bf16.msra.mxu0 %v284_v3 }
  0x10   :  { %269 = vmatprep.subr.bf16.mxu0 %v285_v5 }
  0x13   :  { %270 = vmatpush3.bf16.msra.mxu0 %v285_v5 }
  0x14   :  { %271 = vmatprep.subr.bf16.mxu0 %v286_v6 }
  0x17   :  { %272 = vmatpush3.bf16.msra.mxu0 %v286_v6 }
  0x18   :  { %273 = vmatprep.subr.bf16.mxu0 %v287_v7 }
  0x1b   :  { %274 = vmatpush3.bf16.msra.mxu0 %v287_v7 }
  0x1c   :  { %275 = vmatprep.subr.bf16.mxu0 %v288_v8 }
  0x1f   :  { %276 = vmatpush3.bf16.msra.mxu0 %v288_v8 }
  0x22   :  { %278 = vmatmul.mubr.bf16.vlgmr.msra.gmra.mxu0 %v290_v9 }
  0xe2   :  { %v279_v10 = vpop.f32.mrf.mxu0 }
  0xe3   :  { %v183_v13 = vmul.f32 %v279_v10, %v230_v11 }
  0xe4   :  { %v144_v12 = vpop.f32.mrf.mxu0 }
  0xe5   :  { %v181_v16 = vmul.f32 %v230_v11, %v144_v12  ;;  %v194_v19 = vadd.f32 %v231_v14, %v183_v13 }
  0xe6   :  { %v280_v15 = vpop.f32.mrf.mxu0 }
  0xe7   :  { %v184_v17 = vmul.f32 %v280_v15, %v230_v11  ;;  %v192_v22 = vadd.f32 %v231_v14, %v181_v16 }
  0xe8   :  { %v147_v18 = vpop.f32.mrf.mxu0 }
  0xe9   :  { %v195_v20 = vadd.f32 %v231_v14, %v184_v17  ;;  %v182_v21 = vmul.f32 %v230_v11, %v147_v18 }
  0xeb   :  { %v248_v23 = vpack.c.bf16 %v195_v20, %v194_v19  ;;  %v193_v24 = vadd.f32 %v231_v14, %v182_v21 }
  0xed   :  { %250 = vst [vmem:[%s362_s4 + $0x8] sm:$0xff] %v248_v23   ;;  %v243_v25 = vpack.c.bf16 %v193_v24, %v192_v22 }
  0xef   :  { %244 = vst [vmem:[%s362_s4] sm:$0xff] %v243_v25  }

// kernel: resnet_byol_forward.28
= control target key start
LH: loop header
LB: loop body
LE: loop exit
PB: predicated region body
PF: predicated region fallthrough
CT: control target
= control target key end

     0   :  { %s1248_s18 = smov 0   ;;  %s1250_s19 = smov 0   ;;  %s1367_s0 = inlined_call_operand.vmem [shape: bf16[32,1152], index: 0, kind: input, shape index: {}]   ;;  %s1368_s1 = inlined_call_operand.vmem [shape: bf16[1152,128], index: 1, kind: input, shape index: {}]   ;;  %s1369_s2 = inlined_call_operand.vmem [shape: f32[1,128], index: 2, kind: input, shape index: {}]   ;;  %s1370_s3 = inlined_call_operand.vmem [shape: f32[1,128], index: 3, kind: input, shape index: {}]   ;;  %s1371_s4 = inlined_call_operand.vmem [shape: bf16[32,128], index: 4, kind: input, shape index: {}]   ;;  %s1372_s5 = inlined_call_operand.vmem [shape: bf16[32,128], index: 5, kind: output, shape index: {}]  }
   0x1   :  { %s1252_s20 = smov 0   ;;  %s1254_s21 = smov 0  }
   0x2   :  { %s1256_s22 = smov 0  }
   0x3 LB: > { %s27_s23 = sadd.s32 1, %s1211_s21  ;;  %p50_p1 = scmp.ne.s32.totalorder %s1203_s19, %s1199_s18  ;;  %s1215_s22 = sphi %s1256_s22, %s15_s22   ;;  %s1211_s21 = sphi %s1254_s21, %s1376_s21   ;;  %s1207_s20 = sphi %s1252_s20, %s1375_s20   ;;  %s1203_s19 = sphi %s1250_s19, %s1374_s19   ;;  %s1199_s18 = sphi %s1248_s18, %s1373_s18  }
   0x4   : > { %p28_p0 = scmp.ge.s32.totalorder %s27_s23, 3  ;;  %p51_p2 = scmp.eq.s32.totalorder %s1215_s22, 0 }
   0x5   : > { %s43_s25 = sadd.s32 1, %s1203_s19  ;;  %p965_p5 = scmp.ge.s32.totalorder %s1215_s22, 3 }
   0x6   : > { %s1378_s23 = smov (%p28_p0, %s27_s23), 0  ;;  %p52_p3 = por %p51_p2, %p50_p1 }
   0x7   : > { %s39_s24 = ssub.s32 %s1211_s21, %s1378_s23  ;;  %236 = sbr.rel (%p965_p5) target bundleno = 21 (0x15), region = 28 }
   0x8   : > { %p41_p4 = scmp.eq.s32.totalorder %s39_s24, 0 }
   0xa   : > { %s1283_s26 = scalar_select %p41_p4, %s1203_s19, %s43_s25  }
   0xc   : > { %239 = sbr.rel (!%p52_p3) target bundleno = 21 (0x15), region = 32  ;;  %s241_s27 = sand.u32 (%p52_p3), 1, %s1203_s19  }
   0xd   : > { %s1019_s28 = smul.u32 (%p52_p3), 12, %s1211_s21 }
   0xe   : > { %s1102_s29 = smul.u32 (%p52_p3), 48, %s241_s27 }
   0xf   : > { %s249_s7 = scalar_lea.vmem (%p52_p3), %s1367_s0, %s1019_s28 }
  0x10   : > { %v264_v0 = vld [vmem:[%s249_s7] sm:$0xff] (%p52_p3)  ;;  %v268_v2 = vld [vmem:[%s249_s7 + $0x48] sm:$0xff] (%p52_p3)  ;;  %s243_s8 = scalar_lea.vmem (%p52_p3), [#allocation3], %s1102_s29  ;;  %v971_v6 = vld [vmem:[%s249_s7 + $0x50] sm:$0xf] (%p52_p3) }
  0x11   : > { %v266_v1 = vld [vmem:[%s249_s7 + $0x24] sm:$0xff]  ;;  %265 = vst [vmem:[%s243_s8] sm:$0xff] %v264_v0  ;;  %269 = vst [vmem:[%s243_s8 + $0x18] sm:$0xff] %v268_v2  ;;  %v270_v3 = vld [vmem:[%s249_s7 + $0x6c] sm:$0xff] }
  0x12   : > { %267 = vst [vmem:[%s243_s8 + $0xc] sm:$0xff] %v266_v1  ;;  %v967_v4 = vld [vmem:[%s249_s7 + $0x8] sm:$0xf]  ;;  %v969_v5 = vld [vmem:[%s249_s7 + $0x2c] sm:$0xf]  ;;  %271 = vst [vmem:[%s243_s8 + $0x24] sm:$0xff] %v270_v3 }
  0x13   : > { %968 = vst [vmem:[%s243_s8 + $0x8] sm:$0xf] %v967_v4  ;;  %970 = vst [vmem:[%s243_s8 + $0x14] sm:$0xf] %v969_v5  ;;  %v973_v7 = vld [vmem:[%s249_s7 + $0x74] sm:$0xf] }
  0x14   : > { %972 = vst [vmem:[%s243_s8 + $0x20] sm:$0xf] %v971_v6  ;;  %974 = vst [vmem:[%s243_s8 + $0x2c] sm:$0xf] %v973_v7 }
  0x15 PF: > { %p975_p6 = scmp.ge.s32.totalorder %s1215_s22, 1  ;;  %p304_p7 = scmp.lt.s32.totalorder %s1215_s22, 4 }
  0x17   : > { %p305_p8 = pnand %p975_p6, %p304_p7 }
  0x18   : > { %s311_s9 = sand.u32 (!%p305_p8), 1, %s1199_s18   ;;  %s365_s10 = smul.u32 (!%p305_p8), 48, %s1207_s20 }
  0x19   : > { %308 = sbr.rel (%p305_p8) target bundleno = 303 (0x12f), region = 62  ;;  %p977_p10 = scmp.ne.s32.totalorder (!%p305_p8), %s1207_s20, 0 }
  0x1a   : > { %s1103_s11 = smul.u32 (!%p305_p8), 48, %s311_s9  ;;  %p366_p9 = scmp.lt.s32.totalorder (!%p305_p8), %s365_s10, 143 }
  0x1c   : > { %s1300_s16 = scalar_lea.vmem (!%p305_p8), [#allocation3], %s1103_s11 }
  0x1e   : > { %s1380_s10 = smov (!%p366_p9, %s365_s10), 143  ;;  %402 = sbr.rel (%p977_p10) target bundleno = 38 (0x26), region = 70 }
  0x1f   : > { %s976_s12 = sshll.u32 %s1380_s10, 2 }
  0x20   : > { %s1298_s15 = scalar_lea.vmem %s1368_s1, %s976_s12 }
  0x23   : > { %v1217_v8 = vmov 0.0  }
  0x24   : > { %403 = vst [vmem:[#allocation2 + $0x10] sm:$0xff] %v1217_v8  ;;  %404 = vst [vmem:[#allocation2] sm:$0xff] %v1217_v8 }
  0x25   : > { %405 = vst [vmem:[#allocation2 + $0x18] sm:$0xff] %v1217_v8  ;;  %406 = vst [vmem:[#allocation2 + $0x8] sm:$0xff] %v1217_v8 }
  0x26 PF: > { %v1145_v9 = vld [vmem:[%s1298_s15 + $0x78] sm:$0xff]   ;;  %v1148_v12 = vld [vmem:[%s1298_s15 + $0x70] sm:$0xff]   ;;  %v1151_v15 = vld [vmem:[%s1298_s15 + $0x68] sm:$0xff]   ;;  %p1008_p11 = scmp.ne.s32.totalorder %s1207_s20, 2 }
  0x27   : > { %v1146_v10 = vld [vmem:[%s1298_s15 + $0x38] sm:$0xff]   ;;  %1044 = vmatprep.subr.bf16.mxu0 %v1145_v9  ;;  %v1149_v13 = vld [vmem:[%s1298_s15 + $0x30] sm:$0xff]   ;;  %v1152_v16 = vld [vmem:[%s1298_s15 + $0x28] sm:$0xff]  }
  0x28   : > { %v1147_v11 = vld [vmem:[%s1298_s15 + $0xb8] sm:$0xff]   ;;  %1045 = vmatpush3.bf16.msra.mxu0 %v1146_v10  ;;  %v1150_v14 = vld [vmem:[%s1298_s15 + $0xb0] sm:$0xff]   ;;  %v1153_v17 = vld [vmem:[%s1298_s15 + $0xa8] sm:$0xff]  }
  0x29   : > { %1082 = vmatprep.subr.bf16.mxu1 %v1147_v11  ;;  %1046 = vmatprep.subr.bf16.mxu0 %v1148_v12  ;;  %v1154_v18 = vld [vmem:[%s1298_s15 + $0x60] sm:$0xff]   ;;  %v1157_v21 = vld [vmem:[%s1298_s15 + $0x58] sm:$0xff]   ;;  %v1160_v24 = vld [vmem:[%s1298_s15 + $0x50] sm:$0xff]  }
  0x2a   : > { %1083 = vmatpush3.bf16.msra.mxu1 %v1147_v11  ;;  %v1155_v19 = vld [vmem:[%s1298_s15 + $0x20] sm:$0xff]   ;;  %v1159_v22 = vld [vmem:[%s1298_s15 + $0x98] sm:$0xff]   ;;  %v1162_v25 = vld [vmem:[%s1298_s15 + $0x90] sm:$0xff]  }
  0x2b   : > { %1084 = vmatprep.subr.bf16.mxu1 %v1150_v14  ;;  %v1156_v20 = vld [vmem:[%s1298_s15 + $0xa0] sm:$0xff]   ;;  %v1158_v23 = vld [vmem:[%s1298_s15 + $0x18] sm:$0xff]   ;;  %v1161_v26 = vld [vmem:[%s1298_s15 + $0x10] sm:$0xff]  }
  0x2c   : > { %1047 = vmatpush3.bf16.msra.mxu0 %v1149_v13  ;;  %v1163_v27 = vld [vmem:[%s1298_s15 + $0x48] sm:$0xff]   ;;  %v1166_v30 = vld [vmem:[%s1298_s15 + $0x40] sm:$0xff]   ;;  %v407_v44 = vld [vmem:[#allocation2 + $0x10] sm:$0xff] }
  0x2d   : > { %1048 = vmatprep.subr.bf16.mxu0 %v1151_v15  ;;  %v1164_v28 = vld [vmem:[%s1298_s15 + $0x8] sm:$0xff]   ;;  %v1168_v31 = vld [vmem:[%s1298_s15 + $0x80] sm:$0xff]   ;;  %v409_v58 = vld [vmem:[#allocation2 + $0x18] sm:$0xff] }
  0x2e   : > { %1085 = vmatpush3.bf16.msra.mxu1 %v1150_v14  ;;  %v1165_v29 = vld [vmem:[%s1298_s15 + $0x88] sm:$0xff]   ;;  %v1171_v32 = vld [vmem:[%s1300_s16 + $0x4] ss:$12 sps:$4 sm:$0xff]  }
  0x2f   : > { %1086 = vmatprep.subr.bf16.mxu1 %v1153_v17  ;;  %v1172_v33 = vld [vmem:[%s1300_s16 + $0x8] ss:$12 sps:$4 sm:$0xff]   ;;  %675 = vmatprep.mubr.bf16.mxu0 %v1171_v32  ;;  %v1169_v35 = vld [vmem:[%s1300_s16] ss:$12 sps:$4 sm:$0xff]   ;;  %v1176_v38 = vld [vmem:[%s1300_s16 + $0x18] ss:$12 sps:$4 sm:$0xff]  }
  0x30   : > { %1049 = vmatpush3.bf16.msra.mxu0 %v1152_v16  ;;  %v1167_v34 = vld [vmem:[%s1298_s15] sm:$0xff]   ;;  %1098 = vmatprep.mubr.bf16.mxu1 %v1172_v33  ;;  %v1174_v36 = vld [vmem:[%s1300_s16 + $0x1c] ss:$12 sps:$4 sm:$0xff]  }
  0x31   : > { %1050 = vmatprep.subr.bf16.mxu0 %v1154_v18  ;;  %v1173_v37 = vld [vmem:[%s1300_s16 + $0x20] ss:$12 sps:$4 sm:$0xff]  }
  0x32   : > { %1087 = vmatpush3.bf16.msra.mxu1 %v1153_v17  ;;  %v408_v52 = vld [vmem:[#allocation2] sm:$0xff]  ;;  %v410_v0 = vld [vmem:[#allocation2 + $0x8] sm:$0xff] }
  0x33   : > { %1088 = vmatprep.subr.bf16.mxu1 %v1156_v20 }
  0x34   : > { %1051 = vmatpush3.bf16.msra.mxu0 %v1155_v19 }
  0x35   : > { %1052 = vmatprep.subr.bf16.mxu0 %v1157_v21 }
  0x36   : > { %1089 = vmatpush3.bf16.msra.mxu1 %v1156_v20 }
  0x37   : > { %1090 = vmatprep.subr.bf16.mxu1 %v1159_v22 }
  0x38   : > { %1053 = vmatpush3.bf16.msra.mxu0 %v1158_v23 }
  0x39   : > { %1054 = vmatprep.subr.bf16.mxu0 %v1160_v24 }
  0x3a   : > { %1091 = vmatpush3.bf16.msra.mxu1 %v1159_v22 }
  0x3b   : > { %1092 = vmatprep.subr.bf16.mxu1 %v1162_v25 }
  0x3c   : > { %1055 = vmatpush3.bf16.msra.mxu0 %v1161_v26 }
  0x3d   : > { %1056 = vmatprep.subr.bf16.mxu0 %v1163_v27 }
  0x3e   : > { %1093 = vmatpush3.bf16.msra.mxu1 %v1162_v25 }
  0x3f   : > { %1094 = vmatprep.subr.bf16.mxu1 %v1165_v29 }
  0x40   : > { %1057 = vmatpush3.bf16.msra.mxu0 %v1164_v28 }
  0x41   : > { %1058 = vmatprep.subr.bf16.mxu0 %v1166_v30 }
  0x42   : > { %1095 = vmatpush3.bf16.msra.mxu1 %v1165_v29 }
  0x43   : > { %1096 = vmatprep.subr.bf16.mxu1 %v1168_v31 }
  0x44   : > { %1059 = vmatpush3.bf16.msra.mxu0 %v1167_v34 }
  0x46   : > { %1097 = vmatpush3.bf16.msra.mxu1 %v1168_v31 }
  0x47   : > { %676 = vmatmul.mubr.bf16.vlgmr.msra.gmra.mxu0 %v1169_v35 }
  0x48   : > { %683 = vmatprep.mubr.bf16.mxu0 %v1174_v36 }
  0x49   : > { %1099 = vmatmul.mubr.bf16.vlgmr.msra.gmra.mxu1 %v1173_v37 }
  0x4f   : > { %684 = vmatmul.mubr.bf16.gmra.mxu0 %v1176_v38 }
 0x107   : > { %v1060_v39 = vpop.f32.mrf.mxu0 }
 0x109   : > { %v1061_v40 = vpop.f32.mrf.mxu0  ;;  %v1100_v41 = vpop.f32.mrf.mxu1 }
 0x10a   : > { %v1062_v42 = vadd.f32 %v1061_v40, %v1060_v39 }
 0x10b   : > { %v1063_v43 = vpop.f32.mrf.mxu0  ;;  %v726_v45 = vpop.f32.mrf.mxu1 }
 0x10c   : > { %v727_v46 = vadd.f32 %v1062_v42, %v726_v45 }
 0x10d   : > { %v1064_v47 = vpop.f32.mrf.mxu0  ;;  %v1101_v48 = vpop.f32.mrf.mxu1 }
 0x10e   : > { %v741_v49 = vadd.f32 %v727_v46, %v407_v44  ;;  %v1065_v50 = vadd.f32 %v1064_v47, %v1063_v43 }
 0x10f   : > { %v1066_v51 = vpop.f32.mrf.mxu0  ;;  %v729_v53 = vpop.f32.mrf.mxu1 }
 0x110   : > { %745 = vst [vmem:[#allocation2 + $0x10] sm:$0xff] %v741_v49  ;;  %v730_v54 = vadd.f32 %v1065_v50, %v729_v53 }
 0x111   : > { %v1067_v55 = vpop.f32.mrf.mxu0 }
 0x112   : > { %v742_v56 = vadd.f32 %v730_v54, %v408_v52  ;;  %v1068_v57 = vadd.f32 %v1067_v55, %v1066_v51 }
 0x113   : > { %v1069_v59 = vpop.f32.mrf.mxu0 }
 0x114   : > { %746 = vst [vmem:[#allocation2] sm:$0xff] %v742_v56  ;;  %v735_v60 = vadd.f32 %v1100_v41, %v1068_v57 }
 0x115   : > { %v1070_v61 = vpop.f32.mrf.mxu0 }
 0x116   : > { %v743_v62 = vadd.f32 %v735_v60, %v409_v58  ;;  %v1071_v63 = vadd.f32 %v1070_v61, %v1069_v59 }
 0x118   : > { %747 = vst [vmem:[#allocation2 + $0x18] sm:$0xff] %v743_v62  ;;  %v738_v1 = vadd.f32 %v1101_v48, %v1071_v63  ;;  %752 = sbr.rel (%p1008_p11) target bundleno = 303 (0x12f), region = 74 }
 0x11a   : > { %v744_v2 = vadd.f32 %v738_v1, %v410_v0 }
 0x11c   : > { %748 = vst [vmem:[#allocation2 + $0x8] sm:$0xff] %v744_v2 }
 0x11d   : > { %v753_v3 = vld [vmem:[#allocation2 + $0x10] sm:$0xff]  ;;  %v754_v4 = vld [vmem:[#allocation2] sm:$0xff]  ;;  %v1042_v15 = vld [vmem:[%s1371_s4 + $0x8] sm:$0xff]  }
 0x11e   : > { %v1009_v5 = vld [vmem:[%s1369_s2] ss:$0 sm:$0xff]  ;;  %v1030_v19 = vunpack.c.l.bf16 %v1042_v15  ;;  %v1031_v21 = vunpack.c.h.bf16 %v1042_v15 }
 0x11f   : > { %v764_v6 = vmul.f32 %v1009_v5, %v753_v3  ;;  %v765_v7 = vmul.f32 %v1009_v5, %v754_v4  ;;  %v1010_v8 = vld [vmem:[%s1370_s3] ss:$0 sm:$0xff]  ;;  %v755_v10 = vld [vmem:[#allocation2 + $0x18] sm:$0xff] }
 0x120   : > { %v1025_v9 = vld [vmem:[%s1371_s4] sm:$0xff]   ;;  %v766_v14 = vmul.f32 %v1009_v5, %v755_v10 }
 0x121   : > { %v1026_v11 = vunpack.c.l.bf16 %v1025_v9  ;;  %v1027_v12 = vunpack.c.h.bf16 %v1025_v9  ;;  %v775_v16 = vadd.f32 %v1010_v8, %v764_v6  ;;  %v776_v17 = vadd.f32 %v1010_v8, %v765_v7 }
 0x122   : > { %v777_v20 = vadd.f32 %v1010_v8, %v766_v14 }
 0x123   : > { %v756_v13 = vld [vmem:[#allocation2 + $0x8] sm:$0xff]  ;;  %v787_v22 = vadd.f32 %v1026_v11, %v775_v16  ;;  %v788_v23 = vadd.f32 %v1027_v12, %v776_v17 }
 0x124   : > { %v767_v18 = vmul.f32 %v1009_v5, %v756_v13  ;;  %v789_v25 = vadd.f32 %v1030_v19, %v777_v20 }
 0x125   : > { %v791_v26 = vmax.f32 %v787_v22, 0.0  ;;  %v792_v27 = vmax.f32 %v788_v23, 0.0 }
 0x126   : > { %v778_v24 = vadd.f32 %v1010_v8, %v767_v18  ;;  %v793_v29 = vmax.f32 %v789_v25, 0.0 }
 0x127   : > { %v1035_v30 = vpack.c.bf16 %v792_v27, %v791_v26 }
 0x128   : > { %v790_v28 = vadd.f32 %v1031_v21, %v778_v24 }
 0x129   : > { %1036 = vst [vmem:[%s1372_s5] sm:$0xff] %v1035_v30  }
 0x12a   : > { %v794_v31 = vmax.f32 %v790_v28, 0.0 }
 0x12c   : > { %v1040_v32 = vpack.c.bf16 %v794_v31, %v793_v29 }
 0x12e   : > { %1043 = vst [vmem:[%s1372_s5 + $0x8] sm:$0xff] %v1040_v32  }
 0x12f PF: > { %s15_s22 = sadd.s32 1, %s1215_s22   ;;  %s1373_s18 = smov %s1203_s19 }
 0x130   : > { %p12_p12 = scmp.ge.s32.totalorder %s15_s22, 5   ;;  %s1374_s19 = smov %s1283_s26 }
 0x131   : > { %s1375_s20 = smov %s1211_s21  ;;  %s1376_s21 = smov %s1378_s23 }
 0x132   :  { %14 = sbr.rel (!%p12_p12) target bundleno = 3 (0x3), region = 127 }

// kernel: resnet_byol_forward.31
= control target key start
LH: loop header
LB: loop body
LE: loop exit
PB: predicated region body
PF: predicated region fallthrough
CT: control target
= control target key end

     0   :  { %s1228_s15 = smov 0   ;;  %s1230_s16 = smov 0   ;;  %s1362_s0 = inlined_call_operand.vmem [shape: bf16[16,1152], index: 0, kind: input, shape index: {}]   ;;  %s1363_s1 = inlined_call_operand.vmem [shape: bf16[1152,256], index: 1, kind: input, shape index: {}]   ;;  %s1364_s2 = inlined_call_operand.vmem [shape: f32[1,256], index: 2, kind: input, shape index: {}]   ;;  %s1365_s3 = inlined_call_operand.vmem [shape: f32[1,256], index: 3, kind: input, shape index: {}]   ;;  %s1366_s4 = inlined_call_operand.vmem [shape: bf16[16,256], index: 4, kind: output, shape index: {}]  }
   0x1   :  { %s1232_s17 = smov 0   ;;  %s1234_s18 = smov 0  }
   0x2   :  { %s1236_s19 = smov 0  }
   0x3 LB: > { %s26_s20 = sadd.s32 1, %s1195_s18  ;;  %p49_p1 = scmp.ne.s32.totalorder %s1187_s16, %s1183_s15  ;;  %s1199_s19 = sphi %s1236_s19, %s14_s19   ;;  %s1195_s18 = sphi %s1234_s18, %s1370_s18   ;;  %s1191_s17 = sphi %s1232_s17, %s1369_s17   ;;  %s1187_s16 = sphi %s1230_s16, %s1368_s16   ;;  %s1183_s15 = sphi %s1228_s15, %s1367_s15  }
   0x4   : > { %p27_p0 = scmp.ge.s32.totalorder %s26_s20, 3  ;;  %p50_p2 = scmp.eq.s32.totalorder %s1199_s19, 0 }
   0x5   : > { %s42_s22 = sadd.s32 1, %s1187_s16  ;;  %p969_p5 = scmp.ge.s32.totalorder %s1199_s19, 3 }
   0x6   : > { %s1372_s20 = smov (%p27_p0, %s26_s20), 0  ;;  %p51_p3 = por %p50_p2, %p49_p1 }
   0x7   : > { %s38_s21 = ssub.s32 %s1195_s18, %s1372_s20  ;;  %199 = sbr.rel (%p969_p5) target bundleno = 19 (0x13), region = 24 }
   0x8   : > { %p40_p4 = scmp.eq.s32.totalorder %s38_s21, 0 }
   0xa   : > { %s1263_s23 = scalar_select %p40_p4, %s1187_s16, %s42_s22  }
   0xc   : > { %202 = sbr.rel (!%p51_p3) target bundleno = 19 (0x13), region = 28  ;;  %s204_s24 = sand.u32 (%p51_p3), 1, %s1187_s16  }
   0xd   : > { %s1037_s25 = smul.u32 (%p51_p3), 12, %s1195_s18 }
   0xe   : > { %s1041_s26 = smul.u32 (%p51_p3), 24, %s204_s24 }
   0xf   : > { %s212_s29 = scalar_lea.vmem (%p51_p3), %s1362_s0, %s1037_s25 }
  0x10   : > { %v227_v0 = vld [vmem:[%s212_s29] sm:$0xff] (%p51_p3)  ;;  %v971_v2 = vld [vmem:[%s212_s29 + $0x8] sm:$0xf] (%p51_p3)  ;;  %s206_s30 = scalar_lea.vmem (%p51_p3), [#allocation3], %s1041_s26  ;;  %v973_v3 = vld [vmem:[%s212_s29 + $0x2c] sm:$0xf] (%p51_p3) }
  0x11   : > { %v229_v1 = vld [vmem:[%s212_s29 + $0x24] sm:$0xff]  ;;  %228 = vst [vmem:[%s206_s30] sm:$0xff] %v227_v0  ;;  %972 = vst [vmem:[%s206_s30 + $0x8] sm:$0xf] %v971_v2 }
  0x12   : > { %230 = vst [vmem:[%s206_s30 + $0xc] sm:$0xff] %v229_v1  ;;  %974 = vst [vmem:[%s206_s30 + $0x14] sm:$0xf] %v973_v3 }
  0x13 PF: > { %p975_p6 = scmp.ge.s32.totalorder %s1199_s19, 1  ;;  %p262_p7 = scmp.lt.s32.totalorder %s1199_s19, 4 }
  0x15   : > { %p263_p8 = pnand %p975_p6, %p262_p7 }
  0x16   : > { %s269_s5 = sand.u32 (!%p263_p8), 1, %s1183_s15   ;;  %s319_s6 = smul.u32 (!%p263_p8), 48, %s1191_s17 }
  0x17   : > { %266 = sbr.rel (%p263_p8) target bundleno = 322 (0x142), region = 58  ;;  %p978_p10 = scmp.ne.s32.totalorder (!%p263_p8), %s1191_s17, 0 }
  0x18   : > { %s1042_s7 = smul.u32 (!%p263_p8), 24, %s269_s5  ;;  %p321_p9 = scmp.lt.s32.totalorder (!%p263_p8), %s319_s6, 143 }
  0x1a   : > { %s1280_s12 = scalar_lea.vmem (!%p263_p8), [#allocation3], %s1042_s7 }
  0x1c   : > { %s1374_s6 = smov (!%p321_p9, %s319_s6), 143  ;;  %357 = sbr.rel (%p978_p10) target bundleno = 36 (0x24), region = 66 }
  0x1d   : > { %s1038_s8 = sshll.u32 %s1374_s6, 3 }
  0x1e   : > { %s1278_s11 = scalar_lea.vmem %s1363_s1, %s1038_s8 }
  0x21   : > { %v1201_v4 = vmov 0.0  }
  0x22   : > { %358 = vst [vmem:[#allocation2 + $0x10] sm:$0xff] %v1201_v4  ;;  %359 = vst [vmem:[#allocation2] sm:$0xff] %v1201_v4 }
  0x23   : > { %360 = vst [vmem:[#allocation2 + $0x18] sm:$0xff] %v1201_v4  ;;  %361 = vst [vmem:[#allocation2 + $0x8] sm:$0xff] %v1201_v4 }
  0x24 PF: > { %v1085_v5 = vld [vmem:[%s1278_s11 + $0x74] ss:$8 sps:$4 sm:$0xff]   ;;  %v1087_v6 = vld [vmem:[%s1278_s11 + $0x70] ss:$8 sps:$4 sm:$0xff]   ;;  %v1202_v7 = vmov 0   ;;  %p1030_p11 = scmp.ne.s32.totalorder %s1191_s17, 2 }
  0x25   : > { %749 = vmatprep.mubr.bf16.mxu1 %v1202_v7  ;;  %674 = vmatprep.subr.bf16.mxu0 %v1085_v5  ;;  %v1088_v8 = vld [vmem:[%s1278_s11 + $0x64] ss:$8 sps:$4 sm:$0xff]   ;;  %v1090_v9 = vld [vmem:[%s1278_s11 + $0x60] ss:$8 sps:$4 sm:$0xff]   ;;  %v1091_v10 = vld [vmem:[%s1278_s11 + $0x54] ss:$8 sps:$4 sm:$0xff]  }
  0x26   : > { %675 = vmatpush1.bf16.msra.mxu0 %v1087_v6  ;;  %v1093_v11 = vld [vmem:[%s1278_s11 + $0x50] ss:$8 sps:$4 sm:$0xff]   ;;  %v1094_v12 = vld [vmem:[%s1278_s11 + $0x44] ss:$8 sps:$4 sm:$0xff]   ;;  %v1106_v13 = vld [vmem:[%s1278_s11 + $0x174] ss:$8 sps:$4 sm:$0xff]  }
  0x27   : > { %676 = vmatprep.subr.bf16.mxu0 %v1088_v8  ;;  %v1108_v14 = vld [vmem:[%s1278_s11 + $0x170] ss:$8 sps:$4 sm:$0xff]   ;;  %v1096_v15 = vld [vmem:[%s1278_s11 + $0x40] ss:$8 sps:$4 sm:$0xff]   ;;  %v1097_v16 = vld [vmem:[%s1278_s11 + $0x34] ss:$8 sps:$4 sm:$0xff]   ;;  %717 = vmatprep.subr.bf16.mxu1 %v1106_v13 }
  0x28   : > { %v1112_v17 = vld [vmem:[%s1278_s11 + $0x164] ss:$8 sps:$4 sm:$0xff]   ;;  %718 = vmatpush1.bf16.msra.mxu1 %v1108_v14  ;;  %v1114_v18 = vld [vmem:[%s1278_s11 + $0x160] ss:$8 sps:$4 sm:$0xff]   ;;  %v1099_v19 = vld [vmem:[%s1278_s11 + $0x30] ss:$8 sps:$4 sm:$0xff]  }
  0x29   : > { %719 = vmatprep.subr.bf16.mxu1 %v1112_v17  ;;  %v1118_v20 = vld [vmem:[%s1278_s11 + $0x154] ss:$8 sps:$4 sm:$0xff]   ;;  %v1100_v21 = vld [vmem:[%s1278_s11 + $0x24] ss:$8 sps:$4 sm:$0xff]   ;;  %v1120_v22 = vld [vmem:[%s1278_s11 + $0x150] ss:$8 sps:$4 sm:$0xff]  }
  0x2a   : > { %677 = vmatpush1.bf16.msra.mxu0 %v1090_v9  ;;  %v1124_v23 = vld [vmem:[%s1278_s11 + $0x144] ss:$8 sps:$4 sm:$0xff]   ;;  %v1102_v24 = vld [vmem:[%s1278_s11 + $0x20] ss:$8 sps:$4 sm:$0xff]   ;;  %v1103_v25 = vld [vmem:[%s1278_s11 + $0x14] ss:$8 sps:$4 sm:$0xff]  }
  0x2b   : > { %678 = vmatprep.subr.bf16.mxu0 %v1091_v10  ;;  %v1126_v26 = vld [vmem:[%s1278_s11 + $0x140] ss:$8 sps:$4 sm:$0xff]   ;;  %v1130_v27 = vld [vmem:[%s1278_s11 + $0x134] ss:$8 sps:$4 sm:$0xff]   ;;  %v1105_v28 = vld [vmem:[%s1278_s11 + $0x10] ss:$8 sps:$4 sm:$0xff]  }
  0x2c   : > { %720 = vmatpush1.bf16.msra.mxu1 %v1114_v18  ;;  %v1109_v29 = vld [vmem:[%s1278_s11 + $0x4] ss:$8 sps:$4 sm:$0xff]   ;;  %v1132_v30 = vld [vmem:[%s1278_s11 + $0x130] ss:$8 sps:$4 sm:$0xff]   ;;  %v1111_v32 = vld [vmem:[%s1278_s11] ss:$8 sps:$4 sm:$0xff]  }
  0x2d   : > { %721 = vmatprep.subr.bf16.mxu1 %v1118_v20  ;;  %v1136_v31 = vld [vmem:[%s1278_s11 + $0x124] ss:$8 sps:$4 sm:$0xff]   ;;  %v1115_v33 = vld [vmem:[%s1278_s11 + $0xf4] ss:$8 sps:$4 sm:$0xff]   ;;  %v1138_v34 = vld [vmem:[%s1278_s11 + $0x120] ss:$8 sps:$4 sm:$0xff]  }
  0x2e   : > { %679 = vmatpush1.bf16.msra.mxu0 %v1093_v11  ;;  %v1142_v35 = vld [vmem:[%s1278_s11 + $0x114] ss:$8 sps:$4 sm:$0xff]   ;;  %v1117_v36 = vld [vmem:[%s1278_s11 + $0xf0] ss:$8 sps:$4 sm:$0xff]   ;;  %v1121_v37 = vld [vmem:[%s1278_s11 + $0xe4] ss:$8 sps:$4 sm:$0xff]  }
  0x2f   : > { %680 = vmatprep.subr.bf16.mxu0 %v1094_v12  ;;  %v1144_v38 = vld [vmem:[%s1278_s11 + $0x110] ss:$8 sps:$4 sm:$0xff]   ;;  %v1148_v39 = vld [vmem:[%s1278_s11 + $0x104] ss:$8 sps:$4 sm:$0xff]   ;;  %v1123_v41 = vld [vmem:[%s1278_s11 + $0xe0] ss:$8 sps:$4 sm:$0xff]  }
  0x30   : > { %722 = vmatpush1.bf16.msra.mxu1 %v1120_v22  ;;  %v1160_v40 = vld [vmem:[%s1280_s12 + $0x4] ss:$12 sps:$4 sm:$0xff]   ;;  %v1154_v46 = vld [vmem:[%s1280_s12 + $0x8] ss:$12 sps:$4 sm:$0xff]   ;;  %v1158_v56 = vld [vmem:[%s1280_s12] ss:$12 sps:$4 sm:$0xff]  }
  0x31   : > { %723 = vmatprep.subr.bf16.mxu1 %v1124_v23  ;;  %v1127_v42 = vld [vmem:[%s1278_s11 + $0xd4] ss:$8 sps:$4 sm:$0xff]   ;;  %706 = vmatprep.mubr.bf16.mxu0 %v1160_v40  ;;  %v1150_v43 = vld [vmem:[%s1278_s11 + $0x100] ss:$8 sps:$4 sm:$0xff]   ;;  %v1129_v44 = vld [vmem:[%s1278_s11 + $0xd0] ss:$8 sps:$4 sm:$0xff]  }
  0x32   : > { %681 = vmatpush1.bf16.msra.mxu0 %v1096_v15  ;;  %v1133_v45 = vld [vmem:[%s1278_s11 + $0xc4] ss:$8 sps:$4 sm:$0xff]   ;;  %v1135_v47 = vld [vmem:[%s1278_s11 + $0xc0] ss:$8 sps:$4 sm:$0xff]   ;;  %v1139_v48 = vld [vmem:[%s1278_s11 + $0xb4] ss:$8 sps:$4 sm:$0xff]  }
  0x33   : > { %682 = vmatprep.subr.bf16.mxu0 %v1097_v16  ;;  %v1141_v49 = vld [vmem:[%s1278_s11 + $0xb0] ss:$8 sps:$4 sm:$0xff]   ;;  %v1145_v50 = vld [vmem:[%s1278_s11 + $0xa4] ss:$8 sps:$4 sm:$0xff]   ;;  %v1147_v51 = vld [vmem:[%s1278_s11 + $0xa0] ss:$8 sps:$4 sm:$0xff]  }
  0x34   : > { %724 = vmatpush1.bf16.msra.mxu1 %v1126_v26  ;;  %v1151_v52 = vld [vmem:[%s1278_s11 + $0x94] ss:$8 sps:$4 sm:$0xff]   ;;  %v1153_v53 = vld [vmem:[%s1278_s11 + $0x90] ss:$8 sps:$4 sm:$0xff]   ;;  %v1155_v54 = vld [vmem:[%s1278_s11 + $0x84] ss:$8 sps:$4 sm:$0xff]  }
  0x35   : > { %725 = vmatprep.subr.bf16.mxu1 %v1130_v27  ;;  %v1157_v55 = vld [vmem:[%s1278_s11 + $0x80] ss:$8 sps:$4 sm:$0xff]   ;;  %v362_v59 = vld [vmem:[#allocation2 + $0x10] sm:$0xff]  ;;  %v364_v3 = vld [vmem:[#allocation2 + $0x18] sm:$0xff] }
  0x36   : > { %683 = vmatpush1.bf16.msra.mxu0 %v1099_v19  ;;  %v363_v63 = vld [vmem:[#allocation2] sm:$0xff]  ;;  %v365_v8 = vld [vmem:[#allocation2 + $0x8] sm:$0xff] }
  0x37   : > { %684 = vmatprep.subr.bf16.mxu0 %v1100_v21 }
  0x38   : > { %726 = vmatpush1.bf16.msra.mxu1 %v1132_v30 }
  0x39   : > { %727 = vmatprep.subr.bf16.mxu1 %v1136_v31 }
  0x3a   : > { %685 = vmatpush1.bf16.msra.mxu0 %v1102_v24 }
  0x3b   : > { %686 = vmatprep.subr.bf16.mxu0 %v1103_v25 }
  0x3c   : > { %728 = vmatpush1.bf16.msra.mxu1 %v1138_v34 }
  0x3d   : > { %729 = vmatprep.subr.bf16.mxu1 %v1142_v35 }
  0x3e   : > { %687 = vmatpush1.bf16.msra.mxu0 %v1105_v28 }
  0x3f   : > { %688 = vmatprep.subr.bf16.mxu0 %v1109_v29 }
  0x40   : > { %730 = vmatpush1.bf16.msra.mxu1 %v1144_v38 }
  0x41   : > { %731 = vmatprep.subr.bf16.mxu1 %v1148_v39 }
  0x42   : > { %689 = vmatpush1.bf16.msra.mxu0 %v1111_v32 }
  0x43   : > { %690 = vmatprep.subr.bf16.mxu0 %v1115_v33 }
  0x44   : > { %732 = vmatpush1.bf16.msra.mxu1 %v1150_v43 }
  0x46   : > { %691 = vmatpush2.bf16.msra.mxu0 %v1117_v36 }
  0x47   : > { %692 = vmatprep.subr.bf16.mxu0 %v1121_v37  ;;  %750 = vmatmul.mubr.bf16.vlgmr.msra.gmra.mxu1 %v1154_v46 }
  0x4a   : > { %693 = vmatpush2.bf16.msra.mxu0 %v1123_v41 }
  0x4b   : > { %694 = vmatprep.subr.bf16.mxu0 %v1127_v42 }
  0x4e   : > { %695 = vmatpush2.bf16.msra.mxu0 %v1129_v44 }
  0x4f   : > { %696 = vmatprep.subr.bf16.mxu0 %v1133_v45 }
  0x52   : > { %697 = vmatpush2.bf16.msra.mxu0 %v1135_v47 }
  0x53   : > { %698 = vmatprep.subr.bf16.mxu0 %v1139_v48 }
  0x56   : > { %699 = vmatpush2.bf16.msra.mxu0 %v1141_v49 }
  0x57   : > { %700 = vmatprep.subr.bf16.mxu0 %v1145_v50 }
  0x5a   : > { %701 = vmatpush2.bf16.msra.mxu0 %v1147_v51 }
  0x5b   : > { %702 = vmatprep.subr.bf16.mxu0 %v1151_v52 }
  0x5e   : > { %703 = vmatpush2.bf16.msra.mxu0 %v1153_v53 }
  0x5f   : > { %704 = vmatprep.subr.bf16.mxu0 %v1155_v54 }
  0x62   : > { %705 = vmatpush2.bf16.msra.mxu0 %v1157_v55 }
  0x65   : > { %707 = vmatmul.mubr.bf16.vlgmr.msra.gmra.mxu0 %v1158_v56 }
 0x107   : > { %v751_v57 = vpop.f32.mrf.mxu1 }
 0x109   : > { %v753_v58 = vpop.f32.mrf.mxu1 }
 0x10b   : > { %v755_v62 = vpop.f32.mrf.mxu1 }
 0x10d   : > { %v757_v7 = vpop.f32.mrf.mxu1 }
 0x125   : > { %v708_v60 = vpop.f32.mrf.mxu0 }
 0x126   : > { %v752_v61 = vadd.f32 %v751_v57, %v708_v60 }
 0x127   : > { %v710_v0 = vpop.f32.mrf.mxu0 }
 0x128   : > { %v760_v1 = vadd.f32 %v752_v61, %v362_v59  ;;  %v754_v2 = vadd.f32 %v753_v58, %v710_v0 }
 0x129   : > { %v712_v4 = vpop.f32.mrf.mxu0 }
 0x12a   : > { %764 = vst [vmem:[#allocation2 + $0x10] sm:$0xff] %v760_v1  ;;  %v761_v5 = vadd.f32 %v754_v2, %v363_v63  ;;  %v756_v6 = vadd.f32 %v755_v62, %v712_v4 }
 0x12b   : > { %v714_v9 = vpop.f32.mrf.mxu0 }
 0x12c   : > { %765 = vst [vmem:[#allocation2] sm:$0xff] %v761_v5  ;;  %v762_v10 = vadd.f32 %v756_v6, %v364_v3  ;;  %v758_v11 = vadd.f32 %v757_v7, %v714_v9  ;;  %771 = sbr.rel (%p1030_p11) target bundleno = 322 (0x142), region = 70 }
 0x12e   : > { %766 = vst [vmem:[#allocation2 + $0x18] sm:$0xff] %v762_v10  ;;  %v763_v12 = vadd.f32 %v758_v11, %v365_v8 }
 0x130   : > { %767 = vst [vmem:[#allocation2 + $0x8] sm:$0xff] %v763_v12 }
 0x131   : > { %v778_v13 = vlaneseq  ;;  %v776_v15 = vld [vmem:[%s1364_s2] sm:$0x3]  ;;  %v772_v17 = vld [vmem:[#allocation2 + $0x10] sm:$0xff] }
 0x132   : > { %v792_v16 = vld [vmem:[%s1365_s3] sm:$0x3] }
 0x133   : > { %v779_v14 = vshrl.u32 %v778_v13, 7  ;;  %v773_v20 = vld [vmem:[#allocation2] sm:$0xff] }
 0x135   : > { %v780_v18 = vsub.s32 0, %v779_v14  ;;  %v784_v19 = vsub.s32 1, %v779_v14  ;;  %v774_v21 = vld [vmem:[#allocation2 + $0x18] sm:$0xff] }
 0x137   : > { %v775_v22 = vld [vmem:[#allocation2 + $0x8] sm:$0xff]  ;;  %v781_v23 = vrot.slane %v776_v15, %v780_v18  ;;  %v785_v24 = vrot.slane %v776_v15, %v784_v19  ;;  %v797_v25 = vrot.slane %v792_v16, %v780_v18  ;;  %v801_v26 = vrot.slane %v792_v16, %v784_v19 }
 0x139   : > { %v788_v27 = vmul.f32 %v781_v23, %v772_v17  ;;  %v789_v28 = vmul.f32 %v785_v24, %v773_v20  ;;  %v790_v29 = vmul.f32 %v781_v23, %v774_v21  ;;  %v791_v30 = vmul.f32 %v785_v24, %v775_v22 }
 0x13b   : > { %v804_v31 = vadd.f32 %v797_v25, %v788_v27  ;;  %v805_v32 = vadd.f32 %v801_v26, %v789_v28  ;;  %v806_v33 = vadd.f32 %v797_v25, %v790_v29  ;;  %v807_v34 = vadd.f32 %v801_v26, %v791_v30 }
 0x13d   : > { %v808_v35 = vmax.f32 %v804_v31, 0.0  ;;  %v809_v36 = vmax.f32 %v805_v32, 0.0  ;;  %v810_v37 = vmax.f32 %v806_v33, 0.0  ;;  %v811_v38 = vmax.f32 %v807_v34, 0.0 }
 0x13f   : > { %v1039_v39 = vpack.c.bf16 %v809_v36, %v808_v35  ;;  %v1040_v40 = vpack.c.bf16 %v811_v38, %v810_v37 }
 0x141   : > { %824 = vst [vmem:[%s1366_s4] sm:$0xff] %v1039_v39  ;;  %825 = vst [vmem:[%s1366_s4 + $0x8] sm:$0xff] %v1040_v40 }
 0x142 PF: > { %s14_s19 = sadd.s32 1, %s1199_s19   ;;  %s1367_s15 = smov %s1187_s16 }
 0x143   : > { %p11_p12 = scmp.ge.s32.totalorder %s14_s19, 5   ;;  %s1368_s16 = smov %s1263_s23 }
 0x144   : > { %s1369_s17 = smov %s1195_s18  ;;  %s1370_s18 = smov %s1372_s20 }
 0x145   :  { %13 = sbr.rel (!%p11_p12) target bundleno = 3 (0x3), region = 120 }

// kernel: resnet_byol_forward.32
= control target key start
LH: loop header
LB: loop body
LE: loop exit
PB: predicated region body
PF: predicated region fallthrough
CT: control target
= control target key end

     0   :  { %v289_v1 = vmov 0   ;;  %v194_v18 = vlaneseq  ;;  %s378_s1 = inlined_call_operand.vmem [shape: bf16[128,256], index: 1, kind: input, shape index: {}]   ;;  %s379_s0 = inlined_call_operand.vmem [shape: bf16[16,128], index: 0, kind: input, shape index: {}]   ;;  %s380_s2 = inlined_call_operand.vmem [shape: f32[1,256], index: 2, kind: input, shape index: {}]   ;;  %s381_s3 = inlined_call_operand.vmem [shape: f32[1,256], index: 3, kind: input, shape index: {}]   ;;  %s382_s4 = inlined_call_operand.vmem [shape: bf16[16,256], index: 4, kind: output, shape index: {}]  }
   0x1   :  { %v264_v0 = vld [vmem:[%s378_s1 + $0x74] ss:$8 sps:$4 sm:$0xff]   ;;  %166 = vmatprep.mubr.bf16.mxu0 %v289_v1  ;;  %v266_v2 = vld [vmem:[%s378_s1 + $0x70] ss:$8 sps:$4 sm:$0xff]   ;;  %v267_v3 = vld [vmem:[%s378_s1 + $0x64] ss:$8 sps:$4 sm:$0xff]  }
   0x2   :  { %134 = vmatprep.subr.bf16.mxu0 %v264_v0  ;;  %v269_v4 = vld [vmem:[%s378_s1 + $0x60] ss:$8 sps:$4 sm:$0xff]   ;;  %v270_v5 = vld [vmem:[%s378_s1 + $0x54] ss:$8 sps:$4 sm:$0xff]   ;;  %v272_v6 = vld [vmem:[%s378_s1 + $0x50] ss:$8 sps:$4 sm:$0xff]  }
   0x3   :  { %135 = vmatpush1.bf16.msra.mxu0 %v266_v2  ;;  %v273_v7 = vld [vmem:[%s378_s1 + $0x44] ss:$8 sps:$4 sm:$0xff]   ;;  %v275_v8 = vld [vmem:[%s378_s1 + $0x40] ss:$8 sps:$4 sm:$0xff]   ;;  %v276_v9 = vld [vmem:[%s378_s1 + $0x34] ss:$8 sps:$4 sm:$0xff]  }
   0x4   :  { %136 = vmatprep.subr.bf16.mxu0 %v267_v3  ;;  %v278_v10 = vld [vmem:[%s378_s1 + $0x30] ss:$8 sps:$4 sm:$0xff]   ;;  %v279_v11 = vld [vmem:[%s378_s1 + $0x24] ss:$8 sps:$4 sm:$0xff]   ;;  %v281_v12 = vld [vmem:[%s378_s1 + $0x20] ss:$8 sps:$4 sm:$0xff]  }
   0x5   :  { %v282_v13 = vld [vmem:[%s378_s1 + $0x14] ss:$8 sps:$4 sm:$0xff]   ;;  %v284_v14 = vld [vmem:[%s378_s1 + $0x10] ss:$8 sps:$4 sm:$0xff]   ;;  %v285_v15 = vld [vmem:[%s378_s1 + $0x4] ss:$8 sps:$4 sm:$0xff]  }
   0x6   :  { %v287_v16 = vld [vmem:[%s378_s1] ss:$8 sps:$4 sm:$0xff]   ;;  %v195_v19 = vshrl.u32 %v194_v18, 7 }
   0x7   :  { %137 = vmatpush1.bf16.msra.mxu0 %v269_v4  ;;  %v288_v17 = vld [vmem:[%s379_s0] sm:$0xff]  }
   0x8   :  { %138 = vmatprep.subr.bf16.mxu0 %v270_v5  ;;  %v196_v20 = vsub.s32 0, %v195_v19  ;;  %v192_v21 = vld [vmem:[%s380_s2] sm:$0x3]  ;;  %v200_v22 = vsub.s32 1, %v195_v19 }
   0x9   :  { %v208_v24 = vld [vmem:[%s381_s3] sm:$0x3] }
   0xa   :  { %v197_v23 = vrot.slane %v192_v21, %v196_v20  ;;  %v201_v25 = vrot.slane %v192_v21, %v200_v22  ;;  %v213_v28 = vrot.slane %v208_v24, %v196_v20  ;;  %v217_v29 = vrot.slane %v208_v24, %v200_v22 }
   0xb   :  { %139 = vmatpush1.bf16.msra.mxu0 %v272_v6 }
   0xc   :  { %140 = vmatprep.subr.bf16.mxu0 %v273_v7 }
   0xf   :  { %141 = vmatpush1.bf16.msra.mxu0 %v275_v8 }
  0x10   :  { %142 = vmatprep.subr.bf16.mxu0 %v276_v9 }
  0x13   :  { %143 = vmatpush1.bf16.msra.mxu0 %v278_v10 }
  0x14   :  { %144 = vmatprep.subr.bf16.mxu0 %v279_v11 }
  0x17   :  { %145 = vmatpush1.bf16.msra.mxu0 %v281_v12 }
  0x18   :  { %146 = vmatprep.subr.bf16.mxu0 %v282_v13 }
  0x1b   :  { %147 = vmatpush1.bf16.msra.mxu0 %v284_v14 }
  0x1c   :  { %148 = vmatprep.subr.bf16.mxu0 %v285_v15 }
  0x1f   :  { %149 = vmatpush1.bf16.msra.mxu0 %v287_v16 }
  0x22   :  { %167 = vmatmul.mubr.bf16.vlgmr.msra.gmra.mxu0 %v288_v17 }
  0xe2   :  { %v168_v26 = vpop.f32.mrf.mxu0 }
  0xe3   :  { %v204_v27 = vmul.f32 %v197_v23, %v168_v26 }
  0xe4   :  { %v170_v30 = vpop.f32.mrf.mxu0 }
  0xe5   :  { %v205_v31 = vmul.f32 %v201_v25, %v170_v30  ;;  %v220_v33 = vadd.f32 %v213_v28, %v204_v27 }
  0xe6   :  { %v172_v32 = vpop.f32.mrf.mxu0 }
  0xe7   :  { %v221_v34 = vadd.f32 %v217_v29, %v205_v31  ;;  %v206_v35 = vmul.f32 %v197_v23, %v172_v32 }
  0xe8   :  { %v174_v36 = vpop.f32.mrf.mxu0 }
  0xe9   :  { %v261_v37 = vpack.c.bf16 %v221_v34, %v220_v33  ;;  %v207_v38 = vmul.f32 %v201_v25, %v174_v36  ;;  %v222_v39 = vadd.f32 %v213_v28, %v206_v35 }
  0xeb   :  { %236 = vst [vmem:[%s382_s4] sm:$0xff] %v261_v37  ;;  %v223_v40 = vadd.f32 %v217_v29, %v207_v38 }
  0xed   :  { %v262_v41 = vpack.c.bf16 %v223_v40, %v222_v39 }
  0xef   :  { %237 = vst [vmem:[%s382_s4 + $0x8] sm:$0xff] %v262_v41 }

// kernel: resnet_byol_forward.34
= control target key start
LH: loop header
LB: loop body
LE: loop exit
PB: predicated region body
PF: predicated region fallthrough
CT: control target
= control target key end

     0   :  { %s1686_s15 = smov 0   ;;  %s1688_s16 = smov 0   ;;  %s1871_s0 = inlined_call_operand.vmem [shape: bf16[16,2304], index: 0, kind: input, shape index: {}]   ;;  %s1872_s1 = inlined_call_operand.vmem [shape: bf16[2304,256], index: 1, kind: input, shape index: {}]   ;;  %s1873_s2 = inlined_call_operand.vmem [shape: f32[1,256], index: 2, kind: input, shape index: {}]   ;;  %s1874_s3 = inlined_call_operand.vmem [shape: f32[1,256], index: 3, kind: input, shape index: {}]   ;;  %s1875_s4 = inlined_call_operand.vmem [shape: bf16[16,256], index: 4, kind: output, shape index: {}]  }
   0x1   :  { %s1690_s17 = smov 0   ;;  %s1692_s18 = smov 0  }
   0x2   :  { %s1694_s19 = smov 0  }
   0x3 LB: > { %s26_s20 = sadd.s32 1, %s1654_s18  ;;  %p49_p1 = scmp.ne.s32.totalorder %s1646_s16, %s1642_s15  ;;  %s1658_s19 = sphi %s1694_s19, %s14_s19   ;;  %s1654_s18 = sphi %s1692_s18, %s1879_s18   ;;  %s1650_s17 = sphi %s1690_s17, %s1878_s17   ;;  %s1646_s16 = sphi %s1688_s16, %s1877_s16   ;;  %s1642_s15 = sphi %s1686_s15, %s1876_s15  }
   0x4   : > { %p27_p0 = scmp.ge.s32.totalorder %s26_s20, 3  ;;  %p50_p2 = scmp.eq.s32.totalorder %s1658_s19, 0 }
   0x5   : > { %s42_s22 = sadd.s32 1, %s1646_s16  ;;  %p1305_p5 = scmp.ge.s32.totalorder %s1658_s19, 3 }
   0x6   : > { %s1881_s20 = smov (%p27_p0, %s26_s20), 0  ;;  %p51_p3 = por %p50_p2, %p49_p1 }
   0x7   : > { %s38_s21 = ssub.s32 %s1654_s18, %s1881_s20  ;;  %199 = sbr.rel (%p1305_p5) target bundleno = 20 (0x14), region = 24 }
   0x8   : > { %p40_p4 = scmp.eq.s32.totalorder %s38_s21, 0 }
   0xa   : > { %s1721_s23 = scalar_select %p40_p4, %s1646_s16, %s42_s22  }
   0xc   : > { %202 = sbr.rel (!%p51_p3) target bundleno = 20 (0x14), region = 28  ;;  %s204_s24 = sand.u32 (%p51_p3), 1, %s1646_s16  }
   0xd   : > { %s1420_s25 = smul.u32 (%p51_p3), 24, %s1654_s18 }
   0xe   : > { %s1424_s26 = smul.u32 (%p51_p3), 48, %s204_s24 }
   0xf   : > { %s212_s29 = scalar_lea.vmem (%p51_p3), %s1871_s0, %s1420_s25 }
  0x10   : > { %v225_v0 = vld [vmem:[%s212_s29] sm:$0xff] (%p51_p3)  ;;  %v227_v1 = vld [vmem:[%s212_s29 + $0x8] sm:$0xff] (%p51_p3)  ;;  %v229_v2 = vld [vmem:[%s212_s29 + $0x10] sm:$0xff] (%p51_p3)  ;;  %s206_s30 = scalar_lea.vmem (%p51_p3), [#allocation3], %s1424_s26 }
  0x11   : > { %226 = vst [vmem:[%s206_s30] sm:$0xff] %v225_v0  ;;  %228 = vst [vmem:[%s206_s30 + $0x8] sm:$0xff] %v227_v1  ;;  %v231_v3 = vld [vmem:[%s212_s29 + $0x48] sm:$0xff]  ;;  %v233_v4 = vld [vmem:[%s212_s29 + $0x50] sm:$0xff] }
  0x12   : > { %230 = vst [vmem:[%s206_s30 + $0x10] sm:$0xff] %v229_v2  ;;  %v235_v5 = vld [vmem:[%s212_s29 + $0x58] sm:$0xff]  ;;  %232 = vst [vmem:[%s206_s30 + $0x18] sm:$0xff] %v231_v3 }
  0x13   : > { %234 = vst [vmem:[%s206_s30 + $0x20] sm:$0xff] %v233_v4  ;;  %236 = vst [vmem:[%s206_s30 + $0x28] sm:$0xff] %v235_v5 }
  0x14 PF: > { %p1307_p6 = scmp.ge.s32.totalorder %s1658_s19, 1  ;;  %p256_p7 = scmp.lt.s32.totalorder %s1658_s19, 4 }
  0x16   : > { %p257_p8 = pnand %p1307_p6, %p256_p7 }
  0x17   : > { %s263_s5 = sand.u32 (!%p257_p8), 1, %s1642_s15   ;;  %s313_s6 = smul.u32 (!%p257_p8), 96, %s1650_s17 }
  0x18   : > { %260 = sbr.rel (%p257_p8) target bundleno = 387 (0x183), region = 55  ;;  %p1310_p10 = scmp.ne.s32.totalorder (!%p257_p8), %s1650_s17, 0 }
  0x19   : > { %s1425_s7 = smul.u32 (!%p257_p8), 48, %s263_s5  ;;  %p315_p9 = scmp.lt.s32.totalorder (!%p257_p8), %s313_s6, 287 }
  0x1b   : > { %s1738_s12 = scalar_lea.vmem (!%p257_p8), [#allocation3], %s1425_s7 }
  0x1d   : > { %s1883_s6 = smov (!%p315_p9, %s313_s6), 287  ;;  %350 = sbr.rel (%p1310_p10) target bundleno = 37 (0x25), region = 63 }
  0x1e   : > { %s1421_s8 = sshll.u32 %s1883_s6, 3 }
  0x1f   : > { %s1736_s11 = scalar_lea.vmem %s1872_s1, %s1421_s8 }
  0x22   : > { %v1660_v6 = vmov 0.0  }
  0x23   : > { %351 = vst [vmem:[#allocation2 + $0x10] sm:$0xff] %v1660_v6  ;;  %352 = vst [vmem:[#allocation2] sm:$0xff] %v1660_v6 }
  0x24   : > { %353 = vst [vmem:[#allocation2 + $0x18] sm:$0xff] %v1660_v6  ;;  %354 = vst [vmem:[#allocation2 + $0x8] sm:$0xff] %v1660_v6 }
  0x25 PF: > { %v1467_v7 = vld [vmem:[%s1736_s11 + $0x74] ss:$8 sps:$4 sm:$0xff]   ;;  %v1471_v9 = vld [vmem:[%s1736_s11 + $0x70] ss:$8 sps:$4 sm:$0xff]   ;;  %v1473_v11 = vld [vmem:[%s1736_s11 + $0x64] ss:$8 sps:$4 sm:$0xff]  }
  0x26   : > { %v1469_v8 = vld [vmem:[%s1736_s11 + $0x174] ss:$8 sps:$4 sm:$0xff]   ;;  %971 = vmatprep.subr.bf16.mxu0 %v1467_v7  ;;  %v1472_v10 = vld [vmem:[%s1736_s11 + $0x170] ss:$8 sps:$4 sm:$0xff]   ;;  %v1475_v12 = vld [vmem:[%s1736_s11 + $0x164] ss:$8 sps:$4 sm:$0xff]  }
  0x27   : > { %1014 = vmatprep.subr.bf16.mxu1 %v1469_v8  ;;  %972 = vmatpush1.bf16.msra.mxu0 %v1471_v9  ;;  %v1477_v13 = vld [vmem:[%s1736_s11 + $0x60] ss:$8 sps:$4 sm:$0xff]   ;;  %v1479_v15 = vld [vmem:[%s1736_s11 + $0x54] ss:$8 sps:$4 sm:$0xff]   ;;  %v1483_v17 = vld [vmem:[%s1736_s11 + $0x50] ss:$8 sps:$4 sm:$0xff]  }
  0x28   : > { %1015 = vmatpush1.bf16.msra.mxu1 %v1472_v10  ;;  %973 = vmatprep.subr.bf16.mxu0 %v1473_v11  ;;  %v1478_v14 = vld [vmem:[%s1736_s11 + $0x160] ss:$8 sps:$4 sm:$0xff]   ;;  %v1481_v16 = vld [vmem:[%s1736_s11 + $0x154] ss:$8 sps:$4 sm:$0xff]   ;;  %v1484_v18 = vld [vmem:[%s1736_s11 + $0x150] ss:$8 sps:$4 sm:$0xff]  }
  0x29   : > { %1016 = vmatprep.subr.bf16.mxu1 %v1475_v12  ;;  %v1485_v19 = vld [vmem:[%s1736_s11 + $0x44] ss:$8 sps:$4 sm:$0xff]   ;;  %v1489_v21 = vld [vmem:[%s1736_s11 + $0x40] ss:$8 sps:$4 sm:$0xff]   ;;  %v1491_v23 = vld [vmem:[%s1736_s11 + $0x34] ss:$8 sps:$4 sm:$0xff]  }
  0x2a   : > { %v1487_v20 = vld [vmem:[%s1736_s11 + $0x144] ss:$8 sps:$4 sm:$0xff]   ;;  %v1490_v22 = vld [vmem:[%s1736_s11 + $0x140] ss:$8 sps:$4 sm:$0xff]   ;;  %v1493_v24 = vld [vmem:[%s1736_s11 + $0x134] ss:$8 sps:$4 sm:$0xff]  }
  0x2b   : > { %974 = vmatpush1.bf16.msra.mxu0 %v1477_v13  ;;  %v1495_v25 = vld [vmem:[%s1736_s11 + $0x30] ss:$8 sps:$4 sm:$0xff]   ;;  %v1497_v27 = vld [vmem:[%s1736_s11 + $0x24] ss:$8 sps:$4 sm:$0xff]   ;;  %v1501_v29 = vld [vmem:[%s1736_s11 + $0x20] ss:$8 sps:$4 sm:$0xff]  }
  0x2c   : > { %1017 = vmatpush1.bf16.msra.mxu1 %v1478_v14  ;;  %975 = vmatprep.subr.bf16.mxu0 %v1479_v15  ;;  %v1496_v26 = vld [vmem:[%s1736_s11 + $0x130] ss:$8 sps:$4 sm:$0xff]   ;;  %v1499_v28 = vld [vmem:[%s1736_s11 + $0x124] ss:$8 sps:$4 sm:$0xff]   ;;  %v1502_v30 = vld [vmem:[%s1736_s11 + $0x120] ss:$8 sps:$4 sm:$0xff]  }
  0x2d   : > { %1018 = vmatprep.subr.bf16.mxu1 %v1481_v16  ;;  %v1503_v31 = vld [vmem:[%s1736_s11 + $0x14] ss:$8 sps:$4 sm:$0xff]   ;;  %v1507_v33 = vld [vmem:[%s1736_s11 + $0x10] ss:$8 sps:$4 sm:$0xff]   ;;  %v1509_v35 = vld [vmem:[%s1736_s11 + $0x4] ss:$8 sps:$4 sm:$0xff]  }
  0x2e   : > { %v1505_v32 = vld [vmem:[%s1736_s11 + $0x114] ss:$8 sps:$4 sm:$0xff]   ;;  %v1508_v34 = vld [vmem:[%s1736_s11 + $0x110] ss:$8 sps:$4 sm:$0xff]   ;;  %v1511_v36 = vld [vmem:[%s1736_s11 + $0x104] ss:$8 sps:$4 sm:$0xff]  }
  0x2f   : > { %976 = vmatpush1.bf16.msra.mxu0 %v1483_v17  ;;  %v1513_v37 = vld [vmem:[%s1736_s11] ss:$8 sps:$4 sm:$0xff]   ;;  %v1515_v39 = vld [vmem:[%s1736_s11 + $0xf4] ss:$8 sps:$4 sm:$0xff]   ;;  %v1519_v41 = vld [vmem:[%s1736_s11 + $0xf0] ss:$8 sps:$4 sm:$0xff]  }
  0x30   : > { %1019 = vmatpush1.bf16.msra.mxu1 %v1484_v18  ;;  %977 = vmatprep.subr.bf16.mxu0 %v1485_v19  ;;  %v1514_v38 = vld [vmem:[%s1736_s11 + $0x100] ss:$8 sps:$4 sm:$0xff]   ;;  %v1517_v40 = vld [vmem:[%s1736_s11 + $0x1f4] ss:$8 sps:$4 sm:$0xff]   ;;  %v1520_v42 = vld [vmem:[%s1736_s11 + $0x1f0] ss:$8 sps:$4 sm:$0xff]  }
  0x31   : > { %1020 = vmatprep.subr.bf16.mxu1 %v1487_v20  ;;  %v1521_v43 = vld [vmem:[%s1736_s11 + $0xe4] ss:$8 sps:$4 sm:$0xff]   ;;  %v1525_v45 = vld [vmem:[%s1736_s11 + $0xe0] ss:$8 sps:$4 sm:$0xff]   ;;  %v1527_v47 = vld [vmem:[%s1736_s11 + $0xd4] ss:$8 sps:$4 sm:$0xff]  }
  0x32   : > { %v1523_v44 = vld [vmem:[%s1736_s11 + $0x1e4] ss:$8 sps:$4 sm:$0xff]   ;;  %v1526_v46 = vld [vmem:[%s1736_s11 + $0x1e0] ss:$8 sps:$4 sm:$0xff]   ;;  %v1529_v48 = vld [vmem:[%s1736_s11 + $0x1d4] ss:$8 sps:$4 sm:$0xff]  }
  0x33   : > { %978 = vmatpush1.bf16.msra.mxu0 %v1489_v21  ;;  %v1531_v49 = vld [vmem:[%s1736_s11 + $0xd0] ss:$8 sps:$4 sm:$0xff]   ;;  %v1533_v51 = vld [vmem:[%s1736_s11 + $0xc4] ss:$8 sps:$4 sm:$0xff]   ;;  %v1537_v53 = vld [vmem:[%s1736_s11 + $0xc0] ss:$8 sps:$4 sm:$0xff]  }
  0x34   : > { %1021 = vmatpush1.bf16.msra.mxu1 %v1490_v22  ;;  %979 = vmatprep.subr.bf16.mxu0 %v1491_v23  ;;  %v1532_v50 = vld [vmem:[%s1736_s11 + $0x1d0] ss:$8 sps:$4 sm:$0xff]   ;;  %v1535_v52 = vld [vmem:[%s1736_s11 + $0x1c4] ss:$8 sps:$4 sm:$0xff]   ;;  %v1538_v54 = vld [vmem:[%s1736_s11 + $0x1c0] ss:$8 sps:$4 sm:$0xff]  }
  0x35   : > { %1022 = vmatprep.subr.bf16.mxu1 %v1493_v24  ;;  %v1539_v55 = vld [vmem:[%s1736_s11 + $0xb4] ss:$8 sps:$4 sm:$0xff]   ;;  %v1543_v59 = vld [vmem:[%s1736_s11 + $0xb0] ss:$8 sps:$4 sm:$0xff]   ;;  %v1545_v61 = vld [vmem:[%s1736_s11 + $0xa4] ss:$8 sps:$4 sm:$0xff]  }
  0x36   : > { %v1565_v56 = vld [vmem:[%s1738_s12 + $0x4] ss:$24 sps:$4 sm:$0xff]   ;;  %v1544_v60 = vld [vmem:[%s1736_s11 + $0x1b0] ss:$8 sps:$4 sm:$0xff]   ;;  %v1549_v63 = vld [vmem:[%s1736_s11 + $0xa0] ss:$8 sps:$4 sm:$0xff]  }
  0x37   : > { %980 = vmatpush1.bf16.msra.mxu0 %v1495_v25  ;;  %v1541_v57 = vld [vmem:[%s1736_s11 + $0x1b4] ss:$8 sps:$4 sm:$0xff]   ;;  %1003 = vmatprep.mubr.bf16.mxu0 %v1565_v56  ;;  %v1547_v62 = vld [vmem:[%s1736_s11 + $0x1a4] ss:$8 sps:$4 sm:$0xff]   ;;  %v1550_v0 = vld [vmem:[%s1736_s11 + $0x1a0] ss:$8 sps:$4 sm:$0xff]  }
  0x38   : > { %1023 = vmatpush1.bf16.msra.mxu1 %v1496_v26  ;;  %981 = vmatprep.subr.bf16.mxu0 %v1497_v27  ;;  %v1568_v58 = vld [vmem:[%s1738_s12 + $0xc] ss:$24 sps:$4 sm:$0xff]   ;;  %v1555_v3 = vld [vmem:[%s1736_s11 + $0x90] ss:$8 sps:$4 sm:$0xff]   ;;  %v1561_v7 = vld [vmem:[%s1736_s11 + $0x80] ss:$8 sps:$4 sm:$0xff]  }
  0x39   : > { %1024 = vmatprep.subr.bf16.mxu1 %v1499_v28  ;;  %1046 = vmatprep.mubr.bf16.mxu1 %v1568_v58  ;;  %v1551_v1 = vld [vmem:[%s1736_s11 + $0x94] ss:$8 sps:$4 sm:$0xff]   ;;  %v1556_v4 = vld [vmem:[%s1736_s11 + $0x190] ss:$8 sps:$4 sm:$0xff]   ;;  %v1557_v5 = vld [vmem:[%s1736_s11 + $0x84] ss:$8 sps:$4 sm:$0xff]  }
  0x3a   : > { %v1553_v2 = vld [vmem:[%s1736_s11 + $0x194] ss:$8 sps:$4 sm:$0xff]   ;;  %v1559_v6 = vld [vmem:[%s1736_s11 + $0x184] ss:$8 sps:$4 sm:$0xff]   ;;  %v1562_v8 = vld [vmem:[%s1736_s11 + $0x180] ss:$8 sps:$4 sm:$0xff]  }
  0x3b   : > { %982 = vmatpush1.bf16.msra.mxu0 %v1501_v29  ;;  %v1571_v9 = vld [vmem:[%s1736_s11 + $0x274] ss:$8 sps:$4 sm:$0xff]   ;;  %v1563_v10 = vld [vmem:[%s1738_s12] ss:$24 sps:$4 sm:$0xff]   ;;  %v1574_v13 = vld [vmem:[%s1736_s11 + $0x264] ss:$8 sps:$4 sm:$0xff]  }
  0x3c   : > { %1025 = vmatpush1.bf16.msra.mxu1 %v1502_v30  ;;  %983 = vmatprep.subr.bf16.mxu0 %v1503_v31  ;;  %v1566_v11 = vld [vmem:[%s1738_s12 + $0x8] ss:$24 sps:$4 sm:$0xff]   ;;  %v1619_v14 = vld [vmem:[%s1738_s12 + $0x14] ss:$24 sps:$4 sm:$0xff]   ;;  %p1413_p11 = scmp.ne.s32.totalorder %s1650_s17, 2 }
  0x3d   : > { %1026 = vmatprep.subr.bf16.mxu1 %v1505_v32  ;;  %v1569_v12 = vld [vmem:[%s1736_s11 + $0x270] ss:$8 sps:$4 sm:$0xff]   ;;  %v1572_v15 = vld [vmem:[%s1736_s11 + $0x260] ss:$8 sps:$4 sm:$0xff]   ;;  %v1577_v16 = vld [vmem:[%s1736_s11 + $0x254] ss:$8 sps:$4 sm:$0xff]  }
  0x3e   : > { %v1575_v17 = vld [vmem:[%s1736_s11 + $0x250] ss:$8 sps:$4 sm:$0xff]   ;;  %v1580_v18 = vld [vmem:[%s1736_s11 + $0x244] ss:$8 sps:$4 sm:$0xff]   ;;  %v1578_v19 = vld [vmem:[%s1736_s11 + $0x240] ss:$8 sps:$4 sm:$0xff]  }
  0x3f   : > { %984 = vmatpush1.bf16.msra.mxu0 %v1507_v33  ;;  %v1583_v20 = vld [vmem:[%s1736_s11 + $0x234] ss:$8 sps:$4 sm:$0xff]   ;;  %v1581_v21 = vld [vmem:[%s1736_s11 + $0x230] ss:$8 sps:$4 sm:$0xff]   ;;  %v1586_v22 = vld [vmem:[%s1736_s11 + $0x224] ss:$8 sps:$4 sm:$0xff]  }
  0x40   : > { %1027 = vmatpush1.bf16.msra.mxu1 %v1508_v34  ;;  %985 = vmatprep.subr.bf16.mxu0 %v1509_v35  ;;  %v1584_v23 = vld [vmem:[%s1736_s11 + $0x220] ss:$8 sps:$4 sm:$0xff]   ;;  %v1589_v24 = vld [vmem:[%s1736_s11 + $0x214] ss:$8 sps:$4 sm:$0xff]   ;;  %v1587_v25 = vld [vmem:[%s1736_s11 + $0x210] ss:$8 sps:$4 sm:$0xff]  }
  0x41   : > { %1028 = vmatprep.subr.bf16.mxu1 %v1511_v36  ;;  %v1592_v26 = vld [vmem:[%s1736_s11 + $0x204] ss:$8 sps:$4 sm:$0xff]   ;;  %v1590_v27 = vld [vmem:[%s1736_s11 + $0x200] ss:$8 sps:$4 sm:$0xff]   ;;  %v1595_v28 = vld [vmem:[%s1736_s11 + $0x2f4] ss:$8 sps:$4 sm:$0xff]  }
  0x42   : > { %v1593_v29 = vld [vmem:[%s1736_s11 + $0x2f0] ss:$8 sps:$4 sm:$0xff]   ;;  %v1598_v30 = vld [vmem:[%s1736_s11 + $0x2e4] ss:$8 sps:$4 sm:$0xff]   ;;  %v1596_v31 = vld [vmem:[%s1736_s11 + $0x2e0] ss:$8 sps:$4 sm:$0xff]  }
  0x43   : > { %986 = vmatpush1.bf16.msra.mxu0 %v1513_v37  ;;  %v1601_v32 = vld [vmem:[%s1736_s11 + $0x2d4] ss:$8 sps:$4 sm:$0xff]   ;;  %v1599_v33 = vld [vmem:[%s1736_s11 + $0x2d0] ss:$8 sps:$4 sm:$0xff]   ;;  %v1604_v34 = vld [vmem:[%s1736_s11 + $0x2c4] ss:$8 sps:$4 sm:$0xff]  }
  0x44   : > { %1029 = vmatpush1.bf16.msra.mxu1 %v1514_v38  ;;  %987 = vmatprep.subr.bf16.mxu0 %v1515_v39  ;;  %v1602_v35 = vld [vmem:[%s1736_s11 + $0x2c0] ss:$8 sps:$4 sm:$0xff]   ;;  %v1607_v36 = vld [vmem:[%s1736_s11 + $0x2b4] ss:$8 sps:$4 sm:$0xff]   ;;  %v1605_v37 = vld [vmem:[%s1736_s11 + $0x2b0] ss:$8 sps:$4 sm:$0xff]  }
  0x45   : > { %1030 = vmatprep.subr.bf16.mxu1 %v1517_v40  ;;  %v1610_v38 = vld [vmem:[%s1736_s11 + $0x2a4] ss:$8 sps:$4 sm:$0xff]   ;;  %v1608_v39 = vld [vmem:[%s1736_s11 + $0x2a0] ss:$8 sps:$4 sm:$0xff]   ;;  %v1613_v40 = vld [vmem:[%s1736_s11 + $0x294] ss:$8 sps:$4 sm:$0xff]  }
  0x46   : > { %v356_v58 = vld [vmem:[#allocation2] sm:$0xff] }
  0x47   : > { %988 = vmatpush2.bf16.msra.mxu0 %v1519_v41  ;;  %v1611_v41 = vld [vmem:[%s1736_s11 + $0x290] ss:$8 sps:$4 sm:$0xff]  }
  0x48   : > { %1031 = vmatpush2.bf16.msra.mxu1 %v1520_v42  ;;  %989 = vmatprep.subr.bf16.mxu0 %v1521_v43  ;;  %v1616_v42 = vld [vmem:[%s1736_s11 + $0x284] ss:$8 sps:$4 sm:$0xff]   ;;  %v1614_v43 = vld [vmem:[%s1736_s11 + $0x280] ss:$8 sps:$4 sm:$0xff]  }
  0x49   : > { %1032 = vmatprep.subr.bf16.mxu1 %v1523_v44  ;;  %v1617_v44 = vld [vmem:[%s1738_s12 + $0x10] ss:$24 sps:$4 sm:$0xff]  }
  0x4b   : > { %990 = vmatpush2.bf16.msra.mxu0 %v1525_v45 }
  0x4c   : > { %1033 = vmatpush2.bf16.msra.mxu1 %v1526_v46  ;;  %991 = vmatprep.subr.bf16.mxu0 %v1527_v47 }
  0x4d   : > { %1034 = vmatprep.subr.bf16.mxu1 %v1529_v48 }
  0x4f   : > { %992 = vmatpush2.bf16.msra.mxu0 %v1531_v49 }
  0x50   : > { %1035 = vmatpush2.bf16.msra.mxu1 %v1532_v50  ;;  %993 = vmatprep.subr.bf16.mxu0 %v1533_v51 }
  0x51   : > { %1036 = vmatprep.subr.bf16.mxu1 %v1535_v52 }
  0x53   : > { %994 = vmatpush2.bf16.msra.mxu0 %v1537_v53  ;;  %v355_v53 = vld [vmem:[#allocation2 + $0x10] sm:$0xff] }
  0x54   : > { %1037 = vmatpush2.bf16.msra.mxu1 %v1538_v54  ;;  %995 = vmatprep.subr.bf16.mxu0 %v1539_v55 }
  0x55   : > { %1038 = vmatprep.subr.bf16.mxu1 %v1541_v57 }
  0x57   : > { %996 = vmatpush2.bf16.msra.mxu0 %v1543_v59 }
  0x58   : > { %1039 = vmatpush2.bf16.msra.mxu1 %v1544_v60  ;;  %997 = vmatprep.subr.bf16.mxu0 %v1545_v61 }
  0x59   : > { %1040 = vmatprep.subr.bf16.mxu1 %v1547_v62 }
  0x5b   : > { %998 = vmatpush2.bf16.msra.mxu0 %v1549_v63  ;;  %v357_v63 = vld [vmem:[#allocation2 + $0x18] sm:$0xff] }
  0x5c   : > { %1041 = vmatpush2.bf16.msra.mxu1 %v1550_v0  ;;  %999 = vmatprep.subr.bf16.mxu0 %v1551_v1 }
  0x5d   : > { %1042 = vmatprep.subr.bf16.mxu1 %v1553_v2 }
  0x5f   : > { %1000 = vmatpush2.bf16.msra.mxu0 %v1555_v3 }
  0x60   : > { %1043 = vmatpush2.bf16.msra.mxu1 %v1556_v4  ;;  %1001 = vmatprep.subr.bf16.mxu0 %v1557_v5  ;;  %v358_v4 = vld [vmem:[#allocation2 + $0x8] sm:$0xff] }
  0x61   : > { %1044 = vmatprep.subr.bf16.mxu1 %v1559_v6 }
  0x63   : > { %1002 = vmatpush2.bf16.msra.mxu0 %v1561_v7 }
  0x64   : > { %1045 = vmatpush2.bf16.msra.mxu1 %v1562_v8  ;;  %1057 = vmatprep.subr.bf16.mxu0 %v1571_v9 }
  0x66   : > { %1004 = vmatmul.mubr.bf16.vlgmr.msra.gmra.mxu0 %v1563_v10 }
  0x67   : > { %1047 = vmatmul.mubr.bf16.vlgmr.msra.gmra.mxu1 %v1566_v11  ;;  %1058 = vmatpush1.bf16.msra.mxu0 %v1569_v12 }
  0x68   : > { %1059 = vmatprep.subr.bf16.mxu0 %v1574_v13  ;;  %1089 = vmatprep.mubr.bf16.mxu0 %v1619_v14 }
  0x6b   : > { %1060 = vmatpush1.bf16.msra.mxu0 %v1572_v15 }
  0x6c   : > { %1061 = vmatprep.subr.bf16.mxu0 %v1577_v16 }
  0x6f   : > { %1062 = vmatpush1.bf16.msra.mxu0 %v1575_v17 }
  0x70   : > { %1063 = vmatprep.subr.bf16.mxu0 %v1580_v18 }
  0x73   : > { %1064 = vmatpush1.bf16.msra.mxu0 %v1578_v19 }
  0x74   : > { %1065 = vmatprep.subr.bf16.mxu0 %v1583_v20 }
  0x77   : > { %1066 = vmatpush1.bf16.msra.mxu0 %v1581_v21 }
  0x78   : > { %1067 = vmatprep.subr.bf16.mxu0 %v1586_v22 }
  0x7b   : > { %1068 = vmatpush1.bf16.msra.mxu0 %v1584_v23 }
  0x7c   : > { %1069 = vmatprep.subr.bf16.mxu0 %v1589_v24 }
  0x7f   : > { %1070 = vmatpush1.bf16.msra.mxu0 %v1587_v25 }
  0x80   : > { %1071 = vmatprep.subr.bf16.mxu0 %v1592_v26 }
  0x83   : > { %1072 = vmatpush1.bf16.msra.mxu0 %v1590_v27 }
  0x84   : > { %1073 = vmatprep.subr.bf16.mxu0 %v1595_v28 }
  0x87   : > { %1074 = vmatpush2.bf16.msra.mxu0 %v1593_v29 }
  0x88   : > { %1075 = vmatprep.subr.bf16.mxu0 %v1598_v30 }
  0x8b   : > { %1076 = vmatpush2.bf16.msra.mxu0 %v1596_v31 }
  0x8c   : > { %1077 = vmatprep.subr.bf16.mxu0 %v1601_v32 }
  0x8f   : > { %1078 = vmatpush2.bf16.msra.mxu0 %v1599_v33 }
  0x90   : > { %1079 = vmatprep.subr.bf16.mxu0 %v1604_v34 }
  0x93   : > { %1080 = vmatpush2.bf16.msra.mxu0 %v1602_v35 }
  0x94   : > { %1081 = vmatprep.subr.bf16.mxu0 %v1607_v36 }
  0x97   : > { %1082 = vmatpush2.bf16.msra.mxu0 %v1605_v37 }
  0x98   : > { %1083 = vmatprep.subr.bf16.mxu0 %v1610_v38 }
  0x9b   : > { %1084 = vmatpush2.bf16.msra.mxu0 %v1608_v39 }
  0x9c   : > { %1085 = vmatprep.subr.bf16.mxu0 %v1613_v40 }
  0x9f   : > { %1086 = vmatpush2.bf16.msra.mxu0 %v1611_v41 }
  0xa0   : > { %1087 = vmatprep.subr.bf16.mxu0 %v1616_v42 }
  0xa3   : > { %1088 = vmatpush2.bf16.msra.mxu0 %v1614_v43 }
  0xa6   : > { %1090 = vmatmul.mubr.bf16.vlgmr.msra.gmra.mxu0 %v1617_v44 }
 0x126   : > { %v1005_v45 = vpop.f32.mrf.mxu0 }
 0x127   : > { %v1048_v46 = vpop.f32.mrf.mxu1 }
 0x128   : > { %v1007_v47 = vpop.f32.mrf.mxu0  ;;  %v1049_v52 = vadd.f32 %v1048_v46, %v1005_v45 }
 0x129   : > { %v1050_v48 = vpop.f32.mrf.mxu1 }
 0x12a   : > { %v1009_v49 = vpop.f32.mrf.mxu0  ;;  %v1051_v55 = vadd.f32 %v1050_v48, %v1007_v47 }
 0x12b   : > { %v1052_v50 = vpop.f32.mrf.mxu1 }
 0x12c   : > { %v1011_v51 = vpop.f32.mrf.mxu0  ;;  %v1053_v60 = vadd.f32 %v1052_v50, %v1009_v49 }
 0x12d   : > { %v1054_v57 = vpop.f32.mrf.mxu1 }
 0x12e   : > { %v1055_v1 = vadd.f32 %v1054_v57, %v1011_v51 }
 0x166   : > { %v1091_v54 = vpop.f32.mrf.mxu0 }
 0x167   : > { %v1092_v56 = vadd.f32 %v1091_v54, %v1049_v52 }
 0x168   : > { %v1093_v59 = vpop.f32.mrf.mxu0 }
 0x169   : > { %v1100_v61 = vadd.f32 %v1092_v56, %v355_v53  ;;  %v1094_v62 = vadd.f32 %v1093_v59, %v1051_v55 }
 0x16a   : > { %v1095_v0 = vpop.f32.mrf.mxu0 }
 0x16b   : > { %1104 = vst [vmem:[#allocation2 + $0x10] sm:$0xff] %v1100_v61  ;;  %v1101_v2 = vadd.f32 %v1094_v62, %v356_v58  ;;  %v1096_v3 = vadd.f32 %v1095_v0, %v1053_v60 }
 0x16c   : > { %v1097_v5 = vpop.f32.mrf.mxu0 }
 0x16d   : > { %1105 = vst [vmem:[#allocation2] sm:$0xff] %v1101_v2  ;;  %v1102_v6 = vadd.f32 %v1096_v3, %v357_v63  ;;  %v1098_v7 = vadd.f32 %v1097_v5, %v1055_v1  ;;  %1111 = sbr.rel (%p1413_p11) target bundleno = 387 (0x183), region = 67 }
 0x16f   : > { %1106 = vst [vmem:[#allocation2 + $0x18] sm:$0xff] %v1102_v6  ;;  %v1103_v8 = vadd.f32 %v1098_v7, %v358_v4 }
 0x171   : > { %1107 = vst [vmem:[#allocation2 + $0x8] sm:$0xff] %v1103_v8 }
 0x172   : > { %v1118_v9 = vlaneseq  ;;  %v1116_v11 = vld [vmem:[%s1873_s2] sm:$0x3]  ;;  %v1112_v13 = vld [vmem:[#allocation2 + $0x10] sm:$0xff] }
 0x173   : > { %v1132_v12 = vld [vmem:[%s1874_s3] sm:$0x3] }
 0x174   : > { %v1119_v10 = vshrl.u32 %v1118_v9, 7  ;;  %v1113_v16 = vld [vmem:[#allocation2] sm:$0xff] }
 0x176   : > { %v1120_v14 = vsub.s32 0, %v1119_v10  ;;  %v1124_v15 = vsub.s32 1, %v1119_v10  ;;  %v1114_v17 = vld [vmem:[#allocation2 + $0x18] sm:$0xff] }
 0x178   : > { %v1115_v18 = vld [vmem:[#allocation2 + $0x8] sm:$0xff]  ;;  %v1121_v19 = vrot.slane %v1116_v11, %v1120_v14  ;;  %v1125_v20 = vrot.slane %v1116_v11, %v1124_v15  ;;  %v1137_v21 = vrot.slane %v1132_v12, %v1120_v14  ;;  %v1141_v22 = vrot.slane %v1132_v12, %v1124_v15 }
 0x17a   : > { %v1128_v23 = vmul.f32 %v1121_v19, %v1112_v13  ;;  %v1129_v24 = vmul.f32 %v1125_v20, %v1113_v16  ;;  %v1130_v25 = vmul.f32 %v1121_v19, %v1114_v17  ;;  %v1131_v26 = vmul.f32 %v1125_v20, %v1115_v18 }
 0x17c   : > { %v1144_v27 = vadd.f32 %v1137_v21, %v1128_v23  ;;  %v1145_v28 = vadd.f32 %v1141_v22, %v1129_v24  ;;  %v1146_v29 = vadd.f32 %v1137_v21, %v1130_v25  ;;  %v1147_v30 = vadd.f32 %v1141_v22, %v1131_v26 }
 0x17e   : > { %v1148_v31 = vmax.f32 %v1144_v27, 0.0  ;;  %v1149_v32 = vmax.f32 %v1145_v28, 0.0  ;;  %v1150_v33 = vmax.f32 %v1146_v29, 0.0  ;;  %v1151_v34 = vmax.f32 %v1147_v30, 0.0 }
 0x180   : > { %v1422_v35 = vpack.c.bf16 %v1149_v32, %v1148_v31  ;;  %v1423_v36 = vpack.c.bf16 %v1151_v34, %v1150_v33 }
 0x182   : > { %1164 = vst [vmem:[%s1875_s4] sm:$0xff] %v1422_v35  ;;  %1165 = vst [vmem:[%s1875_s4 + $0x8] sm:$0xff] %v1423_v36 }
 0x183 PF: > { %s14_s19 = sadd.s32 1, %s1658_s19   ;;  %s1876_s15 = smov %s1646_s16 }
 0x184   : > { %p11_p12 = scmp.ge.s32.totalorder %s14_s19, 5   ;;  %s1877_s16 = smov %s1721_s23 }
 0x185   : > { %s1878_s17 = smov %s1654_s18  ;;  %s1879_s18 = smov %s1881_s20 }
 0x186   :  { %13 = sbr.rel (!%p11_p12) target bundleno = 3 (0x3), region = 111 }

// kernel: resnet_byol_forward.33
= control target key start
LH: loop header
LB: loop body
LE: loop exit
PB: predicated region body
PF: predicated region fallthrough
CT: control target
= control target key end

     0   :  { %s1791_s18 = smov 0   ;;  %s1793_s19 = smov 0   ;;  %s1982_s0 = inlined_call_operand.vmem [shape: bf16[16,2304], index: 0, kind: input, shape index: {}]   ;;  %s1983_s1 = inlined_call_operand.vmem [shape: bf16[2304,256], index: 1, kind: input, shape index: {}]   ;;  %s1984_s2 = inlined_call_operand.vmem [shape: f32[1,256], index: 2, kind: input, shape index: {}]   ;;  %s1985_s3 = inlined_call_operand.vmem [shape: f32[1,256], index: 3, kind: input, shape index: {}]   ;;  %s1986_s4 = inlined_call_operand.vmem [shape: bf16[16,256], index: 4, kind: input, shape index: {}]   ;;  %s1987_s5 = inlined_call_operand.vmem [shape: bf16[16,256], index: 5, kind: output, shape index: {}]  }
   0x1   :  { %s1795_s20 = smov 0   ;;  %s1797_s21 = smov 0  }
   0x2   :  { %s1799_s22 = smov 0  }
   0x3 LB: > { %s27_s23 = sadd.s32 1, %s1754_s21  ;;  %p50_p1 = scmp.ne.s32.totalorder %s1746_s19, %s1742_s18  ;;  %s1758_s22 = sphi %s1799_s22, %s15_s22   ;;  %s1754_s21 = sphi %s1797_s21, %s1991_s21   ;;  %s1750_s20 = sphi %s1795_s20, %s1990_s20   ;;  %s1746_s19 = sphi %s1793_s19, %s1989_s19   ;;  %s1742_s18 = sphi %s1791_s18, %s1988_s18  }
   0x4   : > { %p28_p0 = scmp.ge.s32.totalorder %s27_s23, 3  ;;  %p51_p2 = scmp.eq.s32.totalorder %s1758_s22, 0 }
   0x5   : > { %s43_s25 = sadd.s32 1, %s1746_s19  ;;  %p1405_p5 = scmp.ge.s32.totalorder %s1758_s22, 3 }
   0x6   : > { %s1993_s23 = smov (%p28_p0, %s27_s23), 0  ;;  %p52_p3 = por %p51_p2, %p50_p1 }
   0x7   : > { %s39_s24 = ssub.s32 %s1754_s21, %s1993_s23  ;;  %243 = sbr.rel (%p1405_p5) target bundleno = 20 (0x14), region = 28 }
   0x8   : > { %p41_p4 = scmp.eq.s32.totalorder %s39_s24, 0 }
   0xa   : > { %s1826_s26 = scalar_select %p41_p4, %s1746_s19, %s43_s25  }
   0xc   : > { %246 = sbr.rel (!%p52_p3) target bundleno = 20 (0x14), region = 32  ;;  %s248_s27 = sand.u32 (%p52_p3), 1, %s1746_s19  }
   0xd   : > { %s1520_s28 = smul.u32 (%p52_p3), 24, %s1754_s21 }
   0xe   : > { %s1524_s29 = smul.u32 (%p52_p3), 48, %s248_s27 }
   0xf   : > { %s256_s7 = scalar_lea.vmem (%p52_p3), %s1982_s0, %s1520_s28 }
  0x10   : > { %v269_v0 = vld [vmem:[%s256_s7] sm:$0xff] (%p52_p3)  ;;  %v271_v1 = vld [vmem:[%s256_s7 + $0x8] sm:$0xff] (%p52_p3)  ;;  %v273_v2 = vld [vmem:[%s256_s7 + $0x10] sm:$0xff] (%p52_p3)  ;;  %s250_s8 = scalar_lea.vmem (%p52_p3), [#allocation3], %s1524_s29 }
  0x11   : > { %270 = vst [vmem:[%s250_s8] sm:$0xff] %v269_v0  ;;  %272 = vst [vmem:[%s250_s8 + $0x8] sm:$0xff] %v271_v1  ;;  %v275_v3 = vld [vmem:[%s256_s7 + $0x48] sm:$0xff]  ;;  %v277_v4 = vld [vmem:[%s256_s7 + $0x50] sm:$0xff] }
  0x12   : > { %274 = vst [vmem:[%s250_s8 + $0x10] sm:$0xff] %v273_v2  ;;  %v279_v5 = vld [vmem:[%s256_s7 + $0x58] sm:$0xff]  ;;  %276 = vst [vmem:[%s250_s8 + $0x18] sm:$0xff] %v275_v3 }
  0x13   : > { %278 = vst [vmem:[%s250_s8 + $0x20] sm:$0xff] %v277_v4  ;;  %280 = vst [vmem:[%s250_s8 + $0x28] sm:$0xff] %v279_v5 }
  0x14 PF: > { %p1407_p6 = scmp.ge.s32.totalorder %s1758_s22, 1  ;;  %p300_p7 = scmp.lt.s32.totalorder %s1758_s22, 4 }
  0x16   : > { %p301_p8 = pnand %p1407_p6, %p300_p7 }
  0x17   : > { %s307_s9 = sand.u32 (!%p301_p8), 1, %s1742_s18   ;;  %s369_s10 = smul.u32 (!%p301_p8), 96, %s1750_s20 }
  0x18   : > { %304 = sbr.rel (%p301_p8) target bundleno = 389 (0x185), region = 59  ;;  %p1410_p10 = scmp.ne.s32.totalorder (!%p301_p8), %s1750_s20, 0 }
  0x19   : > { %s1525_s11 = smul.u32 (!%p301_p8), 48, %s307_s9  ;;  %p371_p9 = scmp.lt.s32.totalorder (!%p301_p8), %s369_s10, 287 }
  0x1b   : > { %s1843_s16 = scalar_lea.vmem (!%p301_p8), [#allocation3], %s1525_s11 }
  0x1d   : > { %s1995_s10 = smov (!%p371_p9, %s369_s10), 287  ;;  %418 = sbr.rel (%p1410_p10) target bundleno = 37 (0x25), region = 67 }
  0x1e   : > { %s1521_s12 = sshll.u32 %s1995_s10, 3 }
  0x1f   : > { %s1841_s15 = scalar_lea.vmem %s1983_s1, %s1521_s12 }
  0x22   : > { %v1760_v6 = vmov 0.0  }
  0x23   : > { %419 = vst [vmem:[#allocation2 + $0x10] sm:$0xff] %v1760_v6  ;;  %420 = vst [vmem:[#allocation2] sm:$0xff] %v1760_v6 }
  0x24   : > { %421 = vst [vmem:[#allocation2 + $0x18] sm:$0xff] %v1760_v6  ;;  %422 = vst [vmem:[#allocation2 + $0x8] sm:$0xff] %v1760_v6 }
  0x25 PF: > { %v1567_v7 = vld [vmem:[%s1841_s15 + $0x74] ss:$8 sps:$4 sm:$0xff]   ;;  %v1571_v9 = vld [vmem:[%s1841_s15 + $0x70] ss:$8 sps:$4 sm:$0xff]   ;;  %v1573_v11 = vld [vmem:[%s1841_s15 + $0x64] ss:$8 sps:$4 sm:$0xff]  }
  0x26   : > { %v1569_v8 = vld [vmem:[%s1841_s15 + $0x174] ss:$8 sps:$4 sm:$0xff]   ;;  %1039 = vmatprep.subr.bf16.mxu0 %v1567_v7  ;;  %v1572_v10 = vld [vmem:[%s1841_s15 + $0x170] ss:$8 sps:$4 sm:$0xff]   ;;  %v1575_v12 = vld [vmem:[%s1841_s15 + $0x164] ss:$8 sps:$4 sm:$0xff]  }
  0x27   : > { %1082 = vmatprep.subr.bf16.mxu1 %v1569_v8  ;;  %1040 = vmatpush1.bf16.msra.mxu0 %v1571_v9  ;;  %v1577_v13 = vld [vmem:[%s1841_s15 + $0x60] ss:$8 sps:$4 sm:$0xff]   ;;  %v1579_v15 = vld [vmem:[%s1841_s15 + $0x54] ss:$8 sps:$4 sm:$0xff]   ;;  %v1583_v17 = vld [vmem:[%s1841_s15 + $0x50] ss:$8 sps:$4 sm:$0xff]  }
  0x28   : > { %1083 = vmatpush1.bf16.msra.mxu1 %v1572_v10  ;;  %1041 = vmatprep.subr.bf16.mxu0 %v1573_v11  ;;  %v1578_v14 = vld [vmem:[%s1841_s15 + $0x160] ss:$8 sps:$4 sm:$0xff]   ;;  %v1581_v16 = vld [vmem:[%s1841_s15 + $0x154] ss:$8 sps:$4 sm:$0xff]   ;;  %v1584_v18 = vld [vmem:[%s1841_s15 + $0x150] ss:$8 sps:$4 sm:$0xff]  }
  0x29   : > { %1084 = vmatprep.subr.bf16.mxu1 %v1575_v12  ;;  %v1585_v19 = vld [vmem:[%s1841_s15 + $0x44] ss:$8 sps:$4 sm:$0xff]   ;;  %v1589_v21 = vld [vmem:[%s1841_s15 + $0x40] ss:$8 sps:$4 sm:$0xff]   ;;  %v1591_v23 = vld [vmem:[%s1841_s15 + $0x34] ss:$8 sps:$4 sm:$0xff]  }
  0x2a   : > { %v1587_v20 = vld [vmem:[%s1841_s15 + $0x144] ss:$8 sps:$4 sm:$0xff]   ;;  %v1590_v22 = vld [vmem:[%s1841_s15 + $0x140] ss:$8 sps:$4 sm:$0xff]   ;;  %v1593_v24 = vld [vmem:[%s1841_s15 + $0x134] ss:$8 sps:$4 sm:$0xff]  }
  0x2b   : > { %1042 = vmatpush1.bf16.msra.mxu0 %v1577_v13  ;;  %v1595_v25 = vld [vmem:[%s1841_s15 + $0x30] ss:$8 sps:$4 sm:$0xff]   ;;  %v1597_v27 = vld [vmem:[%s1841_s15 + $0x24] ss:$8 sps:$4 sm:$0xff]   ;;  %v1601_v29 = vld [vmem:[%s1841_s15 + $0x20] ss:$8 sps:$4 sm:$0xff]  }
  0x2c   : > { %1085 = vmatpush1.bf16.msra.mxu1 %v1578_v14  ;;  %1043 = vmatprep.subr.bf16.mxu0 %v1579_v15  ;;  %v1596_v26 = vld [vmem:[%s1841_s15 + $0x130] ss:$8 sps:$4 sm:$0xff]   ;;  %v1599_v28 = vld [vmem:[%s1841_s15 + $0x124] ss:$8 sps:$4 sm:$0xff]   ;;  %v1602_v30 = vld [vmem:[%s1841_s15 + $0x120] ss:$8 sps:$4 sm:$0xff]  }
  0x2d   : > { %1086 = vmatprep.subr.bf16.mxu1 %v1581_v16  ;;  %v1603_v31 = vld [vmem:[%s1841_s15 + $0x14] ss:$8 sps:$4 sm:$0xff]   ;;  %v1607_v33 = vld [vmem:[%s1841_s15 + $0x10] ss:$8 sps:$4 sm:$0xff]   ;;  %v1609_v35 = vld [vmem:[%s1841_s15 + $0x4] ss:$8 sps:$4 sm:$0xff]  }
  0x2e   : > { %v1605_v32 = vld [vmem:[%s1841_s15 + $0x114] ss:$8 sps:$4 sm:$0xff]   ;;  %v1608_v34 = vld [vmem:[%s1841_s15 + $0x110] ss:$8 sps:$4 sm:$0xff]   ;;  %v1611_v36 = vld [vmem:[%s1841_s15 + $0x104] ss:$8 sps:$4 sm:$0xff]  }
  0x2f   : > { %1044 = vmatpush1.bf16.msra.mxu0 %v1583_v17  ;;  %v1613_v37 = vld [vmem:[%s1841_s15] ss:$8 sps:$4 sm:$0xff]   ;;  %v1615_v39 = vld [vmem:[%s1841_s15 + $0xf4] ss:$8 sps:$4 sm:$0xff]   ;;  %v1619_v41 = vld [vmem:[%s1841_s15 + $0xf0] ss:$8 sps:$4 sm:$0xff]  }
  0x30   : > { %1087 = vmatpush1.bf16.msra.mxu1 %v1584_v18  ;;  %1045 = vmatprep.subr.bf16.mxu0 %v1585_v19  ;;  %v1614_v38 = vld [vmem:[%s1841_s15 + $0x100] ss:$8 sps:$4 sm:$0xff]   ;;  %v1617_v40 = vld [vmem:[%s1841_s15 + $0x1f4] ss:$8 sps:$4 sm:$0xff]   ;;  %v1620_v42 = vld [vmem:[%s1841_s15 + $0x1f0] ss:$8 sps:$4 sm:$0xff]  }
  0x31   : > { %1088 = vmatprep.subr.bf16.mxu1 %v1587_v20  ;;  %v1621_v43 = vld [vmem:[%s1841_s15 + $0xe4] ss:$8 sps:$4 sm:$0xff]   ;;  %v1625_v45 = vld [vmem:[%s1841_s15 + $0xe0] ss:$8 sps:$4 sm:$0xff]   ;;  %v1627_v47 = vld [vmem:[%s1841_s15 + $0xd4] ss:$8 sps:$4 sm:$0xff]  }
  0x32   : > { %v1623_v44 = vld [vmem:[%s1841_s15 + $0x1e4] ss:$8 sps:$4 sm:$0xff]   ;;  %v1626_v46 = vld [vmem:[%s1841_s15 + $0x1e0] ss:$8 sps:$4 sm:$0xff]   ;;  %v1629_v48 = vld [vmem:[%s1841_s15 + $0x1d4] ss:$8 sps:$4 sm:$0xff]  }
  0x33   : > { %1046 = vmatpush1.bf16.msra.mxu0 %v1589_v21  ;;  %v1631_v49 = vld [vmem:[%s1841_s15 + $0xd0] ss:$8 sps:$4 sm:$0xff]   ;;  %v1633_v51 = vld [vmem:[%s1841_s15 + $0xc4] ss:$8 sps:$4 sm:$0xff]   ;;  %v1637_v53 = vld [vmem:[%s1841_s15 + $0xc0] ss:$8 sps:$4 sm:$0xff]  }
  0x34   : > { %1089 = vmatpush1.bf16.msra.mxu1 %v1590_v22  ;;  %1047 = vmatprep.subr.bf16.mxu0 %v1591_v23  ;;  %v1632_v50 = vld [vmem:[%s1841_s15 + $0x1d0] ss:$8 sps:$4 sm:$0xff]   ;;  %v1635_v52 = vld [vmem:[%s1841_s15 + $0x1c4] ss:$8 sps:$4 sm:$0xff]   ;;  %v1638_v54 = vld [vmem:[%s1841_s15 + $0x1c0] ss:$8 sps:$4 sm:$0xff]  }
  0x35   : > { %1090 = vmatprep.subr.bf16.mxu1 %v1593_v24  ;;  %v1639_v55 = vld [vmem:[%s1841_s15 + $0xb4] ss:$8 sps:$4 sm:$0xff]   ;;  %v1643_v59 = vld [vmem:[%s1841_s15 + $0xb0] ss:$8 sps:$4 sm:$0xff]   ;;  %v1645_v61 = vld [vmem:[%s1841_s15 + $0xa4] ss:$8 sps:$4 sm:$0xff]  }
  0x36   : > { %v1665_v56 = vld [vmem:[%s1843_s16 + $0x4] ss:$24 sps:$4 sm:$0xff]   ;;  %v1644_v60 = vld [vmem:[%s1841_s15 + $0x1b0] ss:$8 sps:$4 sm:$0xff]   ;;  %v1649_v63 = vld [vmem:[%s1841_s15 + $0xa0] ss:$8 sps:$4 sm:$0xff]  }
  0x37   : > { %1048 = vmatpush1.bf16.msra.mxu0 %v1595_v25  ;;  %v1641_v57 = vld [vmem:[%s1841_s15 + $0x1b4] ss:$8 sps:$4 sm:$0xff]   ;;  %1071 = vmatprep.mubr.bf16.mxu0 %v1665_v56  ;;  %v1647_v62 = vld [vmem:[%s1841_s15 + $0x1a4] ss:$8 sps:$4 sm:$0xff]   ;;  %v1650_v0 = vld [vmem:[%s1841_s15 + $0x1a0] ss:$8 sps:$4 sm:$0xff]  }
  0x38   : > { %1091 = vmatpush1.bf16.msra.mxu1 %v1596_v26  ;;  %1049 = vmatprep.subr.bf16.mxu0 %v1597_v27  ;;  %v1668_v58 = vld [vmem:[%s1843_s16 + $0xc] ss:$24 sps:$4 sm:$0xff]   ;;  %v1655_v3 = vld [vmem:[%s1841_s15 + $0x90] ss:$8 sps:$4 sm:$0xff]   ;;  %v1661_v7 = vld [vmem:[%s1841_s15 + $0x80] ss:$8 sps:$4 sm:$0xff]  }
  0x39   : > { %1092 = vmatprep.subr.bf16.mxu1 %v1599_v28  ;;  %1114 = vmatprep.mubr.bf16.mxu1 %v1668_v58  ;;  %v1651_v1 = vld [vmem:[%s1841_s15 + $0x94] ss:$8 sps:$4 sm:$0xff]   ;;  %v1656_v4 = vld [vmem:[%s1841_s15 + $0x190] ss:$8 sps:$4 sm:$0xff]   ;;  %v1657_v5 = vld [vmem:[%s1841_s15 + $0x84] ss:$8 sps:$4 sm:$0xff]  }
  0x3a   : > { %v1653_v2 = vld [vmem:[%s1841_s15 + $0x194] ss:$8 sps:$4 sm:$0xff]   ;;  %v1659_v6 = vld [vmem:[%s1841_s15 + $0x184] ss:$8 sps:$4 sm:$0xff]   ;;  %v1662_v8 = vld [vmem:[%s1841_s15 + $0x180] ss:$8 sps:$4 sm:$0xff]  }
  0x3b   : > { %1050 = vmatpush1.bf16.msra.mxu0 %v1601_v29  ;;  %v1671_v9 = vld [vmem:[%s1841_s15 + $0x274] ss:$8 sps:$4 sm:$0xff]   ;;  %v1663_v10 = vld [vmem:[%s1843_s16] ss:$24 sps:$4 sm:$0xff]   ;;  %v1674_v13 = vld [vmem:[%s1841_s15 + $0x264] ss:$8 sps:$4 sm:$0xff]  }
  0x3c   : > { %1093 = vmatpush1.bf16.msra.mxu1 %v1602_v30  ;;  %1051 = vmatprep.subr.bf16.mxu0 %v1603_v31  ;;  %v1666_v11 = vld [vmem:[%s1843_s16 + $0x8] ss:$24 sps:$4 sm:$0xff]   ;;  %v1719_v14 = vld [vmem:[%s1843_s16 + $0x14] ss:$24 sps:$4 sm:$0xff]   ;;  %p1513_p11 = scmp.ne.s32.totalorder %s1750_s20, 2 }
  0x3d   : > { %1094 = vmatprep.subr.bf16.mxu1 %v1605_v32  ;;  %v1669_v12 = vld [vmem:[%s1841_s15 + $0x270] ss:$8 sps:$4 sm:$0xff]   ;;  %v1672_v15 = vld [vmem:[%s1841_s15 + $0x260] ss:$8 sps:$4 sm:$0xff]   ;;  %v1677_v16 = vld [vmem:[%s1841_s15 + $0x254] ss:$8 sps:$4 sm:$0xff]  }
  0x3e   : > { %v1675_v17 = vld [vmem:[%s1841_s15 + $0x250] ss:$8 sps:$4 sm:$0xff]   ;;  %v1680_v18 = vld [vmem:[%s1841_s15 + $0x244] ss:$8 sps:$4 sm:$0xff]   ;;  %v1678_v19 = vld [vmem:[%s1841_s15 + $0x240] ss:$8 sps:$4 sm:$0xff]  }
  0x3f   : > { %1052 = vmatpush1.bf16.msra.mxu0 %v1607_v33  ;;  %v1683_v20 = vld [vmem:[%s1841_s15 + $0x234] ss:$8 sps:$4 sm:$0xff]   ;;  %v1681_v21 = vld [vmem:[%s1841_s15 + $0x230] ss:$8 sps:$4 sm:$0xff]   ;;  %v1686_v22 = vld [vmem:[%s1841_s15 + $0x224] ss:$8 sps:$4 sm:$0xff]  }
  0x40   : > { %1095 = vmatpush1.bf16.msra.mxu1 %v1608_v34  ;;  %1053 = vmatprep.subr.bf16.mxu0 %v1609_v35  ;;  %v1684_v23 = vld [vmem:[%s1841_s15 + $0x220] ss:$8 sps:$4 sm:$0xff]   ;;  %v1689_v24 = vld [vmem:[%s1841_s15 + $0x214] ss:$8 sps:$4 sm:$0xff]   ;;  %v1687_v25 = vld [vmem:[%s1841_s15 + $0x210] ss:$8 sps:$4 sm:$0xff]  }
  0x41   : > { %1096 = vmatprep.subr.bf16.mxu1 %v1611_v36  ;;  %v1692_v26 = vld [vmem:[%s1841_s15 + $0x204] ss:$8 sps:$4 sm:$0xff]   ;;  %v1690_v27 = vld [vmem:[%s1841_s15 + $0x200] ss:$8 sps:$4 sm:$0xff]   ;;  %v1695_v28 = vld [vmem:[%s1841_s15 + $0x2f4] ss:$8 sps:$4 sm:$0xff]  }
  0x42   : > { %v1693_v29 = vld [vmem:[%s1841_s15 + $0x2f0] ss:$8 sps:$4 sm:$0xff]   ;;  %v1698_v30 = vld [vmem:[%s1841_s15 + $0x2e4] ss:$8 sps:$4 sm:$0xff]   ;;  %v1696_v31 = vld [vmem:[%s1841_s15 + $0x2e0] ss:$8 sps:$4 sm:$0xff]  }
  0x43   : > { %1054 = vmatpush1.bf16.msra.mxu0 %v1613_v37  ;;  %v1701_v32 = vld [vmem:[%s1841_s15 + $0x2d4] ss:$8 sps:$4 sm:$0xff]   ;;  %v1699_v33 = vld [vmem:[%s1841_s15 + $0x2d0] ss:$8 sps:$4 sm:$0xff]   ;;  %v1704_v34 = vld [vmem:[%s1841_s15 + $0x2c4] ss:$8 sps:$4 sm:$0xff]  }
  0x44   : > { %1097 = vmatpush1.bf16.msra.mxu1 %v1614_v38  ;;  %1055 = vmatprep.subr.bf16.mxu0 %v1615_v39  ;;  %v1702_v35 = vld [vmem:[%s1841_s15 + $0x2c0] ss:$8 sps:$4 sm:$0xff]   ;;  %v1707_v36 = vld [vmem:[%s1841_s15 + $0x2b4] ss:$8 sps:$4 sm:$0xff]   ;;  %v1705_v37 = vld [vmem:[%s1841_s15 + $0x2b0] ss:$8 sps:$4 sm:$0xff]  }
  0x45   : > { %1098 = vmatprep.subr.bf16.mxu1 %v1617_v40  ;;  %v1710_v38 = vld [vmem:[%s1841_s15 + $0x2a4] ss:$8 sps:$4 sm:$0xff]   ;;  %v1708_v39 = vld [vmem:[%s1841_s15 + $0x2a0] ss:$8 sps:$4 sm:$0xff]   ;;  %v1713_v40 = vld [vmem:[%s1841_s15 + $0x294] ss:$8 sps:$4 sm:$0xff]  }
  0x46   : > { %v424_v58 = vld [vmem:[#allocation2] sm:$0xff] }
  0x47   : > { %1056 = vmatpush2.bf16.msra.mxu0 %v1619_v41  ;;  %v1711_v41 = vld [vmem:[%s1841_s15 + $0x290] ss:$8 sps:$4 sm:$0xff]  }
  0x48   : > { %1099 = vmatpush2.bf16.msra.mxu1 %v1620_v42  ;;  %1057 = vmatprep.subr.bf16.mxu0 %v1621_v43  ;;  %v1716_v42 = vld [vmem:[%s1841_s15 + $0x284] ss:$8 sps:$4 sm:$0xff]   ;;  %v1714_v43 = vld [vmem:[%s1841_s15 + $0x280] ss:$8 sps:$4 sm:$0xff]  }
  0x49   : > { %1100 = vmatprep.subr.bf16.mxu1 %v1623_v44  ;;  %v1717_v44 = vld [vmem:[%s1843_s16 + $0x10] ss:$24 sps:$4 sm:$0xff]  }
  0x4b   : > { %1058 = vmatpush2.bf16.msra.mxu0 %v1625_v45 }
  0x4c   : > { %1101 = vmatpush2.bf16.msra.mxu1 %v1626_v46  ;;  %1059 = vmatprep.subr.bf16.mxu0 %v1627_v47 }
  0x4d   : > { %1102 = vmatprep.subr.bf16.mxu1 %v1629_v48 }
  0x4f   : > { %1060 = vmatpush2.bf16.msra.mxu0 %v1631_v49 }
  0x50   : > { %1103 = vmatpush2.bf16.msra.mxu1 %v1632_v50  ;;  %1061 = vmatprep.subr.bf16.mxu0 %v1633_v51 }
  0x51   : > { %1104 = vmatprep.subr.bf16.mxu1 %v1635_v52 }
  0x53   : > { %1062 = vmatpush2.bf16.msra.mxu0 %v1637_v53  ;;  %v423_v53 = vld [vmem:[#allocation2 + $0x10] sm:$0xff] }
  0x54   : > { %1105 = vmatpush2.bf16.msra.mxu1 %v1638_v54  ;;  %1063 = vmatprep.subr.bf16.mxu0 %v1639_v55 }
  0x55   : > { %1106 = vmatprep.subr.bf16.mxu1 %v1641_v57 }
  0x57   : > { %1064 = vmatpush2.bf16.msra.mxu0 %v1643_v59 }
  0x58   : > { %1107 = vmatpush2.bf16.msra.mxu1 %v1644_v60  ;;  %1065 = vmatprep.subr.bf16.mxu0 %v1645_v61 }
  0x59   : > { %1108 = vmatprep.subr.bf16.mxu1 %v1647_v62 }
  0x5b   : > { %1066 = vmatpush2.bf16.msra.mxu0 %v1649_v63  ;;  %v425_v63 = vld [vmem:[#allocation2 + $0x18] sm:$0xff] }
  0x5c   : > { %1109 = vmatpush2.bf16.msra.mxu1 %v1650_v0  ;;  %1067 = vmatprep.subr.bf16.mxu0 %v1651_v1 }
  0x5d   : > { %1110 = vmatprep.subr.bf16.mxu1 %v1653_v2 }
  0x5f   : > { %1068 = vmatpush2.bf16.msra.mxu0 %v1655_v3 }
  0x60   : > { %1111 = vmatpush2.bf16.msra.mxu1 %v1656_v4  ;;  %1069 = vmatprep.subr.bf16.mxu0 %v1657_v5  ;;  %v426_v4 = vld [vmem:[#allocation2 + $0x8] sm:$0xff] }
  0x61   : > { %1112 = vmatprep.subr.bf16.mxu1 %v1659_v6 }
  0x63   : > { %1070 = vmatpush2.bf16.msra.mxu0 %v1661_v7 }
  0x64   : > { %1113 = vmatpush2.bf16.msra.mxu1 %v1662_v8  ;;  %1125 = vmatprep.subr.bf16.mxu0 %v1671_v9 }
  0x66   : > { %1072 = vmatmul.mubr.bf16.vlgmr.msra.gmra.mxu0 %v1663_v10 }
  0x67   : > { %1115 = vmatmul.mubr.bf16.vlgmr.msra.gmra.mxu1 %v1666_v11  ;;  %1126 = vmatpush1.bf16.msra.mxu0 %v1669_v12 }
  0x68   : > { %1127 = vmatprep.subr.bf16.mxu0 %v1674_v13  ;;  %1157 = vmatprep.mubr.bf16.mxu0 %v1719_v14 }
  0x6b   : > { %1128 = vmatpush1.bf16.msra.mxu0 %v1672_v15 }
  0x6c   : > { %1129 = vmatprep.subr.bf16.mxu0 %v1677_v16 }
  0x6f   : > { %1130 = vmatpush1.bf16.msra.mxu0 %v1675_v17 }
  0x70   : > { %1131 = vmatprep.subr.bf16.mxu0 %v1680_v18 }
  0x73   : > { %1132 = vmatpush1.bf16.msra.mxu0 %v1678_v19 }
  0x74   : > { %1133 = vmatprep.subr.bf16.mxu0 %v1683_v20 }
  0x77   : > { %1134 = vmatpush1.bf16.msra.mxu0 %v1681_v21 }
  0x78   : > { %1135 = vmatprep.subr.bf16.mxu0 %v1686_v22 }
  0x7b   : > { %1136 = vmatpush1.bf16.msra.mxu0 %v1684_v23 }
  0x7c   : > { %1137 = vmatprep.subr.bf16.mxu0 %v1689_v24 }
  0x7f   : > { %1138 = vmatpush1.bf16.msra.mxu0 %v1687_v25 }
  0x80   : > { %1139 = vmatprep.subr.bf16.mxu0 %v1692_v26 }
  0x83   : > { %1140 = vmatpush1.bf16.msra.mxu0 %v1690_v27 }
  0x84   : > { %1141 = vmatprep.subr.bf16.mxu0 %v1695_v28 }
  0x87   : > { %1142 = vmatpush2.bf16.msra.mxu0 %v1693_v29 }
  0x88   : > { %1143 = vmatprep.subr.bf16.mxu0 %v1698_v30 }
  0x8b   : > { %1144 = vmatpush2.bf16.msra.mxu0 %v1696_v31 }
  0x8c   : > { %1145 = vmatprep.subr.bf16.mxu0 %v1701_v32 }
  0x8f   : > { %1146 = vmatpush2.bf16.msra.mxu0 %v1699_v33 }
  0x90   : > { %1147 = vmatprep.subr.bf16.mxu0 %v1704_v34 }
  0x93   : > { %1148 = vmatpush2.bf16.msra.mxu0 %v1702_v35 }
  0x94   : > { %1149 = vmatprep.subr.bf16.mxu0 %v1707_v36 }
  0x97   : > { %1150 = vmatpush2.bf16.msra.mxu0 %v1705_v37 }
  0x98   : > { %1151 = vmatprep.subr.bf16.mxu0 %v1710_v38 }
  0x9b   : > { %1152 = vmatpush2.bf16.msra.mxu0 %v1708_v39 }
  0x9c   : > { %1153 = vmatprep.subr.bf16.mxu0 %v1713_v40 }
  0x9f   : > { %1154 = vmatpush2.bf16.msra.mxu0 %v1711_v41 }
  0xa0   : > { %1155 = vmatprep.subr.bf16.mxu0 %v1716_v42 }
  0xa3   : > { %1156 = vmatpush2.bf16.msra.mxu0 %v1714_v43 }
  0xa6   : > { %1158 = vmatmul.mubr.bf16.vlgmr.msra.gmra.mxu0 %v1717_v44 }
 0x126   : > { %v1073_v45 = vpop.f32.mrf.mxu0 }
 0x127   : > { %v1116_v46 = vpop.f32.mrf.mxu1 }
 0x128   : > { %v1075_v47 = vpop.f32.mrf.mxu0  ;;  %v1117_v52 = vadd.f32 %v1116_v46, %v1073_v45 }
 0x129   : > { %v1118_v48 = vpop.f32.mrf.mxu1 }
 0x12a   : > { %v1077_v49 = vpop.f32.mrf.mxu0  ;;  %v1119_v55 = vadd.f32 %v1118_v48, %v1075_v47 }
 0x12b   : > { %v1120_v50 = vpop.f32.mrf.mxu1 }
 0x12c   : > { %v1079_v51 = vpop.f32.mrf.mxu0  ;;  %v1121_v60 = vadd.f32 %v1120_v50, %v1077_v49 }
 0x12d   : > { %v1122_v57 = vpop.f32.mrf.mxu1 }
 0x12e   : > { %v1123_v1 = vadd.f32 %v1122_v57, %v1079_v51 }
 0x166   : > { %v1159_v54 = vpop.f32.mrf.mxu0 }
 0x167   : > { %v1160_v56 = vadd.f32 %v1159_v54, %v1117_v52 }
 0x168   : > { %v1161_v59 = vpop.f32.mrf.mxu0 }
 0x169   : > { %v1168_v61 = vadd.f32 %v1160_v56, %v423_v53  ;;  %v1162_v62 = vadd.f32 %v1161_v59, %v1119_v55 }
 0x16a   : > { %v1163_v0 = vpop.f32.mrf.mxu0 }
 0x16b   : > { %1172 = vst [vmem:[#allocation2 + $0x10] sm:$0xff] %v1168_v61  ;;  %v1169_v2 = vadd.f32 %v1162_v62, %v424_v58  ;;  %v1164_v3 = vadd.f32 %v1163_v0, %v1121_v60 }
 0x16c   : > { %v1165_v5 = vpop.f32.mrf.mxu0 }
 0x16d   : > { %1173 = vst [vmem:[#allocation2] sm:$0xff] %v1169_v2  ;;  %v1170_v6 = vadd.f32 %v1164_v3, %v425_v63  ;;  %v1166_v7 = vadd.f32 %v1165_v5, %v1123_v1  ;;  %1179 = sbr.rel (%p1513_p11) target bundleno = 389 (0x185), region = 71 }
 0x16f   : > { %1174 = vst [vmem:[#allocation2 + $0x18] sm:$0xff] %v1170_v6  ;;  %v1171_v8 = vadd.f32 %v1166_v7, %v426_v4 }
 0x171   : > { %1175 = vst [vmem:[#allocation2 + $0x8] sm:$0xff] %v1171_v8 }
 0x172   : > { %v1186_v9 = vlaneseq  ;;  %v1184_v11 = vld [vmem:[%s1984_s2] sm:$0x3]  ;;  %v1180_v13 = vld [vmem:[#allocation2 + $0x10] sm:$0xff]  ;;  %v1217_v17 = vld [vmem:[%s1986_s4 + $0x8] sm:$0xff] }
 0x173   : > { %v1200_v12 = vld [vmem:[%s1985_s3] sm:$0x3]  ;;  %v1220_v27 = vunpack.c.l.bf16 %v1217_v17  ;;  %v1221_v28 = vunpack.c.h.bf16 %v1217_v17 }
 0x174   : > { %v1187_v10 = vshrl.u32 %v1186_v9, 7  ;;  %v1216_v16 = vld [vmem:[%s1986_s4] sm:$0xff] }
 0x175   : > { %v1181_v18 = vld [vmem:[#allocation2] sm:$0xff]  ;;  %v1218_v25 = vunpack.c.l.bf16 %v1216_v16  ;;  %v1219_v26 = vunpack.c.h.bf16 %v1216_v16 }
 0x176   : > { %v1188_v14 = vsub.s32 0, %v1187_v10  ;;  %v1192_v15 = vsub.s32 1, %v1187_v10  ;;  %v1182_v19 = vld [vmem:[#allocation2 + $0x18] sm:$0xff] }
 0x178   : > { %v1183_v20 = vld [vmem:[#allocation2 + $0x8] sm:$0xff]  ;;  %v1189_v21 = vrot.slane %v1184_v11, %v1188_v14  ;;  %v1193_v22 = vrot.slane %v1184_v11, %v1192_v15  ;;  %v1205_v23 = vrot.slane %v1200_v12, %v1188_v14  ;;  %v1209_v24 = vrot.slane %v1200_v12, %v1192_v15 }
 0x17a   : > { %v1196_v29 = vmul.f32 %v1189_v21, %v1180_v13  ;;  %v1197_v30 = vmul.f32 %v1193_v22, %v1181_v18  ;;  %v1198_v31 = vmul.f32 %v1189_v21, %v1182_v19  ;;  %v1199_v32 = vmul.f32 %v1193_v22, %v1183_v20 }
 0x17c   : > { %v1212_v33 = vadd.f32 %v1205_v23, %v1196_v29  ;;  %v1213_v34 = vadd.f32 %v1209_v24, %v1197_v30  ;;  %v1214_v35 = vadd.f32 %v1205_v23, %v1198_v31  ;;  %v1215_v36 = vadd.f32 %v1209_v24, %v1199_v32 }
 0x17e   : > { %v1222_v37 = vadd.f32 %v1218_v25, %v1212_v33  ;;  %v1223_v38 = vadd.f32 %v1219_v26, %v1213_v34  ;;  %v1224_v39 = vadd.f32 %v1220_v27, %v1214_v35  ;;  %v1225_v40 = vadd.f32 %v1221_v28, %v1215_v36 }
 0x180   : > { %v1226_v41 = vmax.f32 %v1222_v37, 0.0  ;;  %v1227_v42 = vmax.f32 %v1223_v38, 0.0  ;;  %v1228_v43 = vmax.f32 %v1224_v39, 0.0  ;;  %v1229_v44 = vmax.f32 %v1225_v40, 0.0 }
 0x182   : > { %v1522_v45 = vpack.c.bf16 %v1227_v42, %v1226_v41  ;;  %v1523_v46 = vpack.c.bf16 %v1229_v44, %v1228_v43 }
 0x184   : > { %1242 = vst [vmem:[%s1987_s5] sm:$0xff] %v1522_v45  ;;  %1243 = vst [vmem:[%s1987_s5 + $0x8] sm:$0xff] %v1523_v46 }
 0x185 PF: > { %s15_s22 = sadd.s32 1, %s1758_s22   ;;  %s1988_s18 = smov %s1746_s19 }
 0x186   : > { %p12_p12 = scmp.ge.s32.totalorder %s15_s22, 5   ;;  %s1989_s19 = smov %s1826_s26 }
 0x187   : > { %s1990_s20 = smov %s1754_s21  ;;  %s1991_s21 = smov %s1993_s23 }
 0x188   :  { %14 = sbr.rel (!%p12_p12) target bundleno = 3 (0x3), region = 118 }

// kernel: resnet_byol_forward.36
= control target key start
LH: loop header
LB: loop body
LE: loop exit
PB: predicated region body
PF: predicated region fallthrough
CT: control target
= control target key end

     0   :  { %s2701_s15 = smov 0   ;;  %s2703_s16 = smov 0   ;;  %s3008_s0 = inlined_call_operand.vmem [shape: bf16[16,2304], index: 0, kind: input, shape index: {}]   ;;  %s3009_s1 = inlined_call_operand.vmem [shape: bf16[2304,512], index: 1, kind: input, shape index: {}]   ;;  %s3010_s2 = inlined_call_operand.vmem [shape: f32[1,512], index: 2, kind: input, shape index: {}]   ;;  %s3011_s3 = inlined_call_operand.vmem [shape: f32[1,512], index: 3, kind: input, shape index: {}]   ;;  %s3012_s4 = inlined_call_operand.vmem [shape: bf16[16,512], index: 4, kind: output, shape index: {}]  }
   0x1   :  { %s2705_s17 = smov 0   ;;  %s2707_s18 = smov 0  }
   0x2   :  { %s2709_s19 = smov 0  }
   0x3 LB: > { %s26_s20 = sadd.s32 1, %s2669_s18  ;;  %p49_p1 = scmp.ne.s32.totalorder %s2661_s16, %s2657_s15  ;;  %s2673_s19 = sphi %s2709_s19, %s14_s19   ;;  %s2669_s18 = sphi %s2707_s18, %s3016_s18   ;;  %s2665_s17 = sphi %s2705_s17, %s3015_s17   ;;  %s2661_s16 = sphi %s2703_s16, %s3014_s16   ;;  %s2657_s15 = sphi %s2701_s15, %s3013_s15  }
   0x4   : > { %p27_p0 = scmp.ge.s32.totalorder %s26_s20, 3  ;;  %p50_p2 = scmp.eq.s32.totalorder %s2673_s19, 0 }
   0x5   : > { %s42_s22 = sadd.s32 1, %s2661_s16  ;;  %p2076_p5 = scmp.ge.s32.totalorder %s2673_s19, 3 }
   0x6   : > { %s3018_s20 = smov (%p27_p0, %s26_s20), 0  ;;  %p51_p3 = por %p50_p2, %p49_p1 }
   0x7   : > { %s38_s21 = ssub.s32 %s2669_s18, %s3018_s20  ;;  %199 = sbr.rel (%p2076_p5) target bundleno = 20 (0x14), region = 24 }
   0x8   : > { %p40_p4 = scmp.eq.s32.totalorder %s38_s21, 0 }
   0xa   : > { %s2736_s23 = scalar_select %p40_p4, %s2661_s16, %s42_s22  }
   0xc   : > { %202 = sbr.rel (!%p51_p3) target bundleno = 20 (0x14), region = 28  ;;  %s204_s24 = sand.u32 (%p51_p3), 1, %s2661_s16  }
   0xd   : > { %s2289_s25 = smul.u32 (%p51_p3), 24, %s2669_s18 }
   0xe   : > { %s2295_s26 = smul.u32 (%p51_p3), 48, %s204_s24 }
   0xf   : > { %s212_s29 = scalar_lea.vmem (%p51_p3), %s3008_s0, %s2289_s25 }
  0x10   : > { %v225_v0 = vld [vmem:[%s212_s29] sm:$0xff] (%p51_p3)  ;;  %v227_v1 = vld [vmem:[%s212_s29 + $0x8] sm:$0xff] (%p51_p3)  ;;  %v229_v2 = vld [vmem:[%s212_s29 + $0x10] sm:$0xff] (%p51_p3)  ;;  %s206_s30 = scalar_lea.vmem (%p51_p3), [#allocation3], %s2295_s26 }
  0x11   : > { %226 = vst [vmem:[%s206_s30] sm:$0xff] %v225_v0  ;;  %228 = vst [vmem:[%s206_s30 + $0x8] sm:$0xff] %v227_v1  ;;  %v231_v3 = vld [vmem:[%s212_s29 + $0x48] sm:$0xff]  ;;  %v233_v4 = vld [vmem:[%s212_s29 + $0x50] sm:$0xff] }
  0x12   : > { %230 = vst [vmem:[%s206_s30 + $0x10] sm:$0xff] %v229_v2  ;;  %v235_v5 = vld [vmem:[%s212_s29 + $0x58] sm:$0xff]  ;;  %232 = vst [vmem:[%s206_s30 + $0x18] sm:$0xff] %v231_v3 }
  0x13   : > { %234 = vst [vmem:[%s206_s30 + $0x20] sm:$0xff] %v233_v4  ;;  %236 = vst [vmem:[%s206_s30 + $0x28] sm:$0xff] %v235_v5 }
  0x14 PF: > { %p2078_p6 = scmp.ge.s32.totalorder %s2673_s19, 1  ;;  %p256_p7 = scmp.lt.s32.totalorder %s2673_s19, 4 }
  0x16   : > { %p257_p8 = pnand %p2078_p6, %p256_p7 }
  0x17   : > { %s263_s5 = sand.u32 (!%p257_p8), 1, %s2657_s15   ;;  %s313_s6 = smul.u32 (!%p257_p8), 96, %s2665_s17 }
  0x18   : > { %260 = sbr.rel (%p257_p8) target bundleno = 456 (0x1c8), region = 55  ;;  %p2081_p10 = scmp.ne.s32.totalorder (!%p257_p8), %s2665_s17, 0 }
  0x19   : > { %s2296_s7 = smul.u32 (!%p257_p8), 48, %s263_s5  ;;  %p315_p9 = scmp.lt.s32.totalorder (!%p257_p8), %s313_s6, 287 }
  0x1b   : > { %s2753_s12 = scalar_lea.vmem (!%p257_p8), [#allocation3], %s2296_s7 }
  0x1d   : > { %s3020_s6 = smov (!%p315_p9, %s313_s6), 287  ;;  %350 = sbr.rel (%p2081_p10) target bundleno = 39 (0x27), region = 63 }
  0x1e   : > { %s2290_s8 = sshll.u32 %s3020_s6, 4 }
  0x1f   : > { %s2751_s11 = scalar_lea.vmem %s3009_s1, %s2290_s8 }
  0x22   : > { %v2675_v6 = vmov 0.0  }
  0x23   : > { %351 = vst [vmem:[#allocation2 + $0x30] sm:$0xff] %v2675_v6  ;;  %352 = vst [vmem:[#allocation2] sm:$0xff] %v2675_v6 }
  0x24   : > { %353 = vst [vmem:[#allocation2 + $0x18] sm:$0xff] %v2675_v6  ;;  %354 = vst [vmem:[#allocation2 + $0x10] sm:$0xff] %v2675_v6 }
  0x25   : > { %355 = vst [vmem:[#allocation2 + $0x8] sm:$0xff] %v2675_v6  ;;  %356 = vst [vmem:[#allocation2 + $0x20] sm:$0xff] %v2675_v6 }
  0x26   : > { %357 = vst [vmem:[#allocation2 + $0x28] sm:$0xff] %v2675_v6  ;;  %358 = vst [vmem:[#allocation2 + $0x38] sm:$0xff] %v2675_v6 }
  0x27 PF: > { %v2338_v7 = vld [vmem:[%s2751_s11 + $0xe4] ss:$16 sps:$4 sm:$0xff]   ;;  %v2342_v9 = vld [vmem:[%s2751_s11 + $0xe0] ss:$16 sps:$4 sm:$0xff]   ;;  %p2280_p11 = scmp.ne.s32.totalorder %s2665_s17, 2 }
  0x28   : > { %v2340_v8 = vld [vmem:[%s2751_s11 + $0x2e4] ss:$16 sps:$4 sm:$0xff]   ;;  %1555 = vmatprep.subr.bf16.mxu0 %v2338_v7  ;;  %v2343_v10 = vld [vmem:[%s2751_s11 + $0x2e0] ss:$16 sps:$4 sm:$0xff]  }
  0x29   : > { %1598 = vmatprep.subr.bf16.mxu1 %v2340_v8  ;;  %v2344_v11 = vld [vmem:[%s2751_s11 + $0xc4] ss:$16 sps:$4 sm:$0xff]   ;;  %1556 = vmatpush1.bf16.msra.mxu0 %v2342_v9  ;;  %v2348_v13 = vld [vmem:[%s2751_s11 + $0xc0] ss:$16 sps:$4 sm:$0xff]  }
  0x2a   : > { %1599 = vmatpush1.bf16.msra.mxu1 %v2343_v10  ;;  %v2346_v12 = vld [vmem:[%s2751_s11 + $0x2c4] ss:$16 sps:$4 sm:$0xff]   ;;  %1557 = vmatprep.subr.bf16.mxu0 %v2344_v11  ;;  %v2349_v14 = vld [vmem:[%s2751_s11 + $0x2c0] ss:$16 sps:$4 sm:$0xff]   ;;  %v2445_v10 = vld [vmem:[%s2751_s11 + $0xec] ss:$16 sps:$4 sm:$0xff]  }
  0x2b   : > { %1600 = vmatprep.subr.bf16.mxu1 %v2346_v12  ;;  %v2350_v15 = vld [vmem:[%s2751_s11 + $0xa4] ss:$16 sps:$4 sm:$0xff]   ;;  %v2354_v17 = vld [vmem:[%s2751_s11 + $0xa0] ss:$16 sps:$4 sm:$0xff]  }
  0x2c   : > { %v2352_v16 = vld [vmem:[%s2751_s11 + $0x2a4] ss:$16 sps:$4 sm:$0xff]   ;;  %v2355_v18 = vld [vmem:[%s2751_s11 + $0x2a0] ss:$16 sps:$4 sm:$0xff]  }
  0x2d   : > { %1558 = vmatpush1.bf16.msra.mxu0 %v2348_v13  ;;  %v2356_v19 = vld [vmem:[%s2751_s11 + $0x84] ss:$16 sps:$4 sm:$0xff]   ;;  %v2360_v21 = vld [vmem:[%s2751_s11 + $0x80] ss:$16 sps:$4 sm:$0xff]  }
  0x2e   : > { %1601 = vmatpush1.bf16.msra.mxu1 %v2349_v14  ;;  %1559 = vmatprep.subr.bf16.mxu0 %v2350_v15  ;;  %v2358_v20 = vld [vmem:[%s2751_s11 + $0x284] ss:$16 sps:$4 sm:$0xff]   ;;  %v2361_v22 = vld [vmem:[%s2751_s11 + $0x280] ss:$16 sps:$4 sm:$0xff]   ;;  %v2443_v14 = vld [vmem:[%s2751_s11 + $0xe8] ss:$16 sps:$4 sm:$0xff]  }
  0x2f   : > { %1602 = vmatprep.subr.bf16.mxu1 %v2352_v16  ;;  %v2362_v23 = vld [vmem:[%s2751_s11 + $0x64] ss:$16 sps:$4 sm:$0xff]   ;;  %v2366_v25 = vld [vmem:[%s2751_s11 + $0x60] ss:$16 sps:$4 sm:$0xff]   ;;  %v2451_v16 = vld [vmem:[%s2751_s11 + $0xcc] ss:$16 sps:$4 sm:$0xff]  }
  0x30   : > { %v2364_v24 = vld [vmem:[%s2751_s11 + $0x264] ss:$16 sps:$4 sm:$0xff]   ;;  %v2367_v26 = vld [vmem:[%s2751_s11 + $0x260] ss:$16 sps:$4 sm:$0xff]  }
  0x31   : > { %1560 = vmatpush1.bf16.msra.mxu0 %v2354_v17  ;;  %v2368_v27 = vld [vmem:[%s2751_s11 + $0x44] ss:$16 sps:$4 sm:$0xff]   ;;  %v2372_v29 = vld [vmem:[%s2751_s11 + $0x40] ss:$16 sps:$4 sm:$0xff]  }
  0x32   : > { %1603 = vmatpush1.bf16.msra.mxu1 %v2355_v18  ;;  %1561 = vmatprep.subr.bf16.mxu0 %v2356_v19  ;;  %v2370_v28 = vld [vmem:[%s2751_s11 + $0x244] ss:$16 sps:$4 sm:$0xff]   ;;  %v2373_v30 = vld [vmem:[%s2751_s11 + $0x240] ss:$16 sps:$4 sm:$0xff]   ;;  %v2449_v18 = vld [vmem:[%s2751_s11 + $0xc8] ss:$16 sps:$4 sm:$0xff]  }
  0x33   : > { %1604 = vmatprep.subr.bf16.mxu1 %v2358_v20  ;;  %v2374_v31 = vld [vmem:[%s2751_s11 + $0x24] ss:$16 sps:$4 sm:$0xff]   ;;  %v2378_v33 = vld [vmem:[%s2751_s11 + $0x20] ss:$16 sps:$4 sm:$0xff]   ;;  %v2457_v20 = vld [vmem:[%s2751_s11 + $0xac] ss:$16 sps:$4 sm:$0xff]  }
  0x34   : > { %v2376_v32 = vld [vmem:[%s2751_s11 + $0x224] ss:$16 sps:$4 sm:$0xff]   ;;  %v2379_v34 = vld [vmem:[%s2751_s11 + $0x220] ss:$16 sps:$4 sm:$0xff]  }
  0x35   : > { %1562 = vmatpush1.bf16.msra.mxu0 %v2360_v21  ;;  %v2380_v35 = vld [vmem:[%s2751_s11 + $0x4] ss:$16 sps:$4 sm:$0xff]   ;;  %v2384_v37 = vld [vmem:[%s2751_s11] ss:$16 sps:$4 sm:$0xff]  }
  0x36   : > { %1605 = vmatpush1.bf16.msra.mxu1 %v2361_v22  ;;  %1563 = vmatprep.subr.bf16.mxu0 %v2362_v23  ;;  %v2382_v36 = vld [vmem:[%s2751_s11 + $0x204] ss:$16 sps:$4 sm:$0xff]   ;;  %v2385_v38 = vld [vmem:[%s2751_s11 + $0x200] ss:$16 sps:$4 sm:$0xff]   ;;  %v2455_v22 = vld [vmem:[%s2751_s11 + $0xa8] ss:$16 sps:$4 sm:$0xff]  }
  0x37   : > { %1606 = vmatprep.subr.bf16.mxu1 %v2364_v24  ;;  %v2386_v39 = vld [vmem:[%s2751_s11 + $0x1e4] ss:$16 sps:$4 sm:$0xff]   ;;  %v2390_v41 = vld [vmem:[%s2751_s11 + $0x1e0] ss:$16 sps:$4 sm:$0xff]   ;;  %v2463_v24 = vld [vmem:[%s2751_s11 + $0x8c] ss:$16 sps:$4 sm:$0xff]  }
  0x38   : > { %v2388_v40 = vld [vmem:[%s2751_s11 + $0x3e4] ss:$16 sps:$4 sm:$0xff]   ;;  %v2391_v42 = vld [vmem:[%s2751_s11 + $0x3e0] ss:$16 sps:$4 sm:$0xff]  }
  0x39   : > { %1564 = vmatpush1.bf16.msra.mxu0 %v2366_v25  ;;  %v2392_v43 = vld [vmem:[%s2751_s11 + $0x1c4] ss:$16 sps:$4 sm:$0xff]   ;;  %v2396_v45 = vld [vmem:[%s2751_s11 + $0x1c0] ss:$16 sps:$4 sm:$0xff]  }
  0x3a   : > { %1607 = vmatpush1.bf16.msra.mxu1 %v2367_v26  ;;  %1565 = vmatprep.subr.bf16.mxu0 %v2368_v27  ;;  %v2394_v44 = vld [vmem:[%s2751_s11 + $0x3c4] ss:$16 sps:$4 sm:$0xff]   ;;  %v2397_v46 = vld [vmem:[%s2751_s11 + $0x3c0] ss:$16 sps:$4 sm:$0xff]   ;;  %v2461_v26 = vld [vmem:[%s2751_s11 + $0x88] ss:$16 sps:$4 sm:$0xff]  }
  0x3b   : > { %1608 = vmatprep.subr.bf16.mxu1 %v2370_v28  ;;  %v2398_v47 = vld [vmem:[%s2751_s11 + $0x1a4] ss:$16 sps:$4 sm:$0xff]   ;;  %v2402_v49 = vld [vmem:[%s2751_s11 + $0x1a0] ss:$16 sps:$4 sm:$0xff]   ;;  %v2469_v28 = vld [vmem:[%s2751_s11 + $0x6c] ss:$16 sps:$4 sm:$0xff]  }
  0x3c   : > { %v2400_v48 = vld [vmem:[%s2751_s11 + $0x3a4] ss:$16 sps:$4 sm:$0xff]   ;;  %v2403_v50 = vld [vmem:[%s2751_s11 + $0x3a0] ss:$16 sps:$4 sm:$0xff]  }
  0x3d   : > { %1566 = vmatpush1.bf16.msra.mxu0 %v2372_v29  ;;  %v2404_v51 = vld [vmem:[%s2751_s11 + $0x184] ss:$16 sps:$4 sm:$0xff]   ;;  %v2408_v53 = vld [vmem:[%s2751_s11 + $0x180] ss:$16 sps:$4 sm:$0xff]  }
  0x3e   : > { %1609 = vmatpush1.bf16.msra.mxu1 %v2373_v30  ;;  %1567 = vmatprep.subr.bf16.mxu0 %v2374_v31  ;;  %v2406_v52 = vld [vmem:[%s2751_s11 + $0x384] ss:$16 sps:$4 sm:$0xff]   ;;  %v2409_v54 = vld [vmem:[%s2751_s11 + $0x380] ss:$16 sps:$4 sm:$0xff]   ;;  %v2467_v30 = vld [vmem:[%s2751_s11 + $0x68] ss:$16 sps:$4 sm:$0xff]  }
  0x3f   : > { %1610 = vmatprep.subr.bf16.mxu1 %v2376_v32  ;;  %v2410_v55 = vld [vmem:[%s2751_s11 + $0x164] ss:$16 sps:$4 sm:$0xff]   ;;  %v2414_v59 = vld [vmem:[%s2751_s11 + $0x160] ss:$16 sps:$4 sm:$0xff]   ;;  %v2475_v32 = vld [vmem:[%s2751_s11 + $0x4c] ss:$16 sps:$4 sm:$0xff]  }
  0x40   : > { %v2436_v56 = vld [vmem:[%s2753_s12 + $0x4] ss:$24 sps:$4 sm:$0xff]   ;;  %v2415_v60 = vld [vmem:[%s2751_s11 + $0x360] ss:$16 sps:$4 sm:$0xff]  }
  0x41   : > { %1568 = vmatpush1.bf16.msra.mxu0 %v2378_v33  ;;  %v2412_v57 = vld [vmem:[%s2751_s11 + $0x364] ss:$16 sps:$4 sm:$0xff]   ;;  %1587 = vmatprep.mubr.bf16.mxu0 %v2436_v56  ;;  %v2420_v63 = vld [vmem:[%s2751_s11 + $0x140] ss:$16 sps:$4 sm:$0xff]  }
  0x42   : > { %1611 = vmatpush1.bf16.msra.mxu1 %v2379_v34  ;;  %1569 = vmatprep.subr.bf16.mxu0 %v2380_v35  ;;  %v2808_v58 = vld [vmem:[%s2753_s12 + $0xc] ss:$24 sps:$4 sm:$0xff]   ;;  %v2421_v0 = vld [vmem:[%s2751_s11 + $0x340] ss:$16 sps:$4 sm:$0xff]   ;;  %v2473_v34 = vld [vmem:[%s2751_s11 + $0x48] ss:$16 sps:$4 sm:$0xff]  }
  0x43   : > { %1612 = vmatprep.subr.bf16.mxu1 %v2382_v36  ;;  %1630 = vmatprep.mubr.bf16.mxu1 %v2808_v58  ;;  %v2416_v61 = vld [vmem:[%s2751_s11 + $0x144] ss:$16 sps:$4 sm:$0xff]   ;;  %v2426_v3 = vld [vmem:[%s2751_s11 + $0x120] ss:$16 sps:$4 sm:$0xff]   ;;  %v2481_v36 = vld [vmem:[%s2751_s11 + $0x2c] ss:$16 sps:$4 sm:$0xff]  }
  0x44   : > { %v2418_v62 = vld [vmem:[%s2751_s11 + $0x344] ss:$16 sps:$4 sm:$0xff]   ;;  %v2427_v4 = vld [vmem:[%s2751_s11 + $0x320] ss:$16 sps:$4 sm:$0xff]  }
  0x45   : > { %1570 = vmatpush1.bf16.msra.mxu0 %v2384_v37  ;;  %v2422_v1 = vld [vmem:[%s2751_s11 + $0x124] ss:$16 sps:$4 sm:$0xff]   ;;  %v2432_v7 = vld [vmem:[%s2751_s11 + $0x100] ss:$16 sps:$4 sm:$0xff]  }
  0x46   : > { %1613 = vmatpush1.bf16.msra.mxu1 %v2385_v38  ;;  %1571 = vmatprep.subr.bf16.mxu0 %v2386_v39  ;;  %v2424_v2 = vld [vmem:[%s2751_s11 + $0x324] ss:$16 sps:$4 sm:$0xff]   ;;  %v2433_v8 = vld [vmem:[%s2751_s11 + $0x300] ss:$16 sps:$4 sm:$0xff]   ;;  %v2479_v38 = vld [vmem:[%s2751_s11 + $0x28] ss:$16 sps:$4 sm:$0xff]  }
  0x47   : > { %1614 = vmatprep.subr.bf16.mxu1 %v2388_v40  ;;  %v2428_v5 = vld [vmem:[%s2751_s11 + $0x104] ss:$16 sps:$4 sm:$0xff]   ;;  %v2828_v11 = vld [vmem:[%s2753_s12] ss:$24 sps:$4 sm:$0xff]   ;;  %v2487_v40 = vld [vmem:[%s2751_s11 + $0xc] ss:$16 sps:$4 sm:$0xff]  }
  0x48   : > { %v2430_v6 = vld [vmem:[%s2751_s11 + $0x304] ss:$16 sps:$4 sm:$0xff]   ;;  %v2831_v12 = vld [vmem:[%s2753_s12 + $0x8] ss:$24 sps:$4 sm:$0xff]  }
  0x49   : > { %1572 = vmatpush2.bf16.msra.mxu0 %v2390_v41  ;;  %v2442_v9 = vld [vmem:[%s2751_s11 + $0x4e4] ss:$16 sps:$4 sm:$0xff]   ;;  %v2440_v13 = vld [vmem:[%s2751_s11 + $0x4e0] ss:$16 sps:$4 sm:$0xff]  }
  0x4a   : > { %1615 = vmatpush2.bf16.msra.mxu1 %v2391_v42  ;;  %1573 = vmatprep.subr.bf16.mxu0 %v2392_v43  ;;  %v2448_v15 = vld [vmem:[%s2751_s11 + $0x4c4] ss:$16 sps:$4 sm:$0xff]   ;;  %v2446_v17 = vld [vmem:[%s2751_s11 + $0x4c0] ss:$16 sps:$4 sm:$0xff]   ;;  %v2485_v43 = vld [vmem:[%s2751_s11 + $0x8] ss:$16 sps:$4 sm:$0xff]  }
  0x4b   : > { %1616 = vmatprep.subr.bf16.mxu1 %v2394_v44  ;;  %v2454_v19 = vld [vmem:[%s2751_s11 + $0x4a4] ss:$16 sps:$4 sm:$0xff]   ;;  %v2452_v21 = vld [vmem:[%s2751_s11 + $0x4a0] ss:$16 sps:$4 sm:$0xff]  }
  0x4c   : > { %v2460_v23 = vld [vmem:[%s2751_s11 + $0x484] ss:$16 sps:$4 sm:$0xff]   ;;  %v2458_v25 = vld [vmem:[%s2751_s11 + $0x480] ss:$16 sps:$4 sm:$0xff]  }
  0x4d   : > { %1574 = vmatpush2.bf16.msra.mxu0 %v2396_v45  ;;  %v2466_v27 = vld [vmem:[%s2751_s11 + $0x464] ss:$16 sps:$4 sm:$0xff]   ;;  %v2464_v29 = vld [vmem:[%s2751_s11 + $0x460] ss:$16 sps:$4 sm:$0xff]   ;;  %v2493_v45 = vld [vmem:[%s2751_s11 + $0x1ec] ss:$16 sps:$4 sm:$0xff]  }
  0x4e   : > { %1617 = vmatpush2.bf16.msra.mxu1 %v2397_v46  ;;  %1575 = vmatprep.subr.bf16.mxu0 %v2398_v47  ;;  %v2472_v31 = vld [vmem:[%s2751_s11 + $0x444] ss:$16 sps:$4 sm:$0xff]   ;;  %v2470_v33 = vld [vmem:[%s2751_s11 + $0x440] ss:$16 sps:$4 sm:$0xff]   ;;  %v2491_v47 = vld [vmem:[%s2751_s11 + $0x1e8] ss:$16 sps:$4 sm:$0xff]  }
  0x4f   : > { %1618 = vmatprep.subr.bf16.mxu1 %v2400_v48  ;;  %v2478_v35 = vld [vmem:[%s2751_s11 + $0x424] ss:$16 sps:$4 sm:$0xff]   ;;  %v2476_v37 = vld [vmem:[%s2751_s11 + $0x420] ss:$16 sps:$4 sm:$0xff]  }
  0x50   : > { %v2484_v39 = vld [vmem:[%s2751_s11 + $0x404] ss:$16 sps:$4 sm:$0xff]   ;;  %v2482_v42 = vld [vmem:[%s2751_s11 + $0x400] ss:$16 sps:$4 sm:$0xff]  }
  0x51   : > { %1576 = vmatpush2.bf16.msra.mxu0 %v2402_v49  ;;  %v2864_v41 = vld [vmem:[%s2753_s12 + $0x14] ss:$24 sps:$4 sm:$0xff]   ;;  %v2488_v46 = vld [vmem:[%s2751_s11 + $0x5e0] ss:$16 sps:$4 sm:$0xff]  }
  0x52   : > { %1619 = vmatpush2.bf16.msra.mxu1 %v2403_v50  ;;  %1577 = vmatprep.subr.bf16.mxu0 %v2404_v51  ;;  %v2490_v44 = vld [vmem:[%s2751_s11 + $0x5e4] ss:$16 sps:$4 sm:$0xff]   ;;  %v2499_v49 = vld [vmem:[%s2751_s11 + $0x1cc] ss:$16 sps:$4 sm:$0xff]   ;;  %v2494_v50 = vld [vmem:[%s2751_s11 + $0x5c0] ss:$16 sps:$4 sm:$0xff]  }
  0x53   : > { %1620 = vmatprep.subr.bf16.mxu1 %v2406_v52  ;;  %v2496_v48 = vld [vmem:[%s2751_s11 + $0x5c4] ss:$16 sps:$4 sm:$0xff]   ;;  %v2497_v51 = vld [vmem:[%s2751_s11 + $0x1c8] ss:$16 sps:$4 sm:$0xff]  }
  0x54   : > { %v2502_v52 = vld [vmem:[%s2751_s11 + $0x5a4] ss:$16 sps:$4 sm:$0xff]  }
  0x55   : > { %1578 = vmatpush2.bf16.msra.mxu0 %v2408_v53  ;;  %v2505_v53 = vld [vmem:[%s2751_s11 + $0x1ac] ss:$16 sps:$4 sm:$0xff]  }
  0x56   : > { %1621 = vmatpush2.bf16.msra.mxu1 %v2409_v54  ;;  %1579 = vmatprep.subr.bf16.mxu0 %v2410_v55  ;;  %v2500_v54 = vld [vmem:[%s2751_s11 + $0x5a0] ss:$16 sps:$4 sm:$0xff]   ;;  %v2503_v55 = vld [vmem:[%s2751_s11 + $0x1a8] ss:$16 sps:$4 sm:$0xff]  }
  0x57   : > { %1622 = vmatprep.subr.bf16.mxu1 %v2412_v57  ;;  %v2511_v57 = vld [vmem:[%s2751_s11 + $0x18c] ss:$16 sps:$4 sm:$0xff]  }
  0x59   : > { %1580 = vmatpush2.bf16.msra.mxu0 %v2414_v59  ;;  %v2506_v59 = vld [vmem:[%s2751_s11 + $0x580] ss:$16 sps:$4 sm:$0xff]  }
  0x5a   : > { %1623 = vmatpush2.bf16.msra.mxu1 %v2415_v60  ;;  %1581 = vmatprep.subr.bf16.mxu0 %v2416_v61  ;;  %v2509_v60 = vld [vmem:[%s2751_s11 + $0x188] ss:$16 sps:$4 sm:$0xff]   ;;  %v2514_v61 = vld [vmem:[%s2751_s11 + $0x564] ss:$16 sps:$4 sm:$0xff]  }
  0x5b   : > { %1624 = vmatprep.subr.bf16.mxu1 %v2418_v62  ;;  %v2517_v62 = vld [vmem:[%s2751_s11 + $0x16c] ss:$16 sps:$4 sm:$0xff]  }
  0x5d   : > { %1582 = vmatpush2.bf16.msra.mxu0 %v2420_v63  ;;  %v2512_v63 = vld [vmem:[%s2751_s11 + $0x560] ss:$16 sps:$4 sm:$0xff]  }
  0x5e   : > { %1625 = vmatpush2.bf16.msra.mxu1 %v2421_v0  ;;  %1583 = vmatprep.subr.bf16.mxu0 %v2422_v1  ;;  %v2515_v0 = vld [vmem:[%s2751_s11 + $0x168] ss:$16 sps:$4 sm:$0xff]   ;;  %v2520_v1 = vld [vmem:[%s2751_s11 + $0x544] ss:$16 sps:$4 sm:$0xff]  }
  0x5f   : > { %1626 = vmatprep.subr.bf16.mxu1 %v2424_v2  ;;  %v2523_v2 = vld [vmem:[%s2751_s11 + $0x14c] ss:$16 sps:$4 sm:$0xff]  }
  0x61   : > { %1584 = vmatpush2.bf16.msra.mxu0 %v2426_v3  ;;  %v2518_v3 = vld [vmem:[%s2751_s11 + $0x540] ss:$16 sps:$4 sm:$0xff]  }
  0x62   : > { %1627 = vmatpush2.bf16.msra.mxu1 %v2427_v4  ;;  %1585 = vmatprep.subr.bf16.mxu0 %v2428_v5  ;;  %v2521_v4 = vld [vmem:[%s2751_s11 + $0x148] ss:$16 sps:$4 sm:$0xff]   ;;  %v2526_v5 = vld [vmem:[%s2751_s11 + $0x524] ss:$16 sps:$4 sm:$0xff]  }
  0x63   : > { %1628 = vmatprep.subr.bf16.mxu1 %v2430_v6  ;;  %v2529_v6 = vld [vmem:[%s2751_s11 + $0x12c] ss:$16 sps:$4 sm:$0xff]  }
  0x65   : > { %1586 = vmatpush2.bf16.msra.mxu0 %v2432_v7  ;;  %v2524_v7 = vld [vmem:[%s2751_s11 + $0x520] ss:$16 sps:$4 sm:$0xff]  }
  0x66   : > { %1629 = vmatpush2.bf16.msra.mxu1 %v2433_v8  ;;  %1641 = vmatprep.subr.bf16.mxu0 %v2442_v9  ;;  %v2527_v8 = vld [vmem:[%s2751_s11 + $0x128] ss:$16 sps:$4 sm:$0xff]   ;;  %v2532_v9 = vld [vmem:[%s2751_s11 + $0x504] ss:$16 sps:$4 sm:$0xff]  }
  0x67   : > { %1684 = vmatprep.subr.bf16.mxu1 %v2445_v10  ;;  %v2535_v10 = vld [vmem:[%s2751_s11 + $0x10c] ss:$16 sps:$4 sm:$0xff]  }
  0x68   : > { %1588 = vmatmul.mubr.bf16.vlgmr.msra.gmra.mxu0 %v2828_v11 }
  0x69   : > { %1631 = vmatmul.mubr.bf16.vlgmr.msra.gmra.mxu1 %v2831_v12  ;;  %1642 = vmatpush1.bf16.msra.mxu0 %v2440_v13  ;;  %v2530_v13 = vld [vmem:[%s2751_s11 + $0x500] ss:$16 sps:$4 sm:$0xff]  }
  0x6a   : > { %1685 = vmatpush1.bf16.msra.mxu1 %v2443_v14  ;;  %1643 = vmatprep.subr.bf16.mxu0 %v2448_v15  ;;  %v2533_v14 = vld [vmem:[%s2751_s11 + $0x108] ss:$16 sps:$4 sm:$0xff]   ;;  %v2541_v15 = vld [vmem:[%s2751_s11 + $0x2ec] ss:$16 sps:$4 sm:$0xff]  }
  0x6b   : > { %1686 = vmatprep.subr.bf16.mxu1 %v2451_v16  ;;  %1716 = vmatprep.mubr.bf16.mxu1 %v2436_v56  ;;  %v2508_v56 = vld [vmem:[%s2751_s11 + $0x584] ss:$16 sps:$4 sm:$0xff]   ;;  %v2544_v16 = vld [vmem:[%s2751_s11 + $0x4ec] ss:$16 sps:$4 sm:$0xff]  }
  0x6c   : > { %1673 = vmatprep.mubr.bf16.mxu0 %v2864_v41 }
  0x6d   : > { %1644 = vmatpush1.bf16.msra.mxu0 %v2446_v17  ;;  %v2904_v17 = vld [vmem:[%s2753_s12 + $0x10] ss:$24 sps:$4 sm:$0xff]  }
  0x6e   : > { %1687 = vmatpush1.bf16.msra.mxu1 %v2449_v18  ;;  %1645 = vmatprep.subr.bf16.mxu0 %v2454_v19  ;;  %v2539_v18 = vld [vmem:[%s2751_s11 + $0x2e8] ss:$16 sps:$4 sm:$0xff]  }
  0x6f   : > { %1688 = vmatprep.subr.bf16.mxu1 %v2457_v20  ;;  %v2542_v19 = vld [vmem:[%s2751_s11 + $0x4e8] ss:$16 sps:$4 sm:$0xff]   ;;  %v2547_v20 = vld [vmem:[%s2751_s11 + $0x2cc] ss:$16 sps:$4 sm:$0xff]  }
  0x71   : > { %1646 = vmatpush1.bf16.msra.mxu0 %v2452_v21  ;;  %v2550_v21 = vld [vmem:[%s2751_s11 + $0x4cc] ss:$16 sps:$4 sm:$0xff]  }
  0x72   : > { %1689 = vmatpush1.bf16.msra.mxu1 %v2455_v22  ;;  %1647 = vmatprep.subr.bf16.mxu0 %v2460_v23  ;;  %v2545_v22 = vld [vmem:[%s2751_s11 + $0x2c8] ss:$16 sps:$4 sm:$0xff]  }
  0x73   : > { %1690 = vmatprep.subr.bf16.mxu1 %v2463_v24  ;;  %v2548_v23 = vld [vmem:[%s2751_s11 + $0x4c8] ss:$16 sps:$4 sm:$0xff]   ;;  %v2553_v24 = vld [vmem:[%s2751_s11 + $0x2ac] ss:$16 sps:$4 sm:$0xff]  }
  0x75   : > { %1648 = vmatpush1.bf16.msra.mxu0 %v2458_v25  ;;  %v2556_v25 = vld [vmem:[%s2751_s11 + $0x4ac] ss:$16 sps:$4 sm:$0xff]  }
  0x76   : > { %1691 = vmatpush1.bf16.msra.mxu1 %v2461_v26  ;;  %1649 = vmatprep.subr.bf16.mxu0 %v2466_v27  ;;  %v2554_v26 = vld [vmem:[%s2751_s11 + $0x4a8] ss:$16 sps:$4 sm:$0xff]   ;;  %v2559_v27 = vld [vmem:[%s2751_s11 + $0x28c] ss:$16 sps:$4 sm:$0xff]  }
  0x77   : > { %1692 = vmatprep.subr.bf16.mxu1 %v2469_v28  ;;  %v2562_v28 = vld [vmem:[%s2751_s11 + $0x48c] ss:$16 sps:$4 sm:$0xff]  }
  0x79   : > { %1650 = vmatpush1.bf16.msra.mxu0 %v2464_v29  ;;  %v2557_v29 = vld [vmem:[%s2751_s11 + $0x288] ss:$16 sps:$4 sm:$0xff]  }
  0x7a   : > { %1693 = vmatpush1.bf16.msra.mxu1 %v2467_v30  ;;  %1651 = vmatprep.subr.bf16.mxu0 %v2472_v31  ;;  %v2565_v30 = vld [vmem:[%s2751_s11 + $0x26c] ss:$16 sps:$4 sm:$0xff]  }
  0x7b   : > { %1694 = vmatprep.subr.bf16.mxu1 %v2475_v32  ;;  %v2568_v31 = vld [vmem:[%s2751_s11 + $0x46c] ss:$16 sps:$4 sm:$0xff]   ;;  %v2563_v32 = vld [vmem:[%s2751_s11 + $0x268] ss:$16 sps:$4 sm:$0xff]  }
  0x7d   : > { %1652 = vmatpush1.bf16.msra.mxu0 %v2470_v33  ;;  %v2566_v33 = vld [vmem:[%s2751_s11 + $0x468] ss:$16 sps:$4 sm:$0xff]  }
  0x7e   : > { %1695 = vmatpush1.bf16.msra.mxu1 %v2473_v34  ;;  %1653 = vmatprep.subr.bf16.mxu0 %v2478_v35  ;;  %v2571_v34 = vld [vmem:[%s2751_s11 + $0x24c] ss:$16 sps:$4 sm:$0xff]  }
  0x7f   : > { %1696 = vmatprep.subr.bf16.mxu1 %v2481_v36  ;;  %v2574_v35 = vld [vmem:[%s2751_s11 + $0x44c] ss:$16 sps:$4 sm:$0xff]   ;;  %v2569_v36 = vld [vmem:[%s2751_s11 + $0x248] ss:$16 sps:$4 sm:$0xff]  }
  0x81   : > { %1654 = vmatpush1.bf16.msra.mxu0 %v2476_v37  ;;  %v2572_v37 = vld [vmem:[%s2751_s11 + $0x448] ss:$16 sps:$4 sm:$0xff]  }
  0x82   : > { %1697 = vmatpush1.bf16.msra.mxu1 %v2479_v38  ;;  %1655 = vmatprep.subr.bf16.mxu0 %v2484_v39  ;;  %v2577_v38 = vld [vmem:[%s2751_s11 + $0x22c] ss:$16 sps:$4 sm:$0xff]  }
  0x83   : > { %1698 = vmatprep.subr.bf16.mxu1 %v2487_v40  ;;  %v2580_v39 = vld [vmem:[%s2751_s11 + $0x42c] ss:$16 sps:$4 sm:$0xff]   ;;  %v2575_v40 = vld [vmem:[%s2751_s11 + $0x228] ss:$16 sps:$4 sm:$0xff]  }
  0x85   : > { %1656 = vmatpush1.bf16.msra.mxu0 %v2482_v42  ;;  %v2583_v42 = vld [vmem:[%s2751_s11 + $0x20c] ss:$16 sps:$4 sm:$0xff]  }
  0x86   : > { %1699 = vmatpush1.bf16.msra.mxu1 %v2485_v43  ;;  %1657 = vmatprep.subr.bf16.mxu0 %v2490_v44  ;;  %v2586_v43 = vld [vmem:[%s2751_s11 + $0x40c] ss:$16 sps:$4 sm:$0xff]   ;;  %v2581_v44 = vld [vmem:[%s2751_s11 + $0x208] ss:$16 sps:$4 sm:$0xff]  }
  0x87   : > { %1700 = vmatprep.subr.bf16.mxu1 %v2493_v45  ;;  %v2584_v45 = vld [vmem:[%s2751_s11 + $0x408] ss:$16 sps:$4 sm:$0xff]  }
  0x89   : > { %1658 = vmatpush2.bf16.msra.mxu0 %v2488_v46  ;;  %v2589_v46 = vld [vmem:[%s2751_s11 + $0x3ec] ss:$16 sps:$4 sm:$0xff]  }
  0x8a   : > { %1701 = vmatpush2.bf16.msra.mxu1 %v2491_v47  ;;  %1659 = vmatprep.subr.bf16.mxu0 %v2496_v48  ;;  %v2592_v47 = vld [vmem:[%s2751_s11 + $0x5ec] ss:$16 sps:$4 sm:$0xff]   ;;  %v2587_v48 = vld [vmem:[%s2751_s11 + $0x3e8] ss:$16 sps:$4 sm:$0xff]  }
  0x8b   : > { %1702 = vmatprep.subr.bf16.mxu1 %v2499_v49  ;;  %v2590_v49 = vld [vmem:[%s2751_s11 + $0x5e8] ss:$16 sps:$4 sm:$0xff]  }
  0x8d   : > { %1660 = vmatpush2.bf16.msra.mxu0 %v2494_v50  ;;  %v2595_v50 = vld [vmem:[%s2751_s11 + $0x3cc] ss:$16 sps:$4 sm:$0xff]  }
  0x8e   : > { %1703 = vmatpush2.bf16.msra.mxu1 %v2497_v51  ;;  %1661 = vmatprep.subr.bf16.mxu0 %v2502_v52  ;;  %v2598_v51 = vld [vmem:[%s2751_s11 + $0x5cc] ss:$16 sps:$4 sm:$0xff]   ;;  %v2593_v52 = vld [vmem:[%s2751_s11 + $0x3c8] ss:$16 sps:$4 sm:$0xff]  }
  0x8f   : > { %1704 = vmatprep.subr.bf16.mxu1 %v2505_v53  ;;  %v2596_v53 = vld [vmem:[%s2751_s11 + $0x5c8] ss:$16 sps:$4 sm:$0xff]  }
  0x91   : > { %1662 = vmatpush2.bf16.msra.mxu0 %v2500_v54  ;;  %v2601_v54 = vld [vmem:[%s2751_s11 + $0x3ac] ss:$16 sps:$4 sm:$0xff]  }
  0x92   : > { %1705 = vmatpush2.bf16.msra.mxu1 %v2503_v55  ;;  %1663 = vmatprep.subr.bf16.mxu0 %v2508_v56  ;;  %v2604_v55 = vld [vmem:[%s2751_s11 + $0x5ac] ss:$16 sps:$4 sm:$0xff]   ;;  %v2599_v56 = vld [vmem:[%s2751_s11 + $0x3a8] ss:$16 sps:$4 sm:$0xff]  }
  0x93   : > { %1706 = vmatprep.subr.bf16.mxu1 %v2511_v57  ;;  %v2602_v57 = vld [vmem:[%s2751_s11 + $0x5a8] ss:$16 sps:$4 sm:$0xff]  }
  0x95   : > { %1664 = vmatpush2.bf16.msra.mxu0 %v2506_v59  ;;  %v2607_v59 = vld [vmem:[%s2751_s11 + $0x38c] ss:$16 sps:$4 sm:$0xff]  }
  0x96   : > { %1707 = vmatpush2.bf16.msra.mxu1 %v2509_v60  ;;  %1665 = vmatprep.subr.bf16.mxu0 %v2514_v61  ;;  %v2610_v60 = vld [vmem:[%s2751_s11 + $0x58c] ss:$16 sps:$4 sm:$0xff]   ;;  %v2605_v61 = vld [vmem:[%s2751_s11 + $0x388] ss:$16 sps:$4 sm:$0xff]  }
  0x97   : > { %1708 = vmatprep.subr.bf16.mxu1 %v2517_v62  ;;  %v2608_v62 = vld [vmem:[%s2751_s11 + $0x588] ss:$16 sps:$4 sm:$0xff]  }
  0x99   : > { %1666 = vmatpush2.bf16.msra.mxu0 %v2512_v63  ;;  %v2613_v63 = vld [vmem:[%s2751_s11 + $0x36c] ss:$16 sps:$4 sm:$0xff]  }
  0x9a   : > { %1709 = vmatpush2.bf16.msra.mxu1 %v2515_v0  ;;  %1667 = vmatprep.subr.bf16.mxu0 %v2520_v1  ;;  %v2616_v0 = vld [vmem:[%s2751_s11 + $0x56c] ss:$16 sps:$4 sm:$0xff]   ;;  %v2611_v1 = vld [vmem:[%s2751_s11 + $0x368] ss:$16 sps:$4 sm:$0xff]  }
  0x9b   : > { %1710 = vmatprep.subr.bf16.mxu1 %v2523_v2  ;;  %v2614_v2 = vld [vmem:[%s2751_s11 + $0x568] ss:$16 sps:$4 sm:$0xff]  }
  0x9d   : > { %1668 = vmatpush2.bf16.msra.mxu0 %v2518_v3  ;;  %v2619_v3 = vld [vmem:[%s2751_s11 + $0x34c] ss:$16 sps:$4 sm:$0xff]  }
  0x9e   : > { %1711 = vmatpush2.bf16.msra.mxu1 %v2521_v4  ;;  %1669 = vmatprep.subr.bf16.mxu0 %v2526_v5  ;;  %v2622_v4 = vld [vmem:[%s2751_s11 + $0x54c] ss:$16 sps:$4 sm:$0xff]   ;;  %v2617_v5 = vld [vmem:[%s2751_s11 + $0x348] ss:$16 sps:$4 sm:$0xff]  }
  0x9f   : > { %1712 = vmatprep.subr.bf16.mxu1 %v2529_v6  ;;  %v2620_v6 = vld [vmem:[%s2751_s11 + $0x548] ss:$16 sps:$4 sm:$0xff]  }
  0xa1   : > { %1670 = vmatpush2.bf16.msra.mxu0 %v2524_v7  ;;  %v2625_v7 = vld [vmem:[%s2751_s11 + $0x32c] ss:$16 sps:$4 sm:$0xff]  }
  0xa2   : > { %1713 = vmatpush2.bf16.msra.mxu1 %v2527_v8  ;;  %1671 = vmatprep.subr.bf16.mxu0 %v2532_v9  ;;  %v2628_v8 = vld [vmem:[%s2751_s11 + $0x52c] ss:$16 sps:$4 sm:$0xff]   ;;  %v2623_v9 = vld [vmem:[%s2751_s11 + $0x328] ss:$16 sps:$4 sm:$0xff]  }
  0xa3   : > { %1714 = vmatprep.subr.bf16.mxu1 %v2535_v10  ;;  %v2626_v10 = vld [vmem:[%s2751_s11 + $0x528] ss:$16 sps:$4 sm:$0xff]  }
  0xa5   : > { %1672 = vmatpush2.bf16.msra.mxu0 %v2530_v13  ;;  %v2631_v13 = vld [vmem:[%s2751_s11 + $0x30c] ss:$16 sps:$4 sm:$0xff]  }
  0xa6   : > { %1715 = vmatpush2.bf16.msra.mxu1 %v2533_v14  ;;  %1727 = vmatprep.subr.bf16.mxu0 %v2541_v15  ;;  %v2634_v14 = vld [vmem:[%s2751_s11 + $0x50c] ss:$16 sps:$4 sm:$0xff]   ;;  %v2629_v15 = vld [vmem:[%s2751_s11 + $0x308] ss:$16 sps:$4 sm:$0xff]  }
  0xa7   : > { %1770 = vmatprep.subr.bf16.mxu1 %v2544_v16  ;;  %v2632_v16 = vld [vmem:[%s2751_s11 + $0x508] ss:$16 sps:$4 sm:$0xff]  }
  0xa8   : > { %1674 = vmatmul.mubr.bf16.vlgmr.msra.gmra.mxu0 %v2904_v17 }
  0xa9   : > { %1717 = vmatmul.mubr.bf16.vlgmr.msra.gmra.mxu1 %v2828_v11  ;;  %1728 = vmatpush1.bf16.msra.mxu0 %v2539_v18  ;;  %v2551_v11 = vld [vmem:[%s2751_s11 + $0x2a8] ss:$16 sps:$4 sm:$0xff]  }
  0xaa   : > { %1771 = vmatpush1.bf16.msra.mxu1 %v2542_v19  ;;  %1729 = vmatprep.subr.bf16.mxu0 %v2547_v20 }
  0xab   : > { %1772 = vmatprep.subr.bf16.mxu1 %v2550_v21  ;;  %1759 = vmatprep.mubr.bf16.mxu0 %v2808_v58  ;;  %v2560_v58 = vld [vmem:[%s2751_s11 + $0x488] ss:$16 sps:$4 sm:$0xff]  }
  0xac   : > { %1802 = vmatprep.mubr.bf16.mxu1 %v2864_v41  ;;  %v2578_v41 = vld [vmem:[%s2751_s11 + $0x428] ss:$16 sps:$4 sm:$0xff]  }
  0xad   : > { %1730 = vmatpush1.bf16.msra.mxu0 %v2545_v22 }
  0xae   : > { %1773 = vmatpush1.bf16.msra.mxu1 %v2548_v23  ;;  %1731 = vmatprep.subr.bf16.mxu0 %v2553_v24 }
  0xaf   : > { %1774 = vmatprep.subr.bf16.mxu1 %v2556_v25 }
  0xb1   : > { %1732 = vmatpush1.bf16.msra.mxu0 %v2551_v11  ;;  %v359_v11 = vld [vmem:[#allocation2 + $0x30] sm:$0xff] }
  0xb2   : > { %1775 = vmatpush1.bf16.msra.mxu1 %v2554_v26  ;;  %1733 = vmatprep.subr.bf16.mxu0 %v2559_v27 }
  0xb3   : > { %1776 = vmatprep.subr.bf16.mxu1 %v2562_v28 }
  0xb5   : > { %1734 = vmatpush1.bf16.msra.mxu0 %v2557_v29 }
  0xb6   : > { %1777 = vmatpush1.bf16.msra.mxu1 %v2560_v58  ;;  %1735 = vmatprep.subr.bf16.mxu0 %v2565_v30  ;;  %v360_v58 = vld [vmem:[#allocation2] sm:$0xff] }
  0xb7   : > { %1778 = vmatprep.subr.bf16.mxu1 %v2568_v31 }
  0xb9   : > { %1736 = vmatpush1.bf16.msra.mxu0 %v2563_v32 }
  0xba   : > { %1779 = vmatpush1.bf16.msra.mxu1 %v2566_v33  ;;  %1737 = vmatprep.subr.bf16.mxu0 %v2571_v34  ;;  %v363_v33 = vld [vmem:[#allocation2 + $0x8] sm:$0xff] }
  0xbb   : > { %1780 = vmatprep.subr.bf16.mxu1 %v2574_v35 }
  0xbd   : > { %1738 = vmatpush1.bf16.msra.mxu0 %v2569_v36 }
  0xbe   : > { %1781 = vmatpush1.bf16.msra.mxu1 %v2572_v37  ;;  %1739 = vmatprep.subr.bf16.mxu0 %v2577_v38  ;;  %v364_v37 = vld [vmem:[#allocation2 + $0x20] sm:$0xff] }
  0xbf   : > { %1782 = vmatprep.subr.bf16.mxu1 %v2580_v39 }
  0xc1   : > { %1740 = vmatpush1.bf16.msra.mxu0 %v2575_v40 }
  0xc2   : > { %1783 = vmatpush1.bf16.msra.mxu1 %v2578_v41  ;;  %1741 = vmatprep.subr.bf16.mxu0 %v2583_v42 }
  0xc3   : > { %1784 = vmatprep.subr.bf16.mxu1 %v2586_v43 }
  0xc5   : > { %1742 = vmatpush1.bf16.msra.mxu0 %v2581_v44 }
  0xc6   : > { %1785 = vmatpush1.bf16.msra.mxu1 %v2584_v45  ;;  %1743 = vmatprep.subr.bf16.mxu0 %v2589_v46 }
  0xc7   : > { %1786 = vmatprep.subr.bf16.mxu1 %v2592_v47 }
  0xc9   : > { %1744 = vmatpush2.bf16.msra.mxu0 %v2587_v48 }
  0xca   : > { %1787 = vmatpush2.bf16.msra.mxu1 %v2590_v49  ;;  %1745 = vmatprep.subr.bf16.mxu0 %v2595_v50  ;;  %v361_v49 = vld [vmem:[#allocation2 + $0x18] sm:$0xff] }
  0xcb   : > { %1788 = vmatprep.subr.bf16.mxu1 %v2598_v51 }
  0xcd   : > { %1746 = vmatpush2.bf16.msra.mxu0 %v2593_v52 }
  0xce   : > { %1789 = vmatpush2.bf16.msra.mxu1 %v2596_v53  ;;  %1747 = vmatprep.subr.bf16.mxu0 %v2601_v54  ;;  %v362_v54 = vld [vmem:[#allocation2 + $0x10] sm:$0xff] }
  0xcf   : > { %1790 = vmatprep.subr.bf16.mxu1 %v2604_v55 }
  0xd1   : > { %1748 = vmatpush2.bf16.msra.mxu0 %v2599_v56 }
  0xd2   : > { %1791 = vmatpush2.bf16.msra.mxu1 %v2602_v57  ;;  %1749 = vmatprep.subr.bf16.mxu0 %v2607_v59 }
  0xd3   : > { %1792 = vmatprep.subr.bf16.mxu1 %v2610_v60 }
  0xd5   : > { %1750 = vmatpush2.bf16.msra.mxu0 %v2605_v61  ;;  %v365_v61 = vld [vmem:[#allocation2 + $0x28] sm:$0xff] }
  0xd6   : > { %1793 = vmatpush2.bf16.msra.mxu1 %v2608_v62  ;;  %1751 = vmatprep.subr.bf16.mxu0 %v2613_v63 }
  0xd7   : > { %1794 = vmatprep.subr.bf16.mxu1 %v2616_v0 }
  0xd9   : > { %1752 = vmatpush2.bf16.msra.mxu0 %v2611_v1 }
  0xda   : > { %1795 = vmatpush2.bf16.msra.mxu1 %v2614_v2  ;;  %1753 = vmatprep.subr.bf16.mxu0 %v2619_v3  ;;  %v366_v2 = vld [vmem:[#allocation2 + $0x38] sm:$0xff] }
  0xdb   : > { %1796 = vmatprep.subr.bf16.mxu1 %v2622_v4 }
  0xdd   : > { %1754 = vmatpush2.bf16.msra.mxu0 %v2617_v5 }
  0xde   : > { %1797 = vmatpush2.bf16.msra.mxu1 %v2620_v6  ;;  %1755 = vmatprep.subr.bf16.mxu0 %v2625_v7 }
  0xdf   : > { %1798 = vmatprep.subr.bf16.mxu1 %v2628_v8 }
  0xe1   : > { %1756 = vmatpush2.bf16.msra.mxu0 %v2623_v9 }
  0xe2   : > { %1799 = vmatpush2.bf16.msra.mxu1 %v2626_v10  ;;  %1757 = vmatprep.subr.bf16.mxu0 %v2631_v13 }
  0xe3   : > { %1800 = vmatprep.subr.bf16.mxu1 %v2634_v14 }
  0xe5   : > { %1758 = vmatpush2.bf16.msra.mxu0 %v2629_v15 }
  0xe6   : > { %1801 = vmatpush2.bf16.msra.mxu1 %v2632_v16 }
  0xe8   : > { %1760 = vmatmul.mubr.bf16.vlgmr.msra.gmra.mxu0 %v2831_v12 }
  0xe9   : > { %1803 = vmatmul.mubr.bf16.vlgmr.msra.gmra.mxu1 %v2904_v17 }
 0x128   : > { %v1589_v18 = vpop.f32.mrf.mxu0 }
 0x129   : > { %v1632_v19 = vpop.f32.mrf.mxu1 }
 0x12a   : > { %v1591_v20 = vpop.f32.mrf.mxu0  ;;  %v1633_v25 = vadd.f32 %v1632_v19, %v1589_v18 }
 0x12b   : > { %v1634_v21 = vpop.f32.mrf.mxu1 }
 0x12c   : > { %v1593_v22 = vpop.f32.mrf.mxu0  ;;  %v1635_v27 = vadd.f32 %v1634_v21, %v1591_v20 }
 0x12d   : > { %v1636_v23 = vpop.f32.mrf.mxu1 }
 0x12e   : > { %v1595_v24 = vpop.f32.mrf.mxu0  ;;  %v1637_v31 = vadd.f32 %v1636_v23, %v1593_v22 }
 0x12f   : > { %v1638_v29 = vpop.f32.mrf.mxu1 }
 0x130   : > { %v1639_v34 = vadd.f32 %v1638_v29, %v1595_v24 }
 0x168   : > { %v1675_v26 = vpop.f32.mrf.mxu0 }
 0x169   : > { %v1676_v28 = vadd.f32 %v1675_v26, %v1633_v25  ;;  %v1718_v42 = vpop.f32.mrf.mxu1 }
 0x16a   : > { %v1677_v30 = vpop.f32.mrf.mxu0 }
 0x16b   : > { %v1813_v32 = vadd.f32 %v1676_v28, %v359_v11  ;;  %v1678_v12 = vadd.f32 %v1677_v30, %v1635_v27  ;;  %v1720_v43 = vpop.f32.mrf.mxu1 }
 0x16c   : > { %v1679_v17 = vpop.f32.mrf.mxu0 }
 0x16d   : > { %1821 = vst [vmem:[#allocation2 + $0x30] sm:$0xff] %v1813_v32  ;;  %v1814_v35 = vadd.f32 %v1678_v12, %v360_v58  ;;  %v1680_v36 = vadd.f32 %v1679_v17, %v1637_v31  ;;  %v1722_v44 = vpop.f32.mrf.mxu1 }
 0x16e   : > { %v1681_v38 = vpop.f32.mrf.mxu0 }
 0x16f   : > { %1822 = vst [vmem:[#allocation2] sm:$0xff] %v1814_v35  ;;  %v1817_v39 = vadd.f32 %v1680_v36, %v363_v33  ;;  %v1682_v40 = vadd.f32 %v1681_v38, %v1639_v34  ;;  %v1724_v45 = vpop.f32.mrf.mxu1 }
 0x171   : > { %1825 = vst [vmem:[#allocation2 + $0x8] sm:$0xff] %v1817_v39  ;;  %v1818_v41 = vadd.f32 %v1682_v40, %v364_v37 }
 0x173   : > { %1826 = vst [vmem:[#allocation2 + $0x20] sm:$0xff] %v1818_v41 }
 0x1a8   : > { %v1761_v46 = vpop.f32.mrf.mxu0 }
 0x1a9   : > { %v1804_v47 = vpop.f32.mrf.mxu1  ;;  %v1762_v48 = vadd.f32 %v1761_v46, %v1718_v42 }
 0x1aa   : > { %v1763_v50 = vpop.f32.mrf.mxu0 }
 0x1ab   : > { %v1806_v51 = vpop.f32.mrf.mxu1  ;;  %v1805_v52 = vadd.f32 %v1804_v47, %v1762_v48  ;;  %v1764_v53 = vadd.f32 %v1763_v50, %v1720_v43 }
 0x1ac   : > { %v1765_v55 = vpop.f32.mrf.mxu0 }
 0x1ad   : > { %v1808_v56 = vpop.f32.mrf.mxu1  ;;  %v1815_v57 = vadd.f32 %v1805_v52, %v361_v49  ;;  %v1807_v59 = vadd.f32 %v1806_v51, %v1764_v53  ;;  %v1766_v60 = vadd.f32 %v1765_v55, %v1722_v44 }
 0x1ae   : > { %v1767_v62 = vpop.f32.mrf.mxu0 }
 0x1af   : > { %1823 = vst [vmem:[#allocation2 + $0x18] sm:$0xff] %v1815_v57  ;;  %v1816_v63 = vadd.f32 %v1807_v59, %v362_v54  ;;  %v1809_v0 = vadd.f32 %v1808_v56, %v1766_v60  ;;  %v1768_v1 = vadd.f32 %v1767_v62, %v1724_v45  ;;  %v1810_v3 = vpop.f32.mrf.mxu1 }
 0x1b1   : > { %1824 = vst [vmem:[#allocation2 + $0x10] sm:$0xff] %v1816_v63  ;;  %v1819_v4 = vadd.f32 %v1809_v0, %v365_v61  ;;  %v1811_v5 = vadd.f32 %v1810_v3, %v1768_v1  ;;  %1832 = sbr.rel (%p2280_p11) target bundleno = 456 (0x1c8), region = 67 }
 0x1b3   : > { %1827 = vst [vmem:[#allocation2 + $0x28] sm:$0xff] %v1819_v4  ;;  %v1820_v6 = vadd.f32 %v1811_v5, %v366_v2 }
 0x1b5   : > { %1828 = vst [vmem:[#allocation2 + $0x38] sm:$0xff] %v1820_v6 }
 0x1b6   : > { %v1843_v7 = vlaneseq  ;;  %v1841_v9 = vld [vmem:[%s3010_s2] sm:$0xf]  ;;  %v1833_v13 = vld [vmem:[#allocation2 + $0x30] sm:$0xff]  ;;  %v1835_v20 = vld [vmem:[#allocation2 + $0x18] sm:$0xff] }
 0x1b7   : > { %v1871_v10 = vld [vmem:[%s3011_s3] sm:$0xf]  ;;  %v1837_v21 = vld [vmem:[#allocation2 + $0x8] sm:$0xff] }
 0x1b8   : > { %v1844_v8 = vshrl.u32 %v1843_v7, 7  ;;  %v1834_v14 = vld [vmem:[#allocation2] sm:$0xff]  ;;  %v1836_v26 = vld [vmem:[#allocation2 + $0x10] sm:$0xff] }
 0x1b9   : > { %v1838_v22 = vld [vmem:[#allocation2 + $0x20] sm:$0xff] }
 0x1ba   : > { %v1845_v15 = vsub.s32 0, %v1844_v8  ;;  %v1849_v16 = vsub.s32 1, %v1844_v8  ;;  %v1853_v18 = vsub.s32 2, %v1844_v8  ;;  %v1857_v19 = vsub.s32 3, %v1844_v8  ;;  %v1839_v27 = vld [vmem:[#allocation2 + $0x28] sm:$0xff] }
 0x1bc   : > { %v1846_v23 = vrot.slane %v1841_v9, %v1845_v15  ;;  %v1850_v24 = vrot.slane %v1841_v9, %v1849_v16  ;;  %v1876_v25 = vrot.slane %v1871_v10, %v1845_v15  ;;  %v1880_v11 = vrot.slane %v1871_v10, %v1849_v16  ;;  %v1840_v28 = vld [vmem:[#allocation2 + $0x38] sm:$0xff] }
 0x1bd   : > { %v1854_v29 = vrot.slane %v1841_v9, %v1853_v18  ;;  %v1858_v58 = vrot.slane %v1841_v9, %v1857_v19  ;;  %v1884_v30 = vrot.slane %v1871_v10, %v1853_v18  ;;  %v1888_v31 = vrot.slane %v1871_v10, %v1857_v19 }
 0x1be   : > { %v1863_v32 = vmul.f32 %v1846_v23, %v1833_v13  ;;  %v1864_v12 = vmul.f32 %v1850_v24, %v1834_v14  ;;  %v1867_v33 = vmul.f32 %v1846_v23, %v1837_v21  ;;  %v1868_v17 = vmul.f32 %v1850_v24, %v1838_v22 }
 0x1bf   : > { %v1865_v34 = vmul.f32 %v1854_v29, %v1835_v20  ;;  %v1866_v35 = vmul.f32 %v1858_v58, %v1836_v26  ;;  %v1869_v36 = vmul.f32 %v1854_v29, %v1839_v27  ;;  %v1870_v37 = vmul.f32 %v1858_v58, %v1840_v28 }
 0x1c0   : > { %v1893_v38 = vadd.f32 %v1876_v25, %v1863_v32  ;;  %v1894_v39 = vadd.f32 %v1880_v11, %v1864_v12  ;;  %v1897_v40 = vadd.f32 %v1876_v25, %v1867_v33  ;;  %v1898_v41 = vadd.f32 %v1880_v11, %v1868_v17 }
 0x1c1   : > { %v1895_v42 = vadd.f32 %v1884_v30, %v1865_v34  ;;  %v1896_v43 = vadd.f32 %v1888_v31, %v1866_v35  ;;  %v1899_v44 = vadd.f32 %v1884_v30, %v1869_v36  ;;  %v1900_v45 = vadd.f32 %v1888_v31, %v1870_v37 }
 0x1c2   : > { %v1901_v46 = vmax.f32 %v1893_v38, 0.0  ;;  %v1902_v47 = vmax.f32 %v1894_v39, 0.0  ;;  %v1905_v48 = vmax.f32 %v1897_v40, 0.0  ;;  %v1906_v49 = vmax.f32 %v1898_v41, 0.0 }
 0x1c3   : > { %v1903_v50 = vmax.f32 %v1895_v42, 0.0  ;;  %v1904_v51 = vmax.f32 %v1896_v43, 0.0  ;;  %v1907_v52 = vmax.f32 %v1899_v44, 0.0  ;;  %v1908_v53 = vmax.f32 %v1900_v45, 0.0 }
 0x1c4   : > { %v2291_v54 = vpack.c.bf16 %v1902_v47, %v1901_v46  ;;  %v2293_v55 = vpack.c.bf16 %v1906_v49, %v1905_v48 }
 0x1c5   : > { %v2292_v56 = vpack.c.bf16 %v1904_v51, %v1903_v50  ;;  %v2294_v57 = vpack.c.bf16 %v1908_v53, %v1907_v52 }
 0x1c6   : > { %1933 = vst [vmem:[%s3012_s4] sm:$0xff] %v2291_v54  ;;  %1935 = vst [vmem:[%s3012_s4 + $0x10] sm:$0xff] %v2293_v55 }
 0x1c7   : > { %1934 = vst [vmem:[%s3012_s4 + $0x8] sm:$0xff] %v2292_v56  ;;  %1936 = vst [vmem:[%s3012_s4 + $0x18] sm:$0xff] %v2294_v57 }
 0x1c8 PF: > { %s14_s19 = sadd.s32 1, %s2673_s19   ;;  %s3013_s15 = smov %s2661_s16 }
 0x1c9   : > { %p11_p12 = scmp.ge.s32.totalorder %s14_s19, 5   ;;  %s3014_s16 = smov %s2736_s23 }
 0x1ca   : > { %s3015_s17 = smov %s2669_s18  ;;  %s3016_s18 = smov %s3018_s20 }
 0x1cb   :  { %13 = sbr.rel (!%p11_p12) target bundleno = 3 (0x3), region = 111 }

// kernel: resnet_byol_forward.37
= control target key start
LH: loop header
LB: loop body
LE: loop exit
PB: predicated region body
PF: predicated region fallthrough
CT: control target
= control target key end

     0   :  { %s1052_s1 = inlined_call_operand.vmem [shape: bf16[256,512], index: 1, kind: input, shape index: {}]   ;;  %s1053_s0 = inlined_call_operand.vmem [shape: bf16[16,256], index: 0, kind: input, shape index: {}]   ;;  %s1054_s2 = inlined_call_operand.vmem [shape: f32[1,512], index: 2, kind: input, shape index: {}]   ;;  %s1055_s3 = inlined_call_operand.vmem [shape: f32[1,512], index: 3, kind: input, shape index: {}]   ;;  %s1056_s4 = inlined_call_operand.vmem [shape: bf16[16,512], index: 4, kind: output, shape index: {}]  }
   0x1   :  { %v712_v0 = vld [vmem:[%s1052_s1 + $0xe4] ss:$16 sps:$4 sm:$0xff]   ;;  %v714_v1 = vld [vmem:[%s1052_s1 + $0xec] ss:$16 sps:$4 sm:$0xff]   ;;  %v716_v2 = vld [vmem:[%s1052_s1 + $0xe0] ss:$16 sps:$4 sm:$0xff]  }
   0x2   :  { %433 = vmatprep.subr.bf16.mxu0 %v712_v0  ;;  %v717_v3 = vld [vmem:[%s1052_s1 + $0xe8] ss:$16 sps:$4 sm:$0xff]   ;;  %476 = vmatprep.subr.bf16.mxu1 %v714_v1  ;;  %v718_v4 = vld [vmem:[%s1052_s1 + $0xc4] ss:$16 sps:$4 sm:$0xff]   ;;  %v720_v5 = vld [vmem:[%s1052_s1 + $0xcc] ss:$16 sps:$4 sm:$0xff]  }
   0x3   :  { %434 = vmatpush1.bf16.msra.mxu0 %v716_v2  ;;  %477 = vmatpush1.bf16.msra.mxu1 %v717_v3  ;;  %v722_v6 = vld [vmem:[%s1052_s1 + $0xc0] ss:$16 sps:$4 sm:$0xff]   ;;  %v723_v7 = vld [vmem:[%s1052_s1 + $0xc8] ss:$16 sps:$4 sm:$0xff]   ;;  %v724_v8 = vld [vmem:[%s1052_s1 + $0xa4] ss:$16 sps:$4 sm:$0xff]   ;;  %v548_v2 = vlaneseq }
   0x4   :  { %435 = vmatprep.subr.bf16.mxu0 %v718_v4  ;;  %478 = vmatprep.subr.bf16.mxu1 %v720_v5  ;;  %v726_v9 = vld [vmem:[%s1052_s1 + $0xac] ss:$16 sps:$4 sm:$0xff]   ;;  %v728_v10 = vld [vmem:[%s1052_s1 + $0xa0] ss:$16 sps:$4 sm:$0xff]   ;;  %v729_v11 = vld [vmem:[%s1052_s1 + $0xa8] ss:$16 sps:$4 sm:$0xff]  }
   0x5   :  { %v730_v12 = vld [vmem:[%s1052_s1 + $0x84] ss:$16 sps:$4 sm:$0xff]   ;;  %v732_v13 = vld [vmem:[%s1052_s1 + $0x8c] ss:$16 sps:$4 sm:$0xff]   ;;  %v734_v14 = vld [vmem:[%s1052_s1 + $0x80] ss:$16 sps:$4 sm:$0xff]  }
   0x6   :  { %v735_v15 = vld [vmem:[%s1052_s1 + $0x88] ss:$16 sps:$4 sm:$0xff]   ;;  %v736_v16 = vld [vmem:[%s1052_s1 + $0x64] ss:$16 sps:$4 sm:$0xff]   ;;  %v738_v17 = vld [vmem:[%s1052_s1 + $0x6c] ss:$16 sps:$4 sm:$0xff]  }
   0x7   :  { %436 = vmatpush1.bf16.msra.mxu0 %v722_v6  ;;  %479 = vmatpush1.bf16.msra.mxu1 %v723_v7  ;;  %v740_v18 = vld [vmem:[%s1052_s1 + $0x60] ss:$16 sps:$4 sm:$0xff]   ;;  %v741_v19 = vld [vmem:[%s1052_s1 + $0x68] ss:$16 sps:$4 sm:$0xff]   ;;  %v742_v20 = vld [vmem:[%s1052_s1 + $0x44] ss:$16 sps:$4 sm:$0xff]  }
   0x8   :  { %437 = vmatprep.subr.bf16.mxu0 %v724_v8  ;;  %480 = vmatprep.subr.bf16.mxu1 %v726_v9  ;;  %v744_v21 = vld [vmem:[%s1052_s1 + $0x4c] ss:$16 sps:$4 sm:$0xff]   ;;  %v746_v22 = vld [vmem:[%s1052_s1 + $0x40] ss:$16 sps:$4 sm:$0xff]   ;;  %v747_v23 = vld [vmem:[%s1052_s1 + $0x48] ss:$16 sps:$4 sm:$0xff]  }
   0x9   :  { %v748_v24 = vld [vmem:[%s1052_s1 + $0x24] ss:$16 sps:$4 sm:$0xff]   ;;  %v750_v25 = vld [vmem:[%s1052_s1 + $0x2c] ss:$16 sps:$4 sm:$0xff]   ;;  %v752_v26 = vld [vmem:[%s1052_s1 + $0x20] ss:$16 sps:$4 sm:$0xff]  }
   0xa   :  { %v753_v27 = vld [vmem:[%s1052_s1 + $0x28] ss:$16 sps:$4 sm:$0xff]   ;;  %v754_v28 = vld [vmem:[%s1052_s1 + $0x4] ss:$16 sps:$4 sm:$0xff]   ;;  %v756_v29 = vld [vmem:[%s1052_s1 + $0xc] ss:$16 sps:$4 sm:$0xff]  }
   0xb   :  { %438 = vmatpush1.bf16.msra.mxu0 %v728_v10  ;;  %481 = vmatpush1.bf16.msra.mxu1 %v729_v11  ;;  %v758_v30 = vld [vmem:[%s1052_s1] ss:$16 sps:$4 sm:$0xff]   ;;  %v759_v31 = vld [vmem:[%s1052_s1 + $0x8] ss:$16 sps:$4 sm:$0xff]   ;;  %v760_v32 = vld [vmem:[%s1052_s1 + $0x1e4] ss:$16 sps:$4 sm:$0xff]  }
   0xc   :  { %439 = vmatprep.subr.bf16.mxu0 %v730_v12  ;;  %482 = vmatprep.subr.bf16.mxu1 %v732_v13  ;;  %v762_v33 = vld [vmem:[%s1052_s1 + $0x1ec] ss:$16 sps:$4 sm:$0xff]   ;;  %v764_v34 = vld [vmem:[%s1052_s1 + $0x1e0] ss:$16 sps:$4 sm:$0xff]   ;;  %v765_v35 = vld [vmem:[%s1052_s1 + $0x1e8] ss:$16 sps:$4 sm:$0xff]  }
   0xd   :  { %v766_v36 = vld [vmem:[%s1052_s1 + $0x1c4] ss:$16 sps:$4 sm:$0xff]   ;;  %v768_v37 = vld [vmem:[%s1052_s1 + $0x1cc] ss:$16 sps:$4 sm:$0xff]   ;;  %v770_v38 = vld [vmem:[%s1052_s1 + $0x1c0] ss:$16 sps:$4 sm:$0xff]  }
   0xe   :  { %v771_v39 = vld [vmem:[%s1052_s1 + $0x1c8] ss:$16 sps:$4 sm:$0xff]   ;;  %v772_v40 = vld [vmem:[%s1052_s1 + $0x1a4] ss:$16 sps:$4 sm:$0xff]   ;;  %v774_v41 = vld [vmem:[%s1052_s1 + $0x1ac] ss:$16 sps:$4 sm:$0xff]  }
   0xf   :  { %440 = vmatpush1.bf16.msra.mxu0 %v734_v14  ;;  %483 = vmatpush1.bf16.msra.mxu1 %v735_v15  ;;  %v776_v42 = vld [vmem:[%s1052_s1 + $0x1a0] ss:$16 sps:$4 sm:$0xff]   ;;  %v777_v43 = vld [vmem:[%s1052_s1 + $0x1a8] ss:$16 sps:$4 sm:$0xff]   ;;  %v778_v44 = vld [vmem:[%s1052_s1 + $0x184] ss:$16 sps:$4 sm:$0xff]  }
  0x10   :  { %441 = vmatprep.subr.bf16.mxu0 %v736_v16  ;;  %484 = vmatprep.subr.bf16.mxu1 %v738_v17  ;;  %v780_v45 = vld [vmem:[%s1052_s1 + $0x18c] ss:$16 sps:$4 sm:$0xff]   ;;  %v782_v47 = vld [vmem:[%s1052_s1 + $0x180] ss:$16 sps:$4 sm:$0xff]   ;;  %v783_v48 = vld [vmem:[%s1052_s1 + $0x188] ss:$16 sps:$4 sm:$0xff]  }
  0x11   :  { %v810_v46 = vld [vmem:[%s1053_s0 + $0x4] ss:$8 sps:$4 sm:$0xff]   ;;  %v788_v51 = vld [vmem:[%s1052_s1 + $0x160] ss:$16 sps:$4 sm:$0xff]   ;;  %v789_v52 = vld [vmem:[%s1052_s1 + $0x168] ss:$16 sps:$4 sm:$0xff]  }
  0x12   :  { %v784_v49 = vld [vmem:[%s1052_s1 + $0x164] ss:$16 sps:$4 sm:$0xff]   ;;  %v786_v50 = vld [vmem:[%s1052_s1 + $0x16c] ss:$16 sps:$4 sm:$0xff]   ;;  %465 = vmatprep.mubr.bf16.mxu0 %v810_v46  ;;  %508 = vmatprep.mubr.bf16.mxu1 %v810_v46  ;;  %v794_v55 = vld [vmem:[%s1052_s1 + $0x140] ss:$16 sps:$4 sm:$0xff]  }
  0x13   :  { %442 = vmatpush1.bf16.msra.mxu0 %v740_v18  ;;  %485 = vmatpush1.bf16.msra.mxu1 %v741_v19  ;;  %v790_v53 = vld [vmem:[%s1052_s1 + $0x144] ss:$16 sps:$4 sm:$0xff]   ;;  %v792_v54 = vld [vmem:[%s1052_s1 + $0x14c] ss:$16 sps:$4 sm:$0xff]   ;;  %v795_v56 = vld [vmem:[%s1052_s1 + $0x148] ss:$16 sps:$4 sm:$0xff]  }
  0x14   :  { %443 = vmatprep.subr.bf16.mxu0 %v742_v20  ;;  %486 = vmatprep.subr.bf16.mxu1 %v744_v21  ;;  %v796_v57 = vld [vmem:[%s1052_s1 + $0x124] ss:$16 sps:$4 sm:$0xff]   ;;  %v798_v58 = vld [vmem:[%s1052_s1 + $0x12c] ss:$16 sps:$4 sm:$0xff]   ;;  %v800_v59 = vld [vmem:[%s1052_s1 + $0x120] ss:$16 sps:$4 sm:$0xff]  }
  0x15   :  { %v801_v60 = vld [vmem:[%s1052_s1 + $0x128] ss:$16 sps:$4 sm:$0xff]   ;;  %v802_v61 = vld [vmem:[%s1052_s1 + $0x104] ss:$16 sps:$4 sm:$0xff]   ;;  %v804_v62 = vld [vmem:[%s1052_s1 + $0x10c] ss:$16 sps:$4 sm:$0xff]  }
  0x16   :  { %v806_v63 = vld [vmem:[%s1052_s1 + $0x100] ss:$16 sps:$4 sm:$0xff]   ;;  %v807_v0 = vld [vmem:[%s1052_s1 + $0x108] ss:$16 sps:$4 sm:$0xff]   ;;  %v549_v3 = vshrl.u32 %v548_v2, 7 }
  0x17   :  { %444 = vmatpush1.bf16.msra.mxu0 %v746_v22  ;;  %487 = vmatpush1.bf16.msra.mxu1 %v747_v23  ;;  %v808_v1 = vld [vmem:[%s1053_s0] ss:$8 sps:$4 sm:$0xff]  }
  0x18   :  { %445 = vmatprep.subr.bf16.mxu0 %v748_v24  ;;  %488 = vmatprep.subr.bf16.mxu1 %v750_v25  ;;  %v550_v4 = vsub.s32 0, %v549_v3  ;;  %v558_v5 = vsub.s32 2, %v549_v3  ;;  %v546_v6 = vld [vmem:[%s1054_s2] sm:$0xf]  ;;  %v554_v7 = vsub.s32 1, %v549_v3  ;;  %v562_v8 = vsub.s32 3, %v549_v3 }
  0x19   :  { %v576_v10 = vld [vmem:[%s1055_s3] sm:$0xf] }
  0x1a   :  { %v551_v9 = vrot.slane %v546_v6, %v550_v4  ;;  %v559_v11 = vrot.slane %v546_v6, %v558_v5  ;;  %v555_v12 = vrot.slane %v546_v6, %v554_v7  ;;  %v563_v13 = vrot.slane %v546_v6, %v562_v8 }
  0x1b   :  { %446 = vmatpush1.bf16.msra.mxu0 %v752_v26  ;;  %489 = vmatpush1.bf16.msra.mxu1 %v753_v27  ;;  %v581_v15 = vrot.slane %v576_v10, %v550_v4  ;;  %v589_v17 = vrot.slane %v576_v10, %v558_v5  ;;  %v585_v20 = vrot.slane %v576_v10, %v554_v7 }
  0x1c   :  { %447 = vmatprep.subr.bf16.mxu0 %v754_v28  ;;  %490 = vmatprep.subr.bf16.mxu1 %v756_v29  ;;  %v593_v21 = vrot.slane %v576_v10, %v562_v8 }
  0x1f   :  { %448 = vmatpush1.bf16.msra.mxu0 %v758_v30  ;;  %491 = vmatpush1.bf16.msra.mxu1 %v759_v31 }
  0x20   :  { %449 = vmatprep.subr.bf16.mxu0 %v760_v32  ;;  %492 = vmatprep.subr.bf16.mxu1 %v762_v33 }
  0x23   :  { %450 = vmatpush2.bf16.msra.mxu0 %v764_v34  ;;  %493 = vmatpush2.bf16.msra.mxu1 %v765_v35 }
  0x24   :  { %451 = vmatprep.subr.bf16.mxu0 %v766_v36  ;;  %494 = vmatprep.subr.bf16.mxu1 %v768_v37 }
  0x27   :  { %452 = vmatpush2.bf16.msra.mxu0 %v770_v38  ;;  %495 = vmatpush2.bf16.msra.mxu1 %v771_v39 }
  0x28   :  { %453 = vmatprep.subr.bf16.mxu0 %v772_v40  ;;  %496 = vmatprep.subr.bf16.mxu1 %v774_v41 }
  0x2b   :  { %454 = vmatpush2.bf16.msra.mxu0 %v776_v42  ;;  %497 = vmatpush2.bf16.msra.mxu1 %v777_v43 }
  0x2c   :  { %455 = vmatprep.subr.bf16.mxu0 %v778_v44  ;;  %498 = vmatprep.subr.bf16.mxu1 %v780_v45 }
  0x2f   :  { %456 = vmatpush2.bf16.msra.mxu0 %v782_v47  ;;  %499 = vmatpush2.bf16.msra.mxu1 %v783_v48 }
  0x30   :  { %457 = vmatprep.subr.bf16.mxu0 %v784_v49  ;;  %500 = vmatprep.subr.bf16.mxu1 %v786_v50 }
  0x33   :  { %458 = vmatpush2.bf16.msra.mxu0 %v788_v51  ;;  %501 = vmatpush2.bf16.msra.mxu1 %v789_v52 }
  0x34   :  { %459 = vmatprep.subr.bf16.mxu0 %v790_v53  ;;  %502 = vmatprep.subr.bf16.mxu1 %v792_v54 }
  0x37   :  { %460 = vmatpush2.bf16.msra.mxu0 %v794_v55  ;;  %503 = vmatpush2.bf16.msra.mxu1 %v795_v56 }
  0x38   :  { %461 = vmatprep.subr.bf16.mxu0 %v796_v57  ;;  %504 = vmatprep.subr.bf16.mxu1 %v798_v58 }
  0x3b   :  { %462 = vmatpush2.bf16.msra.mxu0 %v800_v59  ;;  %505 = vmatpush2.bf16.msra.mxu1 %v801_v60 }
  0x3c   :  { %463 = vmatprep.subr.bf16.mxu0 %v802_v61  ;;  %506 = vmatprep.subr.bf16.mxu1 %v804_v62 }
  0x3f   :  { %464 = vmatpush2.bf16.msra.mxu0 %v806_v63  ;;  %507 = vmatpush2.bf16.msra.mxu1 %v807_v0 }
  0x42   :  { %466 = vmatmul.mubr.bf16.vlgmr.msra.gmra.mxu0 %v808_v1  ;;  %509 = vmatmul.mubr.bf16.vlgmr.msra.gmra.mxu1 %v808_v1 }
 0x102   :  { %v467_v14 = vpop.f32.mrf.mxu0  ;;  %v510_v16 = vpop.f32.mrf.mxu1 }
 0x103   :  { %v568_v18 = vmul.f32 %v551_v9, %v467_v14  ;;  %v570_v19 = vmul.f32 %v559_v11, %v510_v16 }
 0x104   :  { %v469_v22 = vpop.f32.mrf.mxu0  ;;  %v512_v23 = vpop.f32.mrf.mxu1 }
 0x105   :  { %v569_v24 = vmul.f32 %v555_v12, %v469_v22  ;;  %v571_v25 = vmul.f32 %v563_v13, %v512_v23  ;;  %v598_v28 = vadd.f32 %v581_v15, %v568_v18  ;;  %v600_v29 = vadd.f32 %v589_v17, %v570_v19 }
 0x106   :  { %v471_v26 = vpop.f32.mrf.mxu0  ;;  %v514_v27 = vpop.f32.mrf.mxu1 }
 0x107   :  { %v599_v30 = vadd.f32 %v585_v20, %v569_v24  ;;  %v601_v31 = vadd.f32 %v593_v21, %v571_v25  ;;  %v572_v32 = vmul.f32 %v551_v9, %v471_v26  ;;  %v574_v33 = vmul.f32 %v559_v11, %v514_v27 }
 0x108   :  { %v473_v34 = vpop.f32.mrf.mxu0  ;;  %v516_v35 = vpop.f32.mrf.mxu1 }
 0x109   :  { %v708_v36 = vpack.c.bf16 %v599_v30, %v598_v28  ;;  %v709_v37 = vpack.c.bf16 %v601_v31, %v600_v29  ;;  %v573_v38 = vmul.f32 %v555_v12, %v473_v34  ;;  %v575_v39 = vmul.f32 %v563_v13, %v516_v35 }
 0x10a   :  { %v602_v40 = vadd.f32 %v581_v15, %v572_v32  ;;  %v604_v41 = vadd.f32 %v589_v17, %v574_v33 }
 0x10b   :  { %630 = vst [vmem:[%s1056_s4] sm:$0xff] %v708_v36  ;;  %631 = vst [vmem:[%s1056_s4 + $0x8] sm:$0xff] %v709_v37  ;;  %v603_v42 = vadd.f32 %v585_v20, %v573_v38  ;;  %v605_v43 = vadd.f32 %v593_v21, %v575_v39 }
 0x10d   :  { %v710_v44 = vpack.c.bf16 %v603_v42, %v602_v40  ;;  %v711_v45 = vpack.c.bf16 %v605_v43, %v604_v41 }
 0x10f   :  { %632 = vst [vmem:[%s1056_s4 + $0x10] sm:$0xff] %v710_v44  ;;  %633 = vst [vmem:[%s1056_s4 + $0x18] sm:$0xff] %v711_v45 }

// kernel: resnet_byol_forward.39
= control target key start
LH: loop header
LB: loop body
LE: loop exit
PB: predicated region body
PF: predicated region fallthrough
CT: control target
= control target key end

     0   :  { %s2701_s15 = smov 0   ;;  %s2703_s16 = smov 0   ;;  %s3008_s0 = inlined_call_operand.vmem [shape: bf16[16,4608], index: 0, kind: input, shape index: {}]   ;;  %s3009_s1 = inlined_call_operand.vmem [shape: bf16[4608,512], index: 1, kind: input, shape index: {}]   ;;  %s3010_s2 = inlined_call_operand.vmem [shape: f32[1,512], index: 2, kind: input, shape index: {}]   ;;  %s3011_s3 = inlined_call_operand.vmem [shape: f32[1,512], index: 3, kind: input, shape index: {}]   ;;  %s3012_s4 = inlined_call_operand.vmem [shape: bf16[16,512], index: 4, kind: output, shape index: {}]  }
   0x1   :  { %s2705_s17 = smov 0   ;;  %s2707_s18 = smov 0  }
   0x2   :  { %s2709_s19 = smov 0  }
   0x3 LB: > { %s26_s20 = sadd.s32 1, %s2669_s18  ;;  %p49_p1 = scmp.ne.s32.totalorder %s2661_s16, %s2657_s15  ;;  %s2673_s19 = sphi %s2709_s19, %s14_s19   ;;  %s2669_s18 = sphi %s2707_s18, %s3016_s18   ;;  %s2665_s17 = sphi %s2705_s17, %s3015_s17   ;;  %s2661_s16 = sphi %s2703_s16, %s3014_s16   ;;  %s2657_s15 = sphi %s2701_s15, %s3013_s15  }
   0x4   : > { %p27_p0 = scmp.ge.s32.totalorder %s26_s20, 6  ;;  %p50_p2 = scmp.eq.s32.totalorder %s2673_s19, 0 }
   0x5   : > { %s42_s22 = sadd.s32 1, %s2661_s16  ;;  %p2076_p5 = scmp.ge.s32.totalorder %s2673_s19, 6 }
   0x6   : > { %s3018_s20 = smov (%p27_p0, %s26_s20), 0  ;;  %p51_p3 = por %p50_p2, %p49_p1 }
   0x7   : > { %s38_s21 = ssub.s32 %s2669_s18, %s3018_s20  ;;  %199 = sbr.rel (%p2076_p5) target bundleno = 20 (0x14), region = 24 }
   0x8   : > { %p40_p4 = scmp.eq.s32.totalorder %s38_s21, 0 }
   0xa   : > { %s2736_s23 = scalar_select %p40_p4, %s2661_s16, %s42_s22  }
   0xc   : > { %202 = sbr.rel (!%p51_p3) target bundleno = 20 (0x14), region = 28  ;;  %s204_s24 = sand.u32 (%p51_p3), 1, %s2661_s16  }
   0xd   : > { %s2289_s25 = smul.u32 (%p51_p3), 24, %s2669_s18 }
   0xe   : > { %s2295_s26 = smul.u32 (%p51_p3), 48, %s204_s24 }
   0xf   : > { %s212_s29 = scalar_lea.vmem (%p51_p3), %s3008_s0, %s2289_s25 }
  0x10   : > { %v225_v0 = vld [vmem:[%s212_s29] sm:$0xff] (%p51_p3)  ;;  %v227_v1 = vld [vmem:[%s212_s29 + $0x8] sm:$0xff] (%p51_p3)  ;;  %v229_v2 = vld [vmem:[%s212_s29 + $0x10] sm:$0xff] (%p51_p3)  ;;  %s206_s30 = scalar_lea.vmem (%p51_p3), [#allocation3], %s2295_s26 }
  0x11   : > { %226 = vst [vmem:[%s206_s30] sm:$0xff] %v225_v0  ;;  %228 = vst [vmem:[%s206_s30 + $0x8] sm:$0xff] %v227_v1  ;;  %v231_v3 = vld [vmem:[%s212_s29 + $0x90] sm:$0xff]  ;;  %v233_v4 = vld [vmem:[%s212_s29 + $0x98] sm:$0xff] }
  0x12   : > { %230 = vst [vmem:[%s206_s30 + $0x10] sm:$0xff] %v229_v2  ;;  %v235_v5 = vld [vmem:[%s212_s29 + $0xa0] sm:$0xff]  ;;  %232 = vst [vmem:[%s206_s30 + $0x18] sm:$0xff] %v231_v3 }
  0x13   : > { %234 = vst [vmem:[%s206_s30 + $0x20] sm:$0xff] %v233_v4  ;;  %236 = vst [vmem:[%s206_s30 + $0x28] sm:$0xff] %v235_v5 }
  0x14 PF: > { %p2078_p6 = scmp.ge.s32.totalorder %s2673_s19, 1  ;;  %p256_p7 = scmp.lt.s32.totalorder %s2673_s19, 7 }
  0x16   : > { %p257_p8 = pnand %p2078_p6, %p256_p7 }
  0x17   : > { %s263_s5 = sand.u32 (!%p257_p8), 1, %s2657_s15   ;;  %s313_s6 = smul.u32 (!%p257_p8), 96, %s2665_s17 }
  0x18   : > { %260 = sbr.rel (%p257_p8) target bundleno = 456 (0x1c8), region = 55  ;;  %p2081_p10 = scmp.ne.s32.totalorder (!%p257_p8), %s2665_s17, 0 }
  0x19   : > { %s2296_s7 = smul.u32 (!%p257_p8), 48, %s263_s5  ;;  %p315_p9 = scmp.lt.s32.totalorder (!%p257_p8), %s313_s6, 575 }
  0x1b   : > { %s2753_s12 = scalar_lea.vmem (!%p257_p8), [#allocation3], %s2296_s7 }
  0x1d   : > { %s3020_s6 = smov (!%p315_p9, %s313_s6), 575  ;;  %350 = sbr.rel (%p2081_p10) target bundleno = 39 (0x27), region = 63 }
  0x1e   : > { %s2290_s8 = sshll.u32 %s3020_s6, 4 }
  0x1f   : > { %s2751_s11 = scalar_lea.vmem %s3009_s1, %s2290_s8 }
  0x22   : > { %v2675_v6 = vmov 0.0  }
  0x23   : > { %351 = vst [vmem:[#allocation2 + $0x30] sm:$0xff] %v2675_v6  ;;  %352 = vst [vmem:[#allocation2] sm:$0xff] %v2675_v6 }
  0x24   : > { %353 = vst [vmem:[#allocation2 + $0x18] sm:$0xff] %v2675_v6  ;;  %354 = vst [vmem:[#allocation2 + $0x10] sm:$0xff] %v2675_v6 }
  0x25   : > { %355 = vst [vmem:[#allocation2 + $0x8] sm:$0xff] %v2675_v6  ;;  %356 = vst [vmem:[#allocation2 + $0x20] sm:$0xff] %v2675_v6 }
  0x26   : > { %357 = vst [vmem:[#allocation2 + $0x28] sm:$0xff] %v2675_v6  ;;  %358 = vst [vmem:[#allocation2 + $0x38] sm:$0xff] %v2675_v6 }
  0x27 PF: > { %v2338_v7 = vld [vmem:[%s2751_s11 + $0xe4] ss:$16 sps:$4 sm:$0xff]   ;;  %v2342_v9 = vld [vmem:[%s2751_s11 + $0xe0] ss:$16 sps:$4 sm:$0xff]   ;;  %p2280_p11 = scmp.ne.s32.totalorder %s2665_s17, 5 }
  0x28   : > { %v2340_v8 = vld [vmem:[%s2751_s11 + $0x2e4] ss:$16 sps:$4 sm:$0xff]   ;;  %1555 = vmatprep.subr.bf16.mxu0 %v2338_v7  ;;  %v2343_v10 = vld [vmem:[%s2751_s11 + $0x2e0] ss:$16 sps:$4 sm:$0xff]  }
  0x29   : > { %1598 = vmatprep.subr.bf16.mxu1 %v2340_v8  ;;  %v2344_v11 = vld [vmem:[%s2751_s11 + $0xc4] ss:$16 sps:$4 sm:$0xff]   ;;  %1556 = vmatpush1.bf16.msra.mxu0 %v2342_v9  ;;  %v2348_v13 = vld [vmem:[%s2751_s11 + $0xc0] ss:$16 sps:$4 sm:$0xff]  }
  0x2a   : > { %1599 = vmatpush1.bf16.msra.mxu1 %v2343_v10  ;;  %v2346_v12 = vld [vmem:[%s2751_s11 + $0x2c4] ss:$16 sps:$4 sm:$0xff]   ;;  %1557 = vmatprep.subr.bf16.mxu0 %v2344_v11  ;;  %v2349_v14 = vld [vmem:[%s2751_s11 + $0x2c0] ss:$16 sps:$4 sm:$0xff]   ;;  %v2445_v10 = vld [vmem:[%s2751_s11 + $0xec] ss:$16 sps:$4 sm:$0xff]  }
  0x2b   : > { %1600 = vmatprep.subr.bf16.mxu1 %v2346_v12  ;;  %v2350_v15 = vld [vmem:[%s2751_s11 + $0xa4] ss:$16 sps:$4 sm:$0xff]   ;;  %v2354_v17 = vld [vmem:[%s2751_s11 + $0xa0] ss:$16 sps:$4 sm:$0xff]  }
  0x2c   : > { %v2352_v16 = vld [vmem:[%s2751_s11 + $0x2a4] ss:$16 sps:$4 sm:$0xff]   ;;  %v2355_v18 = vld [vmem:[%s2751_s11 + $0x2a0] ss:$16 sps:$4 sm:$0xff]  }
  0x2d   : > { %1558 = vmatpush1.bf16.msra.mxu0 %v2348_v13  ;;  %v2356_v19 = vld [vmem:[%s2751_s11 + $0x84] ss:$16 sps:$4 sm:$0xff]   ;;  %v2360_v21 = vld [vmem:[%s2751_s11 + $0x80] ss:$16 sps:$4 sm:$0xff]  }
  0x2e   : > { %1601 = vmatpush1.bf16.msra.mxu1 %v2349_v14  ;;  %1559 = vmatprep.subr.bf16.mxu0 %v2350_v15  ;;  %v2358_v20 = vld [vmem:[%s2751_s11 + $0x284] ss:$16 sps:$4 sm:$0xff]   ;;  %v2361_v22 = vld [vmem:[%s2751_s11 + $0x280] ss:$16 sps:$4 sm:$0xff]   ;;  %v2443_v14 = vld [vmem:[%s2751_s11 + $0xe8] ss:$16 sps:$4 sm:$0xff]  }
  0x2f   : > { %1602 = vmatprep.subr.bf16.mxu1 %v2352_v16  ;;  %v2362_v23 = vld [vmem:[%s2751_s11 + $0x64] ss:$16 sps:$4 sm:$0xff]   ;;  %v2366_v25 = vld [vmem:[%s2751_s11 + $0x60] ss:$16 sps:$4 sm:$0xff]   ;;  %v2451_v16 = vld [vmem:[%s2751_s11 + $0xcc] ss:$16 sps:$4 sm:$0xff]  }
  0x30   : > { %v2364_v24 = vld [vmem:[%s2751_s11 + $0x264] ss:$16 sps:$4 sm:$0xff]   ;;  %v2367_v26 = vld [vmem:[%s2751_s11 + $0x260] ss:$16 sps:$4 sm:$0xff]  }
  0x31   : > { %1560 = vmatpush1.bf16.msra.mxu0 %v2354_v17  ;;  %v2368_v27 = vld [vmem:[%s2751_s11 + $0x44] ss:$16 sps:$4 sm:$0xff]   ;;  %v2372_v29 = vld [vmem:[%s2751_s11 + $0x40] ss:$16 sps:$4 sm:$0xff]  }
  0x32   : > { %1603 = vmatpush1.bf16.msra.mxu1 %v2355_v18  ;;  %1561 = vmatprep.subr.bf16.mxu0 %v2356_v19  ;;  %v2370_v28 = vld [vmem:[%s2751_s11 + $0x244] ss:$16 sps:$4 sm:$0xff]   ;;  %v2373_v30 = vld [vmem:[%s2751_s11 + $0x240] ss:$16 sps:$4 sm:$0xff]   ;;  %v2449_v18 = vld [vmem:[%s2751_s11 + $0xc8] ss:$16 sps:$4 sm:$0xff]  }
  0x33   : > { %1604 = vmatprep.subr.bf16.mxu1 %v2358_v20  ;;  %v2374_v31 = vld [vmem:[%s2751_s11 + $0x24] ss:$16 sps:$4 sm:$0xff]   ;;  %v2378_v33 = vld [vmem:[%s2751_s11 + $0x20] ss:$16 sps:$4 sm:$0xff]   ;;  %v2457_v20 = vld [vmem:[%s2751_s11 + $0xac] ss:$16 sps:$4 sm:$0xff]  }
  0x34   : > { %v2376_v32 = vld [vmem:[%s2751_s11 + $0x224] ss:$16 sps:$4 sm:$0xff]   ;;  %v2379_v34 = vld [vmem:[%s2751_s11 + $0x220] ss:$16 sps:$4 sm:$0xff]  }
  0x35   : > { %1562 = vmatpush1.bf16.msra.mxu0 %v2360_v21  ;;  %v2380_v35 = vld [vmem:[%s2751_s11 + $0x4] ss:$16 sps:$4 sm:$0xff]   ;;  %v2384_v37 = vld [vmem:[%s2751_s11] ss:$16 sps:$4 sm:$0xff]  }
  0x36   : > { %1605 = vmatpush1.bf16.msra.mxu1 %v2361_v22  ;;  %1563 = vmatprep.subr.bf16.mxu0 %v2362_v23  ;;  %v2382_v36 = vld [vmem:[%s2751_s11 + $0x204] ss:$16 sps:$4 sm:$0xff]   ;;  %v2385_v38 = vld [vmem:[%s2751_s11 + $0x200] ss:$16 sps:$4 sm:$0xff]   ;;  %v2455_v22 = vld [vmem:[%s2751_s11 + $0xa8] ss:$16 sps:$4 sm:$0xff]  }
  0x37   : > { %1606 = vmatprep.subr.bf16.mxu1 %v2364_v24  ;;  %v2386_v39 = vld [vmem:[%s2751_s11 + $0x1e4] ss:$16 sps:$4 sm:$0xff]   ;;  %v2390_v41 = vld [vmem:[%s2751_s11 + $0x1e0] ss:$16 sps:$4 sm:$0xff]   ;;  %v2463_v24 = vld [vmem:[%s2751_s11 + $0x8c] ss:$16 sps:$4 sm:$0xff]  }
  0x38   : > { %v2388_v40 = vld [vmem:[%s2751_s11 + $0x3e4] ss:$16 sps:$4 sm:$0xff]   ;;  %v2391_v42 = vld [vmem:[%s2751_s11 + $0x3e0] ss:$16 sps:$4 sm:$0xff]  }
  0x39   : > { %1564 = vmatpush1.bf16.msra.mxu0 %v2366_v25  ;;  %v2392_v43 = vld [vmem:[%s2751_s11 + $0x1c4] ss:$16 sps:$4 sm:$0xff]   ;;  %v2396_v45 = vld [vmem:[%s2751_s11 + $0x1c0] ss:$16 sps:$4 sm:$0xff]  }
  0x3a   : > { %1607 = vmatpush1.bf16.msra.mxu1 %v2367_v26  ;;  %1565 = vmatprep.subr.bf16.mxu0 %v2368_v27  ;;  %v2394_v44 = vld [vmem:[%s2751_s11 + $0x3c4] ss:$16 sps:$4 sm:$0xff]   ;;  %v2397_v46 = vld [vmem:[%s2751_s11 + $0x3c0] ss:$16 sps:$4 sm:$0xff]   ;;  %v2461_v26 = vld [vmem:[%s2751_s11 + $0x88] ss:$16 sps:$4 sm:$0xff]  }
  0x3b   : > { %1608 = vmatprep.subr.bf16.mxu1 %v2370_v28  ;;  %v2398_v47 = vld [vmem:[%s2751_s11 + $0x1a4] ss:$16 sps:$4 sm:$0xff]   ;;  %v2402_v49 = vld [vmem:[%s2751_s11 + $0x1a0] ss:$16 sps:$4 sm:$0xff]   ;;  %v2469_v28 = vld [vmem:[%s2751_s11 + $0x6c] ss:$16 sps:$4 sm:$0xff]  }
  0x3c   : > { %v2400_v48 = vld [vmem:[%s2751_s11 + $0x3a4] ss:$16 sps:$4 sm:$0xff]   ;;  %v2403_v50 = vld [vmem:[%s2751_s11 + $0x3a0] ss:$16 sps:$4 sm:$0xff]  }
  0x3d   : > { %1566 = vmatpush1.bf16.msra.mxu0 %v2372_v29  ;;  %v2404_v51 = vld [vmem:[%s2751_s11 + $0x184] ss:$16 sps:$4 sm:$0xff]   ;;  %v2408_v53 = vld [vmem:[%s2751_s11 + $0x180] ss:$16 sps:$4 sm:$0xff]  }
  0x3e   : > { %1609 = vmatpush1.bf16.msra.mxu1 %v2373_v30  ;;  %1567 = vmatprep.subr.bf16.mxu0 %v2374_v31  ;;  %v2406_v52 = vld [vmem:[%s2751_s11 + $0x384] ss:$16 sps:$4 sm:$0xff]   ;;  %v2409_v54 = vld [vmem:[%s2751_s11 + $0x380] ss:$16 sps:$4 sm:$0xff]   ;;  %v2467_v30 = vld [vmem:[%s2751_s11 + $0x68] ss:$16 sps:$4 sm:$0xff]  }
  0x3f   : > { %1610 = vmatprep.subr.bf16.mxu1 %v2376_v32  ;;  %v2410_v55 = vld [vmem:[%s2751_s11 + $0x164] ss:$16 sps:$4 sm:$0xff]   ;;  %v2414_v59 = vld [vmem:[%s2751_s11 + $0x160] ss:$16 sps:$4 sm:$0xff]   ;;  %v2475_v32 = vld [vmem:[%s2751_s11 + $0x4c] ss:$16 sps:$4 sm:$0xff]  }
  0x40   : > { %v2436_v56 = vld [vmem:[%s2753_s12 + $0x4] ss:$24 sps:$4 sm:$0xff]   ;;  %v2415_v60 = vld [vmem:[%s2751_s11 + $0x360] ss:$16 sps:$4 sm:$0xff]  }
  0x41   : > { %1568 = vmatpush1.bf16.msra.mxu0 %v2378_v33  ;;  %v2412_v57 = vld [vmem:[%s2751_s11 + $0x364] ss:$16 sps:$4 sm:$0xff]   ;;  %1587 = vmatprep.mubr.bf16.mxu0 %v2436_v56  ;;  %v2420_v63 = vld [vmem:[%s2751_s11 + $0x140] ss:$16 sps:$4 sm:$0xff]  }
  0x42   : > { %1611 = vmatpush1.bf16.msra.mxu1 %v2379_v34  ;;  %1569 = vmatprep.subr.bf16.mxu0 %v2380_v35  ;;  %v2808_v58 = vld [vmem:[%s2753_s12 + $0xc] ss:$24 sps:$4 sm:$0xff]   ;;  %v2421_v0 = vld [vmem:[%s2751_s11 + $0x340] ss:$16 sps:$4 sm:$0xff]   ;;  %v2473_v34 = vld [vmem:[%s2751_s11 + $0x48] ss:$16 sps:$4 sm:$0xff]  }
  0x43   : > { %1612 = vmatprep.subr.bf16.mxu1 %v2382_v36  ;;  %1630 = vmatprep.mubr.bf16.mxu1 %v2808_v58  ;;  %v2416_v61 = vld [vmem:[%s2751_s11 + $0x144] ss:$16 sps:$4 sm:$0xff]   ;;  %v2426_v3 = vld [vmem:[%s2751_s11 + $0x120] ss:$16 sps:$4 sm:$0xff]   ;;  %v2481_v36 = vld [vmem:[%s2751_s11 + $0x2c] ss:$16 sps:$4 sm:$0xff]  }
  0x44   : > { %v2418_v62 = vld [vmem:[%s2751_s11 + $0x344] ss:$16 sps:$4 sm:$0xff]   ;;  %v2427_v4 = vld [vmem:[%s2751_s11 + $0x320] ss:$16 sps:$4 sm:$0xff]  }
  0x45   : > { %1570 = vmatpush1.bf16.msra.mxu0 %v2384_v37  ;;  %v2422_v1 = vld [vmem:[%s2751_s11 + $0x124] ss:$16 sps:$4 sm:$0xff]   ;;  %v2432_v7 = vld [vmem:[%s2751_s11 + $0x100] ss:$16 sps:$4 sm:$0xff]  }
  0x46   : > { %1613 = vmatpush1.bf16.msra.mxu1 %v2385_v38  ;;  %1571 = vmatprep.subr.bf16.mxu0 %v2386_v39  ;;  %v2424_v2 = vld [vmem:[%s2751_s11 + $0x324] ss:$16 sps:$4 sm:$0xff]   ;;  %v2433_v8 = vld [vmem:[%s2751_s11 + $0x300] ss:$16 sps:$4 sm:$0xff]   ;;  %v2479_v38 = vld [vmem:[%s2751_s11 + $0x28] ss:$16 sps:$4 sm:$0xff]  }
  0x47   : > { %1614 = vmatprep.subr.bf16.mxu1 %v2388_v40  ;;  %v2428_v5 = vld [vmem:[%s2751_s11 + $0x104] ss:$16 sps:$4 sm:$0xff]   ;;  %v2828_v11 = vld [vmem:[%s2753_s12] ss:$24 sps:$4 sm:$0xff]   ;;  %v2487_v40 = vld [vmem:[%s2751_s11 + $0xc] ss:$16 sps:$4 sm:$0xff]  }
  0x48   : > { %v2430_v6 = vld [vmem:[%s2751_s11 + $0x304] ss:$16 sps:$4 sm:$0xff]   ;;  %v2831_v12 = vld [vmem:[%s2753_s12 + $0x8] ss:$24 sps:$4 sm:$0xff]  }
  0x49   : > { %1572 = vmatpush2.bf16.msra.mxu0 %v2390_v41  ;;  %v2442_v9 = vld [vmem:[%s2751_s11 + $0x4e4] ss:$16 sps:$4 sm:$0xff]   ;;  %v2440_v13 = vld [vmem:[%s2751_s11 + $0x4e0] ss:$16 sps:$4 sm:$0xff]  }
  0x4a   : > { %1615 = vmatpush2.bf16.msra.mxu1 %v2391_v42  ;;  %1573 = vmatprep.subr.bf16.mxu0 %v2392_v43  ;;  %v2448_v15 = vld [vmem:[%s2751_s11 + $0x4c4] ss:$16 sps:$4 sm:$0xff]   ;;  %v2446_v17 = vld [vmem:[%s2751_s11 + $0x4c0] ss:$16 sps:$4 sm:$0xff]   ;;  %v2485_v43 = vld [vmem:[%s2751_s11 + $0x8] ss:$16 sps:$4 sm:$0xff]  }
  0x4b   : > { %1616 = vmatprep.subr.bf16.mxu1 %v2394_v44  ;;  %v2454_v19 = vld [vmem:[%s2751_s11 + $0x4a4] ss:$16 sps:$4 sm:$0xff]   ;;  %v2452_v21 = vld [vmem:[%s2751_s11 + $0x4a0] ss:$16 sps:$4 sm:$0xff]  }
  0x4c   : > { %v2460_v23 = vld [vmem:[%s2751_s11 + $0x484] ss:$16 sps:$4 sm:$0xff]   ;;  %v2458_v25 = vld [vmem:[%s2751_s11 + $0x480] ss:$16 sps:$4 sm:$0xff]  }
  0x4d   : > { %1574 = vmatpush2.bf16.msra.mxu0 %v2396_v45  ;;  %v2466_v27 = vld [vmem:[%s2751_s11 + $0x464] ss:$16 sps:$4 sm:$0xff]   ;;  %v2464_v29 = vld [vmem:[%s2751_s11 + $0x460] ss:$16 sps:$4 sm:$0xff]   ;;  %v2493_v45 = vld [vmem:[%s2751_s11 + $0x1ec] ss:$16 sps:$4 sm:$0xff]  }
  0x4e   : > { %1617 = vmatpush2.bf16.msra.mxu1 %v2397_v46  ;;  %1575 = vmatprep.subr.bf16.mxu0 %v2398_v47  ;;  %v2472_v31 = vld [vmem:[%s2751_s11 + $0x444] ss:$16 sps:$4 sm:$0xff]   ;;  %v2470_v33 = vld [vmem:[%s2751_s11 + $0x440] ss:$16 sps:$4 sm:$0xff]   ;;  %v2491_v47 = vld [vmem:[%s2751_s11 + $0x1e8] ss:$16 sps:$4 sm:$0xff]  }
  0x4f   : > { %1618 = vmatprep.subr.bf16.mxu1 %v2400_v48  ;;  %v2478_v35 = vld [vmem:[%s2751_s11 + $0x424] ss:$16 sps:$4 sm:$0xff]   ;;  %v2476_v37 = vld [vmem:[%s2751_s11 + $0x420] ss:$16 sps:$4 sm:$0xff]  }
  0x50   : > { %v2484_v39 = vld [vmem:[%s2751_s11 + $0x404] ss:$16 sps:$4 sm:$0xff]   ;;  %v2482_v42 = vld [vmem:[%s2751_s11 + $0x400] ss:$16 sps:$4 sm:$0xff]  }
  0x51   : > { %1576 = vmatpush2.bf16.msra.mxu0 %v2402_v49  ;;  %v2864_v41 = vld [vmem:[%s2753_s12 + $0x14] ss:$24 sps:$4 sm:$0xff]   ;;  %v2488_v46 = vld [vmem:[%s2751_s11 + $0x5e0] ss:$16 sps:$4 sm:$0xff]  }
  0x52   : > { %1619 = vmatpush2.bf16.msra.mxu1 %v2403_v50  ;;  %1577 = vmatprep.subr.bf16.mxu0 %v2404_v51  ;;  %v2490_v44 = vld [vmem:[%s2751_s11 + $0x5e4] ss:$16 sps:$4 sm:$0xff]   ;;  %v2499_v49 = vld [vmem:[%s2751_s11 + $0x1cc] ss:$16 sps:$4 sm:$0xff]   ;;  %v2494_v50 = vld [vmem:[%s2751_s11 + $0x5c0] ss:$16 sps:$4 sm:$0xff]  }
  0x53   : > { %1620 = vmatprep.subr.bf16.mxu1 %v2406_v52  ;;  %v2496_v48 = vld [vmem:[%s2751_s11 + $0x5c4] ss:$16 sps:$4 sm:$0xff]   ;;  %v2497_v51 = vld [vmem:[%s2751_s11 + $0x1c8] ss:$16 sps:$4 sm:$0xff]  }
  0x54   : > { %v2502_v52 = vld [vmem:[%s2751_s11 + $0x5a4] ss:$16 sps:$4 sm:$0xff]  }
  0x55   : > { %1578 = vmatpush2.bf16.msra.mxu0 %v2408_v53  ;;  %v2505_v53 = vld [vmem:[%s2751_s11 + $0x1ac] ss:$16 sps:$4 sm:$0xff]  }
  0x56   : > { %1621 = vmatpush2.bf16.msra.mxu1 %v2409_v54  ;;  %1579 = vmatprep.subr.bf16.mxu0 %v2410_v55  ;;  %v2500_v54 = vld [vmem:[%s2751_s11 + $0x5a0] ss:$16 sps:$4 sm:$0xff]   ;;  %v2503_v55 = vld [vmem:[%s2751_s11 + $0x1a8] ss:$16 sps:$4 sm:$0xff]  }
  0x57   : > { %1622 = vmatprep.subr.bf16.mxu1 %v2412_v57  ;;  %v2511_v57 = vld [vmem:[%s2751_s11 + $0x18c] ss:$16 sps:$4 sm:$0xff]  }
  0x59   : > { %1580 = vmatpush2.bf16.msra.mxu0 %v2414_v59  ;;  %v2506_v59 = vld [vmem:[%s2751_s11 + $0x580] ss:$16 sps:$4 sm:$0xff]  }
  0x5a   : > { %1623 = vmatpush2.bf16.msra.mxu1 %v2415_v60  ;;  %1581 = vmatprep.subr.bf16.mxu0 %v2416_v61  ;;  %v2509_v60 = vld [vmem:[%s2751_s11 + $0x188] ss:$16 sps:$4 sm:$0xff]   ;;  %v2514_v61 = vld [vmem:[%s2751_s11 + $0x564] ss:$16 sps:$4 sm:$0xff]  }
  0x5b   : > { %1624 = vmatprep.subr.bf16.mxu1 %v2418_v62  ;;  %v2517_v62 = vld [vmem:[%s2751_s11 + $0x16c] ss:$16 sps:$4 sm:$0xff]  }
  0x5d   : > { %1582 = vmatpush2.bf16.msra.mxu0 %v2420_v63  ;;  %v2512_v63 = vld [vmem:[%s2751_s11 + $0x560] ss:$16 sps:$4 sm:$0xff]  }
  0x5e   : > { %1625 = vmatpush2.bf16.msra.mxu1 %v2421_v0  ;;  %1583 = vmatprep.subr.bf16.mxu0 %v2422_v1  ;;  %v2515_v0 = vld [vmem:[%s2751_s11 + $0x168] ss:$16 sps:$4 sm:$0xff]   ;;  %v2520_v1 = vld [vmem:[%s2751_s11 + $0x544] ss:$16 sps:$4 sm:$0xff]  }
  0x5f   : > { %1626 = vmatprep.subr.bf16.mxu1 %v2424_v2  ;;  %v2523_v2 = vld [vmem:[%s2751_s11 + $0x14c] ss:$16 sps:$4 sm:$0xff]  }
  0x61   : > { %1584 = vmatpush2.bf16.msra.mxu0 %v2426_v3  ;;  %v2518_v3 = vld [vmem:[%s2751_s11 + $0x540] ss:$16 sps:$4 sm:$0xff]  }
  0x62   : > { %1627 = vmatpush2.bf16.msra.mxu1 %v2427_v4  ;;  %1585 = vmatprep.subr.bf16.mxu0 %v2428_v5  ;;  %v2521_v4 = vld [vmem:[%s2751_s11 + $0x148] ss:$16 sps:$4 sm:$0xff]   ;;  %v2526_v5 = vld [vmem:[%s2751_s11 + $0x524] ss:$16 sps:$4 sm:$0xff]  }
  0x63   : > { %1628 = vmatprep.subr.bf16.mxu1 %v2430_v6  ;;  %v2529_v6 = vld [vmem:[%s2751_s11 + $0x12c] ss:$16 sps:$4 sm:$0xff]  }
  0x65   : > { %1586 = vmatpush2.bf16.msra.mxu0 %v2432_v7  ;;  %v2524_v7 = vld [vmem:[%s2751_s11 + $0x520] ss:$16 sps:$4 sm:$0xff]  }
  0x66   : > { %1629 = vmatpush2.bf16.msra.mxu1 %v2433_v8  ;;  %1641 = vmatprep.subr.bf16.mxu0 %v2442_v9  ;;  %v2527_v8 = vld [vmem:[%s2751_s11 + $0x128] ss:$16 sps:$4 sm:$0xff]   ;;  %v2532_v9 = vld [vmem:[%s2751_s11 + $0x504] ss:$16 sps:$4 sm:$0xff]  }
  0x67   : > { %1684 = vmatprep.subr.bf16.mxu1 %v2445_v10  ;;  %v2535_v10 = vld [vmem:[%s2751_s11 + $0x10c] ss:$16 sps:$4 sm:$0xff]  }
  0x68   : > { %1588 = vmatmul.mubr.bf16.vlgmr.msra.gmra.mxu0 %v2828_v11 }
  0x69   : > { %1631 = vmatmul.mubr.bf16.vlgmr.msra.gmra.mxu1 %v2831_v12  ;;  %1642 = vmatpush1.bf16.msra.mxu0 %v2440_v13  ;;  %v2530_v13 = vld [vmem:[%s2751_s11 + $0x500] ss:$16 sps:$4 sm:$0xff]  }
  0x6a   : > { %1685 = vmatpush1.bf16.msra.mxu1 %v2443_v14  ;;  %1643 = vmatprep.subr.bf16.mxu0 %v2448_v15  ;;  %v2533_v14 = vld [vmem:[%s2751_s11 + $0x108] ss:$16 sps:$4 sm:$0xff]   ;;  %v2541_v15 = vld [vmem:[%s2751_s11 + $0x2ec] ss:$16 sps:$4 sm:$0xff]  }
  0x6b   : > { %1686 = vmatprep.subr.bf16.mxu1 %v2451_v16  ;;  %1716 = vmatprep.mubr.bf16.mxu1 %v2436_v56  ;;  %v2508_v56 = vld [vmem:[%s2751_s11 + $0x584] ss:$16 sps:$4 sm:$0xff]   ;;  %v2544_v16 = vld [vmem:[%s2751_s11 + $0x4ec] ss:$16 sps:$4 sm:$0xff]  }
  0x6c   : > { %1673 = vmatprep.mubr.bf16.mxu0 %v2864_v41 }
  0x6d   : > { %1644 = vmatpush1.bf16.msra.mxu0 %v2446_v17  ;;  %v2904_v17 = vld [vmem:[%s2753_s12 + $0x10] ss:$24 sps:$4 sm:$0xff]  }
  0x6e   : > { %1687 = vmatpush1.bf16.msra.mxu1 %v2449_v18  ;;  %1645 = vmatprep.subr.bf16.mxu0 %v2454_v19  ;;  %v2539_v18 = vld [vmem:[%s2751_s11 + $0x2e8] ss:$16 sps:$4 sm:$0xff]  }
  0x6f   : > { %1688 = vmatprep.subr.bf16.mxu1 %v2457_v20  ;;  %v2542_v19 = vld [vmem:[%s2751_s11 + $0x4e8] ss:$16 sps:$4 sm:$0xff]   ;;  %v2547_v20 = vld [vmem:[%s2751_s11 + $0x2cc] ss:$16 sps:$4 sm:$0xff]  }
  0x71   : > { %1646 = vmatpush1.bf16.msra.mxu0 %v2452_v21  ;;  %v2550_v21 = vld [vmem:[%s2751_s11 + $0x4cc] ss:$16 sps:$4 sm:$0xff]  }
  0x72   : > { %1689 = vmatpush1.bf16.msra.mxu1 %v2455_v22  ;;  %1647 = vmatprep.subr.bf16.mxu0 %v2460_v23  ;;  %v2545_v22 = vld [vmem:[%s2751_s11 + $0x2c8] ss:$16 sps:$4 sm:$0xff]  }
  0x73   : > { %1690 = vmatprep.subr.bf16.mxu1 %v2463_v24  ;;  %v2548_v23 = vld [vmem:[%s2751_s11 + $0x4c8] ss:$16 sps:$4 sm:$0xff]   ;;  %v2553_v24 = vld [vmem:[%s2751_s11 + $0x2ac] ss:$16 sps:$4 sm:$0xff]  }
  0x75   : > { %1648 = vmatpush1.bf16.msra.mxu0 %v2458_v25  ;;  %v2556_v25 = vld [vmem:[%s2751_s11 + $0x4ac] ss:$16 sps:$4 sm:$0xff]  }
  0x76   : > { %1691 = vmatpush1.bf16.msra.mxu1 %v2461_v26  ;;  %1649 = vmatprep.subr.bf16.mxu0 %v2466_v27  ;;  %v2554_v26 = vld [vmem:[%s2751_s11 + $0x4a8] ss:$16 sps:$4 sm:$0xff]   ;;  %v2559_v27 = vld [vmem:[%s2751_s11 + $0x28c] ss:$16 sps:$4 sm:$0xff]  }
  0x77   : > { %1692 = vmatprep.subr.bf16.mxu1 %v2469_v28  ;;  %v2562_v28 = vld [vmem:[%s2751_s11 + $0x48c] ss:$16 sps:$4 sm:$0xff]  }
  0x79   : > { %1650 = vmatpush1.bf16.msra.mxu0 %v2464_v29  ;;  %v2557_v29 = vld [vmem:[%s2751_s11 + $0x288] ss:$16 sps:$4 sm:$0xff]  }
  0x7a   : > { %1693 = vmatpush1.bf16.msra.mxu1 %v2467_v30  ;;  %1651 = vmatprep.subr.bf16.mxu0 %v2472_v31  ;;  %v2565_v30 = vld [vmem:[%s2751_s11 + $0x26c] ss:$16 sps:$4 sm:$0xff]  }
  0x7b   : > { %1694 = vmatprep.subr.bf16.mxu1 %v2475_v32  ;;  %v2568_v31 = vld [vmem:[%s2751_s11 + $0x46c] ss:$16 sps:$4 sm:$0xff]   ;;  %v2563_v32 = vld [vmem:[%s2751_s11 + $0x268] ss:$16 sps:$4 sm:$0xff]  }
  0x7d   : > { %1652 = vmatpush1.bf16.msra.mxu0 %v2470_v33  ;;  %v2566_v33 = vld [vmem:[%s2751_s11 + $0x468] ss:$16 sps:$4 sm:$0xff]  }
  0x7e   : > { %1695 = vmatpush1.bf16.msra.mxu1 %v2473_v34  ;;  %1653 = vmatprep.subr.bf16.mxu0 %v2478_v35  ;;  %v2571_v34 = vld [vmem:[%s2751_s11 + $0x24c] ss:$16 sps:$4 sm:$0xff]  }
  0x7f   : > { %1696 = vmatprep.subr.bf16.mxu1 %v2481_v36  ;;  %v2574_v35 = vld [vmem:[%s2751_s11 + $0x44c] ss:$16 sps:$4 sm:$0xff]   ;;  %v2569_v36 = vld [vmem:[%s2751_s11 + $0x248] ss:$16 sps:$4 sm:$0xff]  }
  0x81   : > { %1654 = vmatpush1.bf16.msra.mxu0 %v2476_v37  ;;  %v2572_v37 = vld [vmem:[%s2751_s11 + $0x448] ss:$16 sps:$4 sm:$0xff]  }
  0x82   : > { %1697 = vmatpush1.bf16.msra.mxu1 %v2479_v38  ;;  %1655 = vmatprep.subr.bf16.mxu0 %v2484_v39  ;;  %v2577_v38 = vld [vmem:[%s2751_s11 + $0x22c] ss:$16 sps:$4 sm:$0xff]  }
  0x83   : > { %1698 = vmatprep.subr.bf16.mxu1 %v2487_v40  ;;  %v2580_v39 = vld [vmem:[%s2751_s11 + $0x42c] ss:$16 sps:$4 sm:$0xff]   ;;  %v2575_v40 = vld [vmem:[%s2751_s11 + $0x228] ss:$16 sps:$4 sm:$0xff]  }
  0x85   : > { %1656 = vmatpush1.bf16.msra.mxu0 %v2482_v42  ;;  %v2583_v42 = vld [vmem:[%s2751_s11 + $0x20c] ss:$16 sps:$4 sm:$0xff]  }
  0x86   : > { %1699 = vmatpush1.bf16.msra.mxu1 %v2485_v43  ;;  %1657 = vmatprep.subr.bf16.mxu0 %v2490_v44  ;;  %v2586_v43 = vld [vmem:[%s2751_s11 + $0x40c] ss:$16 sps:$4 sm:$0xff]   ;;  %v2581_v44 = vld [vmem:[%s2751_s11 + $0x208] ss:$16 sps:$4 sm:$0xff]  }
  0x87   : > { %1700 = vmatprep.subr.bf16.mxu1 %v2493_v45  ;;  %v2584_v45 = vld [vmem:[%s2751_s11 + $0x408] ss:$16 sps:$4 sm:$0xff]  }
  0x89   : > { %1658 = vmatpush2.bf16.msra.mxu0 %v2488_v46  ;;  %v2589_v46 = vld [vmem:[%s2751_s11 + $0x3ec] ss:$16 sps:$4 sm:$0xff]  }
  0x8a   : > { %1701 = vmatpush2.bf16.msra.mxu1 %v2491_v47  ;;  %1659 = vmatprep.subr.bf16.mxu0 %v2496_v48  ;;  %v2592_v47 = vld [vmem:[%s2751_s11 + $0x5ec] ss:$16 sps:$4 sm:$0xff]   ;;  %v2587_v48 = vld [vmem:[%s2751_s11 + $0x3e8] ss:$16 sps:$4 sm:$0xff]  }
  0x8b   : > { %1702 = vmatprep.subr.bf16.mxu1 %v2499_v49  ;;  %v2590_v49 = vld [vmem:[%s2751_s11 + $0x5e8] ss:$16 sps:$4 sm:$0xff]  }
  0x8d   : > { %1660 = vmatpush2.bf16.msra.mxu0 %v2494_v50  ;;  %v2595_v50 = vld [vmem:[%s2751_s11 + $0x3cc] ss:$16 sps:$4 sm:$0xff]  }
  0x8e   : > { %1703 = vmatpush2.bf16.msra.mxu1 %v2497_v51  ;;  %1661 = vmatprep.subr.bf16.mxu0 %v2502_v52  ;;  %v2598_v51 = vld [vmem:[%s2751_s11 + $0x5cc] ss:$16 sps:$4 sm:$0xff]   ;;  %v2593_v52 = vld [vmem:[%s2751_s11 + $0x3c8] ss:$16 sps:$4 sm:$0xff]  }
  0x8f   : > { %1704 = vmatprep.subr.bf16.mxu1 %v2505_v53  ;;  %v2596_v53 = vld [vmem:[%s2751_s11 + $0x5c8] ss:$16 sps:$4 sm:$0xff]  }
  0x91   : > { %1662 = vmatpush2.bf16.msra.mxu0 %v2500_v54  ;;  %v2601_v54 = vld [vmem:[%s2751_s11 + $0x3ac] ss:$16 sps:$4 sm:$0xff]  }
  0x92   : > { %1705 = vmatpush2.bf16.msra.mxu1 %v2503_v55  ;;  %1663 = vmatprep.subr.bf16.mxu0 %v2508_v56  ;;  %v2604_v55 = vld [vmem:[%s2751_s11 + $0x5ac] ss:$16 sps:$4 sm:$0xff]   ;;  %v2599_v56 = vld [vmem:[%s2751_s11 + $0x3a8] ss:$16 sps:$4 sm:$0xff]  }
  0x93   : > { %1706 = vmatprep.subr.bf16.mxu1 %v2511_v57  ;;  %v2602_v57 = vld [vmem:[%s2751_s11 + $0x5a8] ss:$16 sps:$4 sm:$0xff]  }
  0x95   : > { %1664 = vmatpush2.bf16.msra.mxu0 %v2506_v59  ;;  %v2607_v59 = vld [vmem:[%s2751_s11 + $0x38c] ss:$16 sps:$4 sm:$0xff]  }
  0x96   : > { %1707 = vmatpush2.bf16.msra.mxu1 %v2509_v60  ;;  %1665 = vmatprep.subr.bf16.mxu0 %v2514_v61  ;;  %v2610_v60 = vld [vmem:[%s2751_s11 + $0x58c] ss:$16 sps:$4 sm:$0xff]   ;;  %v2605_v61 = vld [vmem:[%s2751_s11 + $0x388] ss:$16 sps:$4 sm:$0xff]  }
  0x97   : > { %1708 = vmatprep.subr.bf16.mxu1 %v2517_v62  ;;  %v2608_v62 = vld [vmem:[%s2751_s11 + $0x588] ss:$16 sps:$4 sm:$0xff]  }
  0x99   : > { %1666 = vmatpush2.bf16.msra.mxu0 %v2512_v63  ;;  %v2613_v63 = vld [vmem:[%s2751_s11 + $0x36c] ss:$16 sps:$4 sm:$0xff]  }
  0x9a   : > { %1709 = vmatpush2.bf16.msra.mxu1 %v2515_v0  ;;  %1667 = vmatprep.subr.bf16.mxu0 %v2520_v1  ;;  %v2616_v0 = vld [vmem:[%s2751_s11 + $0x56c] ss:$16 sps:$4 sm:$0xff]   ;;  %v2611_v1 = vld [vmem:[%s2751_s11 + $0x368] ss:$16 sps:$4 sm:$0xff]  }
  0x9b   : > { %1710 = vmatprep.subr.bf16.mxu1 %v2523_v2  ;;  %v2614_v2 = vld [vmem:[%s2751_s11 + $0x568] ss:$16 sps:$4 sm:$0xff]  }
  0x9d   : > { %1668 = vmatpush2.bf16.msra.mxu0 %v2518_v3  ;;  %v2619_v3 = vld [vmem:[%s2751_s11 + $0x34c] ss:$16 sps:$4 sm:$0xff]  }
  0x9e   : > { %1711 = vmatpush2.bf16.msra.mxu1 %v2521_v4  ;;  %1669 = vmatprep.subr.bf16.mxu0 %v2526_v5  ;;  %v2622_v4 = vld [vmem:[%s2751_s11 + $0x54c] ss:$16 sps:$4 sm:$0xff]   ;;  %v2617_v5 = vld [vmem:[%s2751_s11 + $0x348] ss:$16 sps:$4 sm:$0xff]  }
  0x9f   : > { %1712 = vmatprep.subr.bf16.mxu1 %v2529_v6  ;;  %v2620_v6 = vld [vmem:[%s2751_s11 + $0x548] ss:$16 sps:$4 sm:$0xff]  }
  0xa1   : > { %1670 = vmatpush2.bf16.msra.mxu0 %v2524_v7  ;;  %v2625_v7 = vld [vmem:[%s2751_s11 + $0x32c] ss:$16 sps:$4 sm:$0xff]  }
  0xa2   : > { %1713 = vmatpush2.bf16.msra.mxu1 %v2527_v8  ;;  %1671 = vmatprep.subr.bf16.mxu0 %v2532_v9  ;;  %v2628_v8 = vld [vmem:[%s2751_s11 + $0x52c] ss:$16 sps:$4 sm:$0xff]   ;;  %v2623_v9 = vld [vmem:[%s2751_s11 + $0x328] ss:$16 sps:$4 sm:$0xff]  }
  0xa3   : > { %1714 = vmatprep.subr.bf16.mxu1 %v2535_v10  ;;  %v2626_v10 = vld [vmem:[%s2751_s11 + $0x528] ss:$16 sps:$4 sm:$0xff]  }
  0xa5   : > { %1672 = vmatpush2.bf16.msra.mxu0 %v2530_v13  ;;  %v2631_v13 = vld [vmem:[%s2751_s11 + $0x30c] ss:$16 sps:$4 sm:$0xff]  }
  0xa6   : > { %1715 = vmatpush2.bf16.msra.mxu1 %v2533_v14  ;;  %1727 = vmatprep.subr.bf16.mxu0 %v2541_v15  ;;  %v2634_v14 = vld [vmem:[%s2751_s11 + $0x50c] ss:$16 sps:$4 sm:$0xff]   ;;  %v2629_v15 = vld [vmem:[%s2751_s11 + $0x308] ss:$16 sps:$4 sm:$0xff]  }
  0xa7   : > { %1770 = vmatprep.subr.bf16.mxu1 %v2544_v16  ;;  %v2632_v16 = vld [vmem:[%s2751_s11 + $0x508] ss:$16 sps:$4 sm:$0xff]  }
  0xa8   : > { %1674 = vmatmul.mubr.bf16.vlgmr.msra.gmra.mxu0 %v2904_v17 }
  0xa9   : > { %1717 = vmatmul.mubr.bf16.vlgmr.msra.gmra.mxu1 %v2828_v11  ;;  %1728 = vmatpush1.bf16.msra.mxu0 %v2539_v18  ;;  %v2551_v11 = vld [vmem:[%s2751_s11 + $0x2a8] ss:$16 sps:$4 sm:$0xff]  }
  0xaa   : > { %1771 = vmatpush1.bf16.msra.mxu1 %v2542_v19  ;;  %1729 = vmatprep.subr.bf16.mxu0 %v2547_v20 }
  0xab   : > { %1772 = vmatprep.subr.bf16.mxu1 %v2550_v21  ;;  %1759 = vmatprep.mubr.bf16.mxu0 %v2808_v58  ;;  %v2560_v58 = vld [vmem:[%s2751_s11 + $0x488] ss:$16 sps:$4 sm:$0xff]  }
  0xac   : > { %1802 = vmatprep.mubr.bf16.mxu1 %v2864_v41  ;;  %v2578_v41 = vld [vmem:[%s2751_s11 + $0x428] ss:$16 sps:$4 sm:$0xff]  }
  0xad   : > { %1730 = vmatpush1.bf16.msra.mxu0 %v2545_v22 }
  0xae   : > { %1773 = vmatpush1.bf16.msra.mxu1 %v2548_v23  ;;  %1731 = vmatprep.subr.bf16.mxu0 %v2553_v24 }
  0xaf   : > { %1774 = vmatprep.subr.bf16.mxu1 %v2556_v25 }
  0xb1   : > { %1732 = vmatpush1.bf16.msra.mxu0 %v2551_v11  ;;  %v359_v11 = vld [vmem:[#allocation2 + $0x30] sm:$0xff] }
  0xb2   : > { %1775 = vmatpush1.bf16.msra.mxu1 %v2554_v26  ;;  %1733 = vmatprep.subr.bf16.mxu0 %v2559_v27 }
  0xb3   : > { %1776 = vmatprep.subr.bf16.mxu1 %v2562_v28 }
  0xb5   : > { %1734 = vmatpush1.bf16.msra.mxu0 %v2557_v29 }
  0xb6   : > { %1777 = vmatpush1.bf16.msra.mxu1 %v2560_v58  ;;  %1735 = vmatprep.subr.bf16.mxu0 %v2565_v30  ;;  %v360_v58 = vld [vmem:[#allocation2] sm:$0xff] }
  0xb7   : > { %1778 = vmatprep.subr.bf16.mxu1 %v2568_v31 }
  0xb9   : > { %1736 = vmatpush1.bf16.msra.mxu0 %v2563_v32 }
  0xba   : > { %1779 = vmatpush1.bf16.msra.mxu1 %v2566_v33  ;;  %1737 = vmatprep.subr.bf16.mxu0 %v2571_v34  ;;  %v363_v33 = vld [vmem:[#allocation2 + $0x8] sm:$0xff] }
  0xbb   : > { %1780 = vmatprep.subr.bf16.mxu1 %v2574_v35 }
  0xbd   : > { %1738 = vmatpush1.bf16.msra.mxu0 %v2569_v36 }
  0xbe   : > { %1781 = vmatpush1.bf16.msra.mxu1 %v2572_v37  ;;  %1739 = vmatprep.subr.bf16.mxu0 %v2577_v38  ;;  %v364_v37 = vld [vmem:[#allocation2 + $0x20] sm:$0xff] }
  0xbf   : > { %1782 = vmatprep.subr.bf16.mxu1 %v2580_v39 }
  0xc1   : > { %1740 = vmatpush1.bf16.msra.mxu0 %v2575_v40 }
  0xc2   : > { %1783 = vmatpush1.bf16.msra.mxu1 %v2578_v41  ;;  %1741 = vmatprep.subr.bf16.mxu0 %v2583_v42 }
  0xc3   : > { %1784 = vmatprep.subr.bf16.mxu1 %v2586_v43 }
  0xc5   : > { %1742 = vmatpush1.bf16.msra.mxu0 %v2581_v44 }
  0xc6   : > { %1785 = vmatpush1.bf16.msra.mxu1 %v2584_v45  ;;  %1743 = vmatprep.subr.bf16.mxu0 %v2589_v46 }
  0xc7   : > { %1786 = vmatprep.subr.bf16.mxu1 %v2592_v47 }
  0xc9   : > { %1744 = vmatpush2.bf16.msra.mxu0 %v2587_v48 }
  0xca   : > { %1787 = vmatpush2.bf16.msra.mxu1 %v2590_v49  ;;  %1745 = vmatprep.subr.bf16.mxu0 %v2595_v50  ;;  %v361_v49 = vld [vmem:[#allocation2 + $0x18] sm:$0xff] }
  0xcb   : > { %1788 = vmatprep.subr.bf16.mxu1 %v2598_v51 }
  0xcd   : > { %1746 = vmatpush2.bf16.msra.mxu0 %v2593_v52 }
  0xce   : > { %1789 = vmatpush2.bf16.msra.mxu1 %v2596_v53  ;;  %1747 = vmatprep.subr.bf16.mxu0 %v2601_v54  ;;  %v362_v54 = vld [vmem:[#allocation2 + $0x10] sm:$0xff] }
  0xcf   : > { %1790 = vmatprep.subr.bf16.mxu1 %v2604_v55 }
  0xd1   : > { %1748 = vmatpush2.bf16.msra.mxu0 %v2599_v56 }
  0xd2   : > { %1791 = vmatpush2.bf16.msra.mxu1 %v2602_v57  ;;  %1749 = vmatprep.subr.bf16.mxu0 %v2607_v59 }
  0xd3   : > { %1792 = vmatprep.subr.bf16.mxu1 %v2610_v60 }
  0xd5   : > { %1750 = vmatpush2.bf16.msra.mxu0 %v2605_v61  ;;  %v365_v61 = vld [vmem:[#allocation2 + $0x28] sm:$0xff] }
  0xd6   : > { %1793 = vmatpush2.bf16.msra.mxu1 %v2608_v62  ;;  %1751 = vmatprep.subr.bf16.mxu0 %v2613_v63 }
  0xd7   : > { %1794 = vmatprep.subr.bf16.mxu1 %v2616_v0 }
  0xd9   : > { %1752 = vmatpush2.bf16.msra.mxu0 %v2611_v1 }
  0xda   : > { %1795 = vmatpush2.bf16.msra.mxu1 %v2614_v2  ;;  %1753 = vmatprep.subr.bf16.mxu0 %v2619_v3  ;;  %v366_v2 = vld [vmem:[#allocation2 + $0x38] sm:$0xff] }
  0xdb   : > { %1796 = vmatprep.subr.bf16.mxu1 %v2622_v4 }
  0xdd   : > { %1754 = vmatpush2.bf16.msra.mxu0 %v2617_v5 }
  0xde   : > { %1797 = vmatpush2.bf16.msra.mxu1 %v2620_v6  ;;  %1755 = vmatprep.subr.bf16.mxu0 %v2625_v7 }
  0xdf   : > { %1798 = vmatprep.subr.bf16.mxu1 %v2628_v8 }
  0xe1   : > { %1756 = vmatpush2.bf16.msra.mxu0 %v2623_v9 }
  0xe2   : > { %1799 = vmatpush2.bf16.msra.mxu1 %v2626_v10  ;;  %1757 = vmatprep.subr.bf16.mxu0 %v2631_v13 }
  0xe3   : > { %1800 = vmatprep.subr.bf16.mxu1 %v2634_v14 }
  0xe5   : > { %1758 = vmatpush2.bf16.msra.mxu0 %v2629_v15 }
  0xe6   : > { %1801 = vmatpush2.bf16.msra.mxu1 %v2632_v16 }
  0xe8   : > { %1760 = vmatmul.mubr.bf16.vlgmr.msra.gmra.mxu0 %v2831_v12 }
  0xe9   : > { %1803 = vmatmul.mubr.bf16.vlgmr.msra.gmra.mxu1 %v2904_v17 }
 0x128   : > { %v1589_v18 = vpop.f32.mrf.mxu0 }
 0x129   : > { %v1632_v19 = vpop.f32.mrf.mxu1 }
 0x12a   : > { %v1591_v20 = vpop.f32.mrf.mxu0  ;;  %v1633_v25 = vadd.f32 %v1632_v19, %v1589_v18 }
 0x12b   : > { %v1634_v21 = vpop.f32.mrf.mxu1 }
 0x12c   : > { %v1593_v22 = vpop.f32.mrf.mxu0  ;;  %v1635_v27 = vadd.f32 %v1634_v21, %v1591_v20 }
 0x12d   : > { %v1636_v23 = vpop.f32.mrf.mxu1 }
 0x12e   : > { %v1595_v24 = vpop.f32.mrf.mxu0  ;;  %v1637_v31 = vadd.f32 %v1636_v23, %v1593_v22 }
 0x12f   : > { %v1638_v29 = vpop.f32.mrf.mxu1 }
 0x130   : > { %v1639_v34 = vadd.f32 %v1638_v29, %v1595_v24 }
 0x168   : > { %v1675_v26 = vpop.f32.mrf.mxu0 }
 0x169   : > { %v1676_v28 = vadd.f32 %v1675_v26, %v1633_v25  ;;  %v1718_v42 = vpop.f32.mrf.mxu1 }
 0x16a   : > { %v1677_v30 = vpop.f32.mrf.mxu0 }
 0x16b   : > { %v1813_v32 = vadd.f32 %v1676_v28, %v359_v11  ;;  %v1678_v12 = vadd.f32 %v1677_v30, %v1635_v27  ;;  %v1720_v43 = vpop.f32.mrf.mxu1 }
 0x16c   : > { %v1679_v17 = vpop.f32.mrf.mxu0 }
 0x16d   : > { %1821 = vst [vmem:[#allocation2 + $0x30] sm:$0xff] %v1813_v32  ;;  %v1814_v35 = vadd.f32 %v1678_v12, %v360_v58  ;;  %v1680_v36 = vadd.f32 %v1679_v17, %v1637_v31  ;;  %v1722_v44 = vpop.f32.mrf.mxu1 }
 0x16e   : > { %v1681_v38 = vpop.f32.mrf.mxu0 }
 0x16f   : > { %1822 = vst [vmem:[#allocation2] sm:$0xff] %v1814_v35  ;;  %v1817_v39 = vadd.f32 %v1680_v36, %v363_v33  ;;  %v1682_v40 = vadd.f32 %v1681_v38, %v1639_v34  ;;  %v1724_v45 = vpop.f32.mrf.mxu1 }
 0x171   : > { %1825 = vst [vmem:[#allocation2 + $0x8] sm:$0xff] %v1817_v39  ;;  %v1818_v41 = vadd.f32 %v1682_v40, %v364_v37 }
 0x173   : > { %1826 = vst [vmem:[#allocation2 + $0x20] sm:$0xff] %v1818_v41 }
 0x1a8   : > { %v1761_v46 = vpop.f32.mrf.mxu0 }
 0x1a9   : > { %v1804_v47 = vpop.f32.mrf.mxu1  ;;  %v1762_v48 = vadd.f32 %v1761_v46, %v1718_v42 }
 0x1aa   : > { %v1763_v50 = vpop.f32.mrf.mxu0 }
 0x1ab   : > { %v1806_v51 = vpop.f32.mrf.mxu1  ;;  %v1805_v52 = vadd.f32 %v1804_v47, %v1762_v48  ;;  %v1764_v53 = vadd.f32 %v1763_v50, %v1720_v43 }
 0x1ac   : > { %v1765_v55 = vpop.f32.mrf.mxu0 }
 0x1ad   : > { %v1808_v56 = vpop.f32.mrf.mxu1  ;;  %v1815_v57 = vadd.f32 %v1805_v52, %v361_v49  ;;  %v1807_v59 = vadd.f32 %v1806_v51, %v1764_v53  ;;  %v1766_v60 = vadd.f32 %v1765_v55, %v1722_v44 }
 0x1ae   : > { %v1767_v62 = vpop.f32.mrf.mxu0 }
 0x1af   : > { %1823 = vst [vmem:[#allocation2 + $0x18] sm:$0xff] %v1815_v57  ;;  %v1816_v63 = vadd.f32 %v1807_v59, %v362_v54  ;;  %v1809_v0 = vadd.f32 %v1808_v56, %v1766_v60  ;;  %v1768_v1 = vadd.f32 %v1767_v62, %v1724_v45  ;;  %v1810_v3 = vpop.f32.mrf.mxu1 }
 0x1b1   : > { %1824 = vst [vmem:[#allocation2 + $0x10] sm:$0xff] %v1816_v63  ;;  %v1819_v4 = vadd.f32 %v1809_v0, %v365_v61  ;;  %v1811_v5 = vadd.f32 %v1810_v3, %v1768_v1  ;;  %1832 = sbr.rel (%p2280_p11) target bundleno = 456 (0x1c8), region = 67 }
 0x1b3   : > { %1827 = vst [vmem:[#allocation2 + $0x28] sm:$0xff] %v1819_v4  ;;  %v1820_v6 = vadd.f32 %v1811_v5, %v366_v2 }
 0x1b5   : > { %1828 = vst [vmem:[#allocation2 + $0x38] sm:$0xff] %v1820_v6 }
 0x1b6   : > { %v1843_v7 = vlaneseq  ;;  %v1841_v9 = vld [vmem:[%s3010_s2] sm:$0xf]  ;;  %v1833_v13 = vld [vmem:[#allocation2 + $0x30] sm:$0xff]  ;;  %v1835_v20 = vld [vmem:[#allocation2 + $0x18] sm:$0xff] }
 0x1b7   : > { %v1871_v10 = vld [vmem:[%s3011_s3] sm:$0xf]  ;;  %v1837_v21 = vld [vmem:[#allocation2 + $0x8] sm:$0xff] }
 0x1b8   : > { %v1844_v8 = vshrl.u32 %v1843_v7, 7  ;;  %v1834_v14 = vld [vmem:[#allocation2] sm:$0xff]  ;;  %v1836_v26 = vld [vmem:[#allocation2 + $0x10] sm:$0xff] }
 0x1b9   : > { %v1838_v22 = vld [vmem:[#allocation2 + $0x20] sm:$0xff] }
 0x1ba   : > { %v1845_v15 = vsub.s32 0, %v1844_v8  ;;  %v1849_v16 = vsub.s32 1, %v1844_v8  ;;  %v1853_v18 = vsub.s32 2, %v1844_v8  ;;  %v1857_v19 = vsub.s32 3, %v1844_v8  ;;  %v1839_v27 = vld [vmem:[#allocation2 + $0x28] sm:$0xff] }
 0x1bc   : > { %v1846_v23 = vrot.slane %v1841_v9, %v1845_v15  ;;  %v1850_v24 = vrot.slane %v1841_v9, %v1849_v16  ;;  %v1876_v25 = vrot.slane %v1871_v10, %v1845_v15  ;;  %v1880_v11 = vrot.slane %v1871_v10, %v1849_v16  ;;  %v1840_v28 = vld [vmem:[#allocation2 + $0x38] sm:$0xff] }
 0x1bd   : > { %v1854_v29 = vrot.slane %v1841_v9, %v1853_v18  ;;  %v1858_v58 = vrot.slane %v1841_v9, %v1857_v19  ;;  %v1884_v30 = vrot.slane %v1871_v10, %v1853_v18  ;;  %v1888_v31 = vrot.slane %v1871_v10, %v1857_v19 }
 0x1be   : > { %v1863_v32 = vmul.f32 %v1846_v23, %v1833_v13  ;;  %v1864_v12 = vmul.f32 %v1850_v24, %v1834_v14  ;;  %v1867_v33 = vmul.f32 %v1846_v23, %v1837_v21  ;;  %v1868_v17 = vmul.f32 %v1850_v24, %v1838_v22 }
 0x1bf   : > { %v1865_v34 = vmul.f32 %v1854_v29, %v1835_v20  ;;  %v1866_v35 = vmul.f32 %v1858_v58, %v1836_v26  ;;  %v1869_v36 = vmul.f32 %v1854_v29, %v1839_v27  ;;  %v1870_v37 = vmul.f32 %v1858_v58, %v1840_v28 }
 0x1c0   : > { %v1893_v38 = vadd.f32 %v1876_v25, %v1863_v32  ;;  %v1894_v39 = vadd.f32 %v1880_v11, %v1864_v12  ;;  %v1897_v40 = vadd.f32 %v1876_v25, %v1867_v33  ;;  %v1898_v41 = vadd.f32 %v1880_v11, %v1868_v17 }
 0x1c1   : > { %v1895_v42 = vadd.f32 %v1884_v30, %v1865_v34  ;;  %v1896_v43 = vadd.f32 %v1888_v31, %v1866_v35  ;;  %v1899_v44 = vadd.f32 %v1884_v30, %v1869_v36  ;;  %v1900_v45 = vadd.f32 %v1888_v31, %v1870_v37 }
 0x1c2   : > { %v1901_v46 = vmax.f32 %v1893_v38, 0.0  ;;  %v1902_v47 = vmax.f32 %v1894_v39, 0.0  ;;  %v1905_v48 = vmax.f32 %v1897_v40, 0.0  ;;  %v1906_v49 = vmax.f32 %v1898_v41, 0.0 }
 0x1c3   : > { %v1903_v50 = vmax.f32 %v1895_v42, 0.0  ;;  %v1904_v51 = vmax.f32 %v1896_v43, 0.0  ;;  %v1907_v52 = vmax.f32 %v1899_v44, 0.0  ;;  %v1908_v53 = vmax.f32 %v1900_v45, 0.0 }
 0x1c4   : > { %v2291_v54 = vpack.c.bf16 %v1902_v47, %v1901_v46  ;;  %v2293_v55 = vpack.c.bf16 %v1906_v49, %v1905_v48 }
 0x1c5   : > { %v2292_v56 = vpack.c.bf16 %v1904_v51, %v1903_v50  ;;  %v2294_v57 = vpack.c.bf16 %v1908_v53, %v1907_v52 }
 0x1c6   : > { %1933 = vst [vmem:[%s3012_s4] sm:$0xff] %v2291_v54  ;;  %1935 = vst [vmem:[%s3012_s4 + $0x10] sm:$0xff] %v2293_v55 }
 0x1c7   : > { %1934 = vst [vmem:[%s3012_s4 + $0x8] sm:$0xff] %v2292_v56  ;;  %1936 = vst [vmem:[%s3012_s4 + $0x18] sm:$0xff] %v2294_v57 }
 0x1c8 PF: > { %s14_s19 = sadd.s32 1, %s2673_s19   ;;  %s3013_s15 = smov %s2661_s16 }
 0x1c9   : > { %p11_p12 = scmp.ge.s32.totalorder %s14_s19, 8   ;;  %s3014_s16 = smov %s2736_s23 }
 0x1ca   : > { %s3015_s17 = smov %s2669_s18  ;;  %s3016_s18 = smov %s3018_s20 }
 0x1cb   :  { %13 = sbr.rel (!%p11_p12) target bundleno = 3 (0x3), region = 111 }

// kernel: resnet_byol_forward.38
= control target key start
LH: loop header
LB: loop body
LE: loop exit
PB: predicated region body
PF: predicated region fallthrough
CT: control target
= control target key end

     0   :  { %s2816_s18 = smov 0   ;;  %s2818_s19 = smov 0   ;;  %s3135_s0 = inlined_call_operand.vmem [shape: bf16[16,4608], index: 0, kind: input, shape index: {}]   ;;  %s3136_s1 = inlined_call_operand.vmem [shape: bf16[4608,512], index: 1, kind: input, shape index: {}]   ;;  %s3137_s2 = inlined_call_operand.vmem [shape: f32[1,512], index: 2, kind: input, shape index: {}]   ;;  %s3138_s3 = inlined_call_operand.vmem [shape: f32[1,512], index: 3, kind: input, shape index: {}]   ;;  %s3139_s4 = inlined_call_operand.vmem [shape: bf16[16,512], index: 4, kind: input, shape index: {}]   ;;  %s3140_s5 = inlined_call_operand.vmem [shape: bf16[16,512], index: 5, kind: output, shape index: {}]  }
   0x1   :  { %s2820_s20 = smov 0   ;;  %s2822_s21 = smov 0  }
   0x2   :  { %s2824_s22 = smov 0  }
   0x3 LB: > { %s27_s23 = sadd.s32 1, %s2779_s21  ;;  %p50_p1 = scmp.ne.s32.totalorder %s2771_s19, %s2767_s18  ;;  %s2783_s22 = sphi %s2824_s22, %s15_s22   ;;  %s2779_s21 = sphi %s2822_s21, %s3144_s21   ;;  %s2775_s20 = sphi %s2820_s20, %s3143_s20   ;;  %s2771_s19 = sphi %s2818_s19, %s3142_s19   ;;  %s2767_s18 = sphi %s2816_s18, %s3141_s18  }
   0x4   : > { %p28_p0 = scmp.ge.s32.totalorder %s27_s23, 6  ;;  %p51_p2 = scmp.eq.s32.totalorder %s2783_s22, 0 }
   0x5   : > { %s43_s25 = sadd.s32 1, %s2771_s19  ;;  %p2186_p5 = scmp.ge.s32.totalorder %s2783_s22, 6 }
   0x6   : > { %s3146_s23 = smov (%p28_p0, %s27_s23), 0  ;;  %p52_p3 = por %p51_p2, %p50_p1 }
   0x7   : > { %s39_s24 = ssub.s32 %s2779_s21, %s3146_s23  ;;  %243 = sbr.rel (%p2186_p5) target bundleno = 20 (0x14), region = 28 }
   0x8   : > { %p41_p4 = scmp.eq.s32.totalorder %s39_s24, 0 }
   0xa   : > { %s2851_s26 = scalar_select %p41_p4, %s2771_s19, %s43_s25  }
   0xc   : > { %246 = sbr.rel (!%p52_p3) target bundleno = 20 (0x14), region = 32  ;;  %s248_s27 = sand.u32 (%p52_p3), 1, %s2771_s19  }
   0xd   : > { %s2399_s28 = smul.u32 (%p52_p3), 24, %s2779_s21 }
   0xe   : > { %s2405_s29 = smul.u32 (%p52_p3), 48, %s248_s27 }
   0xf   : > { %s256_s7 = scalar_lea.vmem (%p52_p3), %s3135_s0, %s2399_s28 }
  0x10   : > { %v269_v0 = vld [vmem:[%s256_s7] sm:$0xff] (%p52_p3)  ;;  %v271_v1 = vld [vmem:[%s256_s7 + $0x8] sm:$0xff] (%p52_p3)  ;;  %v273_v2 = vld [vmem:[%s256_s7 + $0x10] sm:$0xff] (%p52_p3)  ;;  %s250_s8 = scalar_lea.vmem (%p52_p3), [#allocation3], %s2405_s29 }
  0x11   : > { %270 = vst [vmem:[%s250_s8] sm:$0xff] %v269_v0  ;;  %272 = vst [vmem:[%s250_s8 + $0x8] sm:$0xff] %v271_v1  ;;  %v275_v3 = vld [vmem:[%s256_s7 + $0x90] sm:$0xff]  ;;  %v277_v4 = vld [vmem:[%s256_s7 + $0x98] sm:$0xff] }
  0x12   : > { %274 = vst [vmem:[%s250_s8 + $0x10] sm:$0xff] %v273_v2  ;;  %v279_v5 = vld [vmem:[%s256_s7 + $0xa0] sm:$0xff]  ;;  %276 = vst [vmem:[%s250_s8 + $0x18] sm:$0xff] %v275_v3 }
  0x13   : > { %278 = vst [vmem:[%s250_s8 + $0x20] sm:$0xff] %v277_v4  ;;  %280 = vst [vmem:[%s250_s8 + $0x28] sm:$0xff] %v279_v5 }
  0x14 PF: > { %p2188_p6 = scmp.ge.s32.totalorder %s2783_s22, 1  ;;  %p300_p7 = scmp.lt.s32.totalorder %s2783_s22, 7 }
  0x16   : > { %p301_p8 = pnand %p2188_p6, %p300_p7 }
  0x17   : > { %s307_s9 = sand.u32 (!%p301_p8), 1, %s2767_s18   ;;  %s369_s10 = smul.u32 (!%p301_p8), 96, %s2775_s20 }
  0x18   : > { %304 = sbr.rel (%p301_p8) target bundleno = 458 (0x1ca), region = 59  ;;  %p2191_p10 = scmp.ne.s32.totalorder (!%p301_p8), %s2775_s20, 0 }
  0x19   : > { %s2406_s11 = smul.u32 (!%p301_p8), 48, %s307_s9  ;;  %p371_p9 = scmp.lt.s32.totalorder (!%p301_p8), %s369_s10, 575 }
  0x1b   : > { %s2868_s16 = scalar_lea.vmem (!%p301_p8), [#allocation3], %s2406_s11 }
  0x1d   : > { %s3148_s10 = smov (!%p371_p9, %s369_s10), 575  ;;  %418 = sbr.rel (%p2191_p10) target bundleno = 39 (0x27), region = 67 }
  0x1e   : > { %s2400_s12 = sshll.u32 %s3148_s10, 4 }
  0x1f   : > { %s2866_s15 = scalar_lea.vmem %s3136_s1, %s2400_s12 }
  0x22   : > { %v2785_v6 = vmov 0.0  }
  0x23   : > { %419 = vst [vmem:[#allocation2 + $0x30] sm:$0xff] %v2785_v6  ;;  %420 = vst [vmem:[#allocation2] sm:$0xff] %v2785_v6 }
  0x24   : > { %421 = vst [vmem:[#allocation2 + $0x18] sm:$0xff] %v2785_v6  ;;  %422 = vst [vmem:[#allocation2 + $0x10] sm:$0xff] %v2785_v6 }
  0x25   : > { %423 = vst [vmem:[#allocation2 + $0x8] sm:$0xff] %v2785_v6  ;;  %424 = vst [vmem:[#allocation2 + $0x20] sm:$0xff] %v2785_v6 }
  0x26   : > { %425 = vst [vmem:[#allocation2 + $0x28] sm:$0xff] %v2785_v6  ;;  %426 = vst [vmem:[#allocation2 + $0x38] sm:$0xff] %v2785_v6 }
  0x27 PF: > { %v2448_v7 = vld [vmem:[%s2866_s15 + $0xe4] ss:$16 sps:$4 sm:$0xff]   ;;  %v2452_v9 = vld [vmem:[%s2866_s15 + $0xe0] ss:$16 sps:$4 sm:$0xff]   ;;  %p2390_p11 = scmp.ne.s32.totalorder %s2775_s20, 5 }
  0x28   : > { %v2450_v8 = vld [vmem:[%s2866_s15 + $0x2e4] ss:$16 sps:$4 sm:$0xff]   ;;  %1623 = vmatprep.subr.bf16.mxu0 %v2448_v7  ;;  %v2453_v10 = vld [vmem:[%s2866_s15 + $0x2e0] ss:$16 sps:$4 sm:$0xff]  }
  0x29   : > { %1666 = vmatprep.subr.bf16.mxu1 %v2450_v8  ;;  %v2454_v11 = vld [vmem:[%s2866_s15 + $0xc4] ss:$16 sps:$4 sm:$0xff]   ;;  %1624 = vmatpush1.bf16.msra.mxu0 %v2452_v9  ;;  %v2458_v13 = vld [vmem:[%s2866_s15 + $0xc0] ss:$16 sps:$4 sm:$0xff]  }
  0x2a   : > { %1667 = vmatpush1.bf16.msra.mxu1 %v2453_v10  ;;  %v2456_v12 = vld [vmem:[%s2866_s15 + $0x2c4] ss:$16 sps:$4 sm:$0xff]   ;;  %1625 = vmatprep.subr.bf16.mxu0 %v2454_v11  ;;  %v2459_v14 = vld [vmem:[%s2866_s15 + $0x2c0] ss:$16 sps:$4 sm:$0xff]   ;;  %v2555_v10 = vld [vmem:[%s2866_s15 + $0xec] ss:$16 sps:$4 sm:$0xff]  }
  0x2b   : > { %1668 = vmatprep.subr.bf16.mxu1 %v2456_v12  ;;  %v2460_v15 = vld [vmem:[%s2866_s15 + $0xa4] ss:$16 sps:$4 sm:$0xff]   ;;  %v2464_v17 = vld [vmem:[%s2866_s15 + $0xa0] ss:$16 sps:$4 sm:$0xff]  }
  0x2c   : > { %v2462_v16 = vld [vmem:[%s2866_s15 + $0x2a4] ss:$16 sps:$4 sm:$0xff]   ;;  %v2465_v18 = vld [vmem:[%s2866_s15 + $0x2a0] ss:$16 sps:$4 sm:$0xff]  }
  0x2d   : > { %1626 = vmatpush1.bf16.msra.mxu0 %v2458_v13  ;;  %v2466_v19 = vld [vmem:[%s2866_s15 + $0x84] ss:$16 sps:$4 sm:$0xff]   ;;  %v2470_v21 = vld [vmem:[%s2866_s15 + $0x80] ss:$16 sps:$4 sm:$0xff]  }
  0x2e   : > { %1669 = vmatpush1.bf16.msra.mxu1 %v2459_v14  ;;  %1627 = vmatprep.subr.bf16.mxu0 %v2460_v15  ;;  %v2468_v20 = vld [vmem:[%s2866_s15 + $0x284] ss:$16 sps:$4 sm:$0xff]   ;;  %v2471_v22 = vld [vmem:[%s2866_s15 + $0x280] ss:$16 sps:$4 sm:$0xff]   ;;  %v2553_v14 = vld [vmem:[%s2866_s15 + $0xe8] ss:$16 sps:$4 sm:$0xff]  }
  0x2f   : > { %1670 = vmatprep.subr.bf16.mxu1 %v2462_v16  ;;  %v2472_v23 = vld [vmem:[%s2866_s15 + $0x64] ss:$16 sps:$4 sm:$0xff]   ;;  %v2476_v25 = vld [vmem:[%s2866_s15 + $0x60] ss:$16 sps:$4 sm:$0xff]   ;;  %v2561_v16 = vld [vmem:[%s2866_s15 + $0xcc] ss:$16 sps:$4 sm:$0xff]  }
  0x30   : > { %v2474_v24 = vld [vmem:[%s2866_s15 + $0x264] ss:$16 sps:$4 sm:$0xff]   ;;  %v2477_v26 = vld [vmem:[%s2866_s15 + $0x260] ss:$16 sps:$4 sm:$0xff]  }
  0x31   : > { %1628 = vmatpush1.bf16.msra.mxu0 %v2464_v17  ;;  %v2478_v27 = vld [vmem:[%s2866_s15 + $0x44] ss:$16 sps:$4 sm:$0xff]   ;;  %v2482_v29 = vld [vmem:[%s2866_s15 + $0x40] ss:$16 sps:$4 sm:$0xff]  }
  0x32   : > { %1671 = vmatpush1.bf16.msra.mxu1 %v2465_v18  ;;  %1629 = vmatprep.subr.bf16.mxu0 %v2466_v19  ;;  %v2480_v28 = vld [vmem:[%s2866_s15 + $0x244] ss:$16 sps:$4 sm:$0xff]   ;;  %v2483_v30 = vld [vmem:[%s2866_s15 + $0x240] ss:$16 sps:$4 sm:$0xff]   ;;  %v2559_v18 = vld [vmem:[%s2866_s15 + $0xc8] ss:$16 sps:$4 sm:$0xff]  }
  0x33   : > { %1672 = vmatprep.subr.bf16.mxu1 %v2468_v20  ;;  %v2484_v31 = vld [vmem:[%s2866_s15 + $0x24] ss:$16 sps:$4 sm:$0xff]   ;;  %v2488_v33 = vld [vmem:[%s2866_s15 + $0x20] ss:$16 sps:$4 sm:$0xff]   ;;  %v2567_v20 = vld [vmem:[%s2866_s15 + $0xac] ss:$16 sps:$4 sm:$0xff]  }
  0x34   : > { %v2486_v32 = vld [vmem:[%s2866_s15 + $0x224] ss:$16 sps:$4 sm:$0xff]   ;;  %v2489_v34 = vld [vmem:[%s2866_s15 + $0x220] ss:$16 sps:$4 sm:$0xff]  }
  0x35   : > { %1630 = vmatpush1.bf16.msra.mxu0 %v2470_v21  ;;  %v2490_v35 = vld [vmem:[%s2866_s15 + $0x4] ss:$16 sps:$4 sm:$0xff]   ;;  %v2494_v37 = vld [vmem:[%s2866_s15] ss:$16 sps:$4 sm:$0xff]  }
  0x36   : > { %1673 = vmatpush1.bf16.msra.mxu1 %v2471_v22  ;;  %1631 = vmatprep.subr.bf16.mxu0 %v2472_v23  ;;  %v2492_v36 = vld [vmem:[%s2866_s15 + $0x204] ss:$16 sps:$4 sm:$0xff]   ;;  %v2495_v38 = vld [vmem:[%s2866_s15 + $0x200] ss:$16 sps:$4 sm:$0xff]   ;;  %v2565_v22 = vld [vmem:[%s2866_s15 + $0xa8] ss:$16 sps:$4 sm:$0xff]  }
  0x37   : > { %1674 = vmatprep.subr.bf16.mxu1 %v2474_v24  ;;  %v2496_v39 = vld [vmem:[%s2866_s15 + $0x1e4] ss:$16 sps:$4 sm:$0xff]   ;;  %v2500_v41 = vld [vmem:[%s2866_s15 + $0x1e0] ss:$16 sps:$4 sm:$0xff]   ;;  %v2573_v24 = vld [vmem:[%s2866_s15 + $0x8c] ss:$16 sps:$4 sm:$0xff]  }
  0x38   : > { %v2498_v40 = vld [vmem:[%s2866_s15 + $0x3e4] ss:$16 sps:$4 sm:$0xff]   ;;  %v2501_v42 = vld [vmem:[%s2866_s15 + $0x3e0] ss:$16 sps:$4 sm:$0xff]  }
  0x39   : > { %1632 = vmatpush1.bf16.msra.mxu0 %v2476_v25  ;;  %v2502_v43 = vld [vmem:[%s2866_s15 + $0x1c4] ss:$16 sps:$4 sm:$0xff]   ;;  %v2506_v45 = vld [vmem:[%s2866_s15 + $0x1c0] ss:$16 sps:$4 sm:$0xff]  }
  0x3a   : > { %1675 = vmatpush1.bf16.msra.mxu1 %v2477_v26  ;;  %1633 = vmatprep.subr.bf16.mxu0 %v2478_v27  ;;  %v2504_v44 = vld [vmem:[%s2866_s15 + $0x3c4] ss:$16 sps:$4 sm:$0xff]   ;;  %v2507_v46 = vld [vmem:[%s2866_s15 + $0x3c0] ss:$16 sps:$4 sm:$0xff]   ;;  %v2571_v26 = vld [vmem:[%s2866_s15 + $0x88] ss:$16 sps:$4 sm:$0xff]  }
  0x3b   : > { %1676 = vmatprep.subr.bf16.mxu1 %v2480_v28  ;;  %v2508_v47 = vld [vmem:[%s2866_s15 + $0x1a4] ss:$16 sps:$4 sm:$0xff]   ;;  %v2512_v49 = vld [vmem:[%s2866_s15 + $0x1a0] ss:$16 sps:$4 sm:$0xff]   ;;  %v2579_v28 = vld [vmem:[%s2866_s15 + $0x6c] ss:$16 sps:$4 sm:$0xff]  }
  0x3c   : > { %v2510_v48 = vld [vmem:[%s2866_s15 + $0x3a4] ss:$16 sps:$4 sm:$0xff]   ;;  %v2513_v50 = vld [vmem:[%s2866_s15 + $0x3a0] ss:$16 sps:$4 sm:$0xff]  }
  0x3d   : > { %1634 = vmatpush1.bf16.msra.mxu0 %v2482_v29  ;;  %v2514_v51 = vld [vmem:[%s2866_s15 + $0x184] ss:$16 sps:$4 sm:$0xff]   ;;  %v2518_v53 = vld [vmem:[%s2866_s15 + $0x180] ss:$16 sps:$4 sm:$0xff]  }
  0x3e   : > { %1677 = vmatpush1.bf16.msra.mxu1 %v2483_v30  ;;  %1635 = vmatprep.subr.bf16.mxu0 %v2484_v31  ;;  %v2516_v52 = vld [vmem:[%s2866_s15 + $0x384] ss:$16 sps:$4 sm:$0xff]   ;;  %v2519_v54 = vld [vmem:[%s2866_s15 + $0x380] ss:$16 sps:$4 sm:$0xff]   ;;  %v2577_v30 = vld [vmem:[%s2866_s15 + $0x68] ss:$16 sps:$4 sm:$0xff]  }
  0x3f   : > { %1678 = vmatprep.subr.bf16.mxu1 %v2486_v32  ;;  %v2520_v55 = vld [vmem:[%s2866_s15 + $0x164] ss:$16 sps:$4 sm:$0xff]   ;;  %v2524_v59 = vld [vmem:[%s2866_s15 + $0x160] ss:$16 sps:$4 sm:$0xff]   ;;  %v2585_v32 = vld [vmem:[%s2866_s15 + $0x4c] ss:$16 sps:$4 sm:$0xff]  }
  0x40   : > { %v2546_v56 = vld [vmem:[%s2868_s16 + $0x4] ss:$24 sps:$4 sm:$0xff]   ;;  %v2525_v60 = vld [vmem:[%s2866_s15 + $0x360] ss:$16 sps:$4 sm:$0xff]  }
  0x41   : > { %1636 = vmatpush1.bf16.msra.mxu0 %v2488_v33  ;;  %v2522_v57 = vld [vmem:[%s2866_s15 + $0x364] ss:$16 sps:$4 sm:$0xff]   ;;  %1655 = vmatprep.mubr.bf16.mxu0 %v2546_v56  ;;  %v2530_v63 = vld [vmem:[%s2866_s15 + $0x140] ss:$16 sps:$4 sm:$0xff]  }
  0x42   : > { %1679 = vmatpush1.bf16.msra.mxu1 %v2489_v34  ;;  %1637 = vmatprep.subr.bf16.mxu0 %v2490_v35  ;;  %v2923_v58 = vld [vmem:[%s2868_s16 + $0xc] ss:$24 sps:$4 sm:$0xff]   ;;  %v2531_v0 = vld [vmem:[%s2866_s15 + $0x340] ss:$16 sps:$4 sm:$0xff]   ;;  %v2583_v34 = vld [vmem:[%s2866_s15 + $0x48] ss:$16 sps:$4 sm:$0xff]  }
  0x43   : > { %1680 = vmatprep.subr.bf16.mxu1 %v2492_v36  ;;  %1698 = vmatprep.mubr.bf16.mxu1 %v2923_v58  ;;  %v2526_v61 = vld [vmem:[%s2866_s15 + $0x144] ss:$16 sps:$4 sm:$0xff]   ;;  %v2536_v3 = vld [vmem:[%s2866_s15 + $0x120] ss:$16 sps:$4 sm:$0xff]   ;;  %v2591_v36 = vld [vmem:[%s2866_s15 + $0x2c] ss:$16 sps:$4 sm:$0xff]  }
  0x44   : > { %v2528_v62 = vld [vmem:[%s2866_s15 + $0x344] ss:$16 sps:$4 sm:$0xff]   ;;  %v2537_v4 = vld [vmem:[%s2866_s15 + $0x320] ss:$16 sps:$4 sm:$0xff]  }
  0x45   : > { %1638 = vmatpush1.bf16.msra.mxu0 %v2494_v37  ;;  %v2532_v1 = vld [vmem:[%s2866_s15 + $0x124] ss:$16 sps:$4 sm:$0xff]   ;;  %v2542_v7 = vld [vmem:[%s2866_s15 + $0x100] ss:$16 sps:$4 sm:$0xff]  }
  0x46   : > { %1681 = vmatpush1.bf16.msra.mxu1 %v2495_v38  ;;  %1639 = vmatprep.subr.bf16.mxu0 %v2496_v39  ;;  %v2534_v2 = vld [vmem:[%s2866_s15 + $0x324] ss:$16 sps:$4 sm:$0xff]   ;;  %v2543_v8 = vld [vmem:[%s2866_s15 + $0x300] ss:$16 sps:$4 sm:$0xff]   ;;  %v2589_v38 = vld [vmem:[%s2866_s15 + $0x28] ss:$16 sps:$4 sm:$0xff]  }
  0x47   : > { %1682 = vmatprep.subr.bf16.mxu1 %v2498_v40  ;;  %v2538_v5 = vld [vmem:[%s2866_s15 + $0x104] ss:$16 sps:$4 sm:$0xff]   ;;  %v2943_v11 = vld [vmem:[%s2868_s16] ss:$24 sps:$4 sm:$0xff]   ;;  %v2597_v40 = vld [vmem:[%s2866_s15 + $0xc] ss:$16 sps:$4 sm:$0xff]  }
  0x48   : > { %v2540_v6 = vld [vmem:[%s2866_s15 + $0x304] ss:$16 sps:$4 sm:$0xff]   ;;  %v2946_v12 = vld [vmem:[%s2868_s16 + $0x8] ss:$24 sps:$4 sm:$0xff]  }
  0x49   : > { %1640 = vmatpush2.bf16.msra.mxu0 %v2500_v41  ;;  %v2552_v9 = vld [vmem:[%s2866_s15 + $0x4e4] ss:$16 sps:$4 sm:$0xff]   ;;  %v2550_v13 = vld [vmem:[%s2866_s15 + $0x4e0] ss:$16 sps:$4 sm:$0xff]  }
  0x4a   : > { %1683 = vmatpush2.bf16.msra.mxu1 %v2501_v42  ;;  %1641 = vmatprep.subr.bf16.mxu0 %v2502_v43  ;;  %v2558_v15 = vld [vmem:[%s2866_s15 + $0x4c4] ss:$16 sps:$4 sm:$0xff]   ;;  %v2556_v17 = vld [vmem:[%s2866_s15 + $0x4c0] ss:$16 sps:$4 sm:$0xff]   ;;  %v2595_v43 = vld [vmem:[%s2866_s15 + $0x8] ss:$16 sps:$4 sm:$0xff]  }
  0x4b   : > { %1684 = vmatprep.subr.bf16.mxu1 %v2504_v44  ;;  %v2564_v19 = vld [vmem:[%s2866_s15 + $0x4a4] ss:$16 sps:$4 sm:$0xff]   ;;  %v2562_v21 = vld [vmem:[%s2866_s15 + $0x4a0] ss:$16 sps:$4 sm:$0xff]  }
  0x4c   : > { %v2570_v23 = vld [vmem:[%s2866_s15 + $0x484] ss:$16 sps:$4 sm:$0xff]   ;;  %v2568_v25 = vld [vmem:[%s2866_s15 + $0x480] ss:$16 sps:$4 sm:$0xff]  }
  0x4d   : > { %1642 = vmatpush2.bf16.msra.mxu0 %v2506_v45  ;;  %v2576_v27 = vld [vmem:[%s2866_s15 + $0x464] ss:$16 sps:$4 sm:$0xff]   ;;  %v2574_v29 = vld [vmem:[%s2866_s15 + $0x460] ss:$16 sps:$4 sm:$0xff]   ;;  %v2603_v45 = vld [vmem:[%s2866_s15 + $0x1ec] ss:$16 sps:$4 sm:$0xff]  }
  0x4e   : > { %1685 = vmatpush2.bf16.msra.mxu1 %v2507_v46  ;;  %1643 = vmatprep.subr.bf16.mxu0 %v2508_v47  ;;  %v2582_v31 = vld [vmem:[%s2866_s15 + $0x444] ss:$16 sps:$4 sm:$0xff]   ;;  %v2580_v33 = vld [vmem:[%s2866_s15 + $0x440] ss:$16 sps:$4 sm:$0xff]   ;;  %v2601_v47 = vld [vmem:[%s2866_s15 + $0x1e8] ss:$16 sps:$4 sm:$0xff]  }
  0x4f   : > { %1686 = vmatprep.subr.bf16.mxu1 %v2510_v48  ;;  %v2588_v35 = vld [vmem:[%s2866_s15 + $0x424] ss:$16 sps:$4 sm:$0xff]   ;;  %v2586_v37 = vld [vmem:[%s2866_s15 + $0x420] ss:$16 sps:$4 sm:$0xff]  }
  0x50   : > { %v2594_v39 = vld [vmem:[%s2866_s15 + $0x404] ss:$16 sps:$4 sm:$0xff]   ;;  %v2592_v42 = vld [vmem:[%s2866_s15 + $0x400] ss:$16 sps:$4 sm:$0xff]  }
  0x51   : > { %1644 = vmatpush2.bf16.msra.mxu0 %v2512_v49  ;;  %v2979_v41 = vld [vmem:[%s2868_s16 + $0x14] ss:$24 sps:$4 sm:$0xff]   ;;  %v2598_v46 = vld [vmem:[%s2866_s15 + $0x5e0] ss:$16 sps:$4 sm:$0xff]  }
  0x52   : > { %1687 = vmatpush2.bf16.msra.mxu1 %v2513_v50  ;;  %1645 = vmatprep.subr.bf16.mxu0 %v2514_v51  ;;  %v2600_v44 = vld [vmem:[%s2866_s15 + $0x5e4] ss:$16 sps:$4 sm:$0xff]   ;;  %v2609_v49 = vld [vmem:[%s2866_s15 + $0x1cc] ss:$16 sps:$4 sm:$0xff]   ;;  %v2604_v50 = vld [vmem:[%s2866_s15 + $0x5c0] ss:$16 sps:$4 sm:$0xff]  }
  0x53   : > { %1688 = vmatprep.subr.bf16.mxu1 %v2516_v52  ;;  %v2606_v48 = vld [vmem:[%s2866_s15 + $0x5c4] ss:$16 sps:$4 sm:$0xff]   ;;  %v2607_v51 = vld [vmem:[%s2866_s15 + $0x1c8] ss:$16 sps:$4 sm:$0xff]  }
  0x54   : > { %v2612_v52 = vld [vmem:[%s2866_s15 + $0x5a4] ss:$16 sps:$4 sm:$0xff]  }
  0x55   : > { %1646 = vmatpush2.bf16.msra.mxu0 %v2518_v53  ;;  %v2615_v53 = vld [vmem:[%s2866_s15 + $0x1ac] ss:$16 sps:$4 sm:$0xff]  }
  0x56   : > { %1689 = vmatpush2.bf16.msra.mxu1 %v2519_v54  ;;  %1647 = vmatprep.subr.bf16.mxu0 %v2520_v55  ;;  %v2610_v54 = vld [vmem:[%s2866_s15 + $0x5a0] ss:$16 sps:$4 sm:$0xff]   ;;  %v2613_v55 = vld [vmem:[%s2866_s15 + $0x1a8] ss:$16 sps:$4 sm:$0xff]  }
  0x57   : > { %1690 = vmatprep.subr.bf16.mxu1 %v2522_v57  ;;  %v2621_v57 = vld [vmem:[%s2866_s15 + $0x18c] ss:$16 sps:$4 sm:$0xff]  }
  0x59   : > { %1648 = vmatpush2.bf16.msra.mxu0 %v2524_v59  ;;  %v2616_v59 = vld [vmem:[%s2866_s15 + $0x580] ss:$16 sps:$4 sm:$0xff]  }
  0x5a   : > { %1691 = vmatpush2.bf16.msra.mxu1 %v2525_v60  ;;  %1649 = vmatprep.subr.bf16.mxu0 %v2526_v61  ;;  %v2619_v60 = vld [vmem:[%s2866_s15 + $0x188] ss:$16 sps:$4 sm:$0xff]   ;;  %v2624_v61 = vld [vmem:[%s2866_s15 + $0x564] ss:$16 sps:$4 sm:$0xff]  }
  0x5b   : > { %1692 = vmatprep.subr.bf16.mxu1 %v2528_v62  ;;  %v2627_v62 = vld [vmem:[%s2866_s15 + $0x16c] ss:$16 sps:$4 sm:$0xff]  }
  0x5d   : > { %1650 = vmatpush2.bf16.msra.mxu0 %v2530_v63  ;;  %v2622_v63 = vld [vmem:[%s2866_s15 + $0x560] ss:$16 sps:$4 sm:$0xff]  }
  0x5e   : > { %1693 = vmatpush2.bf16.msra.mxu1 %v2531_v0  ;;  %1651 = vmatprep.subr.bf16.mxu0 %v2532_v1  ;;  %v2625_v0 = vld [vmem:[%s2866_s15 + $0x168] ss:$16 sps:$4 sm:$0xff]   ;;  %v2630_v1 = vld [vmem:[%s2866_s15 + $0x544] ss:$16 sps:$4 sm:$0xff]  }
  0x5f   : > { %1694 = vmatprep.subr.bf16.mxu1 %v2534_v2  ;;  %v2633_v2 = vld [vmem:[%s2866_s15 + $0x14c] ss:$16 sps:$4 sm:$0xff]  }
  0x61   : > { %1652 = vmatpush2.bf16.msra.mxu0 %v2536_v3  ;;  %v2628_v3 = vld [vmem:[%s2866_s15 + $0x540] ss:$16 sps:$4 sm:$0xff]  }
  0x62   : > { %1695 = vmatpush2.bf16.msra.mxu1 %v2537_v4  ;;  %1653 = vmatprep.subr.bf16.mxu0 %v2538_v5  ;;  %v2631_v4 = vld [vmem:[%s2866_s15 + $0x148] ss:$16 sps:$4 sm:$0xff]   ;;  %v2636_v5 = vld [vmem:[%s2866_s15 + $0x524] ss:$16 sps:$4 sm:$0xff]  }
  0x63   : > { %1696 = vmatprep.subr.bf16.mxu1 %v2540_v6  ;;  %v2639_v6 = vld [vmem:[%s2866_s15 + $0x12c] ss:$16 sps:$4 sm:$0xff]  }
  0x65   : > { %1654 = vmatpush2.bf16.msra.mxu0 %v2542_v7  ;;  %v2634_v7 = vld [vmem:[%s2866_s15 + $0x520] ss:$16 sps:$4 sm:$0xff]  }
  0x66   : > { %1697 = vmatpush2.bf16.msra.mxu1 %v2543_v8  ;;  %1709 = vmatprep.subr.bf16.mxu0 %v2552_v9  ;;  %v2637_v8 = vld [vmem:[%s2866_s15 + $0x128] ss:$16 sps:$4 sm:$0xff]   ;;  %v2642_v9 = vld [vmem:[%s2866_s15 + $0x504] ss:$16 sps:$4 sm:$0xff]  }
  0x67   : > { %1752 = vmatprep.subr.bf16.mxu1 %v2555_v10  ;;  %v2645_v10 = vld [vmem:[%s2866_s15 + $0x10c] ss:$16 sps:$4 sm:$0xff]  }
  0x68   : > { %1656 = vmatmul.mubr.bf16.vlgmr.msra.gmra.mxu0 %v2943_v11 }
  0x69   : > { %1699 = vmatmul.mubr.bf16.vlgmr.msra.gmra.mxu1 %v2946_v12  ;;  %1710 = vmatpush1.bf16.msra.mxu0 %v2550_v13  ;;  %v2640_v13 = vld [vmem:[%s2866_s15 + $0x500] ss:$16 sps:$4 sm:$0xff]  }
  0x6a   : > { %1753 = vmatpush1.bf16.msra.mxu1 %v2553_v14  ;;  %1711 = vmatprep.subr.bf16.mxu0 %v2558_v15  ;;  %v2643_v14 = vld [vmem:[%s2866_s15 + $0x108] ss:$16 sps:$4 sm:$0xff]   ;;  %v2651_v15 = vld [vmem:[%s2866_s15 + $0x2ec] ss:$16 sps:$4 sm:$0xff]  }
  0x6b   : > { %1754 = vmatprep.subr.bf16.mxu1 %v2561_v16  ;;  %1784 = vmatprep.mubr.bf16.mxu1 %v2546_v56  ;;  %v2618_v56 = vld [vmem:[%s2866_s15 + $0x584] ss:$16 sps:$4 sm:$0xff]   ;;  %v2654_v16 = vld [vmem:[%s2866_s15 + $0x4ec] ss:$16 sps:$4 sm:$0xff]  }
  0x6c   : > { %1741 = vmatprep.mubr.bf16.mxu0 %v2979_v41 }
  0x6d   : > { %1712 = vmatpush1.bf16.msra.mxu0 %v2556_v17  ;;  %v3019_v17 = vld [vmem:[%s2868_s16 + $0x10] ss:$24 sps:$4 sm:$0xff]  }
  0x6e   : > { %1755 = vmatpush1.bf16.msra.mxu1 %v2559_v18  ;;  %1713 = vmatprep.subr.bf16.mxu0 %v2564_v19  ;;  %v2649_v18 = vld [vmem:[%s2866_s15 + $0x2e8] ss:$16 sps:$4 sm:$0xff]  }
  0x6f   : > { %1756 = vmatprep.subr.bf16.mxu1 %v2567_v20  ;;  %v2652_v19 = vld [vmem:[%s2866_s15 + $0x4e8] ss:$16 sps:$4 sm:$0xff]   ;;  %v2657_v20 = vld [vmem:[%s2866_s15 + $0x2cc] ss:$16 sps:$4 sm:$0xff]  }
  0x71   : > { %1714 = vmatpush1.bf16.msra.mxu0 %v2562_v21  ;;  %v2660_v21 = vld [vmem:[%s2866_s15 + $0x4cc] ss:$16 sps:$4 sm:$0xff]  }
  0x72   : > { %1757 = vmatpush1.bf16.msra.mxu1 %v2565_v22  ;;  %1715 = vmatprep.subr.bf16.mxu0 %v2570_v23  ;;  %v2655_v22 = vld [vmem:[%s2866_s15 + $0x2c8] ss:$16 sps:$4 sm:$0xff]  }
  0x73   : > { %1758 = vmatprep.subr.bf16.mxu1 %v2573_v24  ;;  %v2658_v23 = vld [vmem:[%s2866_s15 + $0x4c8] ss:$16 sps:$4 sm:$0xff]   ;;  %v2663_v24 = vld [vmem:[%s2866_s15 + $0x2ac] ss:$16 sps:$4 sm:$0xff]  }
  0x75   : > { %1716 = vmatpush1.bf16.msra.mxu0 %v2568_v25  ;;  %v2666_v25 = vld [vmem:[%s2866_s15 + $0x4ac] ss:$16 sps:$4 sm:$0xff]  }
  0x76   : > { %1759 = vmatpush1.bf16.msra.mxu1 %v2571_v26  ;;  %1717 = vmatprep.subr.bf16.mxu0 %v2576_v27  ;;  %v2664_v26 = vld [vmem:[%s2866_s15 + $0x4a8] ss:$16 sps:$4 sm:$0xff]   ;;  %v2669_v27 = vld [vmem:[%s2866_s15 + $0x28c] ss:$16 sps:$4 sm:$0xff]  }
  0x77   : > { %1760 = vmatprep.subr.bf16.mxu1 %v2579_v28  ;;  %v2672_v28 = vld [vmem:[%s2866_s15 + $0x48c] ss:$16 sps:$4 sm:$0xff]  }
  0x79   : > { %1718 = vmatpush1.bf16.msra.mxu0 %v2574_v29  ;;  %v2667_v29 = vld [vmem:[%s2866_s15 + $0x288] ss:$16 sps:$4 sm:$0xff]  }
  0x7a   : > { %1761 = vmatpush1.bf16.msra.mxu1 %v2577_v30  ;;  %1719 = vmatprep.subr.bf16.mxu0 %v2582_v31  ;;  %v2675_v30 = vld [vmem:[%s2866_s15 + $0x26c] ss:$16 sps:$4 sm:$0xff]  }
  0x7b   : > { %1762 = vmatprep.subr.bf16.mxu1 %v2585_v32  ;;  %v2678_v31 = vld [vmem:[%s2866_s15 + $0x46c] ss:$16 sps:$4 sm:$0xff]   ;;  %v2673_v32 = vld [vmem:[%s2866_s15 + $0x268] ss:$16 sps:$4 sm:$0xff]  }
  0x7d   : > { %1720 = vmatpush1.bf16.msra.mxu0 %v2580_v33  ;;  %v2676_v33 = vld [vmem:[%s2866_s15 + $0x468] ss:$16 sps:$4 sm:$0xff]  }
  0x7e   : > { %1763 = vmatpush1.bf16.msra.mxu1 %v2583_v34  ;;  %1721 = vmatprep.subr.bf16.mxu0 %v2588_v35  ;;  %v2681_v34 = vld [vmem:[%s2866_s15 + $0x24c] ss:$16 sps:$4 sm:$0xff]  }
  0x7f   : > { %1764 = vmatprep.subr.bf16.mxu1 %v2591_v36  ;;  %v2684_v35 = vld [vmem:[%s2866_s15 + $0x44c] ss:$16 sps:$4 sm:$0xff]   ;;  %v2679_v36 = vld [vmem:[%s2866_s15 + $0x248] ss:$16 sps:$4 sm:$0xff]  }
  0x81   : > { %1722 = vmatpush1.bf16.msra.mxu0 %v2586_v37  ;;  %v2682_v37 = vld [vmem:[%s2866_s15 + $0x448] ss:$16 sps:$4 sm:$0xff]  }
  0x82   : > { %1765 = vmatpush1.bf16.msra.mxu1 %v2589_v38  ;;  %1723 = vmatprep.subr.bf16.mxu0 %v2594_v39  ;;  %v2687_v38 = vld [vmem:[%s2866_s15 + $0x22c] ss:$16 sps:$4 sm:$0xff]  }
  0x83   : > { %1766 = vmatprep.subr.bf16.mxu1 %v2597_v40  ;;  %v2690_v39 = vld [vmem:[%s2866_s15 + $0x42c] ss:$16 sps:$4 sm:$0xff]   ;;  %v2685_v40 = vld [vmem:[%s2866_s15 + $0x228] ss:$16 sps:$4 sm:$0xff]  }
  0x85   : > { %1724 = vmatpush1.bf16.msra.mxu0 %v2592_v42  ;;  %v2693_v42 = vld [vmem:[%s2866_s15 + $0x20c] ss:$16 sps:$4 sm:$0xff]  }
  0x86   : > { %1767 = vmatpush1.bf16.msra.mxu1 %v2595_v43  ;;  %1725 = vmatprep.subr.bf16.mxu0 %v2600_v44  ;;  %v2696_v43 = vld [vmem:[%s2866_s15 + $0x40c] ss:$16 sps:$4 sm:$0xff]   ;;  %v2691_v44 = vld [vmem:[%s2866_s15 + $0x208] ss:$16 sps:$4 sm:$0xff]  }
  0x87   : > { %1768 = vmatprep.subr.bf16.mxu1 %v2603_v45  ;;  %v2694_v45 = vld [vmem:[%s2866_s15 + $0x408] ss:$16 sps:$4 sm:$0xff]  }
  0x89   : > { %1726 = vmatpush2.bf16.msra.mxu0 %v2598_v46  ;;  %v2699_v46 = vld [vmem:[%s2866_s15 + $0x3ec] ss:$16 sps:$4 sm:$0xff]  }
  0x8a   : > { %1769 = vmatpush2.bf16.msra.mxu1 %v2601_v47  ;;  %1727 = vmatprep.subr.bf16.mxu0 %v2606_v48  ;;  %v2702_v47 = vld [vmem:[%s2866_s15 + $0x5ec] ss:$16 sps:$4 sm:$0xff]   ;;  %v2697_v48 = vld [vmem:[%s2866_s15 + $0x3e8] ss:$16 sps:$4 sm:$0xff]  }
  0x8b   : > { %1770 = vmatprep.subr.bf16.mxu1 %v2609_v49  ;;  %v2700_v49 = vld [vmem:[%s2866_s15 + $0x5e8] ss:$16 sps:$4 sm:$0xff]  }
  0x8d   : > { %1728 = vmatpush2.bf16.msra.mxu0 %v2604_v50  ;;  %v2705_v50 = vld [vmem:[%s2866_s15 + $0x3cc] ss:$16 sps:$4 sm:$0xff]  }
  0x8e   : > { %1771 = vmatpush2.bf16.msra.mxu1 %v2607_v51  ;;  %1729 = vmatprep.subr.bf16.mxu0 %v2612_v52  ;;  %v2708_v51 = vld [vmem:[%s2866_s15 + $0x5cc] ss:$16 sps:$4 sm:$0xff]   ;;  %v2703_v52 = vld [vmem:[%s2866_s15 + $0x3c8] ss:$16 sps:$4 sm:$0xff]  }
  0x8f   : > { %1772 = vmatprep.subr.bf16.mxu1 %v2615_v53  ;;  %v2706_v53 = vld [vmem:[%s2866_s15 + $0x5c8] ss:$16 sps:$4 sm:$0xff]  }
  0x91   : > { %1730 = vmatpush2.bf16.msra.mxu0 %v2610_v54  ;;  %v2711_v54 = vld [vmem:[%s2866_s15 + $0x3ac] ss:$16 sps:$4 sm:$0xff]  }
  0x92   : > { %1773 = vmatpush2.bf16.msra.mxu1 %v2613_v55  ;;  %1731 = vmatprep.subr.bf16.mxu0 %v2618_v56  ;;  %v2714_v55 = vld [vmem:[%s2866_s15 + $0x5ac] ss:$16 sps:$4 sm:$0xff]   ;;  %v2709_v56 = vld [vmem:[%s2866_s15 + $0x3a8] ss:$16 sps:$4 sm:$0xff]  }
  0x93   : > { %1774 = vmatprep.subr.bf16.mxu1 %v2621_v57  ;;  %v2712_v57 = vld [vmem:[%s2866_s15 + $0x5a8] ss:$16 sps:$4 sm:$0xff]  }
  0x95   : > { %1732 = vmatpush2.bf16.msra.mxu0 %v2616_v59  ;;  %v2717_v59 = vld [vmem:[%s2866_s15 + $0x38c] ss:$16 sps:$4 sm:$0xff]  }
  0x96   : > { %1775 = vmatpush2.bf16.msra.mxu1 %v2619_v60  ;;  %1733 = vmatprep.subr.bf16.mxu0 %v2624_v61  ;;  %v2720_v60 = vld [vmem:[%s2866_s15 + $0x58c] ss:$16 sps:$4 sm:$0xff]   ;;  %v2715_v61 = vld [vmem:[%s2866_s15 + $0x388] ss:$16 sps:$4 sm:$0xff]  }
  0x97   : > { %1776 = vmatprep.subr.bf16.mxu1 %v2627_v62  ;;  %v2718_v62 = vld [vmem:[%s2866_s15 + $0x588] ss:$16 sps:$4 sm:$0xff]  }
  0x99   : > { %1734 = vmatpush2.bf16.msra.mxu0 %v2622_v63  ;;  %v2723_v63 = vld [vmem:[%s2866_s15 + $0x36c] ss:$16 sps:$4 sm:$0xff]  }
  0x9a   : > { %1777 = vmatpush2.bf16.msra.mxu1 %v2625_v0  ;;  %1735 = vmatprep.subr.bf16.mxu0 %v2630_v1  ;;  %v2726_v0 = vld [vmem:[%s2866_s15 + $0x56c] ss:$16 sps:$4 sm:$0xff]   ;;  %v2721_v1 = vld [vmem:[%s2866_s15 + $0x368] ss:$16 sps:$4 sm:$0xff]  }
  0x9b   : > { %1778 = vmatprep.subr.bf16.mxu1 %v2633_v2  ;;  %v2724_v2 = vld [vmem:[%s2866_s15 + $0x568] ss:$16 sps:$4 sm:$0xff]  }
  0x9d   : > { %1736 = vmatpush2.bf16.msra.mxu0 %v2628_v3  ;;  %v2729_v3 = vld [vmem:[%s2866_s15 + $0x34c] ss:$16 sps:$4 sm:$0xff]  }
  0x9e   : > { %1779 = vmatpush2.bf16.msra.mxu1 %v2631_v4  ;;  %1737 = vmatprep.subr.bf16.mxu0 %v2636_v5  ;;  %v2732_v4 = vld [vmem:[%s2866_s15 + $0x54c] ss:$16 sps:$4 sm:$0xff]   ;;  %v2727_v5 = vld [vmem:[%s2866_s15 + $0x348] ss:$16 sps:$4 sm:$0xff]  }
  0x9f   : > { %1780 = vmatprep.subr.bf16.mxu1 %v2639_v6  ;;  %v2730_v6 = vld [vmem:[%s2866_s15 + $0x548] ss:$16 sps:$4 sm:$0xff]  }
  0xa1   : > { %1738 = vmatpush2.bf16.msra.mxu0 %v2634_v7  ;;  %v2735_v7 = vld [vmem:[%s2866_s15 + $0x32c] ss:$16 sps:$4 sm:$0xff]  }
  0xa2   : > { %1781 = vmatpush2.bf16.msra.mxu1 %v2637_v8  ;;  %1739 = vmatprep.subr.bf16.mxu0 %v2642_v9  ;;  %v2738_v8 = vld [vmem:[%s2866_s15 + $0x52c] ss:$16 sps:$4 sm:$0xff]   ;;  %v2733_v9 = vld [vmem:[%s2866_s15 + $0x328] ss:$16 sps:$4 sm:$0xff]  }
  0xa3   : > { %1782 = vmatprep.subr.bf16.mxu1 %v2645_v10  ;;  %v2736_v10 = vld [vmem:[%s2866_s15 + $0x528] ss:$16 sps:$4 sm:$0xff]  }
  0xa5   : > { %1740 = vmatpush2.bf16.msra.mxu0 %v2640_v13  ;;  %v2741_v13 = vld [vmem:[%s2866_s15 + $0x30c] ss:$16 sps:$4 sm:$0xff]  }
  0xa6   : > { %1783 = vmatpush2.bf16.msra.mxu1 %v2643_v14  ;;  %1795 = vmatprep.subr.bf16.mxu0 %v2651_v15  ;;  %v2744_v14 = vld [vmem:[%s2866_s15 + $0x50c] ss:$16 sps:$4 sm:$0xff]   ;;  %v2739_v15 = vld [vmem:[%s2866_s15 + $0x308] ss:$16 sps:$4 sm:$0xff]  }
  0xa7   : > { %1838 = vmatprep.subr.bf16.mxu1 %v2654_v16  ;;  %v2742_v16 = vld [vmem:[%s2866_s15 + $0x508] ss:$16 sps:$4 sm:$0xff]  }
  0xa8   : > { %1742 = vmatmul.mubr.bf16.vlgmr.msra.gmra.mxu0 %v3019_v17 }
  0xa9   : > { %1785 = vmatmul.mubr.bf16.vlgmr.msra.gmra.mxu1 %v2943_v11  ;;  %1796 = vmatpush1.bf16.msra.mxu0 %v2649_v18  ;;  %v2661_v11 = vld [vmem:[%s2866_s15 + $0x2a8] ss:$16 sps:$4 sm:$0xff]  }
  0xaa   : > { %1839 = vmatpush1.bf16.msra.mxu1 %v2652_v19  ;;  %1797 = vmatprep.subr.bf16.mxu0 %v2657_v20 }
  0xab   : > { %1840 = vmatprep.subr.bf16.mxu1 %v2660_v21  ;;  %1827 = vmatprep.mubr.bf16.mxu0 %v2923_v58  ;;  %v2670_v58 = vld [vmem:[%s2866_s15 + $0x488] ss:$16 sps:$4 sm:$0xff]  }
  0xac   : > { %1870 = vmatprep.mubr.bf16.mxu1 %v2979_v41  ;;  %v2688_v41 = vld [vmem:[%s2866_s15 + $0x428] ss:$16 sps:$4 sm:$0xff]  }
  0xad   : > { %1798 = vmatpush1.bf16.msra.mxu0 %v2655_v22 }
  0xae   : > { %1841 = vmatpush1.bf16.msra.mxu1 %v2658_v23  ;;  %1799 = vmatprep.subr.bf16.mxu0 %v2663_v24 }
  0xaf   : > { %1842 = vmatprep.subr.bf16.mxu1 %v2666_v25 }
  0xb1   : > { %1800 = vmatpush1.bf16.msra.mxu0 %v2661_v11  ;;  %v427_v11 = vld [vmem:[#allocation2 + $0x30] sm:$0xff] }
  0xb2   : > { %1843 = vmatpush1.bf16.msra.mxu1 %v2664_v26  ;;  %1801 = vmatprep.subr.bf16.mxu0 %v2669_v27 }
  0xb3   : > { %1844 = vmatprep.subr.bf16.mxu1 %v2672_v28 }
  0xb5   : > { %1802 = vmatpush1.bf16.msra.mxu0 %v2667_v29 }
  0xb6   : > { %1845 = vmatpush1.bf16.msra.mxu1 %v2670_v58  ;;  %1803 = vmatprep.subr.bf16.mxu0 %v2675_v30  ;;  %v428_v58 = vld [vmem:[#allocation2] sm:$0xff] }
  0xb7   : > { %1846 = vmatprep.subr.bf16.mxu1 %v2678_v31 }
  0xb9   : > { %1804 = vmatpush1.bf16.msra.mxu0 %v2673_v32 }
  0xba   : > { %1847 = vmatpush1.bf16.msra.mxu1 %v2676_v33  ;;  %1805 = vmatprep.subr.bf16.mxu0 %v2681_v34  ;;  %v431_v33 = vld [vmem:[#allocation2 + $0x8] sm:$0xff] }
  0xbb   : > { %1848 = vmatprep.subr.bf16.mxu1 %v2684_v35 }
  0xbd   : > { %1806 = vmatpush1.bf16.msra.mxu0 %v2679_v36 }
  0xbe   : > { %1849 = vmatpush1.bf16.msra.mxu1 %v2682_v37  ;;  %1807 = vmatprep.subr.bf16.mxu0 %v2687_v38  ;;  %v432_v37 = vld [vmem:[#allocation2 + $0x20] sm:$0xff] }
  0xbf   : > { %1850 = vmatprep.subr.bf16.mxu1 %v2690_v39 }
  0xc1   : > { %1808 = vmatpush1.bf16.msra.mxu0 %v2685_v40 }
  0xc2   : > { %1851 = vmatpush1.bf16.msra.mxu1 %v2688_v41  ;;  %1809 = vmatprep.subr.bf16.mxu0 %v2693_v42 }
  0xc3   : > { %1852 = vmatprep.subr.bf16.mxu1 %v2696_v43 }
  0xc5   : > { %1810 = vmatpush1.bf16.msra.mxu0 %v2691_v44 }
  0xc6   : > { %1853 = vmatpush1.bf16.msra.mxu1 %v2694_v45  ;;  %1811 = vmatprep.subr.bf16.mxu0 %v2699_v46 }
  0xc7   : > { %1854 = vmatprep.subr.bf16.mxu1 %v2702_v47 }
  0xc9   : > { %1812 = vmatpush2.bf16.msra.mxu0 %v2697_v48 }
  0xca   : > { %1855 = vmatpush2.bf16.msra.mxu1 %v2700_v49  ;;  %1813 = vmatprep.subr.bf16.mxu0 %v2705_v50  ;;  %v429_v49 = vld [vmem:[#allocation2 + $0x18] sm:$0xff] }
  0xcb   : > { %1856 = vmatprep.subr.bf16.mxu1 %v2708_v51 }
  0xcd   : > { %1814 = vmatpush2.bf16.msra.mxu0 %v2703_v52 }
  0xce   : > { %1857 = vmatpush2.bf16.msra.mxu1 %v2706_v53  ;;  %1815 = vmatprep.subr.bf16.mxu0 %v2711_v54  ;;  %v430_v54 = vld [vmem:[#allocation2 + $0x10] sm:$0xff] }
  0xcf   : > { %1858 = vmatprep.subr.bf16.mxu1 %v2714_v55 }
  0xd1   : > { %1816 = vmatpush2.bf16.msra.mxu0 %v2709_v56 }
  0xd2   : > { %1859 = vmatpush2.bf16.msra.mxu1 %v2712_v57  ;;  %1817 = vmatprep.subr.bf16.mxu0 %v2717_v59 }
  0xd3   : > { %1860 = vmatprep.subr.bf16.mxu1 %v2720_v60 }
  0xd5   : > { %1818 = vmatpush2.bf16.msra.mxu0 %v2715_v61  ;;  %v433_v61 = vld [vmem:[#allocation2 + $0x28] sm:$0xff] }
  0xd6   : > { %1861 = vmatpush2.bf16.msra.mxu1 %v2718_v62  ;;  %1819 = vmatprep.subr.bf16.mxu0 %v2723_v63 }
  0xd7   : > { %1862 = vmatprep.subr.bf16.mxu1 %v2726_v0 }
  0xd9   : > { %1820 = vmatpush2.bf16.msra.mxu0 %v2721_v1 }
  0xda   : > { %1863 = vmatpush2.bf16.msra.mxu1 %v2724_v2  ;;  %1821 = vmatprep.subr.bf16.mxu0 %v2729_v3  ;;  %v434_v2 = vld [vmem:[#allocation2 + $0x38] sm:$0xff] }
  0xdb   : > { %1864 = vmatprep.subr.bf16.mxu1 %v2732_v4 }
  0xdd   : > { %1822 = vmatpush2.bf16.msra.mxu0 %v2727_v5 }
  0xde   : > { %1865 = vmatpush2.bf16.msra.mxu1 %v2730_v6  ;;  %1823 = vmatprep.subr.bf16.mxu0 %v2735_v7 }
  0xdf   : > { %1866 = vmatprep.subr.bf16.mxu1 %v2738_v8 }
  0xe1   : > { %1824 = vmatpush2.bf16.msra.mxu0 %v2733_v9 }
  0xe2   : > { %1867 = vmatpush2.bf16.msra.mxu1 %v2736_v10  ;;  %1825 = vmatprep.subr.bf16.mxu0 %v2741_v13 }
  0xe3   : > { %1868 = vmatprep.subr.bf16.mxu1 %v2744_v14 }
  0xe5   : > { %1826 = vmatpush2.bf16.msra.mxu0 %v2739_v15 }
  0xe6   : > { %1869 = vmatpush2.bf16.msra.mxu1 %v2742_v16 }
  0xe8   : > { %1828 = vmatmul.mubr.bf16.vlgmr.msra.gmra.mxu0 %v2946_v12 }
  0xe9   : > { %1871 = vmatmul.mubr.bf16.vlgmr.msra.gmra.mxu1 %v3019_v17 }
 0x128   : > { %v1657_v18 = vpop.f32.mrf.mxu0 }
 0x129   : > { %v1700_v19 = vpop.f32.mrf.mxu1 }
 0x12a   : > { %v1659_v20 = vpop.f32.mrf.mxu0  ;;  %v1701_v25 = vadd.f32 %v1700_v19, %v1657_v18 }
 0x12b   : > { %v1702_v21 = vpop.f32.mrf.mxu1 }
 0x12c   : > { %v1661_v22 = vpop.f32.mrf.mxu0  ;;  %v1703_v27 = vadd.f32 %v1702_v21, %v1659_v20 }
 0x12d   : > { %v1704_v23 = vpop.f32.mrf.mxu1 }
 0x12e   : > { %v1663_v24 = vpop.f32.mrf.mxu0  ;;  %v1705_v31 = vadd.f32 %v1704_v23, %v1661_v22 }
 0x12f   : > { %v1706_v29 = vpop.f32.mrf.mxu1 }
 0x130   : > { %v1707_v34 = vadd.f32 %v1706_v29, %v1663_v24 }
 0x168   : > { %v1743_v26 = vpop.f32.mrf.mxu0 }
 0x169   : > { %v1744_v28 = vadd.f32 %v1743_v26, %v1701_v25  ;;  %v1786_v42 = vpop.f32.mrf.mxu1 }
 0x16a   : > { %v1745_v30 = vpop.f32.mrf.mxu0 }
 0x16b   : > { %v1881_v32 = vadd.f32 %v1744_v28, %v427_v11  ;;  %v1746_v12 = vadd.f32 %v1745_v30, %v1703_v27  ;;  %v1788_v43 = vpop.f32.mrf.mxu1 }
 0x16c   : > { %v1747_v17 = vpop.f32.mrf.mxu0 }
 0x16d   : > { %1889 = vst [vmem:[#allocation2 + $0x30] sm:$0xff] %v1881_v32  ;;  %v1882_v35 = vadd.f32 %v1746_v12, %v428_v58  ;;  %v1748_v36 = vadd.f32 %v1747_v17, %v1705_v31  ;;  %v1790_v44 = vpop.f32.mrf.mxu1 }
 0x16e   : > { %v1749_v38 = vpop.f32.mrf.mxu0 }
 0x16f   : > { %1890 = vst [vmem:[#allocation2] sm:$0xff] %v1882_v35  ;;  %v1885_v39 = vadd.f32 %v1748_v36, %v431_v33  ;;  %v1750_v40 = vadd.f32 %v1749_v38, %v1707_v34  ;;  %v1792_v45 = vpop.f32.mrf.mxu1 }
 0x171   : > { %1893 = vst [vmem:[#allocation2 + $0x8] sm:$0xff] %v1885_v39  ;;  %v1886_v41 = vadd.f32 %v1750_v40, %v432_v37 }
 0x173   : > { %1894 = vst [vmem:[#allocation2 + $0x20] sm:$0xff] %v1886_v41 }
 0x1a8   : > { %v1829_v46 = vpop.f32.mrf.mxu0 }
 0x1a9   : > { %v1872_v47 = vpop.f32.mrf.mxu1  ;;  %v1830_v48 = vadd.f32 %v1829_v46, %v1786_v42 }
 0x1aa   : > { %v1831_v50 = vpop.f32.mrf.mxu0 }
 0x1ab   : > { %v1874_v51 = vpop.f32.mrf.mxu1  ;;  %v1873_v52 = vadd.f32 %v1872_v47, %v1830_v48  ;;  %v1832_v53 = vadd.f32 %v1831_v50, %v1788_v43 }
 0x1ac   : > { %v1833_v55 = vpop.f32.mrf.mxu0 }
 0x1ad   : > { %v1876_v56 = vpop.f32.mrf.mxu1  ;;  %v1883_v57 = vadd.f32 %v1873_v52, %v429_v49  ;;  %v1875_v59 = vadd.f32 %v1874_v51, %v1832_v53  ;;  %v1834_v60 = vadd.f32 %v1833_v55, %v1790_v44 }
 0x1ae   : > { %v1835_v62 = vpop.f32.mrf.mxu0 }
 0x1af   : > { %1891 = vst [vmem:[#allocation2 + $0x18] sm:$0xff] %v1883_v57  ;;  %v1884_v63 = vadd.f32 %v1875_v59, %v430_v54  ;;  %v1877_v0 = vadd.f32 %v1876_v56, %v1834_v60  ;;  %v1836_v1 = vadd.f32 %v1835_v62, %v1792_v45  ;;  %v1878_v3 = vpop.f32.mrf.mxu1 }
 0x1b1   : > { %1892 = vst [vmem:[#allocation2 + $0x10] sm:$0xff] %v1884_v63  ;;  %v1887_v4 = vadd.f32 %v1877_v0, %v433_v61  ;;  %v1879_v5 = vadd.f32 %v1878_v3, %v1836_v1  ;;  %1900 = sbr.rel (%p2390_p11) target bundleno = 458 (0x1ca), region = 71 }
 0x1b3   : > { %1895 = vst [vmem:[#allocation2 + $0x28] sm:$0xff] %v1887_v4  ;;  %v1888_v6 = vadd.f32 %v1879_v5, %v434_v2 }
 0x1b5   : > { %1896 = vst [vmem:[#allocation2 + $0x38] sm:$0xff] %v1888_v6 }
 0x1b6   : > { %v1911_v7 = vlaneseq  ;;  %v1969_v8 = vld [vmem:[%s3139_s4] sm:$0xff]  ;;  %v1970_v10 = vld [vmem:[%s3139_s4 + $0x8] sm:$0xff]  ;;  %v1901_v13 = vld [vmem:[#allocation2 + $0x30] sm:$0xff] }
 0x1b7   : > { %v1909_v14 = vld [vmem:[%s3137_s2] sm:$0xf]  ;;  %v1973_v16 = vunpack.c.l.bf16 %v1969_v8  ;;  %v1974_v18 = vunpack.c.h.bf16 %v1969_v8  ;;  %v1975_v19 = vunpack.c.l.bf16 %v1970_v10  ;;  %v1976_v20 = vunpack.c.h.bf16 %v1970_v10  ;;  %v1971_v21 = vld [vmem:[%s3139_s4 + $0x10] sm:$0xff]  ;;  %v1972_v26 = vld [vmem:[%s3139_s4 + $0x18] sm:$0xff] }
 0x1b8   : > { %v1912_v9 = vshrl.u32 %v1911_v7, 7  ;;  %v1939_v15 = vld [vmem:[%s3138_s3] sm:$0xf]  ;;  %v1903_v27 = vld [vmem:[#allocation2 + $0x18] sm:$0xff]  ;;  %v1905_v28 = vld [vmem:[#allocation2 + $0x8] sm:$0xff]  ;;  %v1977_v58 = vunpack.c.l.bf16 %v1971_v21  ;;  %v1978_v30 = vunpack.c.h.bf16 %v1971_v21  ;;  %v1979_v31 = vunpack.c.l.bf16 %v1972_v26 }
 0x1b9   : > { %v1902_v22 = vld [vmem:[#allocation2] sm:$0xff]  ;;  %v1980_v32 = vunpack.c.h.bf16 %v1972_v26  ;;  %v1904_v35 = vld [vmem:[#allocation2 + $0x10] sm:$0xff] }
 0x1ba   : > { %v1913_v23 = vsub.s32 0, %v1912_v9  ;;  %v1917_v24 = vsub.s32 1, %v1912_v9  ;;  %v1921_v25 = vsub.s32 2, %v1912_v9  ;;  %v1925_v11 = vsub.s32 3, %v1912_v9  ;;  %v1906_v29 = vld [vmem:[#allocation2 + $0x20] sm:$0xff]  ;;  %v1907_v36 = vld [vmem:[#allocation2 + $0x28] sm:$0xff] }
 0x1bc   : > { %v1914_v12 = vrot.slane %v1909_v14, %v1913_v23  ;;  %v1918_v33 = vrot.slane %v1909_v14, %v1917_v24  ;;  %v1944_v17 = vrot.slane %v1939_v15, %v1913_v23  ;;  %v1948_v34 = vrot.slane %v1939_v15, %v1917_v24  ;;  %v1908_v37 = vld [vmem:[#allocation2 + $0x38] sm:$0xff] }
 0x1bd   : > { %v1922_v38 = vrot.slane %v1909_v14, %v1921_v25  ;;  %v1926_v39 = vrot.slane %v1909_v14, %v1925_v11  ;;  %v1952_v40 = vrot.slane %v1939_v15, %v1921_v25  ;;  %v1956_v41 = vrot.slane %v1939_v15, %v1925_v11 }
 0x1be   : > { %v1931_v42 = vmul.f32 %v1914_v12, %v1901_v13  ;;  %v1932_v43 = vmul.f32 %v1918_v33, %v1902_v22  ;;  %v1935_v44 = vmul.f32 %v1914_v12, %v1905_v28  ;;  %v1936_v45 = vmul.f32 %v1918_v33, %v1906_v29 }
 0x1bf   : > { %v1933_v46 = vmul.f32 %v1922_v38, %v1903_v27  ;;  %v1934_v47 = vmul.f32 %v1926_v39, %v1904_v35  ;;  %v1937_v48 = vmul.f32 %v1922_v38, %v1907_v36  ;;  %v1938_v49 = vmul.f32 %v1926_v39, %v1908_v37 }
 0x1c0   : > { %v1961_v50 = vadd.f32 %v1944_v17, %v1931_v42  ;;  %v1962_v51 = vadd.f32 %v1948_v34, %v1932_v43  ;;  %v1965_v52 = vadd.f32 %v1944_v17, %v1935_v44  ;;  %v1966_v53 = vadd.f32 %v1948_v34, %v1936_v45 }
 0x1c1   : > { %v1963_v54 = vadd.f32 %v1952_v40, %v1933_v46  ;;  %v1964_v55 = vadd.f32 %v1956_v41, %v1934_v47  ;;  %v1967_v56 = vadd.f32 %v1952_v40, %v1937_v48  ;;  %v1968_v57 = vadd.f32 %v1956_v41, %v1938_v49 }
 0x1c2   : > { %v1981_v59 = vadd.f32 %v1973_v16, %v1961_v50  ;;  %v1982_v60 = vadd.f32 %v1974_v18, %v1962_v51  ;;  %v1985_v61 = vadd.f32 %v1977_v58, %v1965_v52  ;;  %v1986_v62 = vadd.f32 %v1978_v30, %v1966_v53 }
 0x1c3   : > { %v1983_v63 = vadd.f32 %v1975_v19, %v1963_v54  ;;  %v1984_v0 = vadd.f32 %v1976_v20, %v1964_v55  ;;  %v1987_v1 = vadd.f32 %v1979_v31, %v1967_v56  ;;  %v1988_v2 = vadd.f32 %v1980_v32, %v1968_v57 }
 0x1c4   : > { %v1989_v3 = vmax.f32 %v1981_v59, 0.0  ;;  %v1990_v4 = vmax.f32 %v1982_v60, 0.0  ;;  %v1993_v5 = vmax.f32 %v1985_v61, 0.0  ;;  %v1994_v6 = vmax.f32 %v1986_v62, 0.0 }
 0x1c5   : > { %v1991_v7 = vmax.f32 %v1983_v63, 0.0  ;;  %v1992_v8 = vmax.f32 %v1984_v0, 0.0  ;;  %v1995_v9 = vmax.f32 %v1987_v1, 0.0  ;;  %v1996_v10 = vmax.f32 %v1988_v2, 0.0 }
 0x1c6   : > { %v2401_v13 = vpack.c.bf16 %v1990_v4, %v1989_v3  ;;  %v2403_v14 = vpack.c.bf16 %v1994_v6, %v1993_v5 }
 0x1c7   : > { %v2402_v15 = vpack.c.bf16 %v1992_v8, %v1991_v7  ;;  %v2404_v21 = vpack.c.bf16 %v1996_v10, %v1995_v9 }
 0x1c8   : > { %2021 = vst [vmem:[%s3140_s5] sm:$0xff] %v2401_v13  ;;  %2023 = vst [vmem:[%s3140_s5 + $0x10] sm:$0xff] %v2403_v14 }
 0x1c9   : > { %2022 = vst [vmem:[%s3140_s5 + $0x8] sm:$0xff] %v2402_v15  ;;  %2024 = vst [vmem:[%s3140_s5 + $0x18] sm:$0xff] %v2404_v21 }
 0x1ca PF: > { %s15_s22 = sadd.s32 1, %s2783_s22   ;;  %s3141_s18 = smov %s2771_s19 }
 0x1cb   : > { %p12_p12 = scmp.ge.s32.totalorder %s15_s22, 8   ;;  %s3142_s19 = smov %s2851_s26 }
 0x1cc   : > { %s3143_s20 = smov %s2779_s21  ;;  %s3144_s21 = smov %s3146_s23 }
 0x1cd   :  { %14 = sbr.rel (!%p12_p12) target bundleno = 3 (0x3), region = 118 }

// kernel: resnet_byol_forward.41
= control target key start
LH: loop header
LB: loop body
LE: loop exit
PB: predicated region body
PF: predicated region fallthrough
CT: control target
= control target key end

     0   :  { %v30_v22 = vlaneseq  ;;  %v766_v41 = vmov 0.0   ;;  %vm166_vm0 = vcmask 1041409   ;;  %s944_s0 = inlined_call_operand.vmem [shape: bf16[2,1,512], index: 0, kind: input, shape index: {}]   ;;  %s945_s1 = inlined_call_operand.vmem [shape: bf16[512,128], index: 1, kind: input, shape index: {}]   ;;  %s946_s2 = inlined_call_operand.vmem [shape: f32[1,128], index: 2, kind: input, shape index: {}]   ;;  %s947_s3 = inlined_call_operand.vmem [shape: bf16[128,128], index: 3, kind: input, shape index: {}]   ;;  %s948_s4 = inlined_call_operand.vmem [shape: f32[1,128], index: 4, kind: input, shape index: {}]   ;;  %s949_s5 = inlined_call_operand.hbm [shape: f32[2,128], index: 5, kind: output, shape index: {}]  }
   0x1   :  { %v704_v0 = vld [vmem:[%s945_s1 + $0x78] sm:$0xff]   ;;  %v708_v4 = vld [vmem:[%s945_s1 + $0x70] sm:$0xff]   ;;  %v712_v8 = vld [vmem:[%s945_s1 + $0x68] sm:$0xff]  }
   0x2   :  { %v705_v1 = vld [vmem:[%s945_s1 + $0xf8] sm:$0xff]   ;;  %628 = vmatprep.subr.bf16.mxu0 %v704_v0  ;;  %v709_v5 = vld [vmem:[%s945_s1 + $0xf0] sm:$0xff]   ;;  %v713_v9 = vld [vmem:[%s945_s1 + $0xe8] sm:$0xff]   ;;  %v31_v27 = vshrl.u32 %v30_v22, 7 }
   0x3   :  { %v706_v2 = vld [vmem:[%s945_s1 + $0x38] sm:$0xff]   ;;  %650 = vmatprep.subr.bf16.mxu1 %v705_v1  ;;  %v710_v6 = vld [vmem:[%s945_s1 + $0x30] sm:$0xff]   ;;  %v714_v10 = vld [vmem:[%s945_s1 + $0x28] sm:$0xff]  }
   0x4   :  { %v707_v3 = vld [vmem:[%s945_s1 + $0xb8] sm:$0xff]   ;;  %629 = vmatpush3.bf16.msra.mxu0 %v706_v2  ;;  %v711_v7 = vld [vmem:[%s945_s1 + $0xb0] sm:$0xff]   ;;  %v715_v11 = vld [vmem:[%s945_s1 + $0xa8] sm:$0xff]   ;;  %v36_v32 = vsub.s32 2, %v31_v27  ;;  %v44_v34 = vsub.s32 6, %v31_v27  ;;  %v32_v36 = vsub.s32 0, %v31_v27 }
   0x5   :  { %651 = vmatpush3.bf16.msra.mxu1 %v707_v3  ;;  %630 = vmatprep.subr.bf16.mxu0 %v708_v4  ;;  %v716_v12 = vld [vmem:[%s945_s1 + $0x60] sm:$0xff]   ;;  %v720_v16 = vld [vmem:[%s945_s1 + $0x58] sm:$0xff]   ;;  %v724_v20 = vld [vmem:[%s945_s1 + $0x50] sm:$0xff]   ;;  %v40_v38 = vsub.s32 4, %v31_v27 }
   0x6   :  { %652 = vmatprep.subr.bf16.mxu1 %v709_v5  ;;  %v717_v13 = vld [vmem:[%s945_s1 + $0xe0] sm:$0xff]   ;;  %v721_v17 = vld [vmem:[%s945_s1 + $0xd8] sm:$0xff]   ;;  %v725_v21 = vld [vmem:[%s945_s1 + $0xd0] sm:$0xff]  }
   0x7   :  { %v718_v14 = vld [vmem:[%s945_s1 + $0x20] sm:$0xff]   ;;  %v722_v18 = vld [vmem:[%s945_s1 + $0x18] sm:$0xff]   ;;  %v726_v23 = vld [vmem:[%s945_s1 + $0x10] sm:$0xff]  }
   0x8   :  { %631 = vmatpush3.bf16.msra.mxu0 %v710_v6  ;;  %v719_v15 = vld [vmem:[%s945_s1 + $0xa0] sm:$0xff]   ;;  %v723_v19 = vld [vmem:[%s945_s1 + $0x98] sm:$0xff]   ;;  %v727_v24 = vld [vmem:[%s945_s1 + $0x90] sm:$0xff]  }
   0x9   :  { %653 = vmatpush3.bf16.msra.mxu1 %v711_v7  ;;  %632 = vmatprep.subr.bf16.mxu0 %v712_v8  ;;  %v728_v25 = vld [vmem:[%s945_s1 + $0x48] sm:$0xff]   ;;  %v732_v30 = vld [vmem:[%s945_s1 + $0x40] sm:$0xff]  }
   0xa   :  { %654 = vmatprep.subr.bf16.mxu1 %v713_v9  ;;  %v729_v26 = vld [vmem:[%s945_s1 + $0xc8] sm:$0xff]   ;;  %v733_v31 = vld [vmem:[%s945_s1 + $0xc0] sm:$0xff]  }
   0xb   :  { %v730_v28 = vld [vmem:[%s945_s1 + $0x8] sm:$0xff]   ;;  %v734_v33 = vld [vmem:[%s945_s1] sm:$0xff]  }
   0xc   :  { %633 = vmatpush3.bf16.msra.mxu0 %v714_v10  ;;  %v731_v29 = vld [vmem:[%s945_s1 + $0x88] sm:$0xff]   ;;  %v735_v35 = vld [vmem:[%s945_s1 + $0x80] sm:$0xff]  }
   0xd   :  { %655 = vmatpush3.bf16.msra.mxu1 %v715_v11  ;;  %634 = vmatprep.subr.bf16.mxu0 %v716_v12  ;;  %v625_v37 = vld [vmem:[%s944_s0] sm:$0xff]  }
   0xe   :  { %656 = vmatprep.subr.bf16.mxu1 %v717_v13  ;;  %v626_v39 = vunpack.c.l.bf16 %v625_v37  ;;  %v627_v40 = vunpack.c.h.bf16 %v625_v37 }
  0x10   :  { %635 = vmatpush3.bf16.msra.mxu0 %v718_v14  ;;  %v37_v42 = vrot.slane %v626_v39, %v36_v32  ;;  %v53_v43 = vrot.slane %v627_v40, %v36_v32  ;;  %v45_v44 = vrot.slane %v626_v39, %v44_v34  ;;  %v61_v45 = vrot.slane %v627_v40, %v44_v34 }
  0x11   :  { %657 = vmatpush3.bf16.msra.mxu1 %v719_v15  ;;  %636 = vmatprep.subr.bf16.mxu0 %v720_v16  ;;  %v33_v46 = vrot.slane %v626_v39, %v32_v36  ;;  %v49_v47 = vrot.slane %v627_v40, %v32_v36  ;;  %v41_v48 = vrot.slane %v626_v39, %v40_v38 }
  0x12   :  { %658 = vmatprep.subr.bf16.mxu1 %v721_v17  ;;  %v57_v49 = vrot.slane %v627_v40, %v40_v38  ;;  %v71_v50 = vpack.c.bf16 %v37_v42, %v37_v42  ;;  %v75_v51 = vpack.c.bf16 %v53_v43, %v53_v43  ;;  %v73_v52 = vpack.c.bf16 %v45_v44, %v45_v44 }
  0x13   :  { %v77_v53 = vpack.c.bf16 %v61_v45, %v61_v45  ;;  %v70_v54 = vpack.c.bf16 %v33_v46, %v33_v46  ;;  %v74_v55 = vpack.c.bf16 %v49_v47, %v49_v47  ;;  %v72_v56 = vpack.c.bf16 %v41_v48, %v41_v48 }
  0x14   :  { %637 = vmatpush3.bf16.msra.mxu0 %v722_v18  ;;  %v76_v57 = vpack.c.bf16 %v57_v49, %v57_v49  ;;  %v158_v58 = vunpack.c.l.b16 %v71_v50  ;;  %v162_v59 = vunpack.c.l.b16 %v75_v51  ;;  %v160_v60 = vunpack.c.l.b16 %v73_v52 }
  0x15   :  { %659 = vmatpush3.bf16.msra.mxu1 %v723_v19  ;;  %638 = vmatprep.subr.bf16.mxu0 %v724_v20  ;;  %v164_v61 = vunpack.c.l.b16 %v77_v53 }
  0x16   :  { %660 = vmatprep.subr.bf16.mxu1 %v725_v21 }
  0x18   :  { %639 = vmatpush3.bf16.msra.mxu0 %v726_v23 }
  0x19   :  { %661 = vmatpush3.bf16.msra.mxu1 %v727_v24  ;;  %640 = vmatprep.subr.bf16.mxu0 %v728_v25 }
  0x1a   :  { %662 = vmatprep.subr.bf16.mxu1 %v729_v26 }
  0x1c   :  { %641 = vmatpush3.bf16.msra.mxu0 %v730_v28 }
  0x1d   :  { %663 = vmatpush3.bf16.msra.mxu1 %v731_v29  ;;  %642 = vmatprep.subr.bf16.mxu0 %v732_v30 }
  0x1e   :  { %664 = vmatprep.subr.bf16.mxu1 %v733_v31 }
  0x20   :  { %643 = vmatpush3.bf16.msra.mxu0 %v734_v33 }
  0x21   :  { %665 = vmatpush3.bf16.msra.mxu1 %v735_v35  ;;  %681 = vmatprep.subr.bf16.mxu0 %v766_v41 }
  0x22   :  { %10 = vsyncpa [#allocation3], 0  ;;  %v157_v62 = vunpack.c.l.b16 %v70_v54  ;;  %v161_v63 = vunpack.c.l.b16 %v74_v55  ;;  %v159_v0 = vunpack.c.l.b16 %v72_v56  ;;  %v163_v1 = vunpack.c.l.b16 %v76_v57  ;;  %v736_v12 = vld [vmem:[%s947_s3 + $0x38] sm:$0xff]   ;;  %v737_v15 = vld [vmem:[%s947_s3 + $0x30] sm:$0xff]   ;;  %s768_s26 = smov [#allocation2]  }
  0x23   :  { %v168_v2 = vrot.slane %v162_v59, 7  ;;  %v172_v3 = vrot.slane %v164_v61, 7  ;;  %v738_v16 = vld [vmem:[%s947_s3 + $0x28] sm:$0xff]   ;;  %v739_v17 = vld [vmem:[%s947_s3 + $0x20] sm:$0xff]   ;;  %v740_v18 = vld [vmem:[%s947_s3 + $0x18] sm:$0xff]   ;;  %vm767_vm1 = vmmov 0  }
  0x24   :  { %v165_v4 = vrot.slane %v161_v63, 7  ;;  %v170_v5 = vrot.slane %v163_v1, 7  ;;  %v741_v19 = vld [vmem:[%s947_s3 + $0x10] sm:$0xff]   ;;  %v742_v20 = vld [vmem:[%s947_s3 + $0x8] sm:$0xff]   ;;  %v743_v21 = vld [vmem:[%s947_s3] sm:$0xff]   ;;  %s574_s27 = sshll.u32 %s768_s26, 4  ;;  %s575_s27 = int_to_ptr.vmem [resolvable:$true] %s574_s27 }
  0x25   :  { %v169_v6 = vsel %vm166_vm0, %v168_v2, %v158_v58  ;;  %v173_v7 = vsel %vm166_vm0, %v172_v3, %v160_v60  ;;  %v582_v24 = vld [vmem:[%s946_s2] ss:$0 sm:$0xff]  ;;  %s744_s2 = scalar_lea.vmem %s575_s27, 32  ;;  %p749_p1 = scmp.lt.s32.totalorder %s575_s27, %s575_s27 }
  0x26   :  { %v175_v8 = vpack.c.b16 %v169_v6, %v169_v6  ;;  %v177_v9 = vpack.c.b16 %v173_v7, %v173_v7  ;;  %v167_v10 = vsel %vm166_vm0, %v165_v4, %v157_v62  ;;  %v171_v11 = vsel %vm166_vm0, %v170_v5, %v159_v0  ;;  %v615_v37 = vld [vmem:[%s948_s4] ss:$0 sm:$0xff]  ;;  %p745_p0 = scmp.ne.s32.totalorder %s575_s27, %s744_s2  ;;  %p750_p2 = scmp.lt.s32.totalorder %s744_s2, %s744_s2 }
  0x27   :  { %v174_v13 = vpack.c.b16 %v167_v10, %v167_v10  ;;  %v176_v14 = vpack.c.b16 %v171_v11, %v171_v11 }
  0x28   :  { %406 = vmatprep.mubr.bf16.mxu0 %v175_v8  ;;  %446 = vmatprep.mubr.bf16.mxu1 %v177_v9  ;;  %p751_p3 = por %p750_p2, %p749_p1 }
  0x29   :  { %407 = vmatmul.mubr.bf16.vlgmr.msra.gmra.mxu0 %v174_v13  ;;  %447 = vmatmul.mubr.bf16.vlgmr.msra.gmra.mxu1 %v176_v14 }
  0x2a   :  { %682 = vmatpush3.bf16.msra.mxu0 %v736_v12  ;;  %697 = vmatprep.mubr.msk.bf16.mxu0 %vm767_vm1, %v766_v41  ;;  %p752_p4 = pnand %p751_p3, %p745_p0 }
  0x2b   :  { %683 = vmatprep.subr.bf16.mxu0 %v766_v41 }
  0x2e   :  { %684 = vmatpush3.bf16.msra.mxu0 %v737_v15 }
  0x2f   :  { %685 = vmatprep.subr.bf16.mxu0 %v766_v41 }
  0x32   :  { %686 = vmatpush3.bf16.msra.mxu0 %v738_v16 }
  0x33   :  { %687 = vmatprep.subr.bf16.mxu0 %v766_v41 }
  0x36   :  { %688 = vmatpush3.bf16.msra.mxu0 %v739_v17 }
  0x37   :  { %689 = vmatprep.subr.bf16.mxu0 %v766_v41 }
  0x3a   :  { %690 = vmatpush3.bf16.msra.mxu0 %v740_v18 }
  0x3b   :  { %691 = vmatprep.subr.bf16.mxu0 %v766_v41 }
  0x3e   :  { %692 = vmatpush3.bf16.msra.mxu0 %v741_v19 }
  0x3f   :  { %693 = vmatprep.subr.bf16.mxu0 %v766_v41 }
  0x42   :  { %694 = vmatpush3.bf16.msra.mxu0 %v742_v20 }
  0x43   :  { %695 = vmatprep.subr.bf16.mxu0 %v766_v41 }
  0x46   :  { %696 = vmatpush3.bf16.msra.mxu0 %v743_v21 }
  0xe9   :  { %v644_v22 = vpop.f32.mrf.mxu0  ;;  %v666_v23 = vpop.f32.mrf.mxu1 }
  0xeb   :  { %v645_v25 = vpop.f32.mrf.mxu0  ;;  %v667_v26 = vpop.f32.mrf.mxu1 }
  0xec   :  { %v646_v27 = vadd.f32 %v645_v25, %v644_v22  ;;  %v668_v31 = vadd.f32 %v667_v26, %v666_v23 }
  0xed   :  { %v647_v28 = vpop.f32.mrf.mxu0  ;;  %v669_v29 = vpop.f32.mrf.mxu1 }
  0xee   :  { %v409_v30 = vadd.f32 %v646_v27, %v582_v24 }
  0xef   :  { %v648_v32 = vpop.f32.mrf.mxu0  ;;  %v670_v33 = vpop.f32.mrf.mxu1 }
  0xf0   :  { %v449_v34 = vadd.f32 %v668_v31, %v409_v30 }
  0xf2   :  { %v454_v35 = vmax.f32 %v449_v34, 0.0 }
  0xf4   :  { %v455_v36 = vpack.c.bf16 %v454_v35, %v454_v35 }
  0xf6   :  { %698 = vmatmul.mubr.bf16.vlgmr.msra.gmra.mxu0 %v455_v36 }
 0x1b6   :  { %v561_v38 = vpop.f32.mrf.mxu0 }
 0x1b7   :  { %v562_v39 = vadd.f32 %v615_v37, %v561_v38 }
 0x1b8   :  { %v699_v40 = vpop.f32.mrf.mxu0 }
 0x1b9   :  { %567 = vst [vmem:[#allocation2] sm:$0x3] %v562_v39 }
 0x1ba   :  { %v564_v41 = vpop.f32.mrf.mxu0 }
 0x1bb   :  { %755 = shalt.err (!%p752_p4)
}
 0x1bc   :  { %577 = dma.vmem_to_hbm [thread:$0]  %s575_s27, 32, %s949_s5, [#allocation3]   ;;  %v700_v42 = vpop.f32.mrf.mxu0 }
 0x1bd   :  { %764 = dma.done.wait [#allocation3], 32  }
 0x1be   :  { %765 = vsyncadd [#allocation3], 4294967264 }
 0x1bf   :  { %581 = vsyncpa [#allocation3], 1 }

</bundles_post_ra>
